<compile_context>
chip_gen: v7x
topology: tpu7x:2x2x1
jax: 0.10.0
libtpu: 0.0.40
codegen_flags: <defaults>
</compile_context>

<pallas_src>
import functools

import jax
import jax.numpy as jnp
from jax.experimental import pallas as pl
from jax.experimental.pallas import tpu as pltpu

NUM_CLASS = 4      # num_class() is external in the reference; fixed here.
FEAT_SIZE = 512    # ResNet18 layer4 width.
BN_EPS = 1e-5
_LANE = 128

_VMEM_WHOLE = pl.BlockSpec(memory_space=pltpu.MemorySpace.VMEM)
_VMEM_LIMIT = 48 << 20   # headroom inside v7x's 64 MiB physical VMEM


def _round_up(x, m):
    return (x + m - 1) // m * m


# ----------------------------- Pallas kernels ---------------------------------

def _gemm_kernel(p_ref, w_ref, b_ref, o_ref, *, act):
    """One-shot GEMM (full K resident) + bias + optional activation."""
    y = jnp.dot(p_ref[...], w_ref[...], preferred_element_type=jnp.float32)
    y = y + b_ref[...]
    if act == "relu":
        y = jnp.maximum(y, 0.0)
    elif act == "sigmoid":
        y = jax.nn.sigmoid(y)
    o_ref[...] = y.astype(o_ref.dtype)


def _gemm_res_kernel(p_ref, w_ref, b_ref, r_ref, o_ref):
    """GEMM + bias + fused residual add + ReLU (BasicBlock second conv)."""
    y = jnp.dot(p_ref[...], w_ref[...], preferred_element_type=jnp.float32)
    y = y + b_ref[...] + r_ref[...].astype(jnp.float32)
    o_ref[...] = jnp.maximum(y, 0.0).astype(o_ref.dtype)


def _block1x1_id_kernel(x_ref, w1_ref, b1_ref, w2_ref, b2_ref, o_ref):
    """Fully fused identity BasicBlock for 1x1 spatial activations."""
    x = x_ref[...]
    y1 = jnp.dot(x, w1_ref[...], preferred_element_type=jnp.float32) + b1_ref[...]
    y1 = jnp.maximum(y1, 0.0).astype(jnp.bfloat16)
    y2 = jnp.dot(y1, w2_ref[...], preferred_element_type=jnp.float32) + b2_ref[...]
    o_ref[...] = jnp.maximum(y2 + x.astype(jnp.float32), 0.0).astype(o_ref.dtype)


def _block1x1_ds_kernel(p1_ref, pd_ref, w1_ref, b1_ref, w2_ref, b2_ref,
                        wd_ref, bd_ref, o_ref):
    """Fully fused downsample BasicBlock producing a 1x1 spatial output."""
    y1 = jnp.dot(p1_ref[...], w1_ref[...],
                 preferred_element_type=jnp.float32) + b1_ref[...]
    y1 = jnp.maximum(y1, 0.0).astype(jnp.bfloat16)
    y2 = jnp.dot(y1, w2_ref[...], preferred_element_type=jnp.float32) + b2_ref[...]
    idv = jnp.dot(pd_ref[...], wd_ref[...],
                  preferred_element_type=jnp.float32) + bd_ref[...]
    o_ref[...] = jnp.maximum(y2 + idv, 0.0).astype(o_ref.dtype)


# ------------------------------ GEMM wrapper ----------------------------------

def _gemm(p, w, b, *, act="none", residual=None, out_dtype=jnp.bfloat16):
    """act(p @ w + b [+ residual]); K resident in full, M/N split as parallel
    grid blocks where cheap so v7x's second TensorCore is not idle."""
    m, k = p.shape
    kw_, n = w.shape
    assert kw_ == k
    gm = 2 if (m >= 32 and m % 16 == 0) else 1
    gn = n // _LANE if (n >= 2 * _LANE and n % _LANE == 0) else 1
    tm, tn = m // gm, n // gn

    in_specs = [
        pl.BlockSpec((tm, k), lambda i, j: (i, 0)),
        pl.BlockSpec((k, tn), lambda i, j: (0, j)),
        pl.BlockSpec((1, tn), lambda i, j: (0, j)),
    ]
    args = [p.astype(jnp.bfloat16), w, b]
    if residual is None:
        kern = functools.partial(_gemm_kernel, act=act)
    else:
        in_specs.append(pl.BlockSpec((tm, tn), lambda i, j: (i, j)))
        args.append(residual.astype(jnp.bfloat16))
        kern = _gemm_res_kernel

    return pl.pallas_call(
        kern,
        out_shape=jax.ShapeDtypeStruct((m, n), out_dtype),
        grid=(gm, gn),
        in_specs=in_specs,
        out_specs=pl.BlockSpec((tm, tn), lambda i, j: (i, j)),
        compiler_params=pltpu.CompilerParams(
            dimension_semantics=("parallel", "parallel"),
            vmem_limit_bytes=_VMEM_LIMIT),
    )(*args)


# ------------------------------ conv helpers ----------------------------------

def _im2col(x, kh, kw, stride, padding):
    n, h, w, c = x.shape
    if padding:
        x = jnp.pad(x, ((0, 0), (padding, padding), (padding, padding), (0, 0)))
    ho = (h + 2 * padding - kh) // stride + 1
    wo = (w + 2 * padding - kw) // stride + 1
    cols = []
    for i in range(kh):
        for j in range(kw):
            cols.append(x[:, i:i + stride * (ho - 1) + 1:stride,
                             j:j + stride * (wo - 1) + 1:stride, :])
    p = jnp.stack(cols, axis=3)                        # [n, ho, wo, kh*kw, c]
    return p.reshape(n * ho * wo, kh * kw * c), ho, wo


def maxpool2d_3x3_s2_p1(x):
    # Running max over the 9 shifted strided slices (plain JAX, no 9x stack).
    n, h, w, c = x.shape
    neg = jnp.finfo(x.dtype).min
    xp = jnp.pad(x, ((0, 0), (1, 1), (1, 1), (0, 0)), constant_values=neg)
    ho = (h + 2 - 3) // 2 + 1
    wo = (w + 2 - 3) // 2 + 1
    out = None
    for i in range(3):
        for j in range(3):
            s = xp[:, i:i + 2 * (ho - 1) + 1:2, j:j + 2 * (wo - 1) + 1:2, :]
            out = s if out is None else jnp.maximum(out, s)
    return out


# ------------------------------ blocks / head ---------------------------------

def _basic_block_spatial(x, p, stride):
    """BasicBlock with spatial output > 1x1: two GEMM calls.  Downsample is
    folded into conv2's K dimension; identity residual fused in the epilogue."""
    n, h, w_, c = x.shape
    patches1, ho, wo = _im2col(x, 3, 3, stride, 1)
    y1 = _gemm(patches1, p['w1'], p['b1'], act="relu")           # (M, coutp)
    coutp = y1.shape[-1]
    y1 = y1.reshape(n, ho, wo, coutp)
    patches2, _, _ = _im2col(y1, 3, 3, 1, 1)
    if 'w2d' in p:                                   # downsample block
        ds_in = x[:, ::stride, ::stride, :].reshape(n * ho * wo, c)
        patches2 = jnp.concatenate(
            [patches2, ds_in.astype(patches2.dtype)], axis=1)
        out = _gemm(patches2, p['w2d'], p['b2d'], act="relu")
    else:                                            # identity block
        res = x.reshape(n * ho * wo, c)
        out = _gemm(patches2, p['w2'], p['b2'], residual=res)
    return out.reshape(n, ho, wo, coutp)


def _basic_block_1x1(x, p, stride):
    """BasicBlock whose output is 1x1 spatial: one fused pallas_call."""
    n, h, w_, c = x.shape
    coutp = p['b2'].shape[-1]
    if 'wd' in p:                                    # downsample block
        if h == 1 and w_ == 1:                       # only the centre tap hits
            p1 = x.reshape(n, c).astype(jnp.bfloat16)
            w1 = p['w1c']
        else:
            p1, _, _ = _im2col(x, 3, 3, stride, 1)
            p1 = p1.astype(jnp.bfloat16)
            w1 = p['w1']
        pd = x[:, ::stride, ::stride, :].reshape(n, c).astype(jnp.bfloat16)
        out = pl.pallas_call(
            _block1x1_ds_kernel,
            out_shape=jax.ShapeDtypeStruct((n, coutp), jnp.bfloat16),
            in_specs=[_VMEM_WHOLE] * 8,
            out_specs=_VMEM_WHOLE,
            compiler_params=pltpu.CompilerParams(vmem_limit_bytes=_VMEM_LIMIT),
        )(p1, pd, w1, p['b1'], p['w2c'], p['b2'], p['wd'], p['bd'])
    else:                                            # identity: 1x1 in == out
        x_flat = x.reshape(n, c).astype(jnp.bfloat16)
        out = pl.pallas_call(
            _block1x1_id_kernel,
            out_shape=jax.ShapeDtypeStruct((n, coutp), jnp.bfloat16),
            in_specs=[_VMEM_WHOLE] * 5,
            out_specs=_VMEM_WHOLE,
            compiler_params=pltpu.CompilerParams(vmem_limit_bytes=_VMEM_LIMIT),
        )(x_flat, p['w1c'], p['b1'], p['w2c'], p['b2'])
    return out.reshape(n, 1, 1, coutp)


def _basic_block(x, p, stride):
    n, h, w_, c = x.shape
    ho = (h + 2 - 3) // stride + 1
    wo = (w_ + 2 - 3) // stride + 1
    if ho == 1 and wo == 1:
        return _basic_block_1x1(x, p, stride)
    return _basic_block_spatial(x, p, stride)


def _head(feat, p):
    """Conv2d(512, num_class, 3, p=1) + adaptive_avg_pool2d((1,1)) + sigmoid."""
    n, h, w_, c = feat.shape
    if h == 1 and w_ == 1:
        # Only the centre tap is nonzero on a 1x1 input; avg-pool is identity,
        # sigmoid fused into the GEMM epilogue.  One pallas_call total.
        y = _gemm(feat.reshape(n, c), p['wc'], p['b'], act="sigmoid",
                  out_dtype=jnp.float32)
        return y[:, :NUM_CLASS]
    patches, ho, wo = _im2col(feat, 3, 3, 1, 1)
    y = _gemm(patches, p['w'], p['b'], act="none", out_dtype=jnp.float32)
    y = y[:, :NUM_CLASS].reshape(n, ho * wo, NUM_CLASS)
    return jax.nn.sigmoid(jnp.mean(y, axis=1))


# ------------------------------ parameters ------------------------------------

def init_params(key):
    """Raw parameters mimicking the PyTorch module's state (random init)."""
    keys = iter(jax.random.split(key, 256))

    def conv_w(cin, cout, k):
        fan_in = k * k * cin
        return jax.random.normal(next(keys), (k, k, cin, cout),
                                 jnp.float32) / jnp.sqrt(float(fan_in))

    def bn(c):
        gamma = 1.0 + 0.1 * jax.random.normal(next(keys), (c,), jnp.float32)
        beta = 0.1 * jax.random.normal(next(keys), (c,), jnp.float32)
        mean = 0.1 * jax.random.normal(next(keys), (c,), jnp.float32)
        var = 1.0 + 0.1 * jnp.abs(jax.random.normal(next(keys), (c,), jnp.float32))
        scale = gamma / jnp.sqrt(var + BN_EPS)          # eval-mode BN folded
        shift = beta - mean * scale
        return scale, shift

    def block(cin, cout, downsample):
        p = {'w1': conv_w(cin, cout, 3)}
        p['s1'], p['b1'] = bn(cout)
        p['w2'] = conv_w(cout, cout, 3)
        p['s2'], p['b2'] = bn(cout)
        if downsample:
            p['wd'] = conv_w(cin, cout, 1)
            p['sd'], p['bd'] = bn(cout)
        return p

    params = {'conv1_w': conv_w(4, 64, 7)}
    params['bn1_s'], params['bn1_b'] = bn(64)
    params['layer1'] = [block(64, 64, False), block(64, 64, False)]
    params['layer2'] = [block(64, 128, True), block(128, 128, False)]
    params['layer3'] = [block(128, 256, True), block(256, 256, False)]
    params['layer4'] = [block(256, 512, True), block(512, 512, False)]
    params['out_w'] = conv_w(FEAT_SIZE, NUM_CLASS, 3)
    params['out_b'] = 0.1 * jax.random.normal(next(keys), (NUM_CLASS,), jnp.float32)
    return params


def prepare_params(params):
    """Hoist all weight preprocessing out of the forward pass: fold BN scale
    into the weight columns (shift becomes the bias), cast to bf16, reshape to
    GEMM layout, zero-pad channels to 128-lane multiples, pre-extract centre
    taps, and pre-concatenate the downsample weights onto conv2's K dim."""
    pp = {}

    # --- stem: conv1 7x7/s2 + bn1; cout 64 -> 128 lanes, K 196 -> 256 ---------
    w = params['conv1_w'] * params['bn1_s'].reshape(1, 1, 1, 64)
    w = jnp.pad(w, ((0, 0), (0, 0), (0, 0), (0, _LANE - 64)))
    w2 = w.reshape(7 * 7 * 4, _LANE)
    kp = _round_up(w2.shape[0], _LANE)
    pp['stem'] = {
        'w': jnp.pad(w2, ((0, kp - w2.shape[0]), (0, 0))).astype(jnp.bfloat16),
        'b': jnp.pad(params['bn1_b'], (0, _LANE - 64)
                     ).reshape(1, _LANE).astype(jnp.float32),
    }

    def fold(w, scale, shift, cin_pad, cout_pad):
        kh, kw, cin, cout = w.shape
        wf = w * scale.reshape(1, 1, 1, cout)
        wf = jnp.pad(wf, ((0, 0), (0, 0), (0, cin_pad - cin),
                          (0, cout_pad - cout)))
        wf = wf.reshape(kh * kw * cin_pad, cout_pad).astype(jnp.bfloat16)
        bf = jnp.pad(shift, (0, cout_pad - cout)
                     ).reshape(1, cout_pad).astype(jnp.float32)
        d = {'w': wf, 'b': bf}
        if kh == 3 and kw == 3:
            d['wc'] = wf[4 * cin_pad:5 * cin_pad]      # centre tap rows
        return d

    def prep_block(raw, cin_pad, cout_pad):
        c1 = fold(raw['w1'], raw['s1'], raw['b1'], cin_pad, cout_pad)
        c2 = fold(raw['w2'], raw['s2'], raw['b2'], cout_pad, cout_pad)
        p = {'w1': c1['w'], 'w1c': c1['wc'], 'b1': c1['b'],
             'w2': c2['w'], 'w2c': c2['wc'], 'b2': c2['b']}
        if 'wd' in raw:
            cd = fold(raw['wd'], raw['sd'], raw['bd'], cin_pad, cout_pad)
            p['wd'] = cd['w']
            p['bd'] = cd['b']
            p['w2d'] = jnp.concatenate([c2['w'], cd['w']], axis=0)
            p['b2d'] = c2['b'] + cd['b']
        return p

    pads = {'layer1': (_LANE, _LANE), 'layer2': (_LANE, _LANE),
            'layer3': (_LANE, 256), 'layer4': (256, 512)}
    for name in ('layer1', 'layer2', 'layer3', 'layer4'):
        cinp, coutp = pads[name]
        blocks = params[name]
        pp[name] = [prep_block(blocks[0], cinp, coutp),
                    prep_block(blocks[1], coutp, coutp)]

    # --- head conv (real bias, no BN); cout 4 -> 128 lanes --------------------
    hw = jnp.pad(params['out_w'],
                 ((0, 0), (0, 0), (0, 0), (0, _LANE - NUM_CLASS)))
    hwf = hw.reshape(9 * FEAT_SIZE, _LANE).astype(jnp.bfloat16)
    pp['head'] = {
        'w': hwf,
        'wc': hwf[4 * FEAT_SIZE:5 * FEAT_SIZE],
        'b': jnp.pad(params['out_b'], (0, _LANE - NUM_CLASS)
                     ).reshape(1, _LANE).astype(jnp.float32),
    }
    return pp


# -------------------------------- forward -------------------------------------

def resnet_forward(pp, x_nchw):
    x = jnp.transpose(x_nchw, (0, 2, 3, 1)).astype(jnp.bfloat16)   # NCHW -> NHWC
    n = x.shape[0]

    # Stem: conv1 7x7/s2 + BN + ReLU as one GEMM (cout carried padded to 128).
    patches, ho, wo = _im2col(x, 7, 7, 2, 3)
    kp = pp['stem']['w'].shape[0]
    patches = jnp.pad(patches, ((0, 0), (0, kp - patches.shape[1])))
    x = _gemm(patches, pp['stem']['w'], pp['stem']['b'], act="relu")
    x = x.reshape(n, ho, wo, -1)

    x = maxpool2d_3x3_s2_p1(x)

    for name, stride in (('layer1', 1), ('layer2', 2), ('layer3', 2),
                         ('layer4', 2)):
        # TODO(synk): nn.Dropout2d before layer4 is identity in eval mode.
        b0, b1 = pp[name]
        x = _basic_block(x, b0, stride)
        x = _basic_block(x, b1, 1)

    feat = x                                             # [N, H, W, 512] bf16
    logit = _head(feat, pp['head'])
    return {'logit': logit,
            'feat': jnp.transpose(feat, (0, 3, 1, 2)).astype(jnp.float32)}


# --------------------------------- main ----------------------------------------

if __name__ == "__main__":
    key = jax.random.PRNGKey(0)
    kp_, kx = jax.random.split(key)
    raw_params = init_params(kp_)
    prepped = prepare_params(raw_params)     # weight prep hoisted out of forward

    x = jax.random.normal(kx, (2, 4, 16, 16), jnp.float32)   # NCHW, like PyTorch

    fwd = jax.jit(resnet_forward)
    out = fwd(prepped, x)
    jax.block_until_ready(out)

    assert out['logit'].shape == (2, NUM_CLASS)
    assert out['feat'].shape == (2, FEAT_SIZE, 1, 1)
    assert bool(jnp.all((out['logit'] >= 0.0) & (out['logit'] <= 1.0)))
    print("KERNEL_OK")
</pallas_src>

<mosaic_0001>
module attributes {stable_mosaic.version = 11 : i64} {
  func.func @_gemm_kernel(%arg0: i32, %arg1: i32, %arg2: memref<64x256xbf16, #tpu.memory_space<vmem>>, %arg3: memref<256x128xbf16, #tpu.memory_space<vmem>>, %arg4: memref<1x128xf32, #tpu.memory_space<vmem>>, %arg5: memref<64x128xbf16, #tpu.memory_space<vmem>>) attributes {dimension_semantics = [#tpu.dimension_semantics<parallel>, #tpu.dimension_semantics<parallel>], iteration_bounds = array<i64: 2, 1>, scalar_prefetch = 0 : i64, scratch_operands = 0 : i64, tpu.core_type = #tpu.core_type<tc>, window_params = [{transform_indices = @transform_0, window_bounds = array<i64: 64, 256>}, {transform_indices = @transform_1, window_bounds = array<i64: 256, 128>}, {transform_indices = @transform_2, window_bounds = array<i64: 1, 128>}, {transform_indices = @transform_3, window_bounds = array<i64: 64, 128>}]} {
    %c0 = arith.constant 0 : index
    %c0_0 = arith.constant 0 : index
    %0 = vector.load %arg2[%c0, %c0_0] : memref<64x256xbf16, #tpu.memory_space<vmem>>, vector<64x256xbf16>
    %c0_1 = arith.constant 0 : index
    %c0_2 = arith.constant 0 : index
    %1 = vector.load %arg3[%c0_1, %c0_2] : memref<256x128xbf16, #tpu.memory_space<vmem>>, vector<256x128xbf16>
    %cst = arith.constant dense<0.000000e+00> : vector<64x128xf32>
    %2 = tpu.matmul %0, %1, %cst {dimension_numbers = #tpu.dot_dimension_numbers<[1], [0], [0], [1], [0, 0, 1, 1], [], []>} : vector<64x256xbf16>, vector<256x128xbf16>, vector<64x128xf32> -> vector<64x128xf32>
    %c0_3 = arith.constant 0 : index
    %c0_4 = arith.constant 0 : index
    %3 = vector.load %arg4[%c0_3, %c0_4] : memref<1x128xf32, #tpu.memory_space<vmem>>, vector<1x128xf32>
    %4 = vector.broadcast %3 : vector<1x128xf32> to vector<64x128xf32>
    %5 = arith.addf %2, %4 : vector<64x128xf32>
    %cst_5 = arith.constant 0.000000e+00 : f32
    %6 = vector.broadcast %cst_5 : f32 to vector<64x128xf32>
    %7 = arith.maximumf %5, %6 : vector<64x128xf32>
    %8 = arith.truncf %7 : vector<64x128xf32> to vector<64x128xbf16>
    %c0_6 = arith.constant 0 : index
    %c0_7 = arith.constant 0 : index
    %9 = vector.load %arg5[%c0_6, %c0_7] : memref<64x128xbf16, #tpu.memory_space<vmem>>, vector<64x128xbf16>
    tpu.vector_store %arg5[%c0_6, %c0_7], %8 {strides = array<i32>} : memref<64x128xbf16, #tpu.memory_space<vmem>>, vector<64x128xbf16>,
    return
  }
  func.func @transform_0(%arg0: i32, %arg1: i32) -> (i32, i32) {
    %c0_i32 = arith.constant 0 : i32
    %c0_i32_0 = arith.constant 0 : i32
    return %arg0, %c0_i32 : i32, i32
  }
  func.func @transform_1(%arg0: i32, %arg1: i32) -> (i32, i32) {
    %c0_i32 = arith.constant 0 : i32
    %c0_i32_0 = arith.constant 0 : i32
    return %c0_i32, %arg1 : i32, i32
  }
  func.func @transform_2(%arg0: i32, %arg1: i32) -> (i32, i32) {
    %c0_i32 = arith.constant 0 : i32
    %c0_i32_0 = arith.constant 0 : i32
    return %c0_i32, %arg1 : i32, i32
  }
  func.func @transform_3(%arg0: i32, %arg1: i32) -> (i32, i32) {
    %c0_i32 = arith.constant 0 : i32
    return %arg0, %arg1 : i32, i32
  }
}

module attributes {stable_mosaic.version = 11 : i64} {
  func.func @_gemm_kernel(%arg0: i32, %arg1: i32, %arg2: memref<16x1152xbf16, #tpu.memory_space<vmem>>, %arg3: memref<1152x128xbf16, #tpu.memory_space<vmem>>, %arg4: memref<1x128xf32, #tpu.memory_space<vmem>>, %arg5: memref<16x128xbf16, #tpu.memory_space<vmem>>) attributes {dimension_semantics = [#tpu.dimension_semantics<parallel>, #tpu.dimension_semantics<parallel>], iteration_bounds = array<i64: 2, 1>, scalar_prefetch = 0 : i64, scratch_operands = 0 : i64, tpu.core_type = #tpu.core_type<tc>, window_params = [{transform_indices = @transform_0, window_bounds = array<i64: 16, 1152>}, {transform_indices = @transform_1, window_bounds = array<i64: 1152, 128>}, {transform_indices = @transform_2, window_bounds = array<i64: 1, 128>}, {transform_indices = @transform_3, window_bounds = array<i64: 16, 128>}]} {
    %c0 = arith.constant 0 : index
    %c0_0 = arith.constant 0 : index
    %0 = vector.load %arg2[%c0, %c0_0] : memref<16x1152xbf16, #tpu.memory_space<vmem>>, vector<16x1152xbf16>
    %c0_1 = arith.constant 0 : index
    %c0_2 = arith.constant 0 : index
    %1 = vector.load %arg3[%c0_1, %c0_2] : memref<1152x128xbf16, #tpu.memory_space<vmem>>, vector<1152x128xbf16>
    %cst = arith.constant dense<0.000000e+00> : vector<16x128xf32>
    %2 = tpu.matmul %0, %1, %cst {dimension_numbers = #tpu.dot_dimension_numbers<[1], [0], [0], [1], [0, 0, 1, 1], [], []>} : vector<16x1152xbf16>, vector<1152x128xbf16>, vector<16x128xf32> -> vector<16x128xf32>
    %c0_3 = arith.constant 0 : index
    %c0_4 = arith.constant 0 : index
    %3 = vector.load %arg4[%c0_3, %c0_4] : memref<1x128xf32, #tpu.memory_space<vmem>>, vector<1x128xf32>
    %4 = vector.broadcast %3 : vector<1x128xf32> to vector<16x128xf32>
    %5 = arith.addf %2, %4 : vector<16x128xf32>
    %cst_5 = arith.constant 0.000000e+00 : f32
    %6 = vector.broadcast %cst_5 : f32 to vector<16x128xf32>
    %7 = arith.maximumf %5, %6 : vector<16x128xf32>
    %8 = arith.truncf %7 : vector<16x128xf32> to vector<16x128xbf16>
    %c0_6 = arith.constant 0 : index
    %c0_7 = arith.constant 0 : index
    %9 = vector.load %arg5[%c0_6, %c0_7] : memref<16x128xbf16, #tpu.memory_space<vmem>>, vector<16x128xbf16>
    tpu.vector_store %arg5[%c0_6, %c0_7], %8 {strides = array<i32>} : memref<16x128xbf16, #tpu.memory_space<vmem>>, vector<16x128xbf16>,
    return
  }
  func.func @transform_0(%arg0: i32, %arg1: i32) -> (i32, i32) {
    %c0_i32 = arith.constant 0 : i32
    %c0_i32_0 = arith.constant 0 : i32
    return %arg0, %c0_i32 : i32, i32
  }
  func.func @transform_1(%arg0: i32, %arg1: i32) -> (i32, i32) {
    %c0_i32 = arith.constant 0 : i32
    %c0_i32_0 = arith.constant 0 : i32
    return %c0_i32, %arg1 : i32, i32
  }
  func.func @transform_2(%arg0: i32, %arg1: i32) -> (i32, i32) {
    %c0_i32 = arith.constant 0 : i32
    %c0_i32_0 = arith.constant 0 : i32
    return %c0_i32, %arg1 : i32, i32
  }
  func.func @transform_3(%arg0: i32, %arg1: i32) -> (i32, i32) {
    %c0_i32 = arith.constant 0 : i32
    return %arg0, %arg1 : i32, i32
  }
}

module attributes {stable_mosaic.version = 11 : i64} {
  func.func @_gemm_res_kernel(%arg0: i32, %arg1: i32, %arg2: memref<16x1152xbf16, #tpu.memory_space<vmem>>, %arg3: memref<1152x128xbf16, #tpu.memory_space<vmem>>, %arg4: memref<1x128xf32, #tpu.memory_space<vmem>>, %arg5: memref<16x128xbf16, #tpu.memory_space<vmem>>, %arg6: memref<16x128xbf16, #tpu.memory_space<vmem>>) attributes {dimension_semantics = [#tpu.dimension_semantics<parallel>, #tpu.dimension_semantics<parallel>], iteration_bounds = array<i64: 2, 1>, scalar_prefetch = 0 : i64, scratch_operands = 0 : i64, tpu.core_type = #tpu.core_type<tc>, window_params = [{transform_indices = @transform_0, window_bounds = array<i64: 16, 1152>}, {transform_indices = @transform_1, window_bounds = array<i64: 1152, 128>}, {transform_indices = @transform_2, window_bounds = array<i64: 1, 128>}, {transform_indices = @transform_3, window_bounds = array<i64: 16, 128>}, {transform_indices = @transform_4, window_bounds = array<i64: 16, 128>}]} {
    %c0 = arith.constant 0 : index
    %c0_0 = arith.constant 0 : index
    %0 = vector.load %arg2[%c0, %c0_0] : memref<16x1152xbf16, #tpu.memory_space<vmem>>, vector<16x1152xbf16>
    %c0_1 = arith.constant 0 : index
    %c0_2 = arith.constant 0 : index
    %1 = vector.load %arg3[%c0_1, %c0_2] : memref<1152x128xbf16, #tpu.memory_space<vmem>>, vector<1152x128xbf16>
    %cst = arith.constant dense<0.000000e+00> : vector<16x128xf32>
    %2 = tpu.matmul %0, %1, %cst {dimension_numbers = #tpu.dot_dimension_numbers<[1], [0], [0], [1], [0, 0, 1, 1], [], []>} : vector<16x1152xbf16>, vector<1152x128xbf16>, vector<16x128xf32> -> vector<16x128xf32>
    %c0_3 = arith.constant 0 : index
    %c0_4 = arith.constant 0 : index
    %3 = vector.load %arg4[%c0_3, %c0_4] : memref<1x128xf32, #tpu.memory_space<vmem>>, vector<1x128xf32>
    %4 = vector.broadcast %3 : vector<1x128xf32> to vector<16x128xf32>
    %5 = arith.addf %2, %4 : vector<16x128xf32>
    %c0_5 = arith.constant 0 : index
    %c0_6 = arith.constant 0 : index
    %6 = vector.load %arg5[%c0_5, %c0_6] : memref<16x128xbf16, #tpu.memory_space<vmem>>, vector<16x128xbf16>
    %7 = arith.extf %6 : vector<16x128xbf16> to vector<16x128xf32>
    %8 = arith.addf %5, %7 : vector<16x128xf32>
    %cst_7 = arith.constant 0.000000e+00 : f32
    %9 = vector.broadcast %cst_7 : f32 to vector<16x128xf32>
    %10 = arith.maximumf %8, %9 : vector<16x128xf32>
    %11 = arith.truncf %10 : vector<16x128xf32> to vector<16x128xbf16>
    %c0_8 = arith.constant 0 : index
    %c0_9 = arith.constant 0 : index
    %12 = vector.load %arg6[%c0_8, %c0_9] : memref<16x128xbf16, #tpu.memory_space<vmem>>, vector<16x128xbf16>
    tpu.vector_store %arg6[%c0_8, %c0_9], %11 {strides = array<i32>} : memref<16x128xbf16, #tpu.memory_space<vmem>>, vector<16x128xbf16>,
    return
  }
  func.func @transform_0(%arg0: i32, %arg1: i32) -> (i32, i32) {
    %c0_i32 = arith.constant 0 : i32
    %c0_i32_0 = arith.constant 0 : i32
    return %arg0, %c0_i32 : i32, i32
  }
  func.func @transform_1(%arg0: i32, %arg1: i32) -> (i32, i32) {
    %c0_i32 = arith.constant 0 : i32
    %c0_i32_0 = arith.constant 0 : i32
    return %c0_i32, %arg1 : i32, i32
  }
  func.func @transform_2(%arg0: i32, %arg1: i32) -> (i32, i32) {
    %c0_i32 = arith.constant 0 : i32
    %c0_i32_0 = arith.constant 0 : i32
    return %c0_i32, %arg1 : i32, i32
  }
  func.func @transform_3(%arg0: i32, %arg1: i32) -> (i32, i32) {
    %c0_i32 = arith.constant 0 : i32
    return %arg0, %arg1 : i32, i32
  }
  func.func @transform_4(%arg0: i32, %arg1: i32) -> (i32, i32) {
    %c0_i32 = arith.constant 0 : i32
    return %arg0, %arg1 : i32, i32
  }
}

module attributes {stable_mosaic.version = 11 : i64} {
  func.func @_gemm_kernel(%arg0: i32, %arg1: i32, %arg2: memref<8x1152xbf16, #tpu.memory_space<vmem>>, %arg3: memref<1152x128xbf16, #tpu.memory_space<vmem>>, %arg4: memref<1x128xf32, #tpu.memory_space<vmem>>, %arg5: memref<8x128xbf16, #tpu.memory_space<vmem>>) attributes {dimension_semantics = [#tpu.dimension_semantics<parallel>, #tpu.dimension_semantics<parallel>], iteration_bounds = array<i64: 1, 1>, scalar_prefetch = 0 : i64, scratch_operands = 0 : i64, tpu.core_type = #tpu.core_type<tc>, window_params = [{transform_indices = @transform_0, window_bounds = array<i64: 8, 1152>}, {transform_indices = @transform_1, window_bounds = array<i64: 1152, 128>}, {transform_indices = @transform_2, window_bounds = array<i64: 1, 128>}, {transform_indices = @transform_3, window_bounds = array<i64: 8, 128>}]} {
    %c0 = arith.constant 0 : index
    %c0_0 = arith.constant 0 : index
    %0 = vector.load %arg2[%c0, %c0_0] : memref<8x1152xbf16, #tpu.memory_space<vmem>>, vector<8x1152xbf16>
    %c0_1 = arith.constant 0 : index
    %c0_2 = arith.constant 0 : index
    %1 = vector.load %arg3[%c0_1, %c0_2] : memref<1152x128xbf16, #tpu.memory_space<vmem>>, vector<1152x128xbf16>
    %cst = arith.constant dense<0.000000e+00> : vector<8x128xf32>
    %2 = tpu.matmul %0, %1, %cst {dimension_numbers = #tpu.dot_dimension_numbers<[1], [0], [0], [1], [0, 0, 1, 1], [], []>} : vector<8x1152xbf16>, vector<1152x128xbf16>, vector<8x128xf32> -> vector<8x128xf32>
    %c0_3 = arith.constant 0 : index
    %c0_4 = arith.constant 0 : index
    %3 = vector.load %arg4[%c0_3, %c0_4] : memref<1x128xf32, #tpu.memory_space<vmem>>, vector<1x128xf32>
    %4 = vector.broadcast %3 : vector<1x128xf32> to vector<8x128xf32>
    %5 = arith.addf %2, %4 : vector<8x128xf32>
    %cst_5 = arith.constant 0.000000e+00 : f32
    %6 = vector.broadcast %cst_5 : f32 to vector<8x128xf32>
    %7 = arith.maximumf %5, %6 : vector<8x128xf32>
    %8 = arith.truncf %7 : vector<8x128xf32> to vector<8x128xbf16>
    %c0_6 = arith.constant 0 : index
    %c0_7 = arith.constant 0 : index
    %9 = vector.load %arg5[%c0_6, %c0_7] : memref<8x128xbf16, #tpu.memory_space<vmem>>, vector<8x128xbf16>
    tpu.vector_store %arg5[%c0_6, %c0_7], %8 {strides = array<i32>} : memref<8x128xbf16, #tpu.memory_space<vmem>>, vector<8x128xbf16>,
    return
  }
  func.func @transform_0(%arg0: i32, %arg1: i32) -> (i32, i32) {
    %c0_i32 = arith.constant 0 : i32
    %c0_i32_0 = arith.constant 0 : i32
    return %arg0, %c0_i32 : i32, i32
  }
  func.func @transform_1(%arg0: i32, %arg1: i32) -> (i32, i32) {
    %c0_i32 = arith.constant 0 : i32
    %c0_i32_0 = arith.constant 0 : i32
    return %c0_i32, %arg1 : i32, i32
  }
  func.func @transform_2(%arg0: i32, %arg1: i32) -> (i32, i32) {
    %c0_i32 = arith.constant 0 : i32
    %c0_i32_0 = arith.constant 0 : i32
    return %c0_i32, %arg1 : i32, i32
  }
  func.func @transform_3(%arg0: i32, %arg1: i32) -> (i32, i32) {
    %c0_i32 = arith.constant 0 : i32
    return %arg0, %arg1 : i32, i32
  }
}

module attributes {stable_mosaic.version = 11 : i64} {
  func.func @_gemm_kernel(%arg0: i32, %arg1: i32, %arg2: memref<8x1280xbf16, #tpu.memory_space<vmem>>, %arg3: memref<1280x128xbf16, #tpu.memory_space<vmem>>, %arg4: memref<1x128xf32, #tpu.memory_space<vmem>>, %arg5: memref<8x128xbf16, #tpu.memory_space<vmem>>) attributes {dimension_semantics = [#tpu.dimension_semantics<parallel>, #tpu.dimension_semantics<parallel>], iteration_bounds = array<i64: 1, 1>, scalar_prefetch = 0 : i64, scratch_operands = 0 : i64, tpu.core_type = #tpu.core_type<tc>, window_params = [{transform_indices = @transform_0, window_bounds = array<i64: 8, 1280>}, {transform_indices = @transform_1, window_bounds = array<i64: 1280, 128>}, {transform_indices = @transform_2, window_bounds = array<i64: 1, 128>}, {transform_indices = @transform_3, window_bounds = array<i64: 8, 128>}]} {
    %c0 = arith.constant 0 : index
    %c0_0 = arith.constant 0 : index
    %0 = vector.load %arg2[%c0, %c0_0] : memref<8x1280xbf16, #tpu.memory_space<vmem>>, vector<8x1280xbf16>
    %c0_1 = arith.constant 0 : index
    %c0_2 = arith.constant 0 : index
    %1 = vector.load %arg3[%c0_1, %c0_2] : memref<1280x128xbf16, #tpu.memory_space<vmem>>, vector<1280x128xbf16>
    %cst = arith.constant dense<0.000000e+00> : vector<8x128xf32>
    %2 = tpu.matmul %0, %1, %cst {dimension_numbers = #tpu.dot_dimension_numbers<[1], [0], [0], [1], [0, 0, 1, 1], [], []>} : vector<8x1280xbf16>, vector<1280x128xbf16>, vector<8x128xf32> -> vector<8x128xf32>
    %c0_3 = arith.constant 0 : index
    %c0_4 = arith.constant 0 : index
    %3 = vector.load %arg4[%c0_3, %c0_4] : memref<1x128xf32, #tpu.memory_space<vmem>>, vector<1x128xf32>
    %4 = vector.broadcast %3 : vector<1x128xf32> to vector<8x128xf32>
    %5 = arith.addf %2, %4 : vector<8x128xf32>
    %cst_5 = arith.constant 0.000000e+00 : f32
    %6 = vector.broadcast %cst_5 : f32 to vector<8x128xf32>
    %7 = arith.maximumf %5, %6 : vector<8x128xf32>
    %8 = arith.truncf %7 : vector<8x128xf32> to vector<8x128xbf16>
    %c0_6 = arith.constant 0 : index
    %c0_7 = arith.constant 0 : index
    %9 = vector.load %arg5[%c0_6, %c0_7] : memref<8x128xbf16, #tpu.memory_space<vmem>>, vector<8x128xbf16>
    tpu.vector_store %arg5[%c0_6, %c0_7], %8 {strides = array<i32>} : memref<8x128xbf16, #tpu.memory_space<vmem>>, vector<8x128xbf16>,
    return
  }
  func.func @transform_0(%arg0: i32, %arg1: i32) -> (i32, i32) {
    %c0_i32 = arith.constant 0 : i32
    %c0_i32_0 = arith.constant 0 : i32
    return %arg0, %c0_i32 : i32, i32
  }
  func.func @transform_1(%arg0: i32, %arg1: i32) -> (i32, i32) {
    %c0_i32 = arith.constant 0 : i32
    %c0_i32_0 = arith.constant 0 : i32
    return %c0_i32, %arg1 : i32, i32
  }
  func.func @transform_2(%arg0: i32, %arg1: i32) -> (i32, i32) {
    %c0_i32 = arith.constant 0 : i32
    %c0_i32_0 = arith.constant 0 : i32
    return %c0_i32, %arg1 : i32, i32
  }
  func.func @transform_3(%arg0: i32, %arg1: i32) -> (i32, i32) {
    %c0_i32 = arith.constant 0 : i32
    return %arg0, %arg1 : i32, i32
  }
}

module attributes {stable_mosaic.version = 11 : i64} {
  func.func @_gemm_res_kernel(%arg0: i32, %arg1: i32, %arg2: memref<8x1152xbf16, #tpu.memory_space<vmem>>, %arg3: memref<1152x128xbf16, #tpu.memory_space<vmem>>, %arg4: memref<1x128xf32, #tpu.memory_space<vmem>>, %arg5: memref<8x128xbf16, #tpu.memory_space<vmem>>, %arg6: memref<8x128xbf16, #tpu.memory_space<vmem>>) attributes {dimension_semantics = [#tpu.dimension_semantics<parallel>, #tpu.dimension_semantics<parallel>], iteration_bounds = array<i64: 1, 1>, scalar_prefetch = 0 : i64, scratch_operands = 0 : i64, tpu.core_type = #tpu.core_type<tc>, window_params = [{transform_indices = @transform_0, window_bounds = array<i64: 8, 1152>}, {transform_indices = @transform_1, window_bounds = array<i64: 1152, 128>}, {transform_indices = @transform_2, window_bounds = array<i64: 1, 128>}, {transform_indices = @transform_3, window_bounds = array<i64: 8, 128>}, {transform_indices = @transform_4, window_bounds = array<i64: 8, 128>}]} {
    %c0 = arith.constant 0 : index
    %c0_0 = arith.constant 0 : index
    %0 = vector.load %arg2[%c0, %c0_0] : memref<8x1152xbf16, #tpu.memory_space<vmem>>, vector<8x1152xbf16>
    %c0_1 = arith.constant 0 : index
    %c0_2 = arith.constant 0 : index
    %1 = vector.load %arg3[%c0_1, %c0_2] : memref<1152x128xbf16, #tpu.memory_space<vmem>>, vector<1152x128xbf16>
    %cst = arith.constant dense<0.000000e+00> : vector<8x128xf32>
    %2 = tpu.matmul %0, %1, %cst {dimension_numbers = #tpu.dot_dimension_numbers<[1], [0], [0], [1], [0, 0, 1, 1], [], []>} : vector<8x1152xbf16>, vector<1152x128xbf16>, vector<8x128xf32> -> vector<8x128xf32>
    %c0_3 = arith.constant 0 : index
    %c0_4 = arith.constant 0 : index
    %3 = vector.load %arg4[%c0_3, %c0_4] : memref<1x128xf32, #tpu.memory_space<vmem>>, vector<1x128xf32>
    %4 = vector.broadcast %3 : vector<1x128xf32> to vector<8x128xf32>
    %5 = arith.addf %2, %4 : vector<8x128xf32>
    %c0_5 = arith.constant 0 : index
    %c0_6 = arith.constant 0 : index
    %6 = vector.load %arg5[%c0_5, %c0_6] : memref<8x128xbf16, #tpu.memory_space<vmem>>, vector<8x128xbf16>
    %7 = arith.extf %6 : vector<8x128xbf16> to vector<8x128xf32>
    %8 = arith.addf %5, %7 : vector<8x128xf32>
    %cst_7 = arith.constant 0.000000e+00 : f32
    %9 = vector.broadcast %cst_7 : f32 to vector<8x128xf32>
    %10 = arith.maximumf %8, %9 : vector<8x128xf32>
    %11 = arith.truncf %10 : vector<8x128xf32> to vector<8x128xbf16>
    %c0_8 = arith.constant 0 : index
    %c0_9 = arith.constant 0 : index
    %12 = vector.load %arg6[%c0_8, %c0_9] : memref<8x128xbf16, #tpu.memory_space<vmem>>, vector<8x128xbf16>
    tpu.vector_store %arg6[%c0_8, %c0_9], %11 {strides = array<i32>} : memref<8x128xbf16, #tpu.memory_space<vmem>>, vector<8x128xbf16>,
    return
  }
  func.func @transform_0(%arg0: i32, %arg1: i32) -> (i32, i32) {
    %c0_i32 = arith.constant 0 : i32
    %c0_i32_0 = arith.constant 0 : i32
    return %arg0, %c0_i32 : i32, i32
  }
  func.func @transform_1(%arg0: i32, %arg1: i32) -> (i32, i32) {
    %c0_i32 = arith.constant 0 : i32
    %c0_i32_0 = arith.constant 0 : i32
    return %c0_i32, %arg1 : i32, i32
  }
  func.func @transform_2(%arg0: i32, %arg1: i32) -> (i32, i32) {
    %c0_i32 = arith.constant 0 : i32
    %c0_i32_0 = arith.constant 0 : i32
    return %c0_i32, %arg1 : i32, i32
  }
  func.func @transform_3(%arg0: i32, %arg1: i32) -> (i32, i32) {
    %c0_i32 = arith.constant 0 : i32
    return %arg0, %arg1 : i32, i32
  }
  func.func @transform_4(%arg0: i32, %arg1: i32) -> (i32, i32) {
    %c0_i32 = arith.constant 0 : i32
    return %arg0, %arg1 : i32, i32
  }
}

module attributes {stable_mosaic.version = 11 : i64} {
  func.func @_block1x1_ds_kernel(%arg0: memref<2x1152xbf16, #tpu.memory_space<vmem>>, %arg1: memref<2x128xbf16, #tpu.memory_space<vmem>>, %arg2: memref<1152x256xbf16, #tpu.memory_space<vmem>>, %arg3: memref<1x256xf32, #tpu.memory_space<vmem>>, %arg4: memref<256x256xbf16, #tpu.memory_space<vmem>>, %arg5: memref<1x256xf32, #tpu.memory_space<vmem>>, %arg6: memref<128x256xbf16, #tpu.memory_space<vmem>>, %arg7: memref<1x256xf32, #tpu.memory_space<vmem>>, %arg8: memref<2x256xbf16, #tpu.memory_space<vmem>>) attributes {dimension_semantics = [], scalar_prefetch = 0 : i64, scratch_operands = 0 : i64, tpu.core_type = #tpu.core_type<tc>} {
    %c0 = arith.constant 0 : index
    %c0_0 = arith.constant 0 : index
    %0 = vector.load %arg0[%c0, %c0_0] : memref<2x1152xbf16, #tpu.memory_space<vmem>>, vector<2x1152xbf16>
    %c0_1 = arith.constant 0 : index
    %c0_2 = arith.constant 0 : index
    %1 = vector.load %arg2[%c0_1, %c0_2] : memref<1152x256xbf16, #tpu.memory_space<vmem>>, vector<1152x256xbf16>
    %cst = arith.constant dense<0.000000e+00> : vector<2x256xf32>
    %2 = tpu.matmul %0, %1, %cst {dimension_numbers = #tpu.dot_dimension_numbers<[1], [0], [0], [1], [0, 0, 1, 1], [], []>} : vector<2x1152xbf16>, vector<1152x256xbf16>, vector<2x256xf32> -> vector<2x256xf32>
    %c0_3 = arith.constant 0 : index
    %c0_4 = arith.constant 0 : index
    %3 = vector.load %arg3[%c0_3, %c0_4] : memref<1x256xf32, #tpu.memory_space<vmem>>, vector<1x256xf32>
    %4 = vector.broadcast %3 : vector<1x256xf32> to vector<2x256xf32>
    %5 = arith.addf %2, %4 : vector<2x256xf32>
    %cst_5 = arith.constant 0.000000e+00 : f32
    %6 = vector.broadcast %cst_5 : f32 to vector<2x256xf32>
    %7 = arith.maximumf %5, %6 : vector<2x256xf32>
    %8 = arith.truncf %7 : vector<2x256xf32> to vector<2x256xbf16>
    %c0_6 = arith.constant 0 : index
    %c0_7 = arith.constant 0 : index
    %9 = vector.load %arg4[%c0_6, %c0_7] : memref<256x256xbf16, #tpu.memory_space<vmem>>, vector<256x256xbf16>
    %cst_8 = arith.constant dense<0.000000e+00> : vector<2x256xf32>
    %10 = tpu.matmul %8, %9, %cst_8 {dimension_numbers = #tpu.dot_dimension_numbers<[1], [0], [0], [1], [0, 0, 1, 1], [], []>} : vector<2x256xbf16>, vector<256x256xbf16>, vector<2x256xf32> -> vector<2x256xf32>
    %c0_9 = arith.constant 0 : index
    %c0_10 = arith.constant 0 : index
    %11 = vector.load %arg5[%c0_9, %c0_10] : memref<1x256xf32, #tpu.memory_space<vmem>>, vector<1x256xf32>
    %12 = vector.broadcast %11 : vector<1x256xf32> to vector<2x256xf32>
    %13 = arith.addf %10, %12 : vector<2x256xf32>
    %c0_11 = arith.constant 0 : index
    %c0_12 = arith.constant 0 : index
    %14 = vector.load %arg1[%c0_11, %c0_12] : memref<2x128xbf16, #tpu.memory_space<vmem>>, vector<2x128xbf16>
    %c0_13 = arith.constant 0 : index
    %c0_14 = arith.constant 0 : index
    %15 = vector.load %arg6[%c0_13, %c0_14] : memref<128x256xbf16, #tpu.memory_space<vmem>>, vector<128x256xbf16>
    %cst_15 = arith.constant dense<0.000000e+00> : vector<2x256xf32>
    %16 = tpu.matmul %14, %15, %cst_15 {dimension_numbers = #tpu.dot_dimension_numbers<[1], [0], [0], [1], [0, 0, 1, 1], [], []>} : vector<2x128xbf16>, vector<128x256xbf16>, vector<2x256xf32> -> vector<2x256xf32>
    %c0_16 = arith.constant 0 : index
    %c0_17 = arith.constant 0 : index
    %17 = vector.load %arg7[%c0_16, %c0_17] : memref<1x256xf32, #tpu.memory_space<vmem>>, vector<1x256xf32>
    %18 = vector.broadcast %17 : vector<1x256xf32> to vector<2x256xf32>
    %19 = arith.addf %16, %18 : vector<2x256xf32>
    %20 = arith.addf %13, %19 : vector<2x256xf32>
    %cst_18 = arith.constant 0.000000e+00 : f32
    %21 = vector.broadcast %cst_18 : f32 to vector<2x256xf32>
    %22 = arith.maximumf %20, %21 : vector<2x256xf32>
    %23 = arith.truncf %22 : vector<2x256xf32> to vector<2x256xbf16>
    %c0_19 = arith.constant 0 : index
    %c0_20 = arith.constant 0 : index
    %24 = vector.load %arg8[%c0_19, %c0_20] : memref<2x256xbf16, #tpu.memory_space<vmem>>, vector<2x256xbf16>
    tpu.vector_store %arg8[%c0_19, %c0_20], %23 {strides = array<i32>} : memref<2x256xbf16, #tpu.memory_space<vmem>>, vector<2x256xbf16>,
    return
  }
}

module attributes {stable_mosaic.version = 11 : i64} {
  func.func @_block1x1_id_kernel(%arg0: memref<2x256xbf16, #tpu.memory_space<vmem>>, %arg1: memref<256x256xbf16, #tpu.memory_space<vmem>>, %arg2: memref<1x256xf32, #tpu.memory_space<vmem>>, %arg3: memref<256x256xbf16, #tpu.memory_space<vmem>>, %arg4: memref<1x256xf32, #tpu.memory_space<vmem>>, %arg5: memref<2x256xbf16, #tpu.memory_space<vmem>>) attributes {dimension_semantics = [], scalar_prefetch = 0 : i64, scratch_operands = 0 : i64, tpu.core_type = #tpu.core_type<tc>} {
    %c0 = arith.constant 0 : index
    %c0_0 = arith.constant 0 : index
    %0 = vector.load %arg0[%c0, %c0_0] : memref<2x256xbf16, #tpu.memory_space<vmem>>, vector<2x256xbf16>
    %c0_1 = arith.constant 0 : index
    %c0_2 = arith.constant 0 : index
    %1 = vector.load %arg1[%c0_1, %c0_2] : memref<256x256xbf16, #tpu.memory_space<vmem>>, vector<256x256xbf16>
    %cst = arith.constant dense<0.000000e+00> : vector<2x256xf32>
    %2 = tpu.matmul %0, %1, %cst {dimension_numbers = #tpu.dot_dimension_numbers<[1], [0], [0], [1], [0, 0, 1, 1], [], []>} : vector<2x256xbf16>, vector<256x256xbf16>, vector<2x256xf32> -> vector<2x256xf32>
    %c0_3 = arith.constant 0 : index
    %c0_4 = arith.constant 0 : index
    %3 = vector.load %arg2[%c0_3, %c0_4] : memref<1x256xf32, #tpu.memory_space<vmem>>, vector<1x256xf32>
    %4 = vector.broadcast %3 : vector<1x256xf32> to vector<2x256xf32>
    %5 = arith.addf %2, %4 : vector<2x256xf32>
    %cst_5 = arith.constant 0.000000e+00 : f32
    %6 = vector.broadcast %cst_5 : f32 to vector<2x256xf32>
    %7 = arith.maximumf %5, %6 : vector<2x256xf32>
    %8 = arith.truncf %7 : vector<2x256xf32> to vector<2x256xbf16>
    %c0_6 = arith.constant 0 : index
    %c0_7 = arith.constant 0 : index
    %9 = vector.load %arg3[%c0_6, %c0_7] : memref<256x256xbf16, #tpu.memory_space<vmem>>, vector<256x256xbf16>
    %cst_8 = arith.constant dense<0.000000e+00> : vector<2x256xf32>
    %10 = tpu.matmul %8, %9, %cst_8 {dimension_numbers = #tpu.dot_dimension_numbers<[1], [0], [0], [1], [0, 0, 1, 1], [], []>} : vector<2x256xbf16>, vector<256x256xbf16>, vector<2x256xf32> -> vector<2x256xf32>
    %c0_9 = arith.constant 0 : index
    %c0_10 = arith.constant 0 : index
    %11 = vector.load %arg4[%c0_9, %c0_10] : memref<1x256xf32, #tpu.memory_space<vmem>>, vector<1x256xf32>
    %12 = vector.broadcast %11 : vector<1x256xf32> to vector<2x256xf32>
    %13 = arith.addf %10, %12 : vector<2x256xf32>
    %14 = arith.extf %0 : vector<2x256xbf16> to vector<2x256xf32>
    %15 = arith.addf %13, %14 : vector<2x256xf32>
    %cst_11 = arith.constant 0.000000e+00 : f32
    %16 = vector.broadcast %cst_11 : f32 to vector<2x256xf32>
    %17 = arith.maximumf %15, %16 : vector<2x256xf32>
    %18 = arith.truncf %17 : vector<2x256xf32> to vector<2x256xbf16>
    %c0_12 = arith.constant 0 : index
    %c0_13 = arith.constant 0 : index
    %19 = vector.load %arg5[%c0_12, %c0_13] : memref<2x256xbf16, #tpu.memory_space<vmem>>, vector<2x256xbf16>
    tpu.vector_store %arg5[%c0_12, %c0_13], %18 {strides = array<i32>} : memref<2x256xbf16, #tpu.memory_space<vmem>>, vector<2x256xbf16>,
    return
  }
}

module attributes {stable_mosaic.version = 11 : i64} {
  func.func @_block1x1_ds_kernel(%arg0: memref<2x256xbf16, #tpu.memory_space<vmem>>, %arg1: memref<2x256xbf16, #tpu.memory_space<vmem>>, %arg2: memref<256x512xbf16, #tpu.memory_space<vmem>>, %arg3: memref<1x512xf32, #tpu.memory_space<vmem>>, %arg4: memref<512x512xbf16, #tpu.memory_space<vmem>>, %arg5: memref<1x512xf32, #tpu.memory_space<vmem>>, %arg6: memref<256x512xbf16, #tpu.memory_space<vmem>>, %arg7: memref<1x512xf32, #tpu.memory_space<vmem>>, %arg8: memref<2x512xbf16, #tpu.memory_space<vmem>>) attributes {dimension_semantics = [], scalar_prefetch = 0 : i64, scratch_operands = 0 : i64, tpu.core_type = #tpu.core_type<tc>} {
    %c0 = arith.constant 0 : index
    %c0_0 = arith.constant 0 : index
    %0 = vector.load %arg0[%c0, %c0_0] : memref<2x256xbf16, #tpu.memory_space<vmem>>, vector<2x256xbf16>
    %c0_1 = arith.constant 0 : index
    %c0_2 = arith.constant 0 : index
    %1 = vector.load %arg2[%c0_1, %c0_2] : memref<256x512xbf16, #tpu.memory_space<vmem>>, vector<256x512xbf16>
    %cst = arith.constant dense<0.000000e+00> : vector<2x512xf32>
    %2 = tpu.matmul %0, %1, %cst {dimension_numbers = #tpu.dot_dimension_numbers<[1], [0], [0], [1], [0, 0, 1, 1], [], []>} : vector<2x256xbf16>, vector<256x512xbf16>, vector<2x512xf32> -> vector<2x512xf32>
    %c0_3 = arith.constant 0 : index
    %c0_4 = arith.constant 0 : index
    %3 = vector.load %arg3[%c0_3, %c0_4] : memref<1x512xf32, #tpu.memory_space<vmem>>, vector<1x512xf32>
    %4 = vector.broadcast %3 : vector<1x512xf32> to vector<2x512xf32>
    %5 = arith.addf %2, %4 : vector<2x512xf32>
    %cst_5 = arith.constant 0.000000e+00 : f32
    %6 = vector.broadcast %cst_5 : f32 to vector<2x512xf32>
    %7 = arith.maximumf %5, %6 : vector<2x512xf32>
    %8 = arith.truncf %7 : vector<2x512xf32> to vector<2x512xbf16>
    %c0_6 = arith.constant 0 : index
    %c0_7 = arith.constant 0 : index
    %9 = vector.load %arg4[%c0_6, %c0_7] : memref<512x512xbf16, #tpu.memory_space<vmem>>, vector<512x512xbf16>
    %cst_8 = arith.constant dense<0.000000e+00> : vector<2x512xf32>
    %10 = tpu.matmul %8, %9, %cst_8 {dimension_numbers = #tpu.dot_dimension_numbers<[1], [0], [0], [1], [0, 0, 1, 1], [], []>} : vector<2x512xbf16>, vector<512x512xbf16>, vector<2x512xf32> -> vector<2x512xf32>
    %c0_9 = arith.constant 0 : index
    %c0_10 = arith.constant 0 : index
    %11 = vector.load %arg5[%c0_9, %c0_10] : memref<1x512xf32, #tpu.memory_space<vmem>>, vector<1x512xf32>
    %12 = vector.broadcast %11 : vector<1x512xf32> to vector<2x512xf32>
    %13 = arith.addf %10, %12 : vector<2x512xf32>
    %c0_11 = arith.constant 0 : index
    %c0_12 = arith.constant 0 : index
    %14 = vector.load %arg1[%c0_11, %c0_12] : memref<2x256xbf16, #tpu.memory_space<vmem>>, vector<2x256xbf16>
    %c0_13 = arith.constant 0 : index
    %c0_14 = arith.constant 0 : index
    %15 = vector.load %arg6[%c0_13, %c0_14] : memref<256x512xbf16, #tpu.memory_space<vmem>>, vector<256x512xbf16>
    %cst_15 = arith.constant dense<0.000000e+00> : vector<2x512xf32>
    %16 = tpu.matmul %14, %15, %cst_15 {dimension_numbers = #tpu.dot_dimension_numbers<[1], [0], [0], [1], [0, 0, 1, 1], [], []>} : vector<2x256xbf16>, vector<256x512xbf16>, vector<2x512xf32> -> vector<2x512xf32>
    %c0_16 = arith.constant 0 : index
    %c0_17 = arith.constant 0 : index
    %17 = vector.load %arg7[%c0_16, %c0_17] : memref<1x512xf32, #tpu.memory_space<vmem>>, vector<1x512xf32>
    %18 = vector.broadcast %17 : vector<1x512xf32> to vector<2x512xf32>
    %19 = arith.addf %16, %18 : vector<2x512xf32>
    %20 = arith.addf %13, %19 : vector<2x512xf32>
    %cst_18 = arith.constant 0.000000e+00 : f32
    %21 = vector.broadcast %cst_18 : f32 to vector<2x512xf32>
    %22 = arith.maximumf %20, %21 : vector<2x512xf32>
    %23 = arith.truncf %22 : vector<2x512xf32> to vector<2x512xbf16>
    %c0_19 = arith.constant 0 : index
    %c0_20 = arith.constant 0 : index
    %24 = vector.load %arg8[%c0_19, %c0_20] : memref<2x512xbf16, #tpu.memory_space<vmem>>, vector<2x512xbf16>
    tpu.vector_store %arg8[%c0_19, %c0_20], %23 {strides = array<i32>} : memref<2x512xbf16, #tpu.memory_space<vmem>>, vector<2x512xbf16>,
    return
  }
}

module attributes {stable_mosaic.version = 11 : i64} {
  func.func @_block1x1_id_kernel(%arg0: memref<2x512xbf16, #tpu.memory_space<vmem>>, %arg1: memref<512x512xbf16, #tpu.memory_space<vmem>>, %arg2: memref<1x512xf32, #tpu.memory_space<vmem>>, %arg3: memref<512x512xbf16, #tpu.memory_space<vmem>>, %arg4: memref<1x512xf32, #tpu.memory_space<vmem>>, %arg5: memref<2x512xbf16, #tpu.memory_space<vmem>>) attributes {dimension_semantics = [], scalar_prefetch = 0 : i64, scratch_operands = 0 : i64, tpu.core_type = #tpu.core_type<tc>} {
    %c0 = arith.constant 0 : index
    %c0_0 = arith.constant 0 : index
    %0 = vector.load %arg0[%c0, %c0_0] : memref<2x512xbf16, #tpu.memory_space<vmem>>, vector<2x512xbf16>
    %c0_1 = arith.constant 0 : index
    %c0_2 = arith.constant 0 : index
    %1 = vector.load %arg1[%c0_1, %c0_2] : memref<512x512xbf16, #tpu.memory_space<vmem>>, vector<512x512xbf16>
    %cst = arith.constant dense<0.000000e+00> : vector<2x512xf32>
    %2 = tpu.matmul %0, %1, %cst {dimension_numbers = #tpu.dot_dimension_numbers<[1], [0], [0], [1], [0, 0, 1, 1], [], []>} : vector<2x512xbf16>, vector<512x512xbf16>, vector<2x512xf32> -> vector<2x512xf32>
    %c0_3 = arith.constant 0 : index
    %c0_4 = arith.constant 0 : index
    %3 = vector.load %arg2[%c0_3, %c0_4] : memref<1x512xf32, #tpu.memory_space<vmem>>, vector<1x512xf32>
    %4 = vector.broadcast %3 : vector<1x512xf32> to vector<2x512xf32>
    %5 = arith.addf %2, %4 : vector<2x512xf32>
    %cst_5 = arith.constant 0.000000e+00 : f32
    %6 = vector.broadcast %cst_5 : f32 to vector<2x512xf32>
    %7 = arith.maximumf %5, %6 : vector<2x512xf32>
    %8 = arith.truncf %7 : vector<2x512xf32> to vector<2x512xbf16>
    %c0_6 = arith.constant 0 : index
    %c0_7 = arith.constant 0 : index
    %9 = vector.load %arg3[%c0_6, %c0_7] : memref<512x512xbf16, #tpu.memory_space<vmem>>, vector<512x512xbf16>
    %cst_8 = arith.constant dense<0.000000e+00> : vector<2x512xf32>
    %10 = tpu.matmul %8, %9, %cst_8 {dimension_numbers = #tpu.dot_dimension_numbers<[1], [0], [0], [1], [0, 0, 1, 1], [], []>} : vector<2x512xbf16>, vector<512x512xbf16>, vector<2x512xf32> -> vector<2x512xf32>
    %c0_9 = arith.constant 0 : index
    %c0_10 = arith.constant 0 : index
    %11 = vector.load %arg4[%c0_9, %c0_10] : memref<1x512xf32, #tpu.memory_space<vmem>>, vector<1x512xf32>
    %12 = vector.broadcast %11 : vector<1x512xf32> to vector<2x512xf32>
    %13 = arith.addf %10, %12 : vector<2x512xf32>
    %14 = arith.extf %0 : vector<2x512xbf16> to vector<2x512xf32>
    %15 = arith.addf %13, %14 : vector<2x512xf32>
    %cst_11 = arith.constant 0.000000e+00 : f32
    %16 = vector.broadcast %cst_11 : f32 to vector<2x512xf32>
    %17 = arith.maximumf %15, %16 : vector<2x512xf32>
    %18 = arith.truncf %17 : vector<2x512xf32> to vector<2x512xbf16>
    %c0_12 = arith.constant 0 : index
    %c0_13 = arith.constant 0 : index
    %19 = vector.load %arg5[%c0_12, %c0_13] : memref<2x512xbf16, #tpu.memory_space<vmem>>, vector<2x512xbf16>
    tpu.vector_store %arg5[%c0_12, %c0_13], %18 {strides = array<i32>} : memref<2x512xbf16, #tpu.memory_space<vmem>>, vector<2x512xbf16>,
    return
  }
}

module attributes {stable_mosaic.version = 11 : i64} {
  func.func @_gemm_kernel(%arg0: i32, %arg1: i32, %arg2: memref<2x512xbf16, #tpu.memory_space<vmem>>, %arg3: memref<512x128xbf16, #tpu.memory_space<vmem>>, %arg4: memref<1x128xf32, #tpu.memory_space<vmem>>, %arg5: memref<2x128xf32, #tpu.memory_space<vmem>>) attributes {dimension_semantics = [#tpu.dimension_semantics<parallel>, #tpu.dimension_semantics<parallel>], iteration_bounds = array<i64: 1, 1>, scalar_prefetch = 0 : i64, scratch_operands = 0 : i64, tpu.core_type = #tpu.core_type<tc>, window_params = [{transform_indices = @transform_0, window_bounds = array<i64: 2, 512>}, {transform_indices = @transform_1, window_bounds = array<i64: 512, 128>}, {transform_indices = @transform_2, window_bounds = array<i64: 1, 128>}, {transform_indices = @transform_3, window_bounds = array<i64: 2, 128>}]} {
    %c0 = arith.constant 0 : index
    %c0_0 = arith.constant 0 : index
    %0 = vector.load %arg2[%c0, %c0_0] : memref<2x512xbf16, #tpu.memory_space<vmem>>, vector<2x512xbf16>
    %c0_1 = arith.constant 0 : index
    %c0_2 = arith.constant 0 : index
    %1 = vector.load %arg3[%c0_1, %c0_2] : memref<512x128xbf16, #tpu.memory_space<vmem>>, vector<512x128xbf16>
    %cst = arith.constant dense<0.000000e+00> : vector<2x128xf32>
    %2 = tpu.matmul %0, %1, %cst {dimension_numbers = #tpu.dot_dimension_numbers<[1], [0], [0], [1], [0, 0, 1, 1], [], []>} : vector<2x512xbf16>, vector<512x128xbf16>, vector<2x128xf32> -> vector<2x128xf32>
    %c0_3 = arith.constant 0 : index
    %c0_4 = arith.constant 0 : index
    %3 = vector.load %arg4[%c0_3, %c0_4] : memref<1x128xf32, #tpu.memory_space<vmem>>, vector<1x128xf32>
    %4 = vector.broadcast %3 : vector<1x128xf32> to vector<2x128xf32>
    %5 = arith.addf %2, %4 : vector<2x128xf32>
    %6 = arith.negf %5 : vector<2x128xf32>
    %7 = math.exp %6 : vector<2x128xf32>
    %cst_5 = arith.constant 1.000000e+00 : f32
    %8 = vector.broadcast %cst_5 : f32 to vector<2x128xf32>
    %9 = arith.addf %8, %7 : vector<2x128xf32>
    %10 = arith.divf %8, %9 : vector<2x128xf32>
    %c0_6 = arith.constant 0 : index
    %c0_7 = arith.constant 0 : index
    %11 = vector.load %arg5[%c0_6, %c0_7] : memref<2x128xf32, #tpu.memory_space<vmem>>, vector<2x128xf32>
    tpu.vector_store %arg5[%c0_6, %c0_7], %10 {strides = array<i32>} : memref<2x128xf32, #tpu.memory_space<vmem>>, vector<2x128xf32>,
    return
  }
  func.func @transform_0(%arg0: i32, %arg1: i32) -> (i32, i32) {
    %c0_i32 = arith.constant 0 : i32
    %c0_i32_0 = arith.constant 0 : i32
    return %arg0, %c0_i32 : i32, i32
  }
  func.func @transform_1(%arg0: i32, %arg1: i32) -> (i32, i32) {
    %c0_i32 = arith.constant 0 : i32
    %c0_i32_0 = arith.constant 0 : i32
    return %c0_i32, %arg1 : i32, i32
  }
  func.func @transform_2(%arg0: i32, %arg1: i32) -> (i32, i32) {
    %c0_i32 = arith.constant 0 : i32
    %c0_i32_0 = arith.constant 0 : i32
    return %c0_i32, %arg1 : i32, i32
  }
  func.func @transform_3(%arg0: i32, %arg1: i32) -> (i32, i32) {
    %c0_i32 = arith.constant 0 : i32
    return %arg0, %arg1 : i32, i32
  }
}

</mosaic_0001>

<bundles_post_ra>
// kernel: resnet_forward.14
= control target key start
LH: loop header
LB: loop body
LE: loop exit
PB: predicated region body
PF: predicated region fallthrough
CT: control target
= control target key end

     0   :  { %s858_s12 = smov 0   ;;  %s860_s13 = smov 0   ;;  %s956_s0 = inlined_call_operand.vmem [shape: bf16[128,256], index: 0, kind: input, shape index: {}]   ;;  %s957_s1 = inlined_call_operand.vmem [shape: bf16[256,128], index: 1, kind: input, shape index: {}]   ;;  %s958_s2 = inlined_call_operand.vmem [shape: f32[1,128], index: 2, kind: input, shape index: {}]   ;;  %s959_s3 = inlined_call_operand.vmem [shape: bf16[128,128], index: 3, kind: output, shape index: {}]  }
   0x1   :  { %s862_s14 = smov 0  }
   0x2 LB: > { %s25_s15 = sadd.s32 1, %s832_s13  ;;  %p633_p0 = scmp.ge.s32.totalorder %s836_s14, 1  ;;  %s836_s14 = sphi %s862_s14, %s13_s14   ;;  %s832_s13 = sphi %s860_s13, %s961_s13   ;;  %s828_s12 = sphi %s858_s12, %s960_s12  }
   0x3   : > { %p27_p1 = scmp.ge.s32.totalorder %s25_s15, 2  ;;  %p170_p2 = scmp.lt.s32.totalorder %s836_s14, 3 }
   0x5   : > { %s963_s15 = smov (%p27_p1, %s25_s15), 0  ;;  %p171_p3 = pnand %p633_p0, %p170_p2 }
   0x6   : > { %v786_v0 = vld [vmem:[%s957_s1 + $0x40] sm:$0xff] (!%p171_p3)   ;;  %s634_s18 = sshll.u32 (!%p171_p3), %s828_s12, 3  ;;  %v788_v2 = vld [vmem:[%s957_s1 + $0x48] sm:$0xff] (!%p171_p3)   ;;  %v790_v4 = vld [vmem:[%s957_s1 + $0x50] sm:$0xff] (!%p171_p3)  }
   0x7   : > { %174 = sbr.rel (%p171_p3) target bundleno = 272 (0x110), region = 32  ;;  %v787_v1 = vld [vmem:[%s957_s1] sm:$0xff] (!%p171_p3)   ;;  %706 = vmatprep.subr.bf16.mxu0 (!%p171_p3), %v786_v0  ;;  %746 = vmatprep.subr.bf16.mxu1 (!%p171_p3), %v786_v0  ;;  %v789_v3 = vld [vmem:[%s957_s1 + $0x8] sm:$0xff] (!%p171_p3)   ;;  %p206_p4 = scmp.lt.s32.totalorder (!%p171_p3), %s634_s18, 15  ;;  %v791_v5 = vld [vmem:[%s957_s1 + $0x10] sm:$0xff] (!%p171_p3)  }
   0x8   : > { %707 = vmatpush3.bf16.msra.mxu0 (!%p171_p3), %v787_v1  ;;  %754 = vmatpush3.bf16.msra.mxu1 (!%p171_p3), %v787_v1  ;;  %v792_v6 = vld [vmem:[%s957_s1 + $0x58] sm:$0xff] (!%p171_p3)   ;;  %v794_v8 = vld [vmem:[%s957_s1 + $0x60] sm:$0xff] (!%p171_p3)   ;;  %v796_v10 = vld [vmem:[%s957_s1 + $0x68] sm:$0xff] (!%p171_p3)  }
   0x9   : > { %708 = vmatprep.subr.bf16.mxu0 (!%p171_p3), %v788_v2  ;;  %747 = vmatprep.subr.bf16.mxu1 (!%p171_p3), %v788_v2  ;;  %v793_v7 = vld [vmem:[%s957_s1 + $0x18] sm:$0xff] (!%p171_p3)   ;;  %v795_v9 = vld [vmem:[%s957_s1 + $0x20] sm:$0xff] (!%p171_p3)   ;;  %v797_v13 = vld [vmem:[%s957_s1 + $0x28] sm:$0xff] (!%p171_p3)  }
   0xa   : > { %v798_v14 = vld [vmem:[%s957_s1 + $0x70] sm:$0xff] (!%p171_p3)   ;;  %v800_v16 = vld [vmem:[%s957_s1 + $0x78] sm:$0xff] (!%p171_p3)   ;;  %v639_v26 = vld [vmem:[%s958_s2] ss:$0 sm:$0xff] (!%p171_p3) }
   0xb   : > { %v799_v15 = vld [vmem:[%s957_s1 + $0x30] sm:$0xff] (!%p171_p3)   ;;  %v801_v17 = vld [vmem:[%s957_s1 + $0x38] sm:$0xff] (!%p171_p3)  }
   0xc   : > { %709 = vmatpush3.bf16.msra.mxu0 (!%p171_p3), %v789_v3  ;;  %755 = vmatpush3.bf16.msra.mxu1 (!%p171_p3), %v789_v3 }
   0xd   : > { %710 = vmatprep.subr.bf16.mxu0 (!%p171_p3), %v790_v4  ;;  %748 = vmatprep.subr.bf16.mxu1 (!%p171_p3), %v790_v4 }
   0xe   : > { %s965_s18 = smov (!%p206_p4, %s634_s18), 15 }
   0xf   : > { %s674_s6 = sshll.u32 %s965_s18, 3  ;;  %s638_s5 = sshll.u32 %s965_s18, 2 }
  0x10   : > { %711 = vmatpush3.bf16.msra.mxu0 %v791_v5  ;;  %756 = vmatpush3.bf16.msra.mxu1 %v791_v5  ;;  %s909_s11 = scalar_lea.vmem %s956_s0, %s674_s6  ;;  %s226_s8 = scalar_lea.vmem %s959_s3, %s638_s5 }
  0x11   : > { %712 = vmatprep.subr.bf16.mxu0 %v792_v6  ;;  %749 = vmatprep.subr.bf16.mxu1 %v792_v6  ;;  %v804_v11 = vld [vmem:[%s909_s11 + $0x4] ss:$8 sps:$4 sm:$0xff]   ;;  %v802_v18 = vld [vmem:[%s909_s11] ss:$8 sps:$4 sm:$0xff]   ;;  %v808_v20 = vld [vmem:[%s909_s11 + $0x14] ss:$8 sps:$4 sm:$0xff]  }
  0x12   : > { %v807_v12 = vld [vmem:[%s909_s11 + $0x24] ss:$8 sps:$4 sm:$0xff]   ;;  %444 = vmatprep.mubr.bf16.mxu0 %v804_v11  ;;  %v805_v19 = vld [vmem:[%s909_s11 + $0x20] ss:$8 sps:$4 sm:$0xff]   ;;  %v810_v21 = vld [vmem:[%s909_s11 + $0x34] ss:$8 sps:$4 sm:$0xff]  }
  0x13   : > { %460 = vmatprep.mubr.bf16.mxu1 %v807_v12  ;;  %v812_v22 = vld [vmem:[%s909_s11 + $0x10] ss:$8 sps:$4 sm:$0xff]  }
  0x14   : > { %713 = vmatpush3.bf16.msra.mxu0 %v793_v7  ;;  %757 = vmatpush3.bf16.msra.mxu1 %v793_v7  ;;  %v813_v23 = vld [vmem:[%s909_s11 + $0x30] ss:$8 sps:$4 sm:$0xff]  }
  0x15   : > { %714 = vmatprep.subr.bf16.mxu0 %v794_v8  ;;  %750 = vmatprep.subr.bf16.mxu1 %v794_v8 }
  0x18   : > { %715 = vmatpush3.bf16.msra.mxu0 %v795_v9  ;;  %758 = vmatpush3.bf16.msra.mxu1 %v795_v9 }
  0x19   : > { %716 = vmatprep.subr.bf16.mxu0 %v796_v10  ;;  %751 = vmatprep.subr.bf16.mxu1 %v796_v10 }
  0x1c   : > { %717 = vmatpush3.bf16.msra.mxu0 %v797_v13  ;;  %759 = vmatpush3.bf16.msra.mxu1 %v797_v13 }
  0x1d   : > { %718 = vmatprep.subr.bf16.mxu0 %v798_v14  ;;  %752 = vmatprep.subr.bf16.mxu1 %v798_v14 }
  0x20   : > { %719 = vmatpush3.bf16.msra.mxu0 %v799_v15  ;;  %760 = vmatpush3.bf16.msra.mxu1 %v799_v15 }
  0x21   : > { %720 = vmatprep.subr.bf16.mxu0 %v800_v16  ;;  %753 = vmatprep.subr.bf16.mxu1 %v800_v16 }
  0x24   : > { %721 = vmatpush3.bf16.msra.mxu0 %v801_v17  ;;  %761 = vmatpush3.bf16.msra.mxu1 %v801_v17 }
  0x27   : > { %445 = vmatmul.mubr.bf16.vlgmr.msra.gmra.mrb[0].mxu0 %v802_v18  ;;  %461 = vmatmul.mubr.bf16.vlgmr.msra.gmra.mrb[0].mxu1 %v805_v19 }
  0x28   : > { %452 = vmatprep.mubr.bf16.mxu0 %v808_v20  ;;  %468 = vmatprep.mubr.bf16.mxu1 %v810_v21 }
  0x2f   : > { %453 = vmatmul.mubr.bf16.gmra.mrb[4].mxu0 %v812_v22  ;;  %469 = vmatmul.mubr.bf16.gmra.mrb[4].mxu1 %v813_v23 }
  0xfa   : > { %v722_v24 = vpop.f32.mrb[0].mxu0  ;;  %v734_v25 = vpop.f32.mrb[0].mxu1 }
  0xfb   : > { %v723_v27 = vpop.f32.mrb[1].mxu0  ;;  %v735_v28 = vpop.f32.mrb[1].mxu1 }
  0xfc   : > { %v724_v29 = vadd.f32 %v723_v27, %v722_v24  ;;  %v736_v30 = vadd.f32 %v735_v28, %v734_v25  ;;  %v725_v31 = vpop.f32.mrb[2].mxu0  ;;  %v737_v32 = vpop.f32.mrb[2].mxu1 }
  0xfd   : > { %v726_v33 = vpop.f32.mrb[3].mxu0  ;;  %v738_v34 = vpop.f32.mrb[3].mxu1 }
  0xfe   : > { %v447_v35 = vadd.f32 %v724_v29, %v639_v26  ;;  %v463_v36 = vadd.f32 %v736_v30, %v639_v26  ;;  %v727_v37 = vadd.f32 %v726_v33, %v725_v31  ;;  %v739_v38 = vadd.f32 %v738_v34, %v737_v32 }
 0x100   : > { %v450_v39 = vadd.f32 %v727_v37, %v639_v26  ;;  %v466_v40 = vadd.f32 %v739_v38, %v639_v26  ;;  %v477_v41 = vmax.f32 %v447_v35, 0.0  ;;  %v481_v42 = vmax.f32 %v463_v36, 0.0 }
 0x102   : > { %v478_v43 = vmax.f32 %v450_v39, 0.0  ;;  %v482_v44 = vmax.f32 %v466_v40, 0.0  ;;  %v728_v45 = vpop.f32.mrb[4].mxu0  ;;  %v740_v46 = vpop.f32.mrb[4].mxu1 }
 0x103   : > { %v729_v47 = vpop.f32.mrb[5].mxu0  ;;  %v741_v48 = vpop.f32.mrb[5].mxu1 }
 0x104   : > { %v686_v49 = vpack.c.bf16 %v478_v43, %v477_v41  ;;  %v696_v50 = vpack.c.bf16 %v482_v44, %v481_v42  ;;  %v730_v51 = vadd.f32 %v729_v47, %v728_v45  ;;  %v742_v52 = vadd.f32 %v741_v48, %v740_v46  ;;  %v731_v53 = vpop.f32.mrb[6].mxu0  ;;  %v743_v54 = vpop.f32.mrb[6].mxu1 }
 0x105   : > { %v732_v55 = vpop.f32.mrb[7].mxu0  ;;  %v744_v56 = vpop.f32.mrb[7].mxu1 }
 0x106   : > { %687 = vst [vmem:[%s226_s8] sm:$0xff] %v686_v49   ;;  %704 = vst [vmem:[%s226_s8 + $0x10] sm:$0xff] %v696_v50   ;;  %v455_v57 = vadd.f32 %v730_v51, %v639_v26  ;;  %v471_v58 = vadd.f32 %v742_v52, %v639_v26  ;;  %v733_v59 = vadd.f32 %v732_v55, %v731_v53 }
 0x107   : > { %v745_v60 = vadd.f32 %v744_v56, %v743_v54 }
 0x108   : > { %v458_v61 = vadd.f32 %v733_v59, %v639_v26  ;;  %v479_v63 = vmax.f32 %v455_v57, 0.0  ;;  %v483_v0 = vmax.f32 %v471_v58, 0.0 }
 0x109   : > { %v474_v62 = vadd.f32 %v745_v60, %v639_v26 }
 0x10a   : > { %v480_v1 = vmax.f32 %v458_v61, 0.0 }
 0x10b   : > { %v484_v2 = vmax.f32 %v474_v62, 0.0 }
 0x10c   : > { %v691_v3 = vpack.c.bf16 %v480_v1, %v479_v63 }
 0x10d   : > { %v701_v4 = vpack.c.bf16 %v484_v2, %v483_v0 }
 0x10e   : > { %703 = vst [vmem:[%s226_s8 + $0x8] sm:$0xff] %v691_v3  }
 0x10f   : > { %705 = vst [vmem:[%s226_s8 + $0x18] sm:$0xff] %v701_v4  }
 0x110 PF: > { %s13_s14 = sadd.s32 1, %s836_s14   ;;  %s960_s12 = smov %s832_s13 }
 0x111   : > { %p10_p5 = scmp.ge.s32.totalorder %s13_s14, 4   ;;  %s961_s13 = smov %s963_s15 }
 0x113   :  { %12 = sbr.rel (!%p10_p5) target bundleno = 2 (0x2), region = 68 }

// kernel: resnet_forward.15
= control target key start
LH: loop header
LB: loop body
LE: loop exit
PB: predicated region body
PF: predicated region fallthrough
CT: control target
= control target key end

     0   :  { %s1566_s12 = smov 0   ;;  %s1568_s13 = smov 0   ;;  %s1836_s0 = inlined_call_operand.vmem [shape: bf16[32,1152], index: 0, kind: input, shape index: {}]   ;;  %s1837_s1 = inlined_call_operand.vmem [shape: bf16[1152,128], index: 1, kind: input, shape index: {}]   ;;  %s1838_s2 = inlined_call_operand.vmem [shape: f32[1,128], index: 2, kind: input, shape index: {}]   ;;  %s1839_s3 = inlined_call_operand.vmem [shape: bf16[32,128], index: 3, kind: output, shape index: {}]  }
   0x1   :  { %s1570_s14 = smov 0  }
   0x2 LB: > { %s25_s15 = sadd.s32 1, %s1538_s13  ;;  %p1193_p0 = scmp.ge.s32.totalorder %s1542_s14, 1  ;;  %s1542_s14 = sphi %s1570_s14, %s13_s14   ;;  %s1538_s13 = sphi %s1568_s13, %s1841_s13   ;;  %s1534_s12 = sphi %s1566_s12, %s1840_s12  }
   0x3   : > { %p27_p1 = scmp.ge.s32.totalorder %s25_s15, 2  ;;  %p170_p2 = scmp.lt.s32.totalorder %s1542_s14, 3 }
   0x5   : > { %s1843_s15 = smov (%p27_p1, %s25_s15), 0  ;;  %p171_p3 = pnand %p1193_p0, %p170_p2 }
   0x6   : > { %v1435_v0 = vld [vmem:[%s1837_s1 + $0x40] sm:$0xff] (!%p171_p3)   ;;  %v1439_v4 = vld [vmem:[%s1837_s1 + $0x48] sm:$0xff] (!%p171_p3)   ;;  %v1443_v8 = vld [vmem:[%s1837_s1 + $0x50] sm:$0xff] (!%p171_p3)   ;;  %s1194_s21 = sshll.u32 (!%p171_p3), %s1534_s12, 1  ;;  %vm1545_vm0 = vmmov (!%p171_p3), 0  }
   0x7   : > { %174 = sbr.rel (%p171_p3) target bundleno = 324 (0x144), region = 32  ;;  %v1436_v1 = vld [vmem:[%s1837_s1] sm:$0xff] (!%p171_p3)   ;;  %1291 = vmatprep.subr.bf16.mxu0 (!%p171_p3), %v1435_v0  ;;  %v1440_v5 = vld [vmem:[%s1837_s1 + $0x8] sm:$0xff] (!%p171_p3)   ;;  %v1444_v9 = vld [vmem:[%s1837_s1 + $0x10] sm:$0xff] (!%p171_p3)   ;;  %p206_p4 = scmp.lt.s32.totalorder (!%p171_p3), %s1194_s21, 3 }
   0x8   : > { %v1437_v2 = vld [vmem:[%s1837_s1 + $0xc0] sm:$0xff] (!%p171_p3)   ;;  %1292 = vmatpush3.bf16.msra.mxu0 (!%p171_p3), %v1436_v1  ;;  %v1441_v6 = vld [vmem:[%s1837_s1 + $0xc8] sm:$0xff] (!%p171_p3)   ;;  %v1445_v10 = vld [vmem:[%s1837_s1 + $0xd0] sm:$0xff] (!%p171_p3)  }
   0x9   : > { %v1438_v3 = vld [vmem:[%s1837_s1 + $0x80] sm:$0xff] (!%p171_p3)   ;;  %1313 = vmatprep.subr.bf16.mxu1 (!%p171_p3), %v1437_v2  ;;  %1293 = vmatprep.subr.bf16.mxu0 (!%p171_p3), %v1439_v4  ;;  %v1442_v7 = vld [vmem:[%s1837_s1 + $0x88] sm:$0xff] (!%p171_p3)   ;;  %v1446_v11 = vld [vmem:[%s1837_s1 + $0x90] sm:$0xff] (!%p171_p3)  }
   0xa   : > { %1314 = vmatpush3.bf16.msra.mxu1 (!%p171_p3), %v1438_v3  ;;  %v1447_v12 = vld [vmem:[%s1837_s1 + $0x58] sm:$0xff] (!%p171_p3)   ;;  %v1451_v16 = vld [vmem:[%s1837_s1 + $0x60] sm:$0xff] (!%p171_p3)   ;;  %v1455_v20 = vld [vmem:[%s1837_s1 + $0x68] sm:$0xff] (!%p171_p3)  }
   0xb   : > { %1315 = vmatprep.subr.bf16.mxu1 (!%p171_p3), %v1441_v6  ;;  %v1448_v13 = vld [vmem:[%s1837_s1 + $0x18] sm:$0xff] (!%p171_p3)   ;;  %v1452_v17 = vld [vmem:[%s1837_s1 + $0x20] sm:$0xff] (!%p171_p3)   ;;  %v1456_v21 = vld [vmem:[%s1837_s1 + $0x28] sm:$0xff] (!%p171_p3)   ;;  %v1544_v6 = vmov (!%p171_p3), 0.0  }
   0xc   : > { %1294 = vmatpush3.bf16.msra.mxu0 (!%p171_p3), %v1440_v5  ;;  %v1449_v14 = vld [vmem:[%s1837_s1 + $0xd8] sm:$0xff] (!%p171_p3)   ;;  %v1453_v18 = vld [vmem:[%s1837_s1 + $0xe0] sm:$0xff] (!%p171_p3)   ;;  %v1457_v22 = vld [vmem:[%s1837_s1 + $0xe8] sm:$0xff] (!%p171_p3)  }
   0xd   : > { %1295 = vmatprep.subr.bf16.mxu0 (!%p171_p3), %v1443_v8  ;;  %v1450_v15 = vld [vmem:[%s1837_s1 + $0x98] sm:$0xff] (!%p171_p3)   ;;  %v1454_v19 = vld [vmem:[%s1837_s1 + $0xa0] sm:$0xff] (!%p171_p3)   ;;  %v1458_v23 = vld [vmem:[%s1837_s1 + $0xa8] sm:$0xff] (!%p171_p3)  }
   0xe   : > { %1316 = vmatpush3.bf16.msra.mxu1 %v1442_v7  ;;  %s1845_s21 = smov (!%p206_p4, %s1194_s21), 3  ;;  %v1459_v24 = vld [vmem:[%s1837_s1 + $0x70] sm:$0xff]   ;;  %v1463_v28 = vld [vmem:[%s1837_s1 + $0x78] sm:$0xff]   ;;  %v1470_v34 = vld [vmem:[%s1837_s1 + $0x140] sm:$0xff]  }
   0xf   : > { %1317 = vmatprep.subr.bf16.mxu1 %v1445_v10  ;;  %s1408_s20 = smul.u32 36, %s1845_s21  ;;  %v1460_v25 = vld [vmem:[%s1837_s1 + $0x30] sm:$0xff]   ;;  %v1464_v29 = vld [vmem:[%s1837_s1 + $0x38] sm:$0xff]   ;;  %v1474_v37 = vld [vmem:[%s1837_s1 + $0x100] sm:$0xff]  }
  0x10   : > { %1296 = vmatpush3.bf16.msra.mxu0 %v1444_v9  ;;  %v1461_v26 = vld [vmem:[%s1837_s1 + $0xf0] sm:$0xff]   ;;  %v1465_v30 = vld [vmem:[%s1837_s1 + $0xf8] sm:$0xff]   ;;  %v1475_v38 = vld [vmem:[%s1837_s1 + $0x1c0] sm:$0xff]  }
  0x11   : > { %1297 = vmatprep.subr.bf16.mxu0 %v1447_v12  ;;  %v1462_v27 = vld [vmem:[%s1837_s1 + $0xb0] sm:$0xff]   ;;  %s1680_s4 = scalar_lea.vmem %s1836_s0, %s1408_s20  ;;  %v1469_v33 = vld [vmem:[%s1837_s1 + $0xb8] sm:$0xff]   ;;  %v1476_v39 = vld [vmem:[%s1837_s1 + $0x180] sm:$0xff]  }
  0x12   : > { %1318 = vmatpush3.bf16.msra.mxu1 %v1446_v11  ;;  %v1466_v31 = vld [vmem:[%s1680_s4] ss:$36 sps:$4 sm:$0xff]   ;;  %v1471_v35 = vld [vmem:[%s1680_s4 + $0x8] ss:$36 sps:$4 sm:$0xff]   ;;  %v1481_v44 = vld [vmem:[%s1837_s1 + $0x150] sm:$0xff]  }
  0x13   : > { %1319 = vmatprep.subr.bf16.mxu1 %v1449_v14  ;;  %v1468_v32 = vld [vmem:[%s1680_s4 + $0x4] ss:$36 sps:$4 sm:$0xff]   ;;  %v1473_v36 = vld [vmem:[%s1680_s4 + $0xc] ss:$36 sps:$4 sm:$0xff]   ;;  %v1485_v48 = vld [vmem:[%s1837_s1 + $0x158] sm:$0xff]  }
  0x14   : > { %1298 = vmatpush3.bf16.msra.mxu0 %v1448_v13  ;;  %900 = vmatprep.mubr.bf16.mxu0 %v1468_v32  ;;  %v1477_v40 = vld [vmem:[%s1837_s1 + $0x148] sm:$0xff]   ;;  %v1482_v45 = vld [vmem:[%s1837_s1 + $0x110] sm:$0xff]   ;;  %v1486_v49 = vld [vmem:[%s1837_s1 + $0x118] sm:$0xff]  }
  0x15   : > { %1299 = vmatprep.subr.bf16.mxu0 %v1451_v16  ;;  %941 = vmatprep.mubr.bf16.mxu1 %v1473_v36  ;;  %v1478_v41 = vld [vmem:[%s1837_s1 + $0x108] sm:$0xff]   ;;  %v1483_v46 = vld [vmem:[%s1837_s1 + $0x1d0] sm:$0xff]   ;;  %v1487_v50 = vld [vmem:[%s1837_s1 + $0x1d8] sm:$0xff]  }
  0x16   : > { %1320 = vmatpush3.bf16.msra.mxu1 %v1450_v15  ;;  %v1479_v42 = vld [vmem:[%s1837_s1 + $0x1c8] sm:$0xff]   ;;  %v1484_v47 = vld [vmem:[%s1837_s1 + $0x190] sm:$0xff]   ;;  %v1488_v51 = vld [vmem:[%s1837_s1 + $0x198] sm:$0xff]  }
  0x17   : > { %1321 = vmatprep.subr.bf16.mxu1 %v1453_v18  ;;  %v1480_v43 = vld [vmem:[%s1837_s1 + $0x188] sm:$0xff]   ;;  %v1489_v52 = vld [vmem:[%s1837_s1 + $0x160] sm:$0xff]   ;;  %v1497_v60 = vld [vmem:[%s1837_s1 + $0x170] sm:$0xff]  }
  0x18   : > { %1300 = vmatpush3.bf16.msra.mxu0 %v1452_v17  ;;  %v1490_v53 = vld [vmem:[%s1837_s1 + $0x120] sm:$0xff]   ;;  %v1493_v56 = vld [vmem:[%s1837_s1 + $0x168] sm:$0xff]   ;;  %v1498_v61 = vld [vmem:[%s1837_s1 + $0x130] sm:$0xff]  }
  0x19   : > { %1301 = vmatprep.subr.bf16.mxu0 %v1455_v20  ;;  %v1491_v54 = vld [vmem:[%s1837_s1 + $0x1e0] sm:$0xff]   ;;  %v1494_v57 = vld [vmem:[%s1837_s1 + $0x128] sm:$0xff]   ;;  %v1499_v62 = vld [vmem:[%s1837_s1 + $0x1f0] sm:$0xff]  }
  0x1a   : > { %1322 = vmatpush3.bf16.msra.mxu1 %v1454_v19  ;;  %v1492_v55 = vld [vmem:[%s1837_s1 + $0x1a0] sm:$0xff]   ;;  %v1495_v58 = vld [vmem:[%s1837_s1 + $0x1e8] sm:$0xff]   ;;  %v1500_v63 = vld [vmem:[%s1837_s1 + $0x1b0] sm:$0xff]  }
  0x1b   : > { %1323 = vmatprep.subr.bf16.mxu1 %v1457_v22  ;;  %v1496_v59 = vld [vmem:[%s1837_s1 + $0x1a8] sm:$0xff]   ;;  %v1501_v0 = vld [vmem:[%s1837_s1 + $0x178] sm:$0xff]   ;;  %v1504_v3 = vld [vmem:[%s1680_s4 + $0x10] ss:$36 sps:$4 sm:$0xff]  }
  0x1c   : > { %1302 = vmatpush3.bf16.msra.mxu0 %v1456_v21  ;;  %v1502_v1 = vld [vmem:[%s1837_s1 + $0x138] sm:$0xff]   ;;  %v1511_v9 = vld [vmem:[%s1837_s1 + $0x200] sm:$0xff]   ;;  %v1512_v10 = vld [vmem:[%s1837_s1 + $0x208] sm:$0xff]  }
  0x1d   : > { %1303 = vmatprep.subr.bf16.mxu0 %v1459_v24  ;;  %v1503_v2 = vld [vmem:[%s1837_s1 + $0x1f8] sm:$0xff]   ;;  %v1513_v11 = vld [vmem:[%s1837_s1 + $0x210] sm:$0xff]   ;;  %v1515_v13 = vld [vmem:[%s1837_s1 + $0x220] sm:$0xff]  }
  0x1e   : > { %1324 = vmatpush3.bf16.msra.mxu1 %v1458_v23  ;;  %v1506_v4 = vld [vmem:[%s1680_s4 + $0x14] ss:$36 sps:$4 sm:$0xff]   ;;  %v1510_v8 = vld [vmem:[%s1680_s4 + $0x1c] ss:$36 sps:$4 sm:$0xff]   ;;  %v1516_v14 = vld [vmem:[%s1837_s1 + $0x228] sm:$0xff]  }
  0x1f   : > { %1325 = vmatprep.subr.bf16.mxu1 %v1461_v26  ;;  %v1507_v5 = vld [vmem:[%s1837_s1 + $0x1b8] sm:$0xff]   ;;  %v1517_v15 = vld [vmem:[%s1837_s1 + $0x230] sm:$0xff]   ;;  %v1519_v17 = vld [vmem:[%s1680_s4 + $0x20] ss:$36 sps:$4 sm:$0xff]  }
  0x20   : > { %1304 = vmatpush3.bf16.msra.mxu0 %v1460_v25  ;;  %v1508_v7 = vld [vmem:[%s1680_s4 + $0x18] ss:$36 sps:$4 sm:$0xff]   ;;  %v1198_v19 = vld [vmem:[%s1838_s2] ss:$0 sm:$0xff]  ;;  %s1197_s4 = sshll.u32 %s1845_s21, 2 }
  0x21   : > { %1305 = vmatprep.subr.bf16.mxu0 %v1463_v28  ;;  %v1514_v12 = vld [vmem:[%s1837_s1 + $0x218] sm:$0xff]   ;;  %s226_s7 = scalar_lea.vmem %s1839_s3, %s1197_s4 }
  0x22   : > { %1326 = vmatpush3.bf16.msra.mxu1 %v1462_v27  ;;  %v1518_v16 = vld [vmem:[%s1837_s1 + $0x238] sm:$0xff]  }
  0x23   : > { %1327 = vmatprep.subr.bf16.mxu1 %v1465_v30 }
  0x24   : > { %1306 = vmatpush3.bf16.msra.mxu0 %v1464_v29 }
  0x25   : > { %1335 = vmatprep.subr.bf16.mxu0 %v1470_v34 }
  0x26   : > { %1328 = vmatpush3.bf16.msra.mxu1 %v1469_v33 }
  0x27   : > { %901 = vmatmul.mubr.bf16.vlgmr.msra.gmra.mrb[0].mxu0 %v1466_v31  ;;  %1357 = vmatprep.subr.bf16.mxu1 %v1475_v38 }
  0x28   : > { %1336 = vmatpush3.bf16.msra.mxu0 %v1474_v37  ;;  %982 = vmatprep.mubr.bf16.mxu0 %v1506_v4 }
  0x29   : > { %942 = vmatmul.mubr.bf16.vlgmr.msra.gmra.mrb[0].mxu1 %v1471_v35  ;;  %1337 = vmatprep.subr.bf16.mxu0 %v1477_v40 }
  0x2a   : > { %1358 = vmatpush3.bf16.msra.mxu1 %v1476_v39  ;;  %1023 = vmatprep.mubr.bf16.mxu1 %v1510_v8 }
  0x2b   : > { %1359 = vmatprep.subr.bf16.mxu1 %v1479_v42 }
  0x2c   : > { %1338 = vmatpush3.bf16.msra.mxu0 %v1478_v41 }
  0x2d   : > { %1339 = vmatprep.subr.bf16.mxu0 %v1481_v44 }
  0x2e   : > { %1360 = vmatpush3.bf16.msra.mxu1 %v1480_v43 }
  0x2f   : > { %1361 = vmatprep.subr.bf16.mxu1 %v1483_v46 }
  0x30   : > { %1340 = vmatpush3.bf16.msra.mxu0 %v1482_v45 }
  0x31   : > { %1341 = vmatprep.subr.bf16.mxu0 %v1485_v48 }
  0x32   : > { %1362 = vmatpush3.bf16.msra.mxu1 %v1484_v47 }
  0x33   : > { %1363 = vmatprep.subr.bf16.mxu1 %v1487_v50 }
  0x34   : > { %1342 = vmatpush3.bf16.msra.mxu0 %v1486_v49 }
  0x35   : > { %1343 = vmatprep.subr.bf16.mxu0 %v1489_v52 }
  0x36   : > { %1364 = vmatpush3.bf16.msra.mxu1 %v1488_v51 }
  0x37   : > { %1365 = vmatprep.subr.bf16.mxu1 %v1491_v54 }
  0x38   : > { %1344 = vmatpush3.bf16.msra.mxu0 %v1490_v53 }
  0x39   : > { %1345 = vmatprep.subr.bf16.mxu0 %v1493_v56 }
  0x3a   : > { %1366 = vmatpush3.bf16.msra.mxu1 %v1492_v55 }
  0x3b   : > { %1367 = vmatprep.subr.bf16.mxu1 %v1495_v58 }
  0x3c   : > { %1346 = vmatpush3.bf16.msra.mxu0 %v1494_v57 }
  0x3d   : > { %1347 = vmatprep.subr.bf16.mxu0 %v1497_v60 }
  0x3e   : > { %1368 = vmatpush3.bf16.msra.mxu1 %v1496_v59 }
  0x3f   : > { %1369 = vmatprep.subr.bf16.mxu1 %v1499_v62 }
  0x40   : > { %1348 = vmatpush3.bf16.msra.mxu0 %v1498_v61 }
  0x41   : > { %1349 = vmatprep.subr.bf16.mxu0 %v1501_v0 }
  0x42   : > { %1370 = vmatpush3.bf16.msra.mxu1 %v1500_v63 }
  0x43   : > { %1371 = vmatprep.subr.bf16.mxu1 %v1503_v2 }
  0x44   : > { %1350 = vmatpush3.bf16.msra.mxu0 %v1502_v1 }
  0x45   : > { %1388 = vmatprep.subr.bf16.mxu0 %v1544_v6 }
  0x46   : > { %1372 = vmatpush3.bf16.msra.mxu1 %v1507_v5 }
  0x47   : > { %983 = vmatmul.mubr.bf16.vlgmr.msra.gmra.mrb[4].mxu0 %v1504_v3 }
  0x48   : > { %1404 = vmatprep.mubr.msk.bf16.mxu0 %vm1545_vm0, %v1544_v6  ;;  %1389 = vmatpush3.bf16.msra.mxu0 %v1511_v9 }
  0x49   : > { %1024 = vmatmul.mubr.bf16.vlgmr.msra.gmra.mrb[4].mxu1 %v1508_v7  ;;  %1390 = vmatprep.subr.bf16.mxu0 %v1544_v6 }
  0x4c   : > { %1391 = vmatpush3.bf16.msra.mxu0 %v1512_v10 }
  0x4d   : > { %1392 = vmatprep.subr.bf16.mxu0 %v1544_v6 }
  0x50   : > { %1393 = vmatpush3.bf16.msra.mxu0 %v1513_v11 }
  0x51   : > { %1394 = vmatprep.subr.bf16.mxu0 %v1544_v6 }
  0x54   : > { %1395 = vmatpush3.bf16.msra.mxu0 %v1514_v12 }
  0x55   : > { %1396 = vmatprep.subr.bf16.mxu0 %v1544_v6 }
  0x58   : > { %1397 = vmatpush3.bf16.msra.mxu0 %v1515_v13 }
  0x59   : > { %1398 = vmatprep.subr.bf16.mxu0 %v1544_v6 }
  0x5c   : > { %1399 = vmatpush3.bf16.msra.mxu0 %v1516_v14 }
  0x5d   : > { %1400 = vmatprep.subr.bf16.mxu0 %v1544_v6 }
  0x60   : > { %1401 = vmatpush3.bf16.msra.mxu0 %v1517_v15 }
  0x61   : > { %1402 = vmatprep.subr.bf16.mxu0 %v1544_v6 }
  0x64   : > { %1403 = vmatpush3.bf16.msra.mxu0 %v1518_v16 }
  0x67   : > { %1405 = vmatmul.mubr.bf16.vlgmr.msra.gmra.mrb[8].mxu0 %v1519_v17 }
  0xfa   : > { %v1307_v18 = vpop.f32.mrb[0].mxu0 }
  0xfb   : > { %v1308_v20 = vpop.f32.mrb[1].mxu0 }
  0xfc   : > { %v1309_v21 = vadd.f32 %v1308_v20, %v1307_v18  ;;  %v1310_v22 = vpop.f32.mrb[2].mxu0  ;;  %v1329_v23 = vpop.f32.mrb[0].mxu1 }
  0xfd   : > { %v1311_v24 = vpop.f32.mrb[3].mxu0  ;;  %v1330_v27 = vpop.f32.mrb[1].mxu1 }
  0xfe   : > { %v903_v25 = vadd.f32 %v1309_v21, %v1198_v19  ;;  %v1312_v26 = vadd.f32 %v1311_v24, %v1310_v22  ;;  %v1331_v28 = vadd.f32 %v1330_v27, %v1329_v23  ;;  %v1332_v29 = vpop.f32.mrb[2].mxu1 }
  0xff   : > { %v1333_v31 = vpop.f32.mrb[3].mxu1 }
 0x100   : > { %v906_v30 = vadd.f32 %v1312_v26, %v1198_v19  ;;  %v944_v32 = vadd.f32 %v1331_v28, %v903_v25  ;;  %v1334_v33 = vadd.f32 %v1333_v31, %v1332_v29 }
 0x102   : > { %v947_v34 = vadd.f32 %v1334_v33, %v906_v30 }
 0x11a   : > { %v1351_v35 = vpop.f32.mrb[4].mxu0 }
 0x11b   : > { %v1352_v36 = vpop.f32.mrb[5].mxu0 }
 0x11c   : > { %v1353_v37 = vadd.f32 %v1352_v36, %v1351_v35  ;;  %v1354_v38 = vpop.f32.mrb[6].mxu0  ;;  %v1373_v39 = vpop.f32.mrb[4].mxu1 }
 0x11d   : > { %v1355_v40 = vpop.f32.mrb[7].mxu0  ;;  %v1374_v43 = vpop.f32.mrb[5].mxu1 }
 0x11e   : > { %v985_v41 = vadd.f32 %v1353_v37, %v944_v32  ;;  %v1356_v42 = vadd.f32 %v1355_v40, %v1354_v38  ;;  %v1375_v44 = vadd.f32 %v1374_v43, %v1373_v39  ;;  %v1376_v45 = vpop.f32.mrb[6].mxu1 }
 0x11f   : > { %v1377_v47 = vpop.f32.mrb[7].mxu1 }
 0x120   : > { %v988_v46 = vadd.f32 %v1356_v42, %v947_v34  ;;  %v1378_v48 = vadd.f32 %v1377_v47, %v1376_v45  ;;  %v1026_v49 = vadd.f32 %v1375_v44, %v985_v41 }
 0x122   : > { %v1029_v50 = vadd.f32 %v1378_v48, %v988_v46 }
 0x13a   : > { %v1066_v51 = vpop.f32.mrb[8].mxu0 }
 0x13b   : > { %v1067_v52 = vadd.f32 %v1066_v51, %v1026_v49  ;;  %v1406_v53 = vpop.f32.mrb[9].mxu0 }
 0x13c   : > { %v1069_v54 = vpop.f32.mrb[10].mxu0 }
 0x13d   : > { %v1070_v55 = vadd.f32 %v1069_v54, %v1029_v50  ;;  %v1407_v56 = vpop.f32.mrb[11].mxu0  ;;  %v1073_v57 = vmax.f32 %v1067_v52, 0.0 }
 0x13f   : > { %v1074_v58 = vmax.f32 %v1070_v55, 0.0 }
 0x141   : > { %v1289_v59 = vpack.c.bf16 %v1074_v58, %v1073_v57 }
 0x143   : > { %1290 = vst [vmem:[%s226_s7] sm:$0xff] %v1289_v59  }
 0x144 PF: > { %s13_s14 = sadd.s32 1, %s1542_s14   ;;  %s1840_s12 = smov %s1538_s13 }
 0x145   : > { %p10_p5 = scmp.ge.s32.totalorder %s13_s14, 4   ;;  %s1841_s13 = smov %s1843_s15 }
 0x147   :  { %12 = sbr.rel (!%p10_p5) target bundleno = 2 (0x2), region = 68 }

// kernel: resnet_forward.16
= control target key start
LH: loop header
LB: loop body
LE: loop exit
PB: predicated region body
PF: predicated region fallthrough
CT: control target
= control target key end

     0   :  { %s1658_s15 = smov 0   ;;  %s1660_s16 = smov 0   ;;  %s1931_s0 = inlined_call_operand.vmem [shape: bf16[32,1152], index: 0, kind: input, shape index: {}]   ;;  %s1932_s1 = inlined_call_operand.vmem [shape: bf16[1152,128], index: 1, kind: input, shape index: {}]   ;;  %s1933_s2 = inlined_call_operand.vmem [shape: f32[1,128], index: 2, kind: input, shape index: {}]   ;;  %s1934_s3 = inlined_call_operand.vmem [shape: bf16[32,128], index: 3, kind: input, shape index: {}]   ;;  %s1935_s4 = inlined_call_operand.vmem [shape: bf16[32,128], index: 4, kind: output, shape index: {}]  }
   0x1   :  { %s1662_s17 = smov 0  }
   0x2 LB: > { %s26_s18 = sadd.s32 1, %s1625_s16  ;;  %p1274_p0 = scmp.ge.s32.totalorder %s1629_s17, 1  ;;  %s1629_s17 = sphi %s1662_s17, %s14_s17   ;;  %s1625_s16 = sphi %s1660_s16, %s1937_s16   ;;  %s1621_s15 = sphi %s1658_s15, %s1936_s15  }
   0x3   : > { %p28_p1 = scmp.ge.s32.totalorder %s26_s18, 2  ;;  %p211_p2 = scmp.lt.s32.totalorder %s1629_s17, 3 }
   0x5   : > { %s1939_s18 = smov (%p28_p1, %s26_s18), 0  ;;  %p212_p3 = pnand %p1274_p0, %p211_p2 }
   0x6   : > { %v1522_v0 = vld [vmem:[%s1932_s1 + $0x40] sm:$0xff] (!%p212_p3)   ;;  %v1526_v4 = vld [vmem:[%s1932_s1 + $0x48] sm:$0xff] (!%p212_p3)   ;;  %v1530_v8 = vld [vmem:[%s1932_s1 + $0x50] sm:$0xff] (!%p212_p3)   ;;  %s1275_s25 = sshll.u32 (!%p212_p3), %s1621_s15, 1  ;;  %vm1632_vm0 = vmmov (!%p212_p3), 0  }
   0x7   : > { %215 = sbr.rel (%p212_p3) target bundleno = 326 (0x146), region = 36  ;;  %v1523_v1 = vld [vmem:[%s1932_s1] sm:$0xff] (!%p212_p3)   ;;  %1378 = vmatprep.subr.bf16.mxu0 (!%p212_p3), %v1522_v0  ;;  %v1527_v5 = vld [vmem:[%s1932_s1 + $0x8] sm:$0xff] (!%p212_p3)   ;;  %v1531_v9 = vld [vmem:[%s1932_s1 + $0x10] sm:$0xff] (!%p212_p3)   ;;  %p257_p4 = scmp.lt.s32.totalorder (!%p212_p3), %s1275_s25, 3 }
   0x8   : > { %v1524_v2 = vld [vmem:[%s1932_s1 + $0xc0] sm:$0xff] (!%p212_p3)   ;;  %1379 = vmatpush3.bf16.msra.mxu0 (!%p212_p3), %v1523_v1  ;;  %v1528_v6 = vld [vmem:[%s1932_s1 + $0xc8] sm:$0xff] (!%p212_p3)   ;;  %v1532_v10 = vld [vmem:[%s1932_s1 + $0xd0] sm:$0xff] (!%p212_p3)  }
   0x9   : > { %v1525_v3 = vld [vmem:[%s1932_s1 + $0x80] sm:$0xff] (!%p212_p3)   ;;  %1400 = vmatprep.subr.bf16.mxu1 (!%p212_p3), %v1524_v2  ;;  %1380 = vmatprep.subr.bf16.mxu0 (!%p212_p3), %v1526_v4  ;;  %v1529_v7 = vld [vmem:[%s1932_s1 + $0x88] sm:$0xff] (!%p212_p3)   ;;  %v1533_v11 = vld [vmem:[%s1932_s1 + $0x90] sm:$0xff] (!%p212_p3)  }
   0xa   : > { %1401 = vmatpush3.bf16.msra.mxu1 (!%p212_p3), %v1525_v3  ;;  %v1534_v12 = vld [vmem:[%s1932_s1 + $0x58] sm:$0xff] (!%p212_p3)   ;;  %v1538_v16 = vld [vmem:[%s1932_s1 + $0x60] sm:$0xff] (!%p212_p3)   ;;  %v1542_v20 = vld [vmem:[%s1932_s1 + $0x68] sm:$0xff] (!%p212_p3)  }
   0xb   : > { %1402 = vmatprep.subr.bf16.mxu1 (!%p212_p3), %v1528_v6  ;;  %v1535_v13 = vld [vmem:[%s1932_s1 + $0x18] sm:$0xff] (!%p212_p3)   ;;  %v1539_v17 = vld [vmem:[%s1932_s1 + $0x20] sm:$0xff] (!%p212_p3)   ;;  %v1543_v21 = vld [vmem:[%s1932_s1 + $0x28] sm:$0xff] (!%p212_p3)   ;;  %v1631_v6 = vmov (!%p212_p3), 0.0  }
   0xc   : > { %1381 = vmatpush3.bf16.msra.mxu0 (!%p212_p3), %v1527_v5  ;;  %v1536_v14 = vld [vmem:[%s1932_s1 + $0xd8] sm:$0xff] (!%p212_p3)   ;;  %v1540_v18 = vld [vmem:[%s1932_s1 + $0xe0] sm:$0xff] (!%p212_p3)   ;;  %v1544_v22 = vld [vmem:[%s1932_s1 + $0xe8] sm:$0xff] (!%p212_p3)  }
   0xd   : > { %1382 = vmatprep.subr.bf16.mxu0 (!%p212_p3), %v1530_v8  ;;  %v1537_v15 = vld [vmem:[%s1932_s1 + $0x98] sm:$0xff] (!%p212_p3)   ;;  %v1541_v19 = vld [vmem:[%s1932_s1 + $0xa0] sm:$0xff] (!%p212_p3)   ;;  %v1545_v23 = vld [vmem:[%s1932_s1 + $0xa8] sm:$0xff] (!%p212_p3)  }
   0xe   : > { %1403 = vmatpush3.bf16.msra.mxu1 %v1529_v7  ;;  %s1941_s25 = smov (!%p257_p4, %s1275_s25), 3  ;;  %v1546_v24 = vld [vmem:[%s1932_s1 + $0x70] sm:$0xff]   ;;  %v1550_v28 = vld [vmem:[%s1932_s1 + $0x78] sm:$0xff]   ;;  %v1557_v34 = vld [vmem:[%s1932_s1 + $0x140] sm:$0xff]  }
   0xf   : > { %1404 = vmatprep.subr.bf16.mxu1 %v1532_v10  ;;  %s1495_s26 = smul.u32 36, %s1941_s25  ;;  %v1547_v25 = vld [vmem:[%s1932_s1 + $0x30] sm:$0xff]   ;;  %v1551_v29 = vld [vmem:[%s1932_s1 + $0x38] sm:$0xff]   ;;  %v1561_v37 = vld [vmem:[%s1932_s1 + $0x100] sm:$0xff]  }
  0x10   : > { %1383 = vmatpush3.bf16.msra.mxu0 %v1531_v9  ;;  %v1548_v26 = vld [vmem:[%s1932_s1 + $0xf0] sm:$0xff]   ;;  %v1552_v30 = vld [vmem:[%s1932_s1 + $0xf8] sm:$0xff]   ;;  %v1562_v38 = vld [vmem:[%s1932_s1 + $0x1c0] sm:$0xff]  }
  0x11   : > { %1384 = vmatprep.subr.bf16.mxu0 %v1534_v12  ;;  %v1549_v27 = vld [vmem:[%s1932_s1 + $0xb0] sm:$0xff]   ;;  %s1772_s10 = scalar_lea.vmem %s1931_s0, %s1495_s26  ;;  %v1556_v33 = vld [vmem:[%s1932_s1 + $0xb8] sm:$0xff]   ;;  %v1563_v39 = vld [vmem:[%s1932_s1 + $0x180] sm:$0xff]  }
  0x12   : > { %1405 = vmatpush3.bf16.msra.mxu1 %v1533_v11  ;;  %v1553_v31 = vld [vmem:[%s1772_s10] ss:$36 sps:$4 sm:$0xff]   ;;  %v1558_v35 = vld [vmem:[%s1772_s10 + $0x8] ss:$36 sps:$4 sm:$0xff]   ;;  %v1568_v44 = vld [vmem:[%s1932_s1 + $0x150] sm:$0xff]  }
  0x13   : > { %1406 = vmatprep.subr.bf16.mxu1 %v1536_v14  ;;  %v1555_v32 = vld [vmem:[%s1772_s10 + $0x4] ss:$36 sps:$4 sm:$0xff]   ;;  %v1560_v36 = vld [vmem:[%s1772_s10 + $0xc] ss:$36 sps:$4 sm:$0xff]   ;;  %v1572_v48 = vld [vmem:[%s1932_s1 + $0x158] sm:$0xff]  }
  0x14   : > { %1385 = vmatpush3.bf16.msra.mxu0 %v1535_v13  ;;  %960 = vmatprep.mubr.bf16.mxu0 %v1555_v32  ;;  %v1564_v40 = vld [vmem:[%s1932_s1 + $0x148] sm:$0xff]   ;;  %v1569_v45 = vld [vmem:[%s1932_s1 + $0x110] sm:$0xff]   ;;  %v1573_v49 = vld [vmem:[%s1932_s1 + $0x118] sm:$0xff]  }
  0x15   : > { %1386 = vmatprep.subr.bf16.mxu0 %v1538_v16  ;;  %1001 = vmatprep.mubr.bf16.mxu1 %v1560_v36  ;;  %v1565_v41 = vld [vmem:[%s1932_s1 + $0x108] sm:$0xff]   ;;  %v1570_v46 = vld [vmem:[%s1932_s1 + $0x1d0] sm:$0xff]   ;;  %v1574_v50 = vld [vmem:[%s1932_s1 + $0x1d8] sm:$0xff]  }
  0x16   : > { %1407 = vmatpush3.bf16.msra.mxu1 %v1537_v15  ;;  %v1566_v42 = vld [vmem:[%s1932_s1 + $0x1c8] sm:$0xff]   ;;  %v1571_v47 = vld [vmem:[%s1932_s1 + $0x190] sm:$0xff]   ;;  %v1575_v51 = vld [vmem:[%s1932_s1 + $0x198] sm:$0xff]  }
  0x17   : > { %1408 = vmatprep.subr.bf16.mxu1 %v1540_v18  ;;  %v1567_v43 = vld [vmem:[%s1932_s1 + $0x188] sm:$0xff]   ;;  %v1576_v52 = vld [vmem:[%s1932_s1 + $0x160] sm:$0xff]   ;;  %v1584_v60 = vld [vmem:[%s1932_s1 + $0x170] sm:$0xff]  }
  0x18   : > { %1387 = vmatpush3.bf16.msra.mxu0 %v1539_v17  ;;  %v1577_v53 = vld [vmem:[%s1932_s1 + $0x120] sm:$0xff]   ;;  %v1580_v56 = vld [vmem:[%s1932_s1 + $0x168] sm:$0xff]   ;;  %v1585_v61 = vld [vmem:[%s1932_s1 + $0x130] sm:$0xff]  }
  0x19   : > { %1388 = vmatprep.subr.bf16.mxu0 %v1542_v20  ;;  %v1578_v54 = vld [vmem:[%s1932_s1 + $0x1e0] sm:$0xff]   ;;  %v1581_v57 = vld [vmem:[%s1932_s1 + $0x128] sm:$0xff]   ;;  %v1586_v62 = vld [vmem:[%s1932_s1 + $0x1f0] sm:$0xff]  }
  0x1a   : > { %1409 = vmatpush3.bf16.msra.mxu1 %v1541_v19  ;;  %v1579_v55 = vld [vmem:[%s1932_s1 + $0x1a0] sm:$0xff]   ;;  %v1582_v58 = vld [vmem:[%s1932_s1 + $0x1e8] sm:$0xff]   ;;  %v1587_v63 = vld [vmem:[%s1932_s1 + $0x1b0] sm:$0xff]  }
  0x1b   : > { %1410 = vmatprep.subr.bf16.mxu1 %v1544_v22  ;;  %v1583_v59 = vld [vmem:[%s1932_s1 + $0x1a8] sm:$0xff]   ;;  %v1588_v0 = vld [vmem:[%s1932_s1 + $0x178] sm:$0xff]   ;;  %v1591_v3 = vld [vmem:[%s1772_s10 + $0x10] ss:$36 sps:$4 sm:$0xff]  }
  0x1c   : > { %1389 = vmatpush3.bf16.msra.mxu0 %v1543_v21  ;;  %v1589_v1 = vld [vmem:[%s1932_s1 + $0x138] sm:$0xff]   ;;  %v1598_v9 = vld [vmem:[%s1932_s1 + $0x200] sm:$0xff]   ;;  %v1599_v10 = vld [vmem:[%s1932_s1 + $0x208] sm:$0xff]  }
  0x1d   : > { %1390 = vmatprep.subr.bf16.mxu0 %v1546_v24  ;;  %v1590_v2 = vld [vmem:[%s1932_s1 + $0x1f8] sm:$0xff]   ;;  %v1600_v11 = vld [vmem:[%s1932_s1 + $0x210] sm:$0xff]   ;;  %v1602_v13 = vld [vmem:[%s1932_s1 + $0x220] sm:$0xff]  }
  0x1e   : > { %1411 = vmatpush3.bf16.msra.mxu1 %v1545_v23  ;;  %v1593_v4 = vld [vmem:[%s1772_s10 + $0x14] ss:$36 sps:$4 sm:$0xff]   ;;  %v1597_v8 = vld [vmem:[%s1772_s10 + $0x1c] ss:$36 sps:$4 sm:$0xff]   ;;  %v1603_v14 = vld [vmem:[%s1932_s1 + $0x228] sm:$0xff]  }
  0x1f   : > { %1412 = vmatprep.subr.bf16.mxu1 %v1548_v26  ;;  %v1594_v5 = vld [vmem:[%s1932_s1 + $0x1b8] sm:$0xff]   ;;  %v1604_v15 = vld [vmem:[%s1932_s1 + $0x230] sm:$0xff]   ;;  %v1606_v17 = vld [vmem:[%s1772_s10 + $0x20] ss:$36 sps:$4 sm:$0xff]  }
  0x20   : > { %1391 = vmatpush3.bf16.msra.mxu0 %v1547_v25  ;;  %v1595_v7 = vld [vmem:[%s1772_s10 + $0x18] ss:$36 sps:$4 sm:$0xff]   ;;  %v1281_v19 = vld [vmem:[%s1933_s2] ss:$0 sm:$0xff]  ;;  %s1278_s10 = sshll.u32 %s1941_s25, 2 }
  0x21   : > { %1392 = vmatprep.subr.bf16.mxu0 %v1550_v28  ;;  %v1601_v12 = vld [vmem:[%s1932_s1 + $0x218] sm:$0xff]   ;;  %s277_s21 = scalar_lea.vmem %s1934_s3, %s1278_s10  ;;  %s286_s25 = scalar_lea.vmem %s1935_s4, %s1278_s10 }
  0x22   : > { %1413 = vmatpush3.bf16.msra.mxu1 %v1549_v27  ;;  %v1605_v16 = vld [vmem:[%s1932_s1 + $0x238] sm:$0xff]  }
  0x23   : > { %1414 = vmatprep.subr.bf16.mxu1 %v1552_v30 }
  0x24   : > { %1393 = vmatpush3.bf16.msra.mxu0 %v1551_v29 }
  0x25   : > { %1422 = vmatprep.subr.bf16.mxu0 %v1557_v34 }
  0x26   : > { %1415 = vmatpush3.bf16.msra.mxu1 %v1556_v33 }
  0x27   : > { %961 = vmatmul.mubr.bf16.vlgmr.msra.gmra.mrb[0].mxu0 %v1553_v31  ;;  %1444 = vmatprep.subr.bf16.mxu1 %v1562_v38 }
  0x28   : > { %1423 = vmatpush3.bf16.msra.mxu0 %v1561_v37  ;;  %1042 = vmatprep.mubr.bf16.mxu0 %v1593_v4 }
  0x29   : > { %1002 = vmatmul.mubr.bf16.vlgmr.msra.gmra.mrb[0].mxu1 %v1558_v35  ;;  %1424 = vmatprep.subr.bf16.mxu0 %v1564_v40 }
  0x2a   : > { %1445 = vmatpush3.bf16.msra.mxu1 %v1563_v39  ;;  %1083 = vmatprep.mubr.bf16.mxu1 %v1597_v8 }
  0x2b   : > { %1446 = vmatprep.subr.bf16.mxu1 %v1566_v42 }
  0x2c   : > { %1425 = vmatpush3.bf16.msra.mxu0 %v1565_v41 }
  0x2d   : > { %1426 = vmatprep.subr.bf16.mxu0 %v1568_v44 }
  0x2e   : > { %1447 = vmatpush3.bf16.msra.mxu1 %v1567_v43 }
  0x2f   : > { %1448 = vmatprep.subr.bf16.mxu1 %v1570_v46 }
  0x30   : > { %1427 = vmatpush3.bf16.msra.mxu0 %v1569_v45 }
  0x31   : > { %1428 = vmatprep.subr.bf16.mxu0 %v1572_v48 }
  0x32   : > { %1449 = vmatpush3.bf16.msra.mxu1 %v1571_v47 }
  0x33   : > { %1450 = vmatprep.subr.bf16.mxu1 %v1574_v50 }
  0x34   : > { %1429 = vmatpush3.bf16.msra.mxu0 %v1573_v49 }
  0x35   : > { %1430 = vmatprep.subr.bf16.mxu0 %v1576_v52 }
  0x36   : > { %1451 = vmatpush3.bf16.msra.mxu1 %v1575_v51  ;;  %v1370_v51 = vld [vmem:[%s277_s21] sm:$0xff]  }
  0x37   : > { %1452 = vmatprep.subr.bf16.mxu1 %v1578_v54  ;;  %v1371_v52 = vunpack.c.l.bf16 %v1370_v51 }
  0x38   : > { %1431 = vmatpush3.bf16.msra.mxu0 %v1577_v53 }
  0x39   : > { %1432 = vmatprep.subr.bf16.mxu0 %v1580_v56  ;;  %v1372_v56 = vunpack.c.h.bf16 %v1370_v51 }
  0x3a   : > { %1453 = vmatpush3.bf16.msra.mxu1 %v1579_v55 }
  0x3b   : > { %1454 = vmatprep.subr.bf16.mxu1 %v1582_v58 }
  0x3c   : > { %1433 = vmatpush3.bf16.msra.mxu0 %v1581_v57 }
  0x3d   : > { %1434 = vmatprep.subr.bf16.mxu0 %v1584_v60 }
  0x3e   : > { %1455 = vmatpush3.bf16.msra.mxu1 %v1583_v59 }
  0x3f   : > { %1456 = vmatprep.subr.bf16.mxu1 %v1586_v62 }
  0x40   : > { %1435 = vmatpush3.bf16.msra.mxu0 %v1585_v61 }
  0x41   : > { %1436 = vmatprep.subr.bf16.mxu0 %v1588_v0 }
  0x42   : > { %1457 = vmatpush3.bf16.msra.mxu1 %v1587_v63 }
  0x43   : > { %1458 = vmatprep.subr.bf16.mxu1 %v1590_v2 }
  0x44   : > { %1437 = vmatpush3.bf16.msra.mxu0 %v1589_v1 }
  0x45   : > { %1475 = vmatprep.subr.bf16.mxu0 %v1631_v6 }
  0x46   : > { %1459 = vmatpush3.bf16.msra.mxu1 %v1594_v5 }
  0x47   : > { %1043 = vmatmul.mubr.bf16.vlgmr.msra.gmra.mrb[4].mxu0 %v1591_v3 }
  0x48   : > { %1491 = vmatprep.mubr.msk.bf16.mxu0 %vm1632_vm0, %v1631_v6  ;;  %1476 = vmatpush3.bf16.msra.mxu0 %v1598_v9 }
  0x49   : > { %1084 = vmatmul.mubr.bf16.vlgmr.msra.gmra.mrb[4].mxu1 %v1595_v7  ;;  %1477 = vmatprep.subr.bf16.mxu0 %v1631_v6 }
  0x4c   : > { %1478 = vmatpush3.bf16.msra.mxu0 %v1599_v10 }
  0x4d   : > { %1479 = vmatprep.subr.bf16.mxu0 %v1631_v6 }
  0x50   : > { %1480 = vmatpush3.bf16.msra.mxu0 %v1600_v11 }
  0x51   : > { %1481 = vmatprep.subr.bf16.mxu0 %v1631_v6 }
  0x54   : > { %1482 = vmatpush3.bf16.msra.mxu0 %v1601_v12 }
  0x55   : > { %1483 = vmatprep.subr.bf16.mxu0 %v1631_v6 }
  0x58   : > { %1484 = vmatpush3.bf16.msra.mxu0 %v1602_v13 }
  0x59   : > { %1485 = vmatprep.subr.bf16.mxu0 %v1631_v6 }
  0x5c   : > { %1486 = vmatpush3.bf16.msra.mxu0 %v1603_v14 }
  0x5d   : > { %1487 = vmatprep.subr.bf16.mxu0 %v1631_v6 }
  0x60   : > { %1488 = vmatpush3.bf16.msra.mxu0 %v1604_v15 }
  0x61   : > { %1489 = vmatprep.subr.bf16.mxu0 %v1631_v6 }
  0x64   : > { %1490 = vmatpush3.bf16.msra.mxu0 %v1605_v16 }
  0x67   : > { %1492 = vmatmul.mubr.bf16.vlgmr.msra.gmra.mrb[8].mxu0 %v1606_v17 }
  0xfa   : > { %v1394_v18 = vpop.f32.mrb[0].mxu0 }
  0xfb   : > { %v1395_v20 = vpop.f32.mrb[1].mxu0 }
  0xfc   : > { %v1396_v21 = vadd.f32 %v1395_v20, %v1394_v18  ;;  %v1397_v22 = vpop.f32.mrb[2].mxu0  ;;  %v1416_v23 = vpop.f32.mrb[0].mxu1 }
  0xfd   : > { %v1398_v24 = vpop.f32.mrb[3].mxu0  ;;  %v1417_v27 = vpop.f32.mrb[1].mxu1 }
  0xfe   : > { %v963_v25 = vadd.f32 %v1396_v21, %v1281_v19  ;;  %v1399_v26 = vadd.f32 %v1398_v24, %v1397_v22  ;;  %v1418_v28 = vadd.f32 %v1417_v27, %v1416_v23  ;;  %v1419_v29 = vpop.f32.mrb[2].mxu1 }
  0xff   : > { %v1420_v31 = vpop.f32.mrb[3].mxu1 }
 0x100   : > { %v966_v30 = vadd.f32 %v1399_v26, %v1281_v19  ;;  %v1004_v32 = vadd.f32 %v1418_v28, %v963_v25  ;;  %v1421_v33 = vadd.f32 %v1420_v31, %v1419_v29 }
 0x102   : > { %v1007_v34 = vadd.f32 %v1421_v33, %v966_v30 }
 0x11a   : > { %v1438_v35 = vpop.f32.mrb[4].mxu0 }
 0x11b   : > { %v1439_v36 = vpop.f32.mrb[5].mxu0 }
 0x11c   : > { %v1440_v37 = vadd.f32 %v1439_v36, %v1438_v35  ;;  %v1441_v38 = vpop.f32.mrb[6].mxu0  ;;  %v1460_v39 = vpop.f32.mrb[4].mxu1 }
 0x11d   : > { %v1442_v40 = vpop.f32.mrb[7].mxu0  ;;  %v1461_v43 = vpop.f32.mrb[5].mxu1 }
 0x11e   : > { %v1045_v41 = vadd.f32 %v1440_v37, %v1004_v32  ;;  %v1443_v42 = vadd.f32 %v1442_v40, %v1441_v38  ;;  %v1462_v44 = vadd.f32 %v1461_v43, %v1460_v39  ;;  %v1463_v45 = vpop.f32.mrb[6].mxu1 }
 0x11f   : > { %v1464_v47 = vpop.f32.mrb[7].mxu1 }
 0x120   : > { %v1048_v46 = vadd.f32 %v1443_v42, %v1007_v34  ;;  %v1465_v48 = vadd.f32 %v1464_v47, %v1463_v45  ;;  %v1086_v49 = vadd.f32 %v1462_v44, %v1045_v41 }
 0x122   : > { %v1089_v50 = vadd.f32 %v1465_v48, %v1048_v46 }
 0x13a   : > { %v1126_v53 = vpop.f32.mrb[8].mxu0 }
 0x13b   : > { %v1127_v54 = vadd.f32 %v1126_v53, %v1086_v49  ;;  %v1493_v55 = vpop.f32.mrb[9].mxu0 }
 0x13c   : > { %v1129_v57 = vpop.f32.mrb[10].mxu0 }
 0x13d   : > { %v1137_v58 = vadd.f32 %v1371_v52, %v1127_v54  ;;  %v1130_v59 = vadd.f32 %v1129_v57, %v1089_v50  ;;  %v1494_v60 = vpop.f32.mrb[11].mxu0 }
 0x13f   : > { %v1138_v61 = vadd.f32 %v1372_v56, %v1130_v59  ;;  %v1139_v62 = vmax.f32 %v1137_v58, 0.0 }
 0x141   : > { %v1140_v63 = vmax.f32 %v1138_v61, 0.0 }
 0x143   : > { %v1376_v0 = vpack.c.bf16 %v1140_v63, %v1139_v62 }
 0x145   : > { %1377 = vst [vmem:[%s286_s25] sm:$0xff] %v1376_v0  }
 0x146 PF: > { %s14_s17 = sadd.s32 1, %s1629_s17   ;;  %s1936_s15 = smov %s1625_s16 }
 0x147   : > { %p11_p5 = scmp.ge.s32.totalorder %s14_s17, 4   ;;  %s1937_s16 = smov %s1939_s18 }
 0x149   :  { %13 = sbr.rel (!%p11_p5) target bundleno = 2 (0x2), region = 75 }

// kernel: resnet_forward.19
= control target key start
LH: loop header
LB: loop body
LE: loop exit
PB: predicated region body
PF: predicated region fallthrough
CT: control target
= control target key end

     0   :  { %vm1125_vm0 = vmmov 0   ;;  %s1383_s1 = inlined_call_operand.vmem [shape: bf16[1152,128], index: 1, kind: input, shape index: {}]   ;;  %s1384_s0 = inlined_call_operand.vmem [shape: bf16[8,1152], index: 0, kind: input, shape index: {}]   ;;  %s1385_s2 = inlined_call_operand.vmem [shape: f32[1,128], index: 2, kind: input, shape index: {}]   ;;  %s1386_s3 = inlined_call_operand.vmem [shape: bf16[8,128], index: 3, kind: output, shape index: {}]  }
   0x1   :  { %v1043_v0 = vld [vmem:[%s1383_s1 + $0x40] sm:$0xff]   ;;  %v1047_v4 = vld [vmem:[%s1383_s1 + $0x48] sm:$0xff]   ;;  %v1051_v8 = vld [vmem:[%s1383_s1 + $0x50] sm:$0xff]  }
   0x2   :  { %v1044_v1 = vld [vmem:[%s1383_s1] sm:$0xff]   ;;  %924 = vmatprep.subr.bf16.mxu0 %v1043_v0  ;;  %v1048_v5 = vld [vmem:[%s1383_s1 + $0x8] sm:$0xff]   ;;  %v1052_v9 = vld [vmem:[%s1383_s1 + $0x10] sm:$0xff]  }
   0x3   :  { %v1045_v2 = vld [vmem:[%s1383_s1 + $0xc0] sm:$0xff]   ;;  %925 = vmatpush3.bf16.msra.mxu0 %v1044_v1  ;;  %v1049_v6 = vld [vmem:[%s1383_s1 + $0xc8] sm:$0xff]   ;;  %v1053_v10 = vld [vmem:[%s1383_s1 + $0xd0] sm:$0xff]  }
   0x4   :  { %v1046_v3 = vld [vmem:[%s1383_s1 + $0x80] sm:$0xff]   ;;  %946 = vmatprep.subr.bf16.mxu1 %v1045_v2  ;;  %926 = vmatprep.subr.bf16.mxu0 %v1047_v4  ;;  %v1050_v7 = vld [vmem:[%s1383_s1 + $0x88] sm:$0xff]   ;;  %v1054_v11 = vld [vmem:[%s1383_s1 + $0x90] sm:$0xff]  }
   0x5   :  { %947 = vmatpush3.bf16.msra.mxu1 %v1046_v3  ;;  %v1055_v12 = vld [vmem:[%s1383_s1 + $0x58] sm:$0xff]   ;;  %v1059_v16 = vld [vmem:[%s1383_s1 + $0x60] sm:$0xff]   ;;  %v1063_v20 = vld [vmem:[%s1383_s1 + $0x68] sm:$0xff]  }
   0x6   :  { %948 = vmatprep.subr.bf16.mxu1 %v1049_v6  ;;  %v1056_v13 = vld [vmem:[%s1383_s1 + $0x18] sm:$0xff]   ;;  %v1060_v17 = vld [vmem:[%s1383_s1 + $0x20] sm:$0xff]   ;;  %v1064_v21 = vld [vmem:[%s1383_s1 + $0x28] sm:$0xff]  }
   0x7   :  { %927 = vmatpush3.bf16.msra.mxu0 %v1048_v5  ;;  %v1057_v14 = vld [vmem:[%s1383_s1 + $0xd8] sm:$0xff]   ;;  %v1061_v18 = vld [vmem:[%s1383_s1 + $0xe0] sm:$0xff]   ;;  %v1065_v22 = vld [vmem:[%s1383_s1 + $0xe8] sm:$0xff]  }
   0x8   :  { %928 = vmatprep.subr.bf16.mxu0 %v1051_v8  ;;  %v1058_v15 = vld [vmem:[%s1383_s1 + $0x98] sm:$0xff]   ;;  %v1062_v19 = vld [vmem:[%s1383_s1 + $0xa0] sm:$0xff]   ;;  %v1066_v23 = vld [vmem:[%s1383_s1 + $0xa8] sm:$0xff]  }
   0x9   :  { %949 = vmatpush3.bf16.msra.mxu1 %v1050_v7  ;;  %v1067_v24 = vld [vmem:[%s1383_s1 + $0x70] sm:$0xff]   ;;  %v1071_v28 = vld [vmem:[%s1383_s1 + $0x78] sm:$0xff]   ;;  %v15_v31 = vld [vmem:[%s1384_s0] sm:$0xff] }
   0xa   :  { %950 = vmatprep.subr.bf16.mxu1 %v1053_v10  ;;  %v1068_v25 = vld [vmem:[%s1383_s1 + $0x30] sm:$0xff]   ;;  %v1072_v29 = vld [vmem:[%s1383_s1 + $0x38] sm:$0xff]   ;;  %v843_v32 = vcombine.low %v15_v31, %v15_v31  ;;  %v844_v33 = vcombine.high %v15_v31, %v15_v31  ;;  %v1077_v35 = vld [vmem:[%s1383_s1 + $0x140] sm:$0xff]  }
   0xb   :  { %929 = vmatpush3.bf16.msra.mxu0 %v1052_v9  ;;  %v1069_v26 = vld [vmem:[%s1383_s1 + $0xf0] sm:$0xff]   ;;  %v1073_v30 = vld [vmem:[%s1383_s1 + $0xf8] sm:$0xff]   ;;  %v16_v36 = vld [vmem:[%s1384_s0 + $0x8] sm:$0xff]  ;;  %v1124_v9 = vmov 0.0  }
   0xc   :  { %930 = vmatprep.subr.bf16.mxu0 %v1055_v12  ;;  %v1070_v27 = vld [vmem:[%s1383_s1 + $0xb0] sm:$0xff]   ;;  %v1076_v34 = vld [vmem:[%s1383_s1 + $0xb8] sm:$0xff]   ;;  %667 = vmatprep.mubr.bf16.mxu0 %v844_v33  ;;  %v845_v37 = vcombine.low %v16_v36, %v16_v36  ;;  %v846_v38 = vcombine.high %v16_v36, %v16_v36  ;;  %v1080_v39 = vld [vmem:[%s1383_s1 + $0x100] sm:$0xff]  }
   0xd   :  { %951 = vmatpush3.bf16.msra.mxu1 %v1054_v11  ;;  %v1081_v40 = vld [vmem:[%s1383_s1 + $0x1c0] sm:$0xff]   ;;  %v1083_v42 = vld [vmem:[%s1383_s1 + $0x148] sm:$0xff]   ;;  %v1087_v46 = vld [vmem:[%s1383_s1 + $0x150] sm:$0xff]  }
   0xe   :  { %952 = vmatprep.subr.bf16.mxu1 %v1057_v14  ;;  %707 = vmatprep.mubr.bf16.mxu1 %v846_v38  ;;  %v1082_v41 = vld [vmem:[%s1383_s1 + $0x180] sm:$0xff]   ;;  %v1084_v43 = vld [vmem:[%s1383_s1 + $0x108] sm:$0xff]   ;;  %v1088_v47 = vld [vmem:[%s1383_s1 + $0x110] sm:$0xff]  }
   0xf   :  { %931 = vmatpush3.bf16.msra.mxu0 %v1056_v13  ;;  %v1085_v44 = vld [vmem:[%s1383_s1 + $0x1c8] sm:$0xff]   ;;  %v1089_v48 = vld [vmem:[%s1383_s1 + $0x1d0] sm:$0xff]   ;;  %v1091_v50 = vld [vmem:[%s1383_s1 + $0x158] sm:$0xff]  }
  0x10   :  { %932 = vmatprep.subr.bf16.mxu0 %v1059_v16  ;;  %v1086_v45 = vld [vmem:[%s1383_s1 + $0x188] sm:$0xff]   ;;  %v1090_v49 = vld [vmem:[%s1383_s1 + $0x190] sm:$0xff]   ;;  %v1092_v51 = vld [vmem:[%s1383_s1 + $0x118] sm:$0xff]  }
  0x11   :  { %953 = vmatpush3.bf16.msra.mxu1 %v1058_v15  ;;  %v1093_v52 = vld [vmem:[%s1383_s1 + $0x1d8] sm:$0xff]   ;;  %v1095_v54 = vld [vmem:[%s1383_s1 + $0x160] sm:$0xff]   ;;  %v1099_v58 = vld [vmem:[%s1383_s1 + $0x168] sm:$0xff]  }
  0x12   :  { %954 = vmatprep.subr.bf16.mxu1 %v1061_v18  ;;  %v1094_v53 = vld [vmem:[%s1383_s1 + $0x198] sm:$0xff]   ;;  %v1096_v55 = vld [vmem:[%s1383_s1 + $0x120] sm:$0xff]   ;;  %v1100_v59 = vld [vmem:[%s1383_s1 + $0x128] sm:$0xff]  }
  0x13   :  { %933 = vmatpush3.bf16.msra.mxu0 %v1060_v17  ;;  %v1097_v56 = vld [vmem:[%s1383_s1 + $0x1e0] sm:$0xff]   ;;  %v1101_v60 = vld [vmem:[%s1383_s1 + $0x1e8] sm:$0xff]   ;;  %v1103_v62 = vld [vmem:[%s1383_s1 + $0x170] sm:$0xff]  }
  0x14   :  { %934 = vmatprep.subr.bf16.mxu0 %v1063_v20  ;;  %v1098_v57 = vld [vmem:[%s1383_s1 + $0x1a0] sm:$0xff]   ;;  %v1102_v61 = vld [vmem:[%s1383_s1 + $0x1a8] sm:$0xff]   ;;  %v1104_v63 = vld [vmem:[%s1383_s1 + $0x130] sm:$0xff]  }
  0x15   :  { %955 = vmatpush3.bf16.msra.mxu1 %v1062_v19  ;;  %v1105_v0 = vld [vmem:[%s1383_s1 + $0x1f0] sm:$0xff]   ;;  %v1107_v2 = vld [vmem:[%s1383_s1 + $0x178] sm:$0xff]   ;;  %v1115_v13 = vld [vmem:[%s1383_s1 + $0x200] sm:$0xff]  }
  0x16   :  { %956 = vmatprep.subr.bf16.mxu1 %v1065_v22  ;;  %v1106_v1 = vld [vmem:[%s1383_s1 + $0x1b0] sm:$0xff]   ;;  %v1108_v3 = vld [vmem:[%s1383_s1 + $0x138] sm:$0xff]   ;;  %v1116_v14 = vld [vmem:[%s1383_s1 + $0x208] sm:$0xff]  }
  0x17   :  { %935 = vmatpush3.bf16.msra.mxu0 %v1064_v21  ;;  %v1109_v4 = vld [vmem:[%s1383_s1 + $0x1f8] sm:$0xff]   ;;  %v17_v5 = vld [vmem:[%s1384_s0 + $0x10] sm:$0xff]  ;;  %v1119_v17 = vld [vmem:[%s1383_s1 + $0x220] sm:$0xff]  }
  0x18   :  { %936 = vmatprep.subr.bf16.mxu0 %v1067_v24  ;;  %v847_v6 = vcombine.low %v17_v5, %v17_v5  ;;  %v848_v7 = vcombine.high %v17_v5, %v17_v5  ;;  %v1112_v8 = vld [vmem:[%s1383_s1 + $0x1b8] sm:$0xff]   ;;  %v1117_v15 = vld [vmem:[%s1383_s1 + $0x210] sm:$0xff]   ;;  %v1120_v18 = vld [vmem:[%s1383_s1 + $0x228] sm:$0xff]  }
  0x19   :  { %957 = vmatpush3.bf16.msra.mxu1 %v1066_v23  ;;  %v18_v10 = vld [vmem:[%s1384_s0 + $0x18] sm:$0xff]  ;;  %v1121_v19 = vld [vmem:[%s1383_s1 + $0x230] sm:$0xff]   ;;  %v1123_v21 = vld [vmem:[%s1384_s0 + $0x20] ss:$0 sps:$4 sm:$0xff]  }
  0x1a   :  { %958 = vmatprep.subr.bf16.mxu1 %v1069_v26  ;;  %v849_v11 = vcombine.low %v18_v10, %v18_v10  ;;  %v850_v12 = vcombine.high %v18_v10, %v18_v10  ;;  %v1118_v16 = vld [vmem:[%s1383_s1 + $0x218] sm:$0xff]   ;;  %v842_v23 = vld [vmem:[%s1385_s2] ss:$0 sm:$0xff] }
  0x1b   :  { %937 = vmatpush3.bf16.msra.mxu0 %v1068_v25  ;;  %v1122_v20 = vld [vmem:[%s1383_s1 + $0x238] sm:$0xff]  }
  0x1c   :  { %938 = vmatprep.subr.bf16.mxu0 %v1071_v28 }
  0x1d   :  { %959 = vmatpush3.bf16.msra.mxu1 %v1070_v27 }
  0x1e   :  { %960 = vmatprep.subr.bf16.mxu1 %v1073_v30 }
  0x1f   :  { %939 = vmatpush3.bf16.msra.mxu0 %v1072_v29 }
  0x20   :  { %968 = vmatprep.subr.bf16.mxu0 %v1077_v35 }
  0x21   :  { %961 = vmatpush3.bf16.msra.mxu1 %v1076_v34 }
  0x22   :  { %668 = vmatmul.mubr.bf16.vlgmr.msra.gmra.mrb[0].mxu0 %v843_v32  ;;  %990 = vmatprep.subr.bf16.mxu1 %v1081_v40 }
  0x23   :  { %969 = vmatpush3.bf16.msra.mxu0 %v1080_v39  ;;  %747 = vmatprep.mubr.bf16.mxu0 %v848_v7 }
  0x24   :  { %708 = vmatmul.mubr.bf16.vlgmr.msra.gmra.mrb[0].mxu1 %v845_v37  ;;  %970 = vmatprep.subr.bf16.mxu0 %v1083_v42 }
  0x25   :  { %991 = vmatpush3.bf16.msra.mxu1 %v1082_v41  ;;  %787 = vmatprep.mubr.bf16.mxu1 %v850_v12 }
  0x26   :  { %992 = vmatprep.subr.bf16.mxu1 %v1085_v44 }
  0x27   :  { %971 = vmatpush3.bf16.msra.mxu0 %v1084_v43 }
  0x28   :  { %972 = vmatprep.subr.bf16.mxu0 %v1087_v46 }
  0x29   :  { %993 = vmatpush3.bf16.msra.mxu1 %v1086_v45 }
  0x2a   :  { %994 = vmatprep.subr.bf16.mxu1 %v1089_v48 }
  0x2b   :  { %973 = vmatpush3.bf16.msra.mxu0 %v1088_v47 }
  0x2c   :  { %974 = vmatprep.subr.bf16.mxu0 %v1091_v50 }
  0x2d   :  { %995 = vmatpush3.bf16.msra.mxu1 %v1090_v49 }
  0x2e   :  { %996 = vmatprep.subr.bf16.mxu1 %v1093_v52 }
  0x2f   :  { %975 = vmatpush3.bf16.msra.mxu0 %v1092_v51 }
  0x30   :  { %976 = vmatprep.subr.bf16.mxu0 %v1095_v54 }
  0x31   :  { %997 = vmatpush3.bf16.msra.mxu1 %v1094_v53 }
  0x32   :  { %998 = vmatprep.subr.bf16.mxu1 %v1097_v56 }
  0x33   :  { %977 = vmatpush3.bf16.msra.mxu0 %v1096_v55 }
  0x34   :  { %978 = vmatprep.subr.bf16.mxu0 %v1099_v58 }
  0x35   :  { %999 = vmatpush3.bf16.msra.mxu1 %v1098_v57 }
  0x36   :  { %1000 = vmatprep.subr.bf16.mxu1 %v1101_v60 }
  0x37   :  { %979 = vmatpush3.bf16.msra.mxu0 %v1100_v59 }
  0x38   :  { %980 = vmatprep.subr.bf16.mxu0 %v1103_v62 }
  0x39   :  { %1001 = vmatpush3.bf16.msra.mxu1 %v1102_v61 }
  0x3a   :  { %1002 = vmatprep.subr.bf16.mxu1 %v1105_v0 }
  0x3b   :  { %981 = vmatpush3.bf16.msra.mxu0 %v1104_v63 }
  0x3c   :  { %982 = vmatprep.subr.bf16.mxu0 %v1107_v2 }
  0x3d   :  { %1003 = vmatpush3.bf16.msra.mxu1 %v1106_v1 }
  0x3e   :  { %1004 = vmatprep.subr.bf16.mxu1 %v1109_v4 }
  0x3f   :  { %983 = vmatpush3.bf16.msra.mxu0 %v1108_v3 }
  0x40   :  { %1021 = vmatprep.subr.bf16.mxu0 %v1124_v9 }
  0x41   :  { %1005 = vmatpush3.bf16.msra.mxu1 %v1112_v8 }
  0x42   :  { %748 = vmatmul.mubr.bf16.vlgmr.msra.gmra.mrb[4].mxu0 %v847_v6 }
  0x43   :  { %1022 = vmatpush3.bf16.msra.mxu0 %v1115_v13  ;;  %1037 = vmatprep.mubr.msk.bf16.mxu0 %vm1125_vm0, %v1124_v9 }
  0x44   :  { %788 = vmatmul.mubr.bf16.vlgmr.msra.gmra.mrb[4].mxu1 %v849_v11  ;;  %1023 = vmatprep.subr.bf16.mxu0 %v1124_v9 }
  0x47   :  { %1024 = vmatpush3.bf16.msra.mxu0 %v1116_v14 }
  0x48   :  { %1025 = vmatprep.subr.bf16.mxu0 %v1124_v9 }
  0x4b   :  { %1026 = vmatpush3.bf16.msra.mxu0 %v1117_v15 }
  0x4c   :  { %1027 = vmatprep.subr.bf16.mxu0 %v1124_v9 }
  0x4f   :  { %1028 = vmatpush3.bf16.msra.mxu0 %v1118_v16 }
  0x50   :  { %1029 = vmatprep.subr.bf16.mxu0 %v1124_v9 }
  0x53   :  { %1030 = vmatpush3.bf16.msra.mxu0 %v1119_v17 }
  0x54   :  { %1031 = vmatprep.subr.bf16.mxu0 %v1124_v9 }
  0x57   :  { %1032 = vmatpush3.bf16.msra.mxu0 %v1120_v18 }
  0x58   :  { %1033 = vmatprep.subr.bf16.mxu0 %v1124_v9 }
  0x5b   :  { %1034 = vmatpush3.bf16.msra.mxu0 %v1121_v19 }
  0x5c   :  { %1035 = vmatprep.subr.bf16.mxu0 %v1124_v9 }
  0x5f   :  { %1036 = vmatpush3.bf16.msra.mxu0 %v1122_v20 }
  0x62   :  { %1038 = vmatmul.mubr.bf16.vlgmr.msra.gmra.mrb[8].mxu0 %v1123_v21 }
  0xf5   :  { %v940_v22 = vpop.f32.mrb[0].mxu0 }
  0xf6   :  { %v941_v24 = vpop.f32.mrb[1].mxu0 }
  0xf7   :  { %v942_v25 = vadd.f32 %v941_v24, %v940_v22  ;;  %v943_v26 = vpop.f32.mrb[2].mxu0  ;;  %v962_v27 = vpop.f32.mrb[0].mxu1 }
  0xf8   :  { %v944_v28 = vpop.f32.mrb[3].mxu0  ;;  %v963_v29 = vpop.f32.mrb[1].mxu1 }
  0xf9   :  { %v670_v30 = vadd.f32 %v942_v25, %v842_v23  ;;  %v964_v31 = vadd.f32 %v963_v29, %v962_v27  ;;  %v965_v32 = vpop.f32.mrb[2].mxu1 }
  0xfa   :  { %v966_v33 = vpop.f32.mrb[3].mxu1 }
  0xfb   :  { %v710_v34 = vadd.f32 %v964_v31, %v670_v30 }
 0x115   :  { %v984_v35 = vpop.f32.mrb[4].mxu0 }
 0x116   :  { %v985_v36 = vpop.f32.mrb[5].mxu0 }
 0x117   :  { %v986_v37 = vadd.f32 %v985_v36, %v984_v35  ;;  %v987_v38 = vpop.f32.mrb[6].mxu0  ;;  %v1006_v39 = vpop.f32.mrb[4].mxu1 }
 0x118   :  { %v988_v40 = vpop.f32.mrb[7].mxu0  ;;  %v1007_v41 = vpop.f32.mrb[5].mxu1 }
 0x119   :  { %v750_v42 = vadd.f32 %v986_v37, %v710_v34  ;;  %v1008_v43 = vadd.f32 %v1007_v41, %v1006_v39  ;;  %v1009_v44 = vpop.f32.mrb[6].mxu1 }
 0x11a   :  { %v1010_v45 = vpop.f32.mrb[7].mxu1 }
 0x11b   :  { %v790_v46 = vadd.f32 %v1008_v43, %v750_v42 }
 0x135   :  { %v829_v47 = vpop.f32.mrb[8].mxu0 }
 0x136   :  { %v830_v48 = vadd.f32 %v829_v47, %v790_v46  ;;  %v1039_v49 = vpop.f32.mrb[9].mxu0 }
 0x137   :  { %v832_v50 = vpop.f32.mrb[10].mxu0 }
 0x138   :  { %v835_v51 = vmax.f32 %v830_v48, 0.0  ;;  %v1040_v52 = vpop.f32.mrb[11].mxu0 }
 0x13a   :  { %v836_v53 = vpack.c.bf16 %v835_v51, %v835_v51 }
 0x13c   :  { %837 = vst [vmem:[%s1386_s3] sm:$0xf] %v836_v53 }

// kernel: resnet_forward.20
= control target key start
LH: loop header
LB: loop body
LE: loop exit
PB: predicated region body
PF: predicated region fallthrough
CT: control target
= control target key end

     0   :  { %s1481_s1 = inlined_call_operand.vmem [shape: bf16[1280,128], index: 1, kind: input, shape index: {}]   ;;  %s1482_s0 = inlined_call_operand.vmem [shape: bf16[8,1280], index: 0, kind: input, shape index: {}]   ;;  %s1483_s2 = inlined_call_operand.vmem [shape: f32[1,128], index: 2, kind: input, shape index: {}]   ;;  %s1484_s3 = inlined_call_operand.vmem [shape: bf16[8,128], index: 3, kind: output, shape index: {}]  }
   0x1   :  { %v1110_v0 = vld [vmem:[%s1481_s1 + $0x40] sm:$0xff]   ;;  %v1114_v4 = vld [vmem:[%s1481_s1 + $0x48] sm:$0xff]   ;;  %v1118_v8 = vld [vmem:[%s1481_s1 + $0x50] sm:$0xff]  }
   0x2   :  { %v1111_v1 = vld [vmem:[%s1481_s1] sm:$0xff]   ;;  %1000 = vmatprep.subr.bf16.mxu0 %v1110_v0  ;;  %v1115_v5 = vld [vmem:[%s1481_s1 + $0x8] sm:$0xff]   ;;  %v1119_v9 = vld [vmem:[%s1481_s1 + $0x10] sm:$0xff]  }
   0x3   :  { %v1112_v2 = vld [vmem:[%s1481_s1 + $0xc0] sm:$0xff]   ;;  %1001 = vmatpush3.bf16.msra.mxu0 %v1111_v1  ;;  %v1116_v6 = vld [vmem:[%s1481_s1 + $0xc8] sm:$0xff]   ;;  %v1120_v10 = vld [vmem:[%s1481_s1 + $0xd0] sm:$0xff]  }
   0x4   :  { %v1113_v3 = vld [vmem:[%s1481_s1 + $0x80] sm:$0xff]   ;;  %1022 = vmatprep.subr.bf16.mxu1 %v1112_v2  ;;  %1002 = vmatprep.subr.bf16.mxu0 %v1114_v4  ;;  %v1117_v7 = vld [vmem:[%s1481_s1 + $0x88] sm:$0xff]   ;;  %v1121_v11 = vld [vmem:[%s1481_s1 + $0x90] sm:$0xff]  }
   0x5   :  { %1023 = vmatpush3.bf16.msra.mxu1 %v1113_v3  ;;  %v1122_v12 = vld [vmem:[%s1481_s1 + $0x58] sm:$0xff]   ;;  %v1126_v16 = vld [vmem:[%s1481_s1 + $0x60] sm:$0xff]   ;;  %v1130_v20 = vld [vmem:[%s1481_s1 + $0x68] sm:$0xff]  }
   0x6   :  { %1024 = vmatprep.subr.bf16.mxu1 %v1116_v6  ;;  %v1123_v13 = vld [vmem:[%s1481_s1 + $0x18] sm:$0xff]   ;;  %v1127_v17 = vld [vmem:[%s1481_s1 + $0x20] sm:$0xff]   ;;  %v1131_v21 = vld [vmem:[%s1481_s1 + $0x28] sm:$0xff]  }
   0x7   :  { %1003 = vmatpush3.bf16.msra.mxu0 %v1115_v5  ;;  %v1124_v14 = vld [vmem:[%s1481_s1 + $0xd8] sm:$0xff]   ;;  %v1128_v18 = vld [vmem:[%s1481_s1 + $0xe0] sm:$0xff]   ;;  %v1132_v22 = vld [vmem:[%s1481_s1 + $0xe8] sm:$0xff]  }
   0x8   :  { %1004 = vmatprep.subr.bf16.mxu0 %v1118_v8  ;;  %v1125_v15 = vld [vmem:[%s1481_s1 + $0x98] sm:$0xff]   ;;  %v1129_v19 = vld [vmem:[%s1481_s1 + $0xa0] sm:$0xff]   ;;  %v1133_v23 = vld [vmem:[%s1481_s1 + $0xa8] sm:$0xff]  }
   0x9   :  { %1025 = vmatpush3.bf16.msra.mxu1 %v1117_v7  ;;  %v1134_v24 = vld [vmem:[%s1481_s1 + $0x70] sm:$0xff]   ;;  %v1138_v28 = vld [vmem:[%s1481_s1 + $0x78] sm:$0xff]   ;;  %v15_v31 = vld [vmem:[%s1482_s0] sm:$0xff] }
   0xa   :  { %1026 = vmatprep.subr.bf16.mxu1 %v1120_v10  ;;  %v1135_v25 = vld [vmem:[%s1481_s1 + $0x30] sm:$0xff]   ;;  %v1139_v29 = vld [vmem:[%s1481_s1 + $0x38] sm:$0xff]   ;;  %v910_v32 = vcombine.low %v15_v31, %v15_v31  ;;  %v911_v33 = vcombine.high %v15_v31, %v15_v31  ;;  %v1144_v35 = vld [vmem:[%s1481_s1 + $0x140] sm:$0xff]  }
   0xb   :  { %1005 = vmatpush3.bf16.msra.mxu0 %v1119_v9  ;;  %v1136_v26 = vld [vmem:[%s1481_s1 + $0xf0] sm:$0xff]   ;;  %v1140_v30 = vld [vmem:[%s1481_s1 + $0xf8] sm:$0xff]   ;;  %v16_v36 = vld [vmem:[%s1482_s0 + $0x8] sm:$0xff] }
   0xc   :  { %1006 = vmatprep.subr.bf16.mxu0 %v1122_v12  ;;  %v1137_v27 = vld [vmem:[%s1481_s1 + $0xb0] sm:$0xff]   ;;  %v1143_v34 = vld [vmem:[%s1481_s1 + $0xb8] sm:$0xff]   ;;  %734 = vmatprep.mubr.bf16.mxu0 %v911_v33  ;;  %v912_v37 = vcombine.low %v16_v36, %v16_v36  ;;  %v913_v38 = vcombine.high %v16_v36, %v16_v36  ;;  %v1147_v39 = vld [vmem:[%s1481_s1 + $0x100] sm:$0xff]  }
   0xd   :  { %1027 = vmatpush3.bf16.msra.mxu1 %v1121_v11  ;;  %v1148_v40 = vld [vmem:[%s1481_s1 + $0x1c0] sm:$0xff]   ;;  %v1150_v42 = vld [vmem:[%s1481_s1 + $0x148] sm:$0xff]   ;;  %v1154_v46 = vld [vmem:[%s1481_s1 + $0x150] sm:$0xff]  }
   0xe   :  { %1028 = vmatprep.subr.bf16.mxu1 %v1124_v14  ;;  %774 = vmatprep.mubr.bf16.mxu1 %v913_v38  ;;  %v1149_v41 = vld [vmem:[%s1481_s1 + $0x180] sm:$0xff]   ;;  %v1151_v43 = vld [vmem:[%s1481_s1 + $0x108] sm:$0xff]   ;;  %v1155_v47 = vld [vmem:[%s1481_s1 + $0x110] sm:$0xff]  }
   0xf   :  { %1007 = vmatpush3.bf16.msra.mxu0 %v1123_v13  ;;  %v1152_v44 = vld [vmem:[%s1481_s1 + $0x1c8] sm:$0xff]   ;;  %v1156_v48 = vld [vmem:[%s1481_s1 + $0x1d0] sm:$0xff]   ;;  %v1158_v50 = vld [vmem:[%s1481_s1 + $0x158] sm:$0xff]  }
  0x10   :  { %1008 = vmatprep.subr.bf16.mxu0 %v1126_v16  ;;  %v1153_v45 = vld [vmem:[%s1481_s1 + $0x188] sm:$0xff]   ;;  %v1157_v49 = vld [vmem:[%s1481_s1 + $0x190] sm:$0xff]   ;;  %v1159_v51 = vld [vmem:[%s1481_s1 + $0x118] sm:$0xff]  }
  0x11   :  { %1029 = vmatpush3.bf16.msra.mxu1 %v1125_v15  ;;  %v1160_v52 = vld [vmem:[%s1481_s1 + $0x1d8] sm:$0xff]   ;;  %v1162_v54 = vld [vmem:[%s1481_s1 + $0x160] sm:$0xff]   ;;  %v1166_v58 = vld [vmem:[%s1481_s1 + $0x168] sm:$0xff]  }
  0x12   :  { %1030 = vmatprep.subr.bf16.mxu1 %v1128_v18  ;;  %v1161_v53 = vld [vmem:[%s1481_s1 + $0x198] sm:$0xff]   ;;  %v1163_v55 = vld [vmem:[%s1481_s1 + $0x120] sm:$0xff]   ;;  %v1167_v59 = vld [vmem:[%s1481_s1 + $0x128] sm:$0xff]  }
  0x13   :  { %1009 = vmatpush3.bf16.msra.mxu0 %v1127_v17  ;;  %v1164_v56 = vld [vmem:[%s1481_s1 + $0x1e0] sm:$0xff]   ;;  %v1168_v60 = vld [vmem:[%s1481_s1 + $0x1e8] sm:$0xff]   ;;  %v1170_v62 = vld [vmem:[%s1481_s1 + $0x170] sm:$0xff]  }
  0x14   :  { %1010 = vmatprep.subr.bf16.mxu0 %v1130_v20  ;;  %v1165_v57 = vld [vmem:[%s1481_s1 + $0x1a0] sm:$0xff]   ;;  %v1169_v61 = vld [vmem:[%s1481_s1 + $0x1a8] sm:$0xff]   ;;  %v1171_v63 = vld [vmem:[%s1481_s1 + $0x130] sm:$0xff]  }
  0x15   :  { %1031 = vmatpush3.bf16.msra.mxu1 %v1129_v19  ;;  %v1172_v0 = vld [vmem:[%s1481_s1 + $0x1f0] sm:$0xff]   ;;  %v1174_v2 = vld [vmem:[%s1481_s1 + $0x178] sm:$0xff]   ;;  %v1180_v9 = vld [vmem:[%s1481_s1 + $0x240] sm:$0xff]  }
  0x16   :  { %1032 = vmatprep.subr.bf16.mxu1 %v1132_v22  ;;  %v1173_v1 = vld [vmem:[%s1481_s1 + $0x1b0] sm:$0xff]   ;;  %v1175_v3 = vld [vmem:[%s1481_s1 + $0x138] sm:$0xff]   ;;  %v1183_v13 = vld [vmem:[%s1481_s1 + $0x200] sm:$0xff]  }
  0x17   :  { %1011 = vmatpush3.bf16.msra.mxu0 %v1131_v21  ;;  %v1176_v4 = vld [vmem:[%s1481_s1 + $0x1f8] sm:$0xff]   ;;  %v17_v5 = vld [vmem:[%s1482_s0 + $0x10] sm:$0xff]  ;;  %v1184_v14 = vld [vmem:[%s1481_s1 + $0x248] sm:$0xff]  }
  0x18   :  { %1012 = vmatprep.subr.bf16.mxu0 %v1134_v24  ;;  %v914_v6 = vcombine.low %v17_v5, %v17_v5  ;;  %v915_v7 = vcombine.high %v17_v5, %v17_v5  ;;  %v1179_v8 = vld [vmem:[%s1481_s1 + $0x1b8] sm:$0xff]   ;;  %v1185_v15 = vld [vmem:[%s1481_s1 + $0x208] sm:$0xff]   ;;  %v1186_v16 = vld [vmem:[%s1481_s1 + $0x250] sm:$0xff]  }
  0x19   :  { %1033 = vmatpush3.bf16.msra.mxu1 %v1133_v23  ;;  %v18_v10 = vld [vmem:[%s1482_s0 + $0x18] sm:$0xff]  ;;  %v1187_v17 = vld [vmem:[%s1481_s1 + $0x210] sm:$0xff]   ;;  %v1190_v20 = vld [vmem:[%s1481_s1 + $0x260] sm:$0xff]  }
  0x1a   :  { %1034 = vmatprep.subr.bf16.mxu1 %v1136_v26  ;;  %v916_v11 = vcombine.low %v18_v10, %v18_v10  ;;  %v917_v12 = vcombine.high %v18_v10, %v18_v10  ;;  %v1188_v18 = vld [vmem:[%s1481_s1 + $0x258] sm:$0xff]   ;;  %v1191_v21 = vld [vmem:[%s1481_s1 + $0x220] sm:$0xff]   ;;  %v1192_v23 = vld [vmem:[%s1481_s1 + $0x268] sm:$0xff]  }
  0x1b   :  { %1013 = vmatpush3.bf16.msra.mxu0 %v1135_v25  ;;  %v1189_v19 = vld [vmem:[%s1481_s1 + $0x218] sm:$0xff]   ;;  %v19_v22 = vld [vmem:[%s1482_s0 + $0x20] sm:$0xff]  ;;  %v1193_v25 = vld [vmem:[%s1481_s1 + $0x228] sm:$0xff]  }
  0x1c   :  { %1014 = vmatprep.subr.bf16.mxu0 %v1138_v28  ;;  %v919_v24 = vcombine.high %v19_v22, %v19_v22  ;;  %v1194_v26 = vld [vmem:[%s1481_s1 + $0x270] sm:$0xff]   ;;  %v1196_v28 = vld [vmem:[%s1481_s1 + $0x278] sm:$0xff]  }
  0x1d   :  { %1035 = vmatpush3.bf16.msra.mxu1 %v1137_v27  ;;  %v1195_v27 = vld [vmem:[%s1481_s1 + $0x230] sm:$0xff]  }
  0x1e   :  { %1036 = vmatprep.subr.bf16.mxu1 %v1140_v30  ;;  %v918_v30 = vcombine.low %v19_v22, %v19_v22 }
  0x1f   :  { %1015 = vmatpush3.bf16.msra.mxu0 %v1139_v29  ;;  %v1197_v29 = vld [vmem:[%s1481_s1 + $0x238] sm:$0xff]  }
  0x20   :  { %1044 = vmatprep.subr.bf16.mxu0 %v1144_v35 }
  0x21   :  { %1037 = vmatpush3.bf16.msra.mxu1 %v1143_v34 }
  0x22   :  { %735 = vmatmul.mubr.bf16.vlgmr.msra.gmra.mrb[0].mxu0 %v910_v32  ;;  %1066 = vmatprep.subr.bf16.mxu1 %v1148_v40  ;;  %v909_v32 = vld [vmem:[%s1483_s2] ss:$0 sm:$0xff] }
  0x23   :  { %1045 = vmatpush3.bf16.msra.mxu0 %v1147_v39  ;;  %814 = vmatprep.mubr.bf16.mxu0 %v915_v7 }
  0x24   :  { %775 = vmatmul.mubr.bf16.vlgmr.msra.gmra.mrb[0].mxu1 %v912_v37  ;;  %1046 = vmatprep.subr.bf16.mxu0 %v1150_v42 }
  0x25   :  { %1067 = vmatpush3.bf16.msra.mxu1 %v1149_v41  ;;  %854 = vmatprep.mubr.bf16.mxu1 %v917_v12 }
  0x26   :  { %1068 = vmatprep.subr.bf16.mxu1 %v1152_v44 }
  0x27   :  { %1047 = vmatpush3.bf16.msra.mxu0 %v1151_v43 }
  0x28   :  { %1048 = vmatprep.subr.bf16.mxu0 %v1154_v46 }
  0x29   :  { %1069 = vmatpush3.bf16.msra.mxu1 %v1153_v45 }
  0x2a   :  { %1070 = vmatprep.subr.bf16.mxu1 %v1156_v48 }
  0x2b   :  { %1049 = vmatpush3.bf16.msra.mxu0 %v1155_v47 }
  0x2c   :  { %1050 = vmatprep.subr.bf16.mxu0 %v1158_v50 }
  0x2d   :  { %1071 = vmatpush3.bf16.msra.mxu1 %v1157_v49 }
  0x2e   :  { %1072 = vmatprep.subr.bf16.mxu1 %v1160_v52 }
  0x2f   :  { %1051 = vmatpush3.bf16.msra.mxu0 %v1159_v51 }
  0x30   :  { %1052 = vmatprep.subr.bf16.mxu0 %v1162_v54 }
  0x31   :  { %1073 = vmatpush3.bf16.msra.mxu1 %v1161_v53 }
  0x32   :  { %1074 = vmatprep.subr.bf16.mxu1 %v1164_v56 }
  0x33   :  { %1053 = vmatpush3.bf16.msra.mxu0 %v1163_v55 }
  0x34   :  { %1054 = vmatprep.subr.bf16.mxu0 %v1166_v58 }
  0x35   :  { %1075 = vmatpush3.bf16.msra.mxu1 %v1165_v57 }
  0x36   :  { %1076 = vmatprep.subr.bf16.mxu1 %v1168_v60 }
  0x37   :  { %1055 = vmatpush3.bf16.msra.mxu0 %v1167_v59 }
  0x38   :  { %1056 = vmatprep.subr.bf16.mxu0 %v1170_v62 }
  0x39   :  { %1077 = vmatpush3.bf16.msra.mxu1 %v1169_v61 }
  0x3a   :  { %1078 = vmatprep.subr.bf16.mxu1 %v1172_v0 }
  0x3b   :  { %1057 = vmatpush3.bf16.msra.mxu0 %v1171_v63 }
  0x3c   :  { %1058 = vmatprep.subr.bf16.mxu0 %v1174_v2 }
  0x3d   :  { %1079 = vmatpush3.bf16.msra.mxu1 %v1173_v1 }
  0x3e   :  { %1080 = vmatprep.subr.bf16.mxu1 %v1176_v4 }
  0x3f   :  { %1059 = vmatpush3.bf16.msra.mxu0 %v1175_v3 }
  0x40   :  { %1088 = vmatprep.subr.bf16.mxu0 %v1180_v9 }
  0x41   :  { %1081 = vmatpush3.bf16.msra.mxu1 %v1179_v8 }
  0x42   :  { %815 = vmatmul.mubr.bf16.vlgmr.msra.gmra.mrb[4].mxu0 %v914_v6 }
  0x43   :  { %1089 = vmatpush3.bf16.msra.mxu0 %v1183_v13  ;;  %894 = vmatprep.mubr.bf16.mxu0 %v919_v24 }
  0x44   :  { %855 = vmatmul.mubr.bf16.vlgmr.msra.gmra.mrb[4].mxu1 %v916_v11  ;;  %1090 = vmatprep.subr.bf16.mxu0 %v1184_v14 }
  0x47   :  { %1091 = vmatpush3.bf16.msra.mxu0 %v1185_v15 }
  0x48   :  { %1092 = vmatprep.subr.bf16.mxu0 %v1186_v16 }
  0x4b   :  { %1093 = vmatpush3.bf16.msra.mxu0 %v1187_v17 }
  0x4c   :  { %1094 = vmatprep.subr.bf16.mxu0 %v1188_v18 }
  0x4f   :  { %1095 = vmatpush3.bf16.msra.mxu0 %v1189_v19 }
  0x50   :  { %1096 = vmatprep.subr.bf16.mxu0 %v1190_v20 }
  0x53   :  { %1097 = vmatpush3.bf16.msra.mxu0 %v1191_v21 }
  0x54   :  { %1098 = vmatprep.subr.bf16.mxu0 %v1192_v23 }
  0x57   :  { %1099 = vmatpush3.bf16.msra.mxu0 %v1193_v25 }
  0x58   :  { %1100 = vmatprep.subr.bf16.mxu0 %v1194_v26 }
  0x5b   :  { %1101 = vmatpush3.bf16.msra.mxu0 %v1195_v27 }
  0x5c   :  { %1102 = vmatprep.subr.bf16.mxu0 %v1196_v28 }
  0x5f   :  { %1103 = vmatpush3.bf16.msra.mxu0 %v1197_v29 }
  0x62   :  { %895 = vmatmul.mubr.bf16.vlgmr.msra.gmra.mrb[8].mxu0 %v918_v30 }
  0xf5   :  { %v1016_v31 = vpop.f32.mrb[0].mxu0 }
  0xf6   :  { %v1017_v33 = vpop.f32.mrb[1].mxu0 }
  0xf7   :  { %v1018_v34 = vadd.f32 %v1017_v33, %v1016_v31  ;;  %v1019_v35 = vpop.f32.mrb[2].mxu0  ;;  %v1038_v36 = vpop.f32.mrb[0].mxu1 }
  0xf8   :  { %v1020_v37 = vpop.f32.mrb[3].mxu0  ;;  %v1039_v38 = vpop.f32.mrb[1].mxu1 }
  0xf9   :  { %v737_v39 = vadd.f32 %v1018_v34, %v909_v32  ;;  %v1040_v40 = vadd.f32 %v1039_v38, %v1038_v36  ;;  %v1041_v41 = vpop.f32.mrb[2].mxu1 }
  0xfa   :  { %v1042_v42 = vpop.f32.mrb[3].mxu1 }
  0xfb   :  { %v777_v43 = vadd.f32 %v1040_v40, %v737_v39 }
 0x115   :  { %v1060_v44 = vpop.f32.mrb[4].mxu0 }
 0x116   :  { %v1061_v45 = vpop.f32.mrb[5].mxu0 }
 0x117   :  { %v1062_v46 = vadd.f32 %v1061_v45, %v1060_v44  ;;  %v1063_v47 = vpop.f32.mrb[6].mxu0  ;;  %v1082_v48 = vpop.f32.mrb[4].mxu1 }
 0x118   :  { %v1064_v49 = vpop.f32.mrb[7].mxu0  ;;  %v1083_v51 = vpop.f32.mrb[5].mxu1 }
 0x119   :  { %v817_v50 = vadd.f32 %v1062_v46, %v777_v43  ;;  %v1084_v52 = vadd.f32 %v1083_v51, %v1082_v48  ;;  %v1085_v53 = vpop.f32.mrb[6].mxu1 }
 0x11a   :  { %v1086_v54 = vpop.f32.mrb[7].mxu1 }
 0x11b   :  { %v857_v55 = vadd.f32 %v1084_v52, %v817_v50 }
 0x135   :  { %v1104_v56 = vpop.f32.mrb[8].mxu0 }
 0x136   :  { %v1105_v57 = vpop.f32.mrb[9].mxu0 }
 0x137   :  { %v1106_v58 = vadd.f32 %v1105_v57, %v1104_v56  ;;  %v1107_v59 = vpop.f32.mrb[10].mxu0 }
 0x138   :  { %v1108_v60 = vpop.f32.mrb[11].mxu0 }
 0x139   :  { %v897_v61 = vadd.f32 %v1106_v58, %v857_v55 }
 0x13b   :  { %v902_v62 = vmax.f32 %v897_v61, 0.0 }
 0x13d   :  { %v903_v63 = vpack.c.bf16 %v902_v62, %v902_v62 }
 0x13f   :  { %904 = vst [vmem:[%s1484_s3] sm:$0xf] %v903_v63 }

// kernel: resnet_forward.22
= control target key start
LH: loop header
LB: loop body
LE: loop exit
PB: predicated region body
PF: predicated region fallthrough
CT: control target
= control target key end

     0   :  { %vm1131_vm0 = vmmov 0   ;;  %s1397_s1 = inlined_call_operand.vmem [shape: bf16[1152,128], index: 1, kind: input, shape index: {}]   ;;  %s1398_s0 = inlined_call_operand.vmem [shape: bf16[8,1152], index: 0, kind: input, shape index: {}]   ;;  %s1399_s2 = inlined_call_operand.vmem [shape: f32[1,128], index: 2, kind: input, shape index: {}]   ;;  %s1400_s3 = inlined_call_operand.vmem [shape: bf16[8,128], index: 3, kind: input, shape index: {}]   ;;  %s1401_s4 = inlined_call_operand.vmem [shape: bf16[8,128], index: 4, kind: output, shape index: {}]  }
   0x1   :  { %v1049_v0 = vld [vmem:[%s1397_s1 + $0x40] sm:$0xff]   ;;  %v1053_v4 = vld [vmem:[%s1397_s1 + $0x48] sm:$0xff]   ;;  %v1057_v8 = vld [vmem:[%s1397_s1 + $0x50] sm:$0xff]  }
   0x2   :  { %v1050_v1 = vld [vmem:[%s1397_s1] sm:$0xff]   ;;  %930 = vmatprep.subr.bf16.mxu0 %v1049_v0  ;;  %v1054_v5 = vld [vmem:[%s1397_s1 + $0x8] sm:$0xff]   ;;  %v1058_v9 = vld [vmem:[%s1397_s1 + $0x10] sm:$0xff]  }
   0x3   :  { %v1051_v2 = vld [vmem:[%s1397_s1 + $0xc0] sm:$0xff]   ;;  %931 = vmatpush3.bf16.msra.mxu0 %v1050_v1  ;;  %v1055_v6 = vld [vmem:[%s1397_s1 + $0xc8] sm:$0xff]   ;;  %v1059_v10 = vld [vmem:[%s1397_s1 + $0xd0] sm:$0xff]  }
   0x4   :  { %v1052_v3 = vld [vmem:[%s1397_s1 + $0x80] sm:$0xff]   ;;  %952 = vmatprep.subr.bf16.mxu1 %v1051_v2  ;;  %932 = vmatprep.subr.bf16.mxu0 %v1053_v4  ;;  %v1056_v7 = vld [vmem:[%s1397_s1 + $0x88] sm:$0xff]   ;;  %v1060_v11 = vld [vmem:[%s1397_s1 + $0x90] sm:$0xff]  }
   0x5   :  { %953 = vmatpush3.bf16.msra.mxu1 %v1052_v3  ;;  %v1061_v12 = vld [vmem:[%s1397_s1 + $0x58] sm:$0xff]   ;;  %v1065_v16 = vld [vmem:[%s1397_s1 + $0x60] sm:$0xff]   ;;  %v1069_v20 = vld [vmem:[%s1397_s1 + $0x68] sm:$0xff]  }
   0x6   :  { %954 = vmatprep.subr.bf16.mxu1 %v1055_v6  ;;  %v1062_v13 = vld [vmem:[%s1397_s1 + $0x18] sm:$0xff]   ;;  %v1066_v17 = vld [vmem:[%s1397_s1 + $0x20] sm:$0xff]   ;;  %v1070_v21 = vld [vmem:[%s1397_s1 + $0x28] sm:$0xff]  }
   0x7   :  { %933 = vmatpush3.bf16.msra.mxu0 %v1054_v5  ;;  %v1063_v14 = vld [vmem:[%s1397_s1 + $0xd8] sm:$0xff]   ;;  %v1067_v18 = vld [vmem:[%s1397_s1 + $0xe0] sm:$0xff]   ;;  %v1071_v22 = vld [vmem:[%s1397_s1 + $0xe8] sm:$0xff]  }
   0x8   :  { %934 = vmatprep.subr.bf16.mxu0 %v1057_v8  ;;  %v1064_v15 = vld [vmem:[%s1397_s1 + $0x98] sm:$0xff]   ;;  %v1068_v19 = vld [vmem:[%s1397_s1 + $0xa0] sm:$0xff]   ;;  %v1072_v23 = vld [vmem:[%s1397_s1 + $0xa8] sm:$0xff]  }
   0x9   :  { %955 = vmatpush3.bf16.msra.mxu1 %v1056_v7  ;;  %v1073_v24 = vld [vmem:[%s1397_s1 + $0x70] sm:$0xff]   ;;  %v1077_v28 = vld [vmem:[%s1397_s1 + $0x78] sm:$0xff]   ;;  %v18_v31 = vld [vmem:[%s1398_s0] sm:$0xff] }
   0xa   :  { %956 = vmatprep.subr.bf16.mxu1 %v1059_v10  ;;  %v1074_v25 = vld [vmem:[%s1397_s1 + $0x30] sm:$0xff]   ;;  %v1078_v29 = vld [vmem:[%s1397_s1 + $0x38] sm:$0xff]   ;;  %v849_v32 = vcombine.low %v18_v31, %v18_v31  ;;  %v850_v33 = vcombine.high %v18_v31, %v18_v31  ;;  %v1083_v35 = vld [vmem:[%s1397_s1 + $0x140] sm:$0xff]  }
   0xb   :  { %935 = vmatpush3.bf16.msra.mxu0 %v1058_v9  ;;  %v1075_v26 = vld [vmem:[%s1397_s1 + $0xf0] sm:$0xff]   ;;  %v1079_v30 = vld [vmem:[%s1397_s1 + $0xf8] sm:$0xff]   ;;  %v19_v36 = vld [vmem:[%s1398_s0 + $0x8] sm:$0xff]  ;;  %v1130_v9 = vmov 0.0  }
   0xc   :  { %936 = vmatprep.subr.bf16.mxu0 %v1061_v12  ;;  %v1076_v27 = vld [vmem:[%s1397_s1 + $0xb0] sm:$0xff]   ;;  %v1082_v34 = vld [vmem:[%s1397_s1 + $0xb8] sm:$0xff]   ;;  %670 = vmatprep.mubr.bf16.mxu0 %v850_v33  ;;  %v851_v37 = vcombine.low %v19_v36, %v19_v36  ;;  %v852_v38 = vcombine.high %v19_v36, %v19_v36  ;;  %v1086_v39 = vld [vmem:[%s1397_s1 + $0x100] sm:$0xff]  }
   0xd   :  { %957 = vmatpush3.bf16.msra.mxu1 %v1060_v11  ;;  %v1087_v40 = vld [vmem:[%s1397_s1 + $0x1c0] sm:$0xff]   ;;  %v1089_v42 = vld [vmem:[%s1397_s1 + $0x148] sm:$0xff]   ;;  %v1093_v46 = vld [vmem:[%s1397_s1 + $0x150] sm:$0xff]  }
   0xe   :  { %958 = vmatprep.subr.bf16.mxu1 %v1063_v14  ;;  %710 = vmatprep.mubr.bf16.mxu1 %v852_v38  ;;  %v1088_v41 = vld [vmem:[%s1397_s1 + $0x180] sm:$0xff]   ;;  %v1090_v43 = vld [vmem:[%s1397_s1 + $0x108] sm:$0xff]   ;;  %v1094_v47 = vld [vmem:[%s1397_s1 + $0x110] sm:$0xff]  }
   0xf   :  { %937 = vmatpush3.bf16.msra.mxu0 %v1062_v13  ;;  %v1091_v44 = vld [vmem:[%s1397_s1 + $0x1c8] sm:$0xff]   ;;  %v1095_v48 = vld [vmem:[%s1397_s1 + $0x1d0] sm:$0xff]   ;;  %v1097_v50 = vld [vmem:[%s1397_s1 + $0x158] sm:$0xff]  }
  0x10   :  { %938 = vmatprep.subr.bf16.mxu0 %v1065_v16  ;;  %v1092_v45 = vld [vmem:[%s1397_s1 + $0x188] sm:$0xff]   ;;  %v1096_v49 = vld [vmem:[%s1397_s1 + $0x190] sm:$0xff]   ;;  %v1098_v51 = vld [vmem:[%s1397_s1 + $0x118] sm:$0xff]  }
  0x11   :  { %959 = vmatpush3.bf16.msra.mxu1 %v1064_v15  ;;  %v1099_v52 = vld [vmem:[%s1397_s1 + $0x1d8] sm:$0xff]   ;;  %v1101_v54 = vld [vmem:[%s1397_s1 + $0x160] sm:$0xff]   ;;  %v1105_v58 = vld [vmem:[%s1397_s1 + $0x168] sm:$0xff]  }
  0x12   :  { %960 = vmatprep.subr.bf16.mxu1 %v1067_v18  ;;  %v1100_v53 = vld [vmem:[%s1397_s1 + $0x198] sm:$0xff]   ;;  %v1102_v55 = vld [vmem:[%s1397_s1 + $0x120] sm:$0xff]   ;;  %v1106_v59 = vld [vmem:[%s1397_s1 + $0x128] sm:$0xff]  }
  0x13   :  { %939 = vmatpush3.bf16.msra.mxu0 %v1066_v17  ;;  %v1103_v56 = vld [vmem:[%s1397_s1 + $0x1e0] sm:$0xff]   ;;  %v1107_v60 = vld [vmem:[%s1397_s1 + $0x1e8] sm:$0xff]   ;;  %v1109_v62 = vld [vmem:[%s1397_s1 + $0x170] sm:$0xff]  }
  0x14   :  { %940 = vmatprep.subr.bf16.mxu0 %v1069_v20  ;;  %v1104_v57 = vld [vmem:[%s1397_s1 + $0x1a0] sm:$0xff]   ;;  %v1108_v61 = vld [vmem:[%s1397_s1 + $0x1a8] sm:$0xff]   ;;  %v1110_v63 = vld [vmem:[%s1397_s1 + $0x130] sm:$0xff]  }
  0x15   :  { %961 = vmatpush3.bf16.msra.mxu1 %v1068_v19  ;;  %v1111_v0 = vld [vmem:[%s1397_s1 + $0x1f0] sm:$0xff]   ;;  %v1113_v2 = vld [vmem:[%s1397_s1 + $0x178] sm:$0xff]   ;;  %v1121_v13 = vld [vmem:[%s1397_s1 + $0x200] sm:$0xff]  }
  0x16   :  { %962 = vmatprep.subr.bf16.mxu1 %v1071_v22  ;;  %v1112_v1 = vld [vmem:[%s1397_s1 + $0x1b0] sm:$0xff]   ;;  %v1114_v3 = vld [vmem:[%s1397_s1 + $0x138] sm:$0xff]   ;;  %v1122_v14 = vld [vmem:[%s1397_s1 + $0x208] sm:$0xff]  }
  0x17   :  { %941 = vmatpush3.bf16.msra.mxu0 %v1070_v21  ;;  %v1115_v4 = vld [vmem:[%s1397_s1 + $0x1f8] sm:$0xff]   ;;  %v20_v5 = vld [vmem:[%s1398_s0 + $0x10] sm:$0xff]  ;;  %v1125_v17 = vld [vmem:[%s1397_s1 + $0x220] sm:$0xff]  }
  0x18   :  { %942 = vmatprep.subr.bf16.mxu0 %v1073_v24  ;;  %v853_v6 = vcombine.low %v20_v5, %v20_v5  ;;  %v854_v7 = vcombine.high %v20_v5, %v20_v5  ;;  %v1118_v8 = vld [vmem:[%s1397_s1 + $0x1b8] sm:$0xff]   ;;  %v1123_v15 = vld [vmem:[%s1397_s1 + $0x210] sm:$0xff]   ;;  %v1126_v18 = vld [vmem:[%s1397_s1 + $0x228] sm:$0xff]  }
  0x19   :  { %963 = vmatpush3.bf16.msra.mxu1 %v1072_v23  ;;  %v21_v10 = vld [vmem:[%s1398_s0 + $0x18] sm:$0xff]  ;;  %v1127_v19 = vld [vmem:[%s1397_s1 + $0x230] sm:$0xff]   ;;  %v1129_v21 = vld [vmem:[%s1398_s0 + $0x20] ss:$0 sps:$4 sm:$0xff]  }
  0x1a   :  { %964 = vmatprep.subr.bf16.mxu1 %v1075_v26  ;;  %v855_v11 = vcombine.low %v21_v10, %v21_v10  ;;  %v856_v12 = vcombine.high %v21_v10, %v21_v10  ;;  %v1124_v16 = vld [vmem:[%s1397_s1 + $0x218] sm:$0xff]   ;;  %v848_v23 = vld [vmem:[%s1399_s2] ss:$0 sm:$0xff] }
  0x1b   :  { %943 = vmatpush3.bf16.msra.mxu0 %v1074_v25  ;;  %v1128_v20 = vld [vmem:[%s1397_s1 + $0x238] sm:$0xff]  }
  0x1c   :  { %944 = vmatprep.subr.bf16.mxu0 %v1077_v28 }
  0x1d   :  { %965 = vmatpush3.bf16.msra.mxu1 %v1076_v27 }
  0x1e   :  { %966 = vmatprep.subr.bf16.mxu1 %v1079_v30 }
  0x1f   :  { %945 = vmatpush3.bf16.msra.mxu0 %v1078_v29 }
  0x20   :  { %974 = vmatprep.subr.bf16.mxu0 %v1083_v35 }
  0x21   :  { %967 = vmatpush3.bf16.msra.mxu1 %v1082_v34 }
  0x22   :  { %671 = vmatmul.mubr.bf16.vlgmr.msra.gmra.mrb[0].mxu0 %v849_v32  ;;  %996 = vmatprep.subr.bf16.mxu1 %v1087_v40 }
  0x23   :  { %975 = vmatpush3.bf16.msra.mxu0 %v1086_v39  ;;  %750 = vmatprep.mubr.bf16.mxu0 %v854_v7 }
  0x24   :  { %711 = vmatmul.mubr.bf16.vlgmr.msra.gmra.mrb[0].mxu1 %v851_v37  ;;  %976 = vmatprep.subr.bf16.mxu0 %v1089_v42 }
  0x25   :  { %997 = vmatpush3.bf16.msra.mxu1 %v1088_v41  ;;  %790 = vmatprep.mubr.bf16.mxu1 %v856_v12 }
  0x26   :  { %998 = vmatprep.subr.bf16.mxu1 %v1091_v44 }
  0x27   :  { %977 = vmatpush3.bf16.msra.mxu0 %v1090_v43 }
  0x28   :  { %978 = vmatprep.subr.bf16.mxu0 %v1093_v46 }
  0x29   :  { %999 = vmatpush3.bf16.msra.mxu1 %v1092_v45 }
  0x2a   :  { %1000 = vmatprep.subr.bf16.mxu1 %v1095_v48 }
  0x2b   :  { %979 = vmatpush3.bf16.msra.mxu0 %v1094_v47  ;;  %v838_v47 = vld [vmem:[%s1400_s3] sm:$0xf] }
  0x2c   :  { %980 = vmatprep.subr.bf16.mxu0 %v1097_v50  ;;  %v839_v48 = vunpack.c.l.bf16 %v838_v47 }
  0x2d   :  { %1001 = vmatpush3.bf16.msra.mxu1 %v1096_v49 }
  0x2e   :  { %1002 = vmatprep.subr.bf16.mxu1 %v1099_v52 }
  0x2f   :  { %981 = vmatpush3.bf16.msra.mxu0 %v1098_v51 }
  0x30   :  { %982 = vmatprep.subr.bf16.mxu0 %v1101_v54 }
  0x31   :  { %1003 = vmatpush3.bf16.msra.mxu1 %v1100_v53 }
  0x32   :  { %1004 = vmatprep.subr.bf16.mxu1 %v1103_v56 }
  0x33   :  { %983 = vmatpush3.bf16.msra.mxu0 %v1102_v55 }
  0x34   :  { %984 = vmatprep.subr.bf16.mxu0 %v1105_v58 }
  0x35   :  { %1005 = vmatpush3.bf16.msra.mxu1 %v1104_v57 }
  0x36   :  { %1006 = vmatprep.subr.bf16.mxu1 %v1107_v60 }
  0x37   :  { %985 = vmatpush3.bf16.msra.mxu0 %v1106_v59 }
  0x38   :  { %986 = vmatprep.subr.bf16.mxu0 %v1109_v62 }
  0x39   :  { %1007 = vmatpush3.bf16.msra.mxu1 %v1108_v61 }
  0x3a   :  { %1008 = vmatprep.subr.bf16.mxu1 %v1111_v0 }
  0x3b   :  { %987 = vmatpush3.bf16.msra.mxu0 %v1110_v63 }
  0x3c   :  { %988 = vmatprep.subr.bf16.mxu0 %v1113_v2 }
  0x3d   :  { %1009 = vmatpush3.bf16.msra.mxu1 %v1112_v1 }
  0x3e   :  { %1010 = vmatprep.subr.bf16.mxu1 %v1115_v4 }
  0x3f   :  { %989 = vmatpush3.bf16.msra.mxu0 %v1114_v3 }
  0x40   :  { %1027 = vmatprep.subr.bf16.mxu0 %v1130_v9 }
  0x41   :  { %1011 = vmatpush3.bf16.msra.mxu1 %v1118_v8 }
  0x42   :  { %751 = vmatmul.mubr.bf16.vlgmr.msra.gmra.mrb[4].mxu0 %v853_v6 }
  0x43   :  { %1028 = vmatpush3.bf16.msra.mxu0 %v1121_v13  ;;  %1043 = vmatprep.mubr.msk.bf16.mxu0 %vm1131_vm0, %v1130_v9 }
  0x44   :  { %791 = vmatmul.mubr.bf16.vlgmr.msra.gmra.mrb[4].mxu1 %v855_v11  ;;  %1029 = vmatprep.subr.bf16.mxu0 %v1130_v9 }
  0x47   :  { %1030 = vmatpush3.bf16.msra.mxu0 %v1122_v14 }
  0x48   :  { %1031 = vmatprep.subr.bf16.mxu0 %v1130_v9 }
  0x4b   :  { %1032 = vmatpush3.bf16.msra.mxu0 %v1123_v15 }
  0x4c   :  { %1033 = vmatprep.subr.bf16.mxu0 %v1130_v9 }
  0x4f   :  { %1034 = vmatpush3.bf16.msra.mxu0 %v1124_v16 }
  0x50   :  { %1035 = vmatprep.subr.bf16.mxu0 %v1130_v9 }
  0x53   :  { %1036 = vmatpush3.bf16.msra.mxu0 %v1125_v17 }
  0x54   :  { %1037 = vmatprep.subr.bf16.mxu0 %v1130_v9 }
  0x57   :  { %1038 = vmatpush3.bf16.msra.mxu0 %v1126_v18 }
  0x58   :  { %1039 = vmatprep.subr.bf16.mxu0 %v1130_v9 }
  0x5b   :  { %1040 = vmatpush3.bf16.msra.mxu0 %v1127_v19 }
  0x5c   :  { %1041 = vmatprep.subr.bf16.mxu0 %v1130_v9 }
  0x5f   :  { %1042 = vmatpush3.bf16.msra.mxu0 %v1128_v20 }
  0x62   :  { %1044 = vmatmul.mubr.bf16.vlgmr.msra.gmra.mrb[8].mxu0 %v1129_v21 }
  0xf5   :  { %v946_v22 = vpop.f32.mrb[0].mxu0 }
  0xf6   :  { %v947_v24 = vpop.f32.mrb[1].mxu0 }
  0xf7   :  { %v948_v25 = vadd.f32 %v947_v24, %v946_v22  ;;  %v949_v26 = vpop.f32.mrb[2].mxu0  ;;  %v968_v27 = vpop.f32.mrb[0].mxu1 }
  0xf8   :  { %v950_v28 = vpop.f32.mrb[3].mxu0  ;;  %v969_v29 = vpop.f32.mrb[1].mxu1 }
  0xf9   :  { %v673_v30 = vadd.f32 %v948_v25, %v848_v23  ;;  %v970_v31 = vadd.f32 %v969_v29, %v968_v27  ;;  %v971_v32 = vpop.f32.mrb[2].mxu1 }
  0xfa   :  { %v972_v33 = vpop.f32.mrb[3].mxu1 }
  0xfb   :  { %v713_v34 = vadd.f32 %v970_v31, %v673_v30 }
 0x115   :  { %v990_v35 = vpop.f32.mrb[4].mxu0 }
 0x116   :  { %v991_v36 = vpop.f32.mrb[5].mxu0 }
 0x117   :  { %v992_v37 = vadd.f32 %v991_v36, %v990_v35  ;;  %v993_v38 = vpop.f32.mrb[6].mxu0  ;;  %v1012_v39 = vpop.f32.mrb[4].mxu1 }
 0x118   :  { %v994_v40 = vpop.f32.mrb[7].mxu0  ;;  %v1013_v41 = vpop.f32.mrb[5].mxu1 }
 0x119   :  { %v753_v42 = vadd.f32 %v992_v37, %v713_v34  ;;  %v1014_v43 = vadd.f32 %v1013_v41, %v1012_v39  ;;  %v1015_v44 = vpop.f32.mrb[6].mxu1 }
 0x11a   :  { %v1016_v45 = vpop.f32.mrb[7].mxu1 }
 0x11b   :  { %v793_v46 = vadd.f32 %v1014_v43, %v753_v42 }
 0x135   :  { %v832_v49 = vpop.f32.mrb[8].mxu0 }
 0x136   :  { %v833_v50 = vadd.f32 %v832_v49, %v793_v46  ;;  %v1045_v51 = vpop.f32.mrb[9].mxu0 }
 0x137   :  { %v835_v52 = vpop.f32.mrb[10].mxu0 }
 0x138   :  { %v840_v53 = vadd.f32 %v839_v48, %v833_v50  ;;  %v1046_v54 = vpop.f32.mrb[11].mxu0 }
 0x13a   :  { %v841_v55 = vmax.f32 %v840_v53, 0.0 }
 0x13c   :  { %v842_v56 = vpack.c.bf16 %v841_v55, %v841_v55 }
 0x13e   :  { %843 = vst [vmem:[%s1401_s4] sm:$0xf] %v842_v56 }

// kernel: resnet_forward.24
= control target key start
LH: loop header
LB: loop body
LE: loop exit
PB: predicated region body
PF: predicated region fallthrough
CT: control target
= control target key end

     0   :  { %v55_v7 = vlaneseq  ;;  %v745_v8 = vmov 1966171168   ;;  %s1002_s1 = inlined_call_operand.vmem [shape: bf16[256,256], index: 1, kind: input, shape index: {}]   ;;  %s1003_s0 = inlined_call_operand.vmem [shape: bf16[2,256], index: 0, kind: input, shape index: {}]   ;;  %s1004_s3 = inlined_call_operand.vmem [shape: bf16[256,256], index: 3, kind: input, shape index: {}]   ;;  %s1005_s2 = inlined_call_operand.vmem [shape: f32[1,256], index: 2, kind: input, shape index: {}]   ;;  %s1006_s4 = inlined_call_operand.vmem [shape: f32[1,256], index: 4, kind: input, shape index: {}]   ;;  %s1007_s5 = inlined_call_operand.vmem [shape: bf16[2,256], index: 5, kind: output, shape index: {}]  }
   0x1   :  { %v649_v0 = vld [vmem:[%s1002_s1 + $0x4] ss:$8 sps:$4 sm:$0xff]   ;;  %v651_v1 = vld [vmem:[%s1002_s1] ss:$8 sps:$4 sm:$0xff]   ;;  %v652_v2 = vld [vmem:[%s1002_s1 + $0x14] ss:$8 sps:$4 sm:$0xff]   ;;  %v67_v9 = vunpack.c.l.s4 %v745_v8 }
   0x2   :  { %250 = vmatprep.subr.bf16.mxu0 %v649_v0  ;;  %v654_v3 = vld [vmem:[%s1002_s1 + $0x10] ss:$8 sps:$4 sm:$0xff]   ;;  %v655_v4 = vld [vmem:[%s1002_s1 + $0x24] ss:$8 sps:$4 sm:$0xff]   ;;  %v657_v5 = vld [vmem:[%s1002_s1 + $0x20] ss:$8 sps:$4 sm:$0xff]  }
   0x3   :  { %251 = vmatpush1.bf16.msra.mxu0 %v651_v1  ;;  %v658_v6 = vld [vmem:[%s1002_s1 + $0x34] ss:$8 sps:$4 sm:$0xff]   ;;  %v660_v10 = vld [vmem:[%s1002_s1 + $0x30] ss:$8 sps:$4 sm:$0xff]   ;;  %v661_v11 = vld [vmem:[%s1002_s1 + $0x44] ss:$8 sps:$4 sm:$0xff]   ;;  %v68_v13 = vunpack.c.0.s8 %v67_v9 }
   0x4   :  { %252 = vmatprep.subr.bf16.mxu0 %v652_v2  ;;  %v804_v12 = vshrl.u32 %v55_v7, 7  ;;  %v663_v14 = vld [vmem:[%s1002_s1 + $0x40] ss:$8 sps:$4 sm:$0xff]   ;;  %v664_v15 = vld [vmem:[%s1002_s1 + $0x54] ss:$8 sps:$4 sm:$0xff]  }
   0x5   :  { %v666_v17 = vld [vmem:[%s1002_s1 + $0x50] ss:$8 sps:$4 sm:$0xff]   ;;  %v667_v18 = vld [vmem:[%s1002_s1 + $0x64] ss:$8 sps:$4 sm:$0xff]   ;;  %v669_v19 = vld [vmem:[%s1002_s1 + $0x60] ss:$8 sps:$4 sm:$0xff]  }
   0x6   :  { %v813_v16 = vsub.s32 %v68_v13, %v804_v12  ;;  %v827_v20 = vld [vmem:[%s1003_s0] sm:$0x3]  ;;  %v697_v22 = vld [vmem:[%s1004_s3 + $0x4] ss:$8 sps:$4 sm:$0xff]   ;;  %v700_v24 = vld [vmem:[%s1004_s3 + $0x14] ss:$8 sps:$4 sm:$0xff]  }
   0x7   :  { %253 = vmatpush1.bf16.msra.mxu0 %v654_v3  ;;  %v699_v23 = vld [vmem:[%s1004_s3] ss:$8 sps:$4 sm:$0xff]   ;;  %v670_v25 = vld [vmem:[%s1002_s1 + $0x74] ss:$8 sps:$4 sm:$0xff]   ;;  %499 = vmatprep.subr.bf16.mxu1 %v697_v22  ;;  %v702_v27 = vld [vmem:[%s1004_s3 + $0x10] ss:$8 sps:$4 sm:$0xff]  }
   0x8   :  { %254 = vmatprep.subr.bf16.mxu0 %v655_v4  ;;  %v831_v21 = vrot.slane %v827_v20, %v813_v16  ;;  %500 = vmatpush1.bf16.msra.mxu1 %v699_v23  ;;  %v703_v29 = vld [vmem:[%s1004_s3 + $0x24] ss:$8 sps:$4 sm:$0xff]   ;;  %v672_v30 = vld [vmem:[%s1002_s1 + $0x70] ss:$8 sps:$4 sm:$0xff]   ;;  %v705_v32 = vld [vmem:[%s1004_s3 + $0x20] ss:$8 sps:$4 sm:$0xff]  }
   0x9   :  { %501 = vmatprep.subr.bf16.mxu1 %v700_v24  ;;  %v673_v31 = vld [vmem:[%s1002_s1 + $0x84] ss:$8 sps:$4 sm:$0xff]   ;;  %v706_v33 = vld [vmem:[%s1004_s3 + $0x34] ss:$8 sps:$4 sm:$0xff]   ;;  %v675_v34 = vld [vmem:[%s1002_s1 + $0x80] ss:$8 sps:$4 sm:$0xff]  }
   0xa   :  { %v73_v26 = vcombine.high %v831_v21, %v831_v21  ;;  %v676_v35 = vld [vmem:[%s1002_s1 + $0x94] ss:$8 sps:$4 sm:$0xff]   ;;  %v708_v36 = vld [vmem:[%s1004_s3 + $0x30] ss:$8 sps:$4 sm:$0xff]   ;;  %v709_v37 = vld [vmem:[%s1004_s3 + $0x44] ss:$8 sps:$4 sm:$0xff]   ;;  %v80_v0 = vrot.slane %v831_v21, %v813_v16 }
   0xb   :  { %255 = vmatpush1.bf16.msra.mxu0 %v657_v5  ;;  %v678_v38 = vld [vmem:[%s1002_s1 + $0x90] ss:$8 sps:$4 sm:$0xff]   ;;  %v679_v39 = vld [vmem:[%s1002_s1 + $0xa4] ss:$8 sps:$4 sm:$0xff]   ;;  %v711_v40 = vld [vmem:[%s1004_s3 + $0x40] ss:$8 sps:$4 sm:$0xff]  }
   0xc   :  { %256 = vmatprep.subr.bf16.mxu0 %v658_v6  ;;  %v87_v28 = vrot.slane %v73_v26, %v813_v16  ;;  %502 = vmatpush1.bf16.msra.mxu1 %v702_v27  ;;  %v712_v41 = vld [vmem:[%s1004_s3 + $0x54] ss:$8 sps:$4 sm:$0xff]   ;;  %v681_v42 = vld [vmem:[%s1002_s1 + $0xa0] ss:$8 sps:$4 sm:$0xff]   ;;  %v714_v44 = vld [vmem:[%s1004_s3 + $0x50] ss:$8 sps:$4 sm:$0xff]  }
   0xd   :  { %503 = vmatprep.subr.bf16.mxu1 %v703_v29  ;;  %v682_v43 = vld [vmem:[%s1002_s1 + $0xb4] ss:$8 sps:$4 sm:$0xff]   ;;  %v715_v45 = vld [vmem:[%s1004_s3 + $0x64] ss:$8 sps:$4 sm:$0xff]   ;;  %v684_v46 = vld [vmem:[%s1002_s1 + $0xb0] ss:$8 sps:$4 sm:$0xff]  }
   0xe   :  { %282 = vmatprep.mubr.bf16.mxu0 %v87_v28  ;;  %v685_v47 = vld [vmem:[%s1002_s1 + $0xc4] ss:$8 sps:$4 sm:$0xff]   ;;  %v717_v48 = vld [vmem:[%s1004_s3 + $0x60] ss:$8 sps:$4 sm:$0xff]   ;;  %v718_v49 = vld [vmem:[%s1004_s3 + $0x74] ss:$8 sps:$4 sm:$0xff]  }
   0xf   :  { %257 = vmatpush1.bf16.msra.mxu0 %v660_v10  ;;  %v687_v50 = vld [vmem:[%s1002_s1 + $0xc0] ss:$8 sps:$4 sm:$0xff]   ;;  %v688_v51 = vld [vmem:[%s1002_s1 + $0xd4] ss:$8 sps:$4 sm:$0xff]   ;;  %v720_v52 = vld [vmem:[%s1004_s3 + $0x70] ss:$8 sps:$4 sm:$0xff]  }
  0x10   :  { %258 = vmatprep.subr.bf16.mxu0 %v661_v11  ;;  %504 = vmatpush1.bf16.msra.mxu1 %v705_v32  ;;  %v721_v53 = vld [vmem:[%s1004_s3 + $0x84] ss:$8 sps:$4 sm:$0xff]   ;;  %v690_v54 = vld [vmem:[%s1002_s1 + $0xd0] ss:$8 sps:$4 sm:$0xff]   ;;  %v723_v56 = vld [vmem:[%s1004_s3 + $0x80] ss:$8 sps:$4 sm:$0xff]   ;;  %v540_v32 = vunpack.c.l.bf16 %v827_v20 }
  0x11   :  { %505 = vmatprep.subr.bf16.mxu1 %v706_v33  ;;  %v691_v55 = vld [vmem:[%s1002_s1 + $0xe4] ss:$8 sps:$4 sm:$0xff]   ;;  %v724_v57 = vld [vmem:[%s1004_s3 + $0x94] ss:$8 sps:$4 sm:$0xff]   ;;  %v693_v58 = vld [vmem:[%s1002_s1 + $0xe0] ss:$8 sps:$4 sm:$0xff]  }
  0x12   :  { %v694_v59 = vld [vmem:[%s1002_s1 + $0xf4] ss:$8 sps:$4 sm:$0xff]   ;;  %v726_v60 = vld [vmem:[%s1004_s3 + $0x90] ss:$8 sps:$4 sm:$0xff]   ;;  %v727_v61 = vld [vmem:[%s1004_s3 + $0xa4] ss:$8 sps:$4 sm:$0xff]  }
  0x13   :  { %259 = vmatpush1.bf16.msra.mxu0 %v663_v14  ;;  %v696_v62 = vld [vmem:[%s1002_s1 + $0xf0] ss:$8 sps:$4 sm:$0xff]   ;;  %v729_v63 = vld [vmem:[%s1004_s3 + $0xa0] ss:$8 sps:$4 sm:$0xff]   ;;  %v730_v1 = vld [vmem:[%s1004_s3 + $0xb4] ss:$8 sps:$4 sm:$0xff]  }
  0x14   :  { %260 = vmatprep.subr.bf16.mxu0 %v664_v15  ;;  %506 = vmatpush1.bf16.msra.mxu1 %v708_v36  ;;  %v732_v2 = vld [vmem:[%s1004_s3 + $0xb0] ss:$8 sps:$4 sm:$0xff]   ;;  %v733_v3 = vld [vmem:[%s1004_s3 + $0xc4] ss:$8 sps:$4 sm:$0xff]   ;;  %v735_v4 = vld [vmem:[%s1004_s3 + $0xc0] ss:$8 sps:$4 sm:$0xff]  }
  0x15   :  { %507 = vmatprep.subr.bf16.mxu1 %v709_v37  ;;  %v736_v5 = vld [vmem:[%s1004_s3 + $0xd4] ss:$8 sps:$4 sm:$0xff]   ;;  %v738_v6 = vld [vmem:[%s1004_s3 + $0xd0] ss:$8 sps:$4 sm:$0xff]   ;;  %v739_v7 = vld [vmem:[%s1004_s3 + $0xe4] ss:$8 sps:$4 sm:$0xff]  }
  0x16   :  { %v741_v8 = vld [vmem:[%s1004_s3 + $0xe0] ss:$8 sps:$4 sm:$0xff]   ;;  %v742_v9 = vld [vmem:[%s1004_s3 + $0xf4] ss:$8 sps:$4 sm:$0xff]   ;;  %v744_v10 = vld [vmem:[%s1004_s3 + $0xf0] ss:$8 sps:$4 sm:$0xff]  }
  0x17   :  { %261 = vmatpush1.bf16.msra.mxu0 %v666_v17  ;;  %v57_v11 = vsub.s32 0, %v804_v12  ;;  %v53_v13 = vld [vmem:[%s1005_s2] sm:$0x3]  ;;  %v61_v14 = vsub.s32 1, %v804_v12  ;;  %v746_v29 = vmov 1983009808  }
  0x18   :  { %262 = vmatprep.subr.bf16.mxu0 %v667_v18  ;;  %508 = vmatpush1.bf16.msra.mxu1 %v711_v40 }
  0x19   :  { %509 = vmatprep.subr.bf16.mxu1 %v712_v41  ;;  %v58_v15 = vrot.slane %v53_v13, %v57_v11  ;;  %v62_v17 = vrot.slane %v53_v13, %v61_v14 }
  0x1b   :  { %263 = vmatpush1.bf16.msra.mxu0 %v669_v19 }
  0x1c   :  { %264 = vmatprep.subr.bf16.mxu0 %v670_v25  ;;  %510 = vmatpush1.bf16.msra.mxu1 %v714_v44 }
  0x1d   :  { %511 = vmatprep.subr.bf16.mxu1 %v715_v45 }
  0x1f   :  { %265 = vmatpush1.bf16.msra.mxu0 %v672_v30  ;;  %v543_v30 = vunpack.c.l.s4 %v746_v29 }
  0x20   :  { %266 = vmatprep.subr.bf16.mxu0 %v673_v31  ;;  %512 = vmatpush1.bf16.msra.mxu1 %v717_v48 }
  0x21   :  { %513 = vmatprep.subr.bf16.mxu1 %v718_v49  ;;  %v544_v31 = vunpack.c.0.s8 %v543_v30 }
  0x23   :  { %267 = vmatpush1.bf16.msra.mxu0 %v675_v34  ;;  %v547_v33 = vsub.s32 %v544_v31, %v804_v12  ;;  %v327_v34 = vld [vmem:[%s1006_s4] sm:$0x3] }
  0x24   :  { %268 = vmatprep.subr.bf16.mxu0 %v676_v35  ;;  %514 = vmatpush1.bf16.msra.mxu1 %v720_v52  ;;  %v332_v36 = vrot.slane %v327_v34, %v57_v11  ;;  %v336_v37 = vrot.slane %v327_v34, %v61_v14 }
  0x25   :  { %515 = vmatprep.subr.bf16.mxu1 %v721_v53  ;;  %v548_v35 = vrot.slane %v540_v32, %v547_v33 }
  0x27   :  { %269 = vmatpush1.bf16.msra.mxu0 %v678_v38 }
  0x28   :  { %270 = vmatprep.subr.bf16.mxu0 %v679_v39  ;;  %516 = vmatpush1.bf16.msra.mxu1 %v723_v56  ;;  %v549_v39 = vcombine.high %v548_v35, %v548_v35 }
  0x29   :  { %517 = vmatprep.subr.bf16.mxu1 %v724_v57 }
  0x2b   :  { %271 = vmatpush1.bf16.msra.mxu0 %v681_v42 }
  0x2c   :  { %272 = vmatprep.subr.bf16.mxu0 %v682_v43  ;;  %518 = vmatpush1.bf16.msra.mxu1 %v726_v60 }
  0x2d   :  { %519 = vmatprep.subr.bf16.mxu1 %v727_v61 }
  0x2f   :  { %273 = vmatpush1.bf16.msra.mxu0 %v684_v46 }
  0x30   :  { %274 = vmatprep.subr.bf16.mxu0 %v685_v47  ;;  %520 = vmatpush1.bf16.msra.mxu1 %v729_v63 }
  0x31   :  { %521 = vmatprep.subr.bf16.mxu1 %v730_v1 }
  0x33   :  { %275 = vmatpush1.bf16.msra.mxu0 %v687_v50 }
  0x34   :  { %276 = vmatprep.subr.bf16.mxu0 %v688_v51  ;;  %522 = vmatpush1.bf16.msra.mxu1 %v732_v2 }
  0x35   :  { %523 = vmatprep.subr.bf16.mxu1 %v733_v3 }
  0x37   :  { %277 = vmatpush1.bf16.msra.mxu0 %v690_v54 }
  0x38   :  { %278 = vmatprep.subr.bf16.mxu0 %v691_v55  ;;  %524 = vmatpush1.bf16.msra.mxu1 %v735_v4 }
  0x39   :  { %525 = vmatprep.subr.bf16.mxu1 %v736_v5 }
  0x3b   :  { %279 = vmatpush1.bf16.msra.mxu0 %v693_v58 }
  0x3c   :  { %280 = vmatprep.subr.bf16.mxu0 %v694_v59  ;;  %526 = vmatpush1.bf16.msra.mxu1 %v738_v6 }
  0x3d   :  { %527 = vmatprep.subr.bf16.mxu1 %v739_v7 }
  0x3f   :  { %281 = vmatpush1.bf16.msra.mxu0 %v696_v62 }
  0x40   :  { %528 = vmatpush1.bf16.msra.mxu1 %v741_v8 }
  0x41   :  { %529 = vmatprep.subr.bf16.mxu1 %v742_v9 }
  0x42   :  { %283 = vmatmul.mubr.bf16.vlgmr.msra.gmra.mrb[0].mxu0 %v80_v0 }
  0x44   :  { %530 = vmatpush1.bf16.msra.mxu1 %v744_v10 }
 0x115   :  { %v284_v18 = vpop.f32.mrb[0].mxu0 }
 0x116   :  { %v285_v19 = vadd.f32 %v284_v18, %v58_v15  ;;  %v286_v21 = vpop.f32.mrb[1].mxu0 }
 0x117   :  { %v287_v22 = vadd.f32 %v286_v21, %v62_v17  ;;  %v288_v23 = vpop.f32.mrb[2].mxu0 }
 0x118   :  { %v291_v24 = vmax.f32 %v285_v19, 0.0  ;;  %v289_v25 = vpop.f32.mrb[3].mxu0 }
 0x119   :  { %v292_v26 = vmax.f32 %v287_v22, 0.0 }
 0x11a   :  { %v293_v28 = vpack.c.bf16 %v291_v24, %v291_v24 }
 0x11b   :  { %v294_v27 = vpack.c.bf16 %v292_v26, %v292_v26 }
 0x11d   :  { %531 = vmatprep.mubr.bf16.mxu1 %v294_v27 }
 0x11e   :  { %532 = vmatmul.mubr.bf16.vlgmr.msra.gmra.mrb[0].mxu1 %v293_v28 }
 0x1f1   :  { %v533_v38 = vpop.f32.mrb[0].mxu1 }
 0x1f2   :  { %v534_v40 = vadd.f32 %v533_v38, %v332_v36  ;;  %v535_v41 = vpop.f32.mrb[1].mxu1 }
 0x1f3   :  { %v536_v42 = vadd.f32 %v535_v41, %v336_v37  ;;  %v537_v43 = vpop.f32.mrb[2].mxu1 }
 0x1f4   :  { %v552_v44 = vadd.f32 %v548_v35, %v534_v40  ;;  %v538_v45 = vpop.f32.mrb[3].mxu1 }
 0x1f5   :  { %v553_v46 = vadd.f32 %v549_v39, %v536_v42 }
 0x1f6   :  { %v554_v47 = vmax.f32 %v552_v44, 0.0 }
 0x1f7   :  { %v555_v20 = vmax.f32 %v553_v46, 0.0 }
 0x1f9   :  { %v645_v48 = vpack.c.bf16 %v555_v20, %v554_v47 }
 0x1fb   :  { %v567_v12 = vrot.slane %v645_v48, %v813_v16 }
 0x1fd   :  { %646 = vst.sshfl [vmem:[%s1007_s5] sm:$0x5 pattern:$0x73625140] %v567_v12 }

// kernel: resnet_forward.23
= control target key start
LH: loop header
LB: loop body
LE: loop exit
PB: predicated region body
PF: predicated region fallthrough
CT: control target
= control target key end

     0   :  { %v178_v7 = vlaneseq  ;;  %v2123_v8 = vmov 1966171168   ;;  %s2824_s2 = inlined_call_operand.vmem [shape: bf16[1152,256], index: 2, kind: input, shape index: {}]   ;;  %s2825_s0 = inlined_call_operand.vmem [shape: bf16[2,1152], index: 0, kind: input, shape index: {}]   ;;  %s2826_s4 = inlined_call_operand.vmem [shape: bf16[256,256], index: 4, kind: input, shape index: {}]   ;;  %s2827_s6 = inlined_call_operand.vmem [shape: bf16[128,256], index: 6, kind: input, shape index: {}]   ;;  %s2828_s3 = inlined_call_operand.vmem [shape: f32[1,256], index: 3, kind: input, shape index: {}]   ;;  %s2829_s1 = inlined_call_operand.vmem [shape: bf16[2,128], index: 1, kind: input, shape index: {}]   ;;  %s2830_s5 = inlined_call_operand.vmem [shape: f32[1,256], index: 5, kind: input, shape index: {}]   ;;  %s2831_s7 = inlined_call_operand.vmem [shape: f32[1,256], index: 7, kind: input, shape index: {}]   ;;  %s2832_s8 = inlined_call_operand.vmem [shape: bf16[2,256], index: 8, kind: output, shape index: {}]  }
   0x1   :  { %v1834_v0 = vld [vmem:[%s2824_s2 + $0x104] ss:$8 sps:$4 sm:$0xff]   ;;  %v1836_v1 = vld [vmem:[%s2824_s2 + $0x100] ss:$8 sps:$4 sm:$0xff]   ;;  %v1837_v2 = vld [vmem:[%s2824_s2 + $0x114] ss:$8 sps:$4 sm:$0xff]   ;;  %v192_v9 = vunpack.c.l.s4 %v2123_v8 }
   0x2   :  { %1023 = vmatprep.subr.bf16.mxu0 %v1834_v0  ;;  %v1839_v3 = vld [vmem:[%s2824_s2 + $0x110] ss:$8 sps:$4 sm:$0xff]   ;;  %v1840_v4 = vld [vmem:[%s2824_s2 + $0x124] ss:$8 sps:$4 sm:$0xff]   ;;  %v1842_v5 = vld [vmem:[%s2824_s2 + $0x120] ss:$8 sps:$4 sm:$0xff]  }
   0x3   :  { %1024 = vmatpush1.bf16.msra.mxu0 %v1836_v1  ;;  %v1843_v6 = vld [vmem:[%s2824_s2 + $0x134] ss:$8 sps:$4 sm:$0xff]   ;;  %v1845_v10 = vld [vmem:[%s2824_s2 + $0x130] ss:$8 sps:$4 sm:$0xff]   ;;  %v1846_v11 = vld [vmem:[%s2824_s2 + $0x144] ss:$8 sps:$4 sm:$0xff]   ;;  %v193_v13 = vunpack.c.0.s8 %v192_v9 }
   0x4   :  { %1025 = vmatprep.subr.bf16.mxu0 %v1837_v2  ;;  %v2197_v12 = vshrl.u32 %v178_v7, 7  ;;  %v1848_v14 = vld [vmem:[%s2824_s2 + $0x140] ss:$8 sps:$4 sm:$0xff]   ;;  %v1849_v15 = vld [vmem:[%s2824_s2 + $0x154] ss:$8 sps:$4 sm:$0xff]  }
   0x5   :  { %v1851_v17 = vld [vmem:[%s2824_s2 + $0x150] ss:$8 sps:$4 sm:$0xff]   ;;  %v1852_v18 = vld [vmem:[%s2824_s2 + $0x164] ss:$8 sps:$4 sm:$0xff]   ;;  %v1854_v21 = vld [vmem:[%s2824_s2 + $0x160] ss:$8 sps:$4 sm:$0xff]  }
   0x6   :  { %v2206_v16 = vsub.s32 %v193_v13, %v2197_v12  ;;  %v2217_v19 = vld [vmem:[%s2825_s0] sm:$0xff]  ;;  %v1855_v22 = vld [vmem:[%s2824_s2 + $0x174] ss:$8 sps:$4 sm:$0xff]   ;;  %v1857_v25 = vld [vmem:[%s2824_s2 + $0x170] ss:$8 sps:$4 sm:$0xff]  }
   0x7   :  { %1026 = vmatpush1.bf16.msra.mxu0 %v1839_v3  ;;  %v1858_v26 = vld [vmem:[%s2824_s2 + $0x184] ss:$8 sps:$4 sm:$0xff]   ;;  %v1860_v28 = vld [vmem:[%s2824_s2 + $0x180] ss:$8 sps:$4 sm:$0xff]   ;;  %v1861_v29 = vld [vmem:[%s2824_s2 + $0x194] ss:$8 sps:$4 sm:$0xff]   ;;  %v190_v51 = vcombine.high %v2217_v19, %v2217_v19 }
   0x8   :  { %1027 = vmatprep.subr.bf16.mxu0 %v1840_v4  ;;  %v2221_v20 = vrot.slane %v2217_v19, %v2206_v16  ;;  %v1907_v30 = vld [vmem:[%s2824_s2 + $0x4] ss:$8 sps:$4 sm:$0xff]   ;;  %v1909_v31 = vld [vmem:[%s2824_s2] ss:$8 sps:$4 sm:$0xff]   ;;  %v1863_v32 = vld [vmem:[%s2824_s2 + $0x190] ss:$8 sps:$4 sm:$0xff]  }
   0x9   :  { %v1864_v33 = vld [vmem:[%s2824_s2 + $0x1a4] ss:$8 sps:$4 sm:$0xff]   ;;  %982 = vmatprep.subr.bf16.mxu1 %v1907_v30  ;;  %v1913_v34 = vld [vmem:[%s2824_s2 + $0x14] ss:$8 sps:$4 sm:$0xff]   ;;  %v1915_v35 = vld [vmem:[%s2824_s2 + $0x10] ss:$8 sps:$4 sm:$0xff]   ;;  %v2322_v56 = vrot.slane %v190_v51, %v2206_v16 }
   0xa   :  { %v205_v23 = vcombine.high %v2221_v20, %v2221_v20  ;;  %983 = vmatpush1.bf16.msra.mxu1 %v1909_v31  ;;  %v1866_v36 = vld [vmem:[%s2824_s2 + $0x1a0] ss:$8 sps:$4 sm:$0xff]   ;;  %v1919_v37 = vld [vmem:[%s2824_s2 + $0x24] ss:$8 sps:$4 sm:$0xff]   ;;  %v1867_v38 = vld [vmem:[%s2824_s2 + $0x1b4] ss:$8 sps:$4 sm:$0xff]   ;;  %v2335_v60 = vrot.slane %v2221_v20, %v2206_v16 }
   0xb   :  { %1028 = vmatpush1.bf16.msra.mxu0 %v1842_v5  ;;  %984 = vmatprep.subr.bf16.mxu1 %v1913_v34  ;;  %v1921_v39 = vld [vmem:[%s2824_s2 + $0x20] ss:$8 sps:$4 sm:$0xff]   ;;  %v1925_v40 = vld [vmem:[%s2824_s2 + $0x34] ss:$8 sps:$4 sm:$0xff]   ;;  %v1869_v41 = vld [vmem:[%s2824_s2 + $0x1b0] ss:$8 sps:$4 sm:$0xff]   ;;  %v206_v62 = vcombine.high %v2322_v56, %v2322_v56 }
   0xc   :  { %1029 = vmatprep.subr.bf16.mxu0 %v1843_v6  ;;  %v227_v24 = vrot.slane %v205_v23, %v2206_v16  ;;  %v1870_v42 = vld [vmem:[%s2824_s2 + $0x1c4] ss:$8 sps:$4 sm:$0xff]   ;;  %v1927_v43 = vld [vmem:[%s2824_s2 + $0x30] ss:$8 sps:$4 sm:$0xff]   ;;  %v1872_v45 = vld [vmem:[%s2824_s2 + $0x1c0] ss:$8 sps:$4 sm:$0xff]   ;;  %v235_v2 = vcombine.high %v2335_v60, %v2335_v60 }
   0xd   :  { %v1931_v44 = vld [vmem:[%s2824_s2 + $0x44] ss:$8 sps:$4 sm:$0xff]   ;;  %v1873_v46 = vld [vmem:[%s2824_s2 + $0x1d4] ss:$8 sps:$4 sm:$0xff]   ;;  %v1933_v47 = vld [vmem:[%s2824_s2 + $0x40] ss:$8 sps:$4 sm:$0xff]   ;;  %v2357_v4 = vrot.slane %v206_v62, %v2206_v16 }
   0xe   :  { %v237_v27 = vcombine.high %v227_v24, %v227_v24  ;;  %1014 = vmatprep.mubr.bf16.mxu1 %v227_v24  ;;  %985 = vmatpush1.bf16.msra.mxu1 %v1915_v35  ;;  %v1937_v48 = vld [vmem:[%s2824_s2 + $0x54] ss:$8 sps:$4 sm:$0xff]   ;;  %v1875_v49 = vld [vmem:[%s2824_s2 + $0x1d0] ss:$8 sps:$4 sm:$0xff]   ;;  %v1876_v50 = vld [vmem:[%s2824_s2 + $0x1e4] ss:$8 sps:$4 sm:$0xff]  }
   0xf   :  { %1030 = vmatpush1.bf16.msra.mxu0 %v1845_v10  ;;  %986 = vmatprep.subr.bf16.mxu1 %v1919_v37  ;;  %v1939_v52 = vld [vmem:[%s2824_s2 + $0x50] ss:$8 sps:$4 sm:$0xff]   ;;  %v1943_v53 = vld [vmem:[%s2824_s2 + $0x64] ss:$8 sps:$4 sm:$0xff]   ;;  %v1878_v54 = vld [vmem:[%s2824_s2 + $0x1e0] ss:$8 sps:$4 sm:$0xff]  }
  0x10   :  { %1031 = vmatprep.subr.bf16.mxu0 %v1846_v11  ;;  %1055 = vmatprep.mubr.bf16.mxu0 %v237_v27  ;;  %v1879_v55 = vld [vmem:[%s2824_s2 + $0x1f4] ss:$8 sps:$4 sm:$0xff]   ;;  %v1945_v57 = vld [vmem:[%s2824_s2 + $0x60] ss:$8 sps:$4 sm:$0xff]   ;;  %v1881_v59 = vld [vmem:[%s2824_s2 + $0x1f0] ss:$8 sps:$4 sm:$0xff]  }
  0x11   :  { %v1949_v58 = vld [vmem:[%s2824_s2 + $0x74] ss:$8 sps:$4 sm:$0xff]   ;;  %v1885_v61 = vld [vmem:[%s2824_s2 + $0x204] ss:$8 sps:$4 sm:$0xff]   ;;  %v1951_v63 = vld [vmem:[%s2824_s2 + $0x70] ss:$8 sps:$4 sm:$0xff]  }
  0x12   :  { %987 = vmatpush1.bf16.msra.mxu1 %v1921_v39  ;;  %v1955_v0 = vld [vmem:[%s2824_s2 + $0x84] ss:$8 sps:$4 sm:$0xff]   ;;  %v1883_v1 = vld [vmem:[%s2824_s2 + $0x200] ss:$8 sps:$4 sm:$0xff]   ;;  %v1888_v3 = vld [vmem:[%s2824_s2 + $0x214] ss:$8 sps:$4 sm:$0xff]  }
  0x13   :  { %1032 = vmatpush1.bf16.msra.mxu0 %v1848_v14  ;;  %988 = vmatprep.subr.bf16.mxu1 %v1925_v40  ;;  %v1957_v5 = vld [vmem:[%s2824_s2 + $0x80] ss:$8 sps:$4 sm:$0xff]   ;;  %v1961_v6 = vld [vmem:[%s2824_s2 + $0x94] ss:$8 sps:$4 sm:$0xff]   ;;  %v1886_v7 = vld [vmem:[%s2824_s2 + $0x210] ss:$8 sps:$4 sm:$0xff]  }
  0x14   :  { %1033 = vmatprep.subr.bf16.mxu0 %v1849_v15  ;;  %v1891_v8 = vld [vmem:[%s2824_s2 + $0x224] ss:$8 sps:$4 sm:$0xff]   ;;  %v1963_v9 = vld [vmem:[%s2824_s2 + $0x90] ss:$8 sps:$4 sm:$0xff]   ;;  %v1889_v11 = vld [vmem:[%s2824_s2 + $0x220] ss:$8 sps:$4 sm:$0xff]  }
  0x15   :  { %v1967_v10 = vld [vmem:[%s2824_s2 + $0xa4] ss:$8 sps:$4 sm:$0xff]   ;;  %v1894_v13 = vld [vmem:[%s2824_s2 + $0x234] ss:$8 sps:$4 sm:$0xff]   ;;  %v1969_v14 = vld [vmem:[%s2824_s2 + $0xa0] ss:$8 sps:$4 sm:$0xff]  }
  0x16   :  { %989 = vmatpush1.bf16.msra.mxu1 %v1927_v43  ;;  %v1973_v15 = vld [vmem:[%s2824_s2 + $0xb4] ss:$8 sps:$4 sm:$0xff]   ;;  %v1975_v19 = vld [vmem:[%s2824_s2 + $0xb0] ss:$8 sps:$4 sm:$0xff]   ;;  %v1979_v20 = vld [vmem:[%s2824_s2 + $0xc4] ss:$8 sps:$4 sm:$0xff]  }
  0x17   :  { %1034 = vmatpush1.bf16.msra.mxu0 %v1851_v17  ;;  %990 = vmatprep.subr.bf16.mxu1 %v1931_v44  ;;  %v1892_v17 = vld [vmem:[%s2824_s2 + $0x230] ss:$8 sps:$4 sm:$0xff]   ;;  %v1981_v23 = vld [vmem:[%s2824_s2 + $0xc0] ss:$8 sps:$4 sm:$0xff]   ;;  %v1985_v24 = vld [vmem:[%s2824_s2 + $0xd4] ss:$8 sps:$4 sm:$0xff]  }
  0x18   :  { %1035 = vmatprep.subr.bf16.mxu0 %v1852_v18  ;;  %v1897_v18 = vld [vmem:[%s2824_s2 + $0x244] ss:$8 sps:$4 sm:$0xff]   ;;  %v1987_v27 = vld [vmem:[%s2824_s2 + $0xd0] ss:$8 sps:$4 sm:$0xff]   ;;  %v1906_v30 = vld [vmem:[%s2824_s2 + $0x274] ss:$8 sps:$4 sm:$0xff]  }
  0x19   :  { %v1993_v31 = vld [vmem:[%s2824_s2 + $0xe0] ss:$8 sps:$4 sm:$0xff]   ;;  %v1912_v34 = vld [vmem:[%s2824_s2 + $0x284] ss:$8 sps:$4 sm:$0xff]   ;;  %v1999_v35 = vld [vmem:[%s2824_s2 + $0xf0] ss:$8 sps:$4 sm:$0xff]  }
  0x1a   :  { %991 = vmatpush1.bf16.msra.mxu1 %v1933_v47  ;;  %v1910_v37 = vld [vmem:[%s2824_s2 + $0x280] ss:$8 sps:$4 sm:$0xff]   ;;  %v2011_v40 = vld [vmem:[%s2824_s2 + $0x414] ss:$8 sps:$4 sm:$0xff]   ;;  %v2009_v43 = vld [vmem:[%s2824_s2 + $0x410] ss:$8 sps:$4 sm:$0xff]  }
  0x1b   :  { %1036 = vmatpush1.bf16.msra.mxu0 %v1854_v21  ;;  %992 = vmatprep.subr.bf16.mxu1 %v1937_v48  ;;  %v1895_v21 = vld [vmem:[%s2824_s2 + $0x240] ss:$8 sps:$4 sm:$0xff]   ;;  %v2017_v44 = vld [vmem:[%s2824_s2 + $0x424] ss:$8 sps:$4 sm:$0xff]   ;;  %v1930_v47 = vld [vmem:[%s2824_s2 + $0x2b4] ss:$8 sps:$4 sm:$0xff]  }
  0x1c   :  { %1037 = vmatprep.subr.bf16.mxu0 %v1855_v22  ;;  %v1900_v22 = vld [vmem:[%s2824_s2 + $0x254] ss:$8 sps:$4 sm:$0xff]   ;;  %v2003_v39 = vld [vmem:[%s2824_s2 + $0x400] ss:$8 sps:$4 sm:$0xff]   ;;  %v1936_v51 = vld [vmem:[%s2824_s2 + $0x2c4] ss:$8 sps:$4 sm:$0xff]  }
  0x1d   :  { %v2015_v48 = vld [vmem:[%s2824_s2 + $0x420] ss:$8 sps:$4 sm:$0xff]   ;;  %v2041_v62 = vld [vmem:[%s2824_s2 + $0x464] ss:$8 sps:$4 sm:$0xff]  }
  0x1e   :  { %993 = vmatpush1.bf16.msra.mxu1 %v1939_v52  ;;  %v2021_v52 = vld [vmem:[%s2824_s2 + $0x430] ss:$8 sps:$4 sm:$0xff]  }
  0x1f   :  { %1038 = vmatpush1.bf16.msra.mxu0 %v1857_v25  ;;  %994 = vmatprep.subr.bf16.mxu1 %v1943_v53  ;;  %v1898_v25 = vld [vmem:[%s2824_s2 + $0x250] ss:$8 sps:$4 sm:$0xff]   ;;  %v2029_v53 = vld [vmem:[%s2824_s2 + $0x444] ss:$8 sps:$4 sm:$0xff]  }
  0x20   :  { %1039 = vmatprep.subr.bf16.mxu0 %v1858_v26  ;;  %v1903_v26 = vld [vmem:[%s2824_s2 + $0x264] ss:$8 sps:$4 sm:$0xff]  }
  0x22   :  { %995 = vmatpush1.bf16.msra.mxu1 %v1945_v57  ;;  %v2027_v57 = vld [vmem:[%s2824_s2 + $0x440] ss:$8 sps:$4 sm:$0xff]  }
  0x23   :  { %1040 = vmatpush1.bf16.msra.mxu0 %v1860_v28  ;;  %996 = vmatprep.subr.bf16.mxu1 %v1949_v58  ;;  %v1991_v28 = vld [vmem:[%s2824_s2 + $0xe4] ss:$8 sps:$4 sm:$0xff]   ;;  %v2035_v58 = vld [vmem:[%s2824_s2 + $0x454] ss:$8 sps:$4 sm:$0xff]  }
  0x24   :  { %1041 = vmatprep.subr.bf16.mxu0 %v1861_v29  ;;  %v1901_v29 = vld [vmem:[%s2824_s2 + $0x260] ss:$8 sps:$4 sm:$0xff]  }
  0x26   :  { %997 = vmatpush1.bf16.msra.mxu1 %v1951_v63  ;;  %v1946_v63 = vld [vmem:[%s2824_s2 + $0x2e0] ss:$8 sps:$4 sm:$0xff]  }
  0x27   :  { %1042 = vmatpush1.bf16.msra.mxu0 %v1863_v32  ;;  %998 = vmatprep.subr.bf16.mxu1 %v1955_v0  ;;  %v1997_v32 = vld [vmem:[%s2824_s2 + $0xf4] ss:$8 sps:$4 sm:$0xff]  }
  0x28   :  { %1043 = vmatprep.subr.bf16.mxu0 %v1864_v33  ;;  %v1904_v33 = vld [vmem:[%s2824_s2 + $0x270] ss:$8 sps:$4 sm:$0xff]   ;;  %v1954_v0 = vld [vmem:[%s2824_s2 + $0x2f4] ss:$8 sps:$4 sm:$0xff]  }
  0x2a   :  { %999 = vmatpush1.bf16.msra.mxu1 %v1957_v5  ;;  %v1960_v5 = vld [vmem:[%s2824_s2 + $0x304] ss:$8 sps:$4 sm:$0xff]  }
  0x2b   :  { %1044 = vmatpush1.bf16.msra.mxu0 %v1866_v36  ;;  %1000 = vmatprep.subr.bf16.mxu1 %v1961_v6  ;;  %v2005_v36 = vld [vmem:[%s2824_s2 + $0x404] ss:$8 sps:$4 sm:$0xff]   ;;  %v2045_v6 = vld [vmem:[%s2824_s2 + $0x470] ss:$8 sps:$4 sm:$0xff]  }
  0x2c   :  { %1045 = vmatprep.subr.bf16.mxu0 %v1867_v38  ;;  %v1918_v38 = vld [vmem:[%s2824_s2 + $0x294] ss:$8 sps:$4 sm:$0xff]  }
  0x2e   :  { %1001 = vmatpush1.bf16.msra.mxu1 %v1963_v9  ;;  %v2553_v9 = vrot.slane %v2322_v56, %v2206_v16  ;;  %v2051_v56 = vld [vmem:[%s2826_s4] ss:$8 sps:$4 sm:$0xff]  }
  0x2f   :  { %1046 = vmatpush1.bf16.msra.mxu0 %v1869_v41  ;;  %1002 = vmatprep.subr.bf16.mxu1 %v1967_v10  ;;  %v1916_v41 = vld [vmem:[%s2824_s2 + $0x290] ss:$8 sps:$4 sm:$0xff]   ;;  %v1958_v10 = vld [vmem:[%s2824_s2 + $0x300] ss:$8 sps:$4 sm:$0xff]  }
  0x30   :  { %1047 = vmatprep.subr.bf16.mxu0 %v1870_v42  ;;  %v1924_v42 = vld [vmem:[%s2824_s2 + $0x2a4] ss:$8 sps:$4 sm:$0xff]  }
  0x32   :  { %1003 = vmatpush1.bf16.msra.mxu1 %v1969_v14 }
  0x33   :  { %1048 = vmatpush1.bf16.msra.mxu0 %v1872_v45  ;;  %1004 = vmatprep.subr.bf16.mxu1 %v1973_v15  ;;  %v2124_v45 = vmov 0   ;;  %v2056_v15 = vld [vmem:[%s2826_s4 + $0x14] ss:$8 sps:$4 sm:$0xff]  }
  0x34   :  { %1049 = vmatprep.subr.bf16.mxu0 %v1873_v46  ;;  %v1922_v46 = vld [vmem:[%s2824_s2 + $0x2a0] ss:$8 sps:$4 sm:$0xff]  }
  0x36   :  { %1005 = vmatpush1.bf16.msra.mxu1 %v1975_v19  ;;  %v2059_v19 = vld [vmem:[%s2826_s4 + $0x24] ss:$8 sps:$4 sm:$0xff]  }
  0x37   :  { %1050 = vmatpush1.bf16.msra.mxu0 %v1875_v49  ;;  %1006 = vmatprep.subr.bf16.mxu1 %v1979_v20  ;;  %v1928_v49 = vld [vmem:[%s2824_s2 + $0x2b0] ss:$8 sps:$4 sm:$0xff]   ;;  %v1970_v20 = vld [vmem:[%s2824_s2 + $0x320] ss:$8 sps:$4 sm:$0xff]  }
  0x38   :  { %1051 = vmatprep.subr.bf16.mxu0 %v1876_v50  ;;  %v2023_v50 = vld [vmem:[%s2824_s2 + $0x434] ss:$8 sps:$4 sm:$0xff]  }
  0x3a   :  { %1007 = vmatpush1.bf16.msra.mxu1 %v1981_v23  ;;  %v2062_v23 = vld [vmem:[%s2826_s4 + $0x34] ss:$8 sps:$4 sm:$0xff]  }
  0x3b   :  { %1052 = vmatpush1.bf16.msra.mxu0 %v1878_v54  ;;  %1008 = vmatprep.subr.bf16.mxu1 %v1985_v24  ;;  %v1934_v54 = vld [vmem:[%s2824_s2 + $0x2c0] ss:$8 sps:$4 sm:$0xff]   ;;  %v1976_v24 = vld [vmem:[%s2824_s2 + $0x330] ss:$8 sps:$4 sm:$0xff]  }
  0x3c   :  { %1053 = vmatprep.subr.bf16.mxu0 %v1879_v55  ;;  %v1942_v55 = vld [vmem:[%s2824_s2 + $0x2d4] ss:$8 sps:$4 sm:$0xff]  }
  0x3e   :  { %1009 = vmatpush1.bf16.msra.mxu1 %v1987_v27  ;;  %v2065_v27 = vld [vmem:[%s2826_s4 + $0x44] ss:$8 sps:$4 sm:$0xff]  }
  0x3f   :  { %1054 = vmatpush1.bf16.msra.mxu0 %v1881_v59  ;;  %1010 = vmatprep.subr.bf16.mxu1 %v1991_v28  ;;  %v1940_v59 = vld [vmem:[%s2824_s2 + $0x2d0] ss:$8 sps:$4 sm:$0xff]   ;;  %v1982_v28 = vld [vmem:[%s2824_s2 + $0x340] ss:$8 sps:$4 sm:$0xff]  }
  0x40   :  { %1064 = vmatprep.subr.bf16.mxu0 %v1885_v61  ;;  %v2033_v61 = vld [vmem:[%s2824_s2 + $0x450] ss:$8 sps:$4 sm:$0xff]  }
  0x42   :  { %1056 = vmatmul.mubr.bf16.vlgmr.msra.gmra.mrb[0].mxu0 %v235_v2  ;;  %1011 = vmatpush1.bf16.msra.mxu1 %v1993_v31  ;;  %v2047_v2 = vld [vmem:[%s2824_s2 + $0x474] ss:$8 sps:$4 sm:$0xff]  }
  0x43   :  { %1065 = vmatpush1.bf16.msra.mxu0 %v1883_v1  ;;  %1096 = vmatprep.mubr.bf16.mxu0 %v2357_v4  ;;  %v2039_v1 = vld [vmem:[%s2824_s2 + $0x460] ss:$8 sps:$4 sm:$0xff]   ;;  %v2068_v31 = vld [vmem:[%s2826_s4 + $0x54] ss:$8 sps:$4 sm:$0xff]  }
  0x44   :  { %1066 = vmatprep.subr.bf16.mxu0 %v1888_v3  ;;  %1012 = vmatprep.subr.bf16.mxu1 %v1997_v32  ;;  %v1952_v3 = vld [vmem:[%s2824_s2 + $0x2f0] ss:$8 sps:$4 sm:$0xff]  }
  0x45   :  { %v1988_v32 = vld [vmem:[%s2824_s2 + $0x350] ss:$8 sps:$4 sm:$0xff]  }
  0x46   :  { %1013 = vmatpush1.bf16.msra.mxu1 %v1999_v35  ;;  %v1994_v35 = vld [vmem:[%s2824_s2 + $0x360] ss:$8 sps:$4 sm:$0xff]  }
  0x47   :  { %1067 = vmatpush1.bf16.msra.mxu0 %v1886_v7  ;;  %1146 = vmatprep.subr.bf16.mxu1 %v2005_v36  ;;  %v1615_v7 = vld.sshfl [vmem:[%s2825_s0 + $0x8] sm:$0x1 pattern:$0x75316420]  ;;  %v2002_v36 = vld [vmem:[%s2824_s2 + $0x374] ss:$8 sps:$4 sm:$0xff]  }
  0x48   :  { %1068 = vmatprep.subr.bf16.mxu0 %v1891_v8  ;;  %v2053_v8 = vld [vmem:[%s2826_s4 + $0x4] ss:$8 sps:$4 sm:$0xff]   ;;  %v252_v14 = vrot.slane %v1615_v7, %v2206_v16  ;;  %v2087_v7 = vld [vmem:[%s2826_s4 + $0xc0] ss:$8 sps:$4 sm:$0xff]  }
  0x49   :  { %1015 = vmatmul.mubr.bf16.vlgmr.msra.gmra.mrb[0].mxu1 %v2335_v60  ;;  %v1948_v60 = vld [vmem:[%s2824_s2 + $0x2e4] ss:$8 sps:$4 sm:$0xff]  }
  0x4a   :  { %1147 = vmatpush1.bf16.msra.mxu1 %v2003_v39  ;;  %1178 = vmatprep.mubr.bf16.mxu1 %v2124_v45  ;;  %v2006_v39 = vld [vmem:[%s2824_s2 + $0x380] ss:$8 sps:$4 sm:$0xff]  }
  0x4b   :  { %1069 = vmatpush1.bf16.msra.mxu0 %v1889_v11  ;;  %1148 = vmatprep.subr.bf16.mxu1 %v2011_v40  ;;  %v238_v11 = vcombine.high %v2357_v4, %v2357_v4  ;;  %v1964_v4 = vld [vmem:[%s2824_s2 + $0x310] ss:$8 sps:$4 sm:$0xff]   ;;  %v2014_v40 = vld [vmem:[%s2824_s2 + $0x394] ss:$8 sps:$4 sm:$0xff]  }
  0x4c   :  { %1070 = vmatprep.subr.bf16.mxu0 %v1894_v13  ;;  %v1966_v13 = vld [vmem:[%s2824_s2 + $0x314] ss:$8 sps:$4 sm:$0xff]  }
  0x4e   :  { %1149 = vmatpush1.bf16.msra.mxu1 %v2009_v43  ;;  %v2018_v43 = vld [vmem:[%s2824_s2 + $0x3a0] ss:$8 sps:$4 sm:$0xff]  }
  0x4f   :  { %1071 = vmatpush1.bf16.msra.mxu0 %v1892_v17  ;;  %1150 = vmatprep.subr.bf16.mxu1 %v2017_v44  ;;  %v1972_v17 = vld [vmem:[%s2824_s2 + $0x324] ss:$8 sps:$4 sm:$0xff]   ;;  %v2026_v44 = vld [vmem:[%s2824_s2 + $0x3b4] ss:$8 sps:$4 sm:$0xff]  }
  0x50   :  { %1072 = vmatprep.subr.bf16.mxu0 %v1897_v18  ;;  %v2054_v18 = vld [vmem:[%s2826_s4 + $0x10] ss:$8 sps:$4 sm:$0xff]  }
  0x52   :  { %1151 = vmatpush1.bf16.msra.mxu1 %v2015_v48  ;;  %v2030_v48 = vld [vmem:[%s2824_s2 + $0x3c0] ss:$8 sps:$4 sm:$0xff]  }
  0x53   :  { %1073 = vmatpush1.bf16.msra.mxu0 %v1895_v21  ;;  %1152 = vmatprep.subr.bf16.mxu1 %v2023_v50  ;;  %v1978_v21 = vld [vmem:[%s2824_s2 + $0x334] ss:$8 sps:$4 sm:$0xff]   ;;  %v2036_v50 = vld [vmem:[%s2824_s2 + $0x3d0] ss:$8 sps:$4 sm:$0xff]  }
  0x54   :  { %1074 = vmatprep.subr.bf16.mxu0 %v1900_v22  ;;  %v2057_v22 = vld [vmem:[%s2826_s4 + $0x20] ss:$8 sps:$4 sm:$0xff]  }
  0x56   :  { %1153 = vmatpush1.bf16.msra.mxu1 %v2021_v52  ;;  %v2042_v52 = vld [vmem:[%s2824_s2 + $0x3e0] ss:$8 sps:$4 sm:$0xff]  }
  0x57   :  { %1075 = vmatpush1.bf16.msra.mxu0 %v1898_v25  ;;  %1154 = vmatprep.subr.bf16.mxu1 %v2029_v53  ;;  %v1984_v25 = vld [vmem:[%s2824_s2 + $0x344] ss:$8 sps:$4 sm:$0xff]   ;;  %v2050_v53 = vld [vmem:[%s2824_s2 + $0x3f4] ss:$8 sps:$4 sm:$0xff]  }
  0x58   :  { %1076 = vmatprep.subr.bf16.mxu0 %v1903_v26  ;;  %v2060_v26 = vld [vmem:[%s2826_s4 + $0x30] ss:$8 sps:$4 sm:$0xff]  }
  0x5a   :  { %1155 = vmatpush1.bf16.msra.mxu1 %v2027_v57  ;;  %v2074_v57 = vld [vmem:[%s2826_s4 + $0x74] ss:$8 sps:$4 sm:$0xff]  }
  0x5b   :  { %1077 = vmatpush1.bf16.msra.mxu0 %v1901_v29  ;;  %1156 = vmatprep.subr.bf16.mxu1 %v2035_v58  ;;  %v1990_v29 = vld [vmem:[%s2824_s2 + $0x354] ss:$8 sps:$4 sm:$0xff]   ;;  %v2048_v58 = vld [vmem:[%s2824_s2 + $0x3f0] ss:$8 sps:$4 sm:$0xff]  }
  0x5c   :  { %1078 = vmatprep.subr.bf16.mxu0 %v1906_v30  ;;  %v2063_v30 = vld [vmem:[%s2826_s4 + $0x40] ss:$8 sps:$4 sm:$0xff]  }
  0x5e   :  { %1157 = vmatpush1.bf16.msra.mxu1 %v2033_v61  ;;  %v236_v61 = vcombine.high %v2553_v9, %v2553_v9 }
  0x5f   :  { %1079 = vmatpush1.bf16.msra.mxu0 %v1904_v33  ;;  %1158 = vmatprep.subr.bf16.mxu1 %v2041_v62  ;;  %v1996_v33 = vld [vmem:[%s2824_s2 + $0x364] ss:$8 sps:$4 sm:$0xff]   ;;  %v2075_v62 = vld [vmem:[%s2826_s4 + $0x80] ss:$8 sps:$4 sm:$0xff]  }
  0x60   :  { %1080 = vmatprep.subr.bf16.mxu0 %v1912_v34  ;;  %v2066_v34 = vld [vmem:[%s2826_s4 + $0x50] ss:$8 sps:$4 sm:$0xff]  }
  0x62   :  { %1159 = vmatpush1.bf16.msra.mxu1 %v2039_v1  ;;  %v2083_v1 = vld [vmem:[%s2826_s4 + $0xa4] ss:$8 sps:$4 sm:$0xff]  }
  0x63   :  { %1081 = vmatpush1.bf16.msra.mxu0 %v1910_v37  ;;  %1160 = vmatprep.subr.bf16.mxu1 %v2047_v2  ;;  %v2000_v37 = vld [vmem:[%s2824_s2 + $0x370] ss:$8 sps:$4 sm:$0xff]   ;;  %v2081_v2 = vld [vmem:[%s2826_s4 + $0xa0] ss:$8 sps:$4 sm:$0xff]  }
  0x64   :  { %1082 = vmatprep.subr.bf16.mxu0 %v1918_v38  ;;  %v2008_v38 = vld [vmem:[%s2824_s2 + $0x384] ss:$8 sps:$4 sm:$0xff]  }
  0x66   :  { %1161 = vmatpush1.bf16.msra.mxu1 %v2045_v6  ;;  %v2089_v6 = vld [vmem:[%s2826_s4 + $0xc4] ss:$8 sps:$4 sm:$0xff]  }
  0x67   :  { %1083 = vmatpush1.bf16.msra.mxu0 %v1916_v41  ;;  %1395 = vmatprep.subr.bf16.mxu1 %v2053_v8  ;;  %v2012_v41 = vld [vmem:[%s2824_s2 + $0x390] ss:$8 sps:$4 sm:$0xff]   ;;  %v2092_v8 = vld [vmem:[%s2826_s4 + $0xd4] ss:$8 sps:$4 sm:$0xff]  }
  0x68   :  { %1084 = vmatprep.subr.bf16.mxu0 %v1924_v42  ;;  %v2020_v42 = vld [vmem:[%s2824_s2 + $0x3a4] ss:$8 sps:$4 sm:$0xff]  }
  0x69   :  { %1179 = vmatmul.mubr.bf16.vlgmr.msra.gmra.mrb[4].mxu1 %v252_v14  ;;  %v2096_v14 = vld [vmem:[%s2826_s4 + $0xf0] ss:$8 sps:$4 sm:$0xff]  }
  0x6a   :  { %1396 = vmatpush1.bf16.msra.mxu1 %v2051_v56  ;;  %v2101_v56 = vld [vmem:[%s2827_s6 + $0x4] ss:$8 sps:$4 sm:$0xff]  }
  0x6b   :  { %1085 = vmatpush1.bf16.msra.mxu0 %v1922_v46  ;;  %1397 = vmatprep.subr.bf16.mxu1 %v2056_v15  ;;  %v2024_v46 = vld [vmem:[%s2824_s2 + $0x3b0] ss:$8 sps:$4 sm:$0xff]  }
  0x6c   :  { %1086 = vmatprep.subr.bf16.mxu0 %v1930_v47  ;;  %v2032_v47 = vld [vmem:[%s2824_s2 + $0x3c4] ss:$8 sps:$4 sm:$0xff]  }
  0x6e   :  { %1398 = vmatpush1.bf16.msra.mxu1 %v2054_v18 }
  0x6f   :  { %1087 = vmatpush1.bf16.msra.mxu0 %v1928_v49  ;;  %1399 = vmatprep.subr.bf16.mxu1 %v2059_v19  ;;  %v2038_v49 = vld [vmem:[%s2824_s2 + $0x3d4] ss:$8 sps:$4 sm:$0xff]  }
  0x70   :  { %1088 = vmatprep.subr.bf16.mxu0 %v1936_v51  ;;  %v2044_v51 = vld [vmem:[%s2824_s2 + $0x3e4] ss:$8 sps:$4 sm:$0xff]  }
  0x72   :  { %1400 = vmatpush1.bf16.msra.mxu1 %v2057_v22 }
  0x73   :  { %1089 = vmatpush1.bf16.msra.mxu0 %v1934_v54  ;;  %1401 = vmatprep.subr.bf16.mxu1 %v2062_v23  ;;  %v2069_v54 = vld [vmem:[%s2826_s4 + $0x60] ss:$8 sps:$4 sm:$0xff]   ;;  %v2751_v23 = vsub.s32 0, %v2197_v12 }
  0x74   :  { %1090 = vmatprep.subr.bf16.mxu0 %v1942_v55  ;;  %v2071_v55 = vld [vmem:[%s2826_s4 + $0x64] ss:$8 sps:$4 sm:$0xff]  }
  0x76   :  { %1402 = vmatpush1.bf16.msra.mxu1 %v2060_v26 }
  0x77   :  { %1091 = vmatpush1.bf16.msra.mxu0 %v1940_v59  ;;  %1403 = vmatprep.subr.bf16.mxu1 %v2065_v27  ;;  %v2072_v59 = vld [vmem:[%s2826_s4 + $0x70] ss:$8 sps:$4 sm:$0xff]  }
  0x78   :  { %1092 = vmatprep.subr.bf16.mxu0 %v1948_v60  ;;  %v2077_v60 = vld [vmem:[%s2826_s4 + $0x84] ss:$8 sps:$4 sm:$0xff]  }
  0x7a   :  { %1404 = vmatpush1.bf16.msra.mxu1 %v2063_v30 }
  0x7b   :  { %1093 = vmatpush1.bf16.msra.mxu0 %v1946_v63  ;;  %1405 = vmatprep.subr.bf16.mxu1 %v2068_v31  ;;  %v2080_v63 = vld [vmem:[%s2826_s4 + $0x94] ss:$8 sps:$4 sm:$0xff]  }
  0x7c   :  { %1094 = vmatprep.subr.bf16.mxu0 %v1954_v0  ;;  %v2078_v0 = vld [vmem:[%s2826_s4 + $0x90] ss:$8 sps:$4 sm:$0xff]  }
  0x7e   :  { %1406 = vmatpush1.bf16.msra.mxu1 %v2066_v34 }
  0x7f   :  { %1095 = vmatpush1.bf16.msra.mxu0 %v1952_v3  ;;  %1407 = vmatprep.subr.bf16.mxu1 %v2071_v55  ;;  %v2086_v3 = vld [vmem:[%s2826_s4 + $0xb4] ss:$8 sps:$4 sm:$0xff]   ;;  %v2120_v55 = vld [vmem:[%s2827_s6 + $0x70] ss:$8 sps:$4 sm:$0xff]  }
  0x80   :  { %1105 = vmatprep.subr.bf16.mxu0 %v1960_v5  ;;  %v2084_v5 = vld [vmem:[%s2826_s4 + $0xb0] ss:$8 sps:$4 sm:$0xff]  }
  0x82   :  { %1097 = vmatmul.mubr.bf16.vlgmr.msra.gmra.mrb[0].mxu0 %v2553_v9  ;;  %1408 = vmatpush1.bf16.msra.mxu1 %v2069_v54  ;;  %v2090_v9 = vld [vmem:[%s2826_s4 + $0xd0] ss:$8 sps:$4 sm:$0xff]   ;;  %v2122_v54 = vld [vmem:[%s2827_s6 + $0x74] ss:$8 sps:$4 sm:$0xff]  }
  0x83   :  { %1106 = vmatpush1.bf16.msra.mxu0 %v1958_v10  ;;  %1137 = vmatprep.mubr.bf16.mxu0 %v238_v11  ;;  %v2095_v10 = vld [vmem:[%s2826_s4 + $0xe4] ss:$8 sps:$4 sm:$0xff]   ;;  %v2093_v11 = vld [vmem:[%s2826_s4 + $0xe0] ss:$8 sps:$4 sm:$0xff]  }
  0x84   :  { %1107 = vmatprep.subr.bf16.mxu0 %v1966_v13  ;;  %1409 = vmatprep.subr.bf16.mxu1 %v2074_v57  ;;  %v2098_v13 = vld [vmem:[%s2826_s4 + $0xf4] ss:$8 sps:$4 sm:$0xff]   ;;  %v1436_v57 = vld [vmem:[%s2829_s1] sm:$0x1] }
  0x86   :  { %1410 = vmatpush1.bf16.msra.mxu1 %v2072_v59  ;;  %v1453_v59 = vld [vmem:[%s2831_s7] sm:$0x3] }
  0x87   :  { %1108 = vmatpush1.bf16.msra.mxu0 %v1964_v4  ;;  %1411 = vmatprep.subr.bf16.mxu1 %v2077_v60 }
  0x88   :  { %1109 = vmatprep.subr.bf16.mxu0 %v1972_v17 }
  0x8a   :  { %1412 = vmatpush1.bf16.msra.mxu1 %v2075_v62 }
  0x8b   :  { %1110 = vmatpush1.bf16.msra.mxu0 %v1970_v20  ;;  %1413 = vmatprep.subr.bf16.mxu1 %v2080_v63 }
  0x8c   :  { %1111 = vmatprep.subr.bf16.mxu0 %v1978_v21 }
  0x8e   :  { %1414 = vmatpush1.bf16.msra.mxu1 %v2078_v0 }
  0x8f   :  { %1112 = vmatpush1.bf16.msra.mxu0 %v1976_v24  ;;  %1415 = vmatprep.subr.bf16.mxu1 %v2083_v1  ;;  %v176_v24 = vld [vmem:[%s2828_s3] sm:$0x3] }
  0x90   :  { %1113 = vmatprep.subr.bf16.mxu0 %v1984_v25  ;;  %v2757_v25 = vsub.s32 1, %v2197_v12  ;;  %v181_v26 = vrot.slane %v176_v24, %v2751_v23  ;;  %v2099_v12 = vld [vmem:[%s2827_s6] ss:$8 sps:$4 sm:$0xff]  }
  0x92   :  { %1416 = vmatpush1.bf16.msra.mxu1 %v2081_v2  ;;  %v185_v27 = vrot.slane %v176_v24, %v2757_v25  ;;  %v1462_v63 = vrot.slane %v1453_v59, %v2757_v25 }
  0x93   :  { %1114 = vmatpush1.bf16.msra.mxu0 %v1982_v28  ;;  %1417 = vmatprep.subr.bf16.mxu1 %v2086_v3 }
  0x94   :  { %1115 = vmatprep.subr.bf16.mxu0 %v1990_v29 }
  0x96   :  { %1418 = vmatpush1.bf16.msra.mxu1 %v2084_v5 }
  0x97   :  { %1116 = vmatpush1.bf16.msra.mxu0 %v1988_v32  ;;  %1419 = vmatprep.subr.bf16.mxu1 %v2089_v6 }
  0x98   :  { %1117 = vmatprep.subr.bf16.mxu0 %v1996_v33 }
  0x9a   :  { %1420 = vmatpush1.bf16.msra.mxu1 %v2087_v7 }
  0x9b   :  { %1118 = vmatpush1.bf16.msra.mxu0 %v1994_v35  ;;  %1421 = vmatprep.subr.bf16.mxu1 %v2092_v8 }
  0x9c   :  { %1119 = vmatprep.subr.bf16.mxu0 %v2002_v36 }
  0x9e   :  { %1422 = vmatpush1.bf16.msra.mxu1 %v2090_v9 }
  0x9f   :  { %1120 = vmatpush1.bf16.msra.mxu0 %v2000_v37  ;;  %1423 = vmatprep.subr.bf16.mxu1 %v2095_v10 }
  0xa0   :  { %1121 = vmatprep.subr.bf16.mxu0 %v2008_v38 }
  0xa2   :  { %1424 = vmatpush1.bf16.msra.mxu1 %v2093_v11 }
  0xa3   :  { %1122 = vmatpush1.bf16.msra.mxu0 %v2006_v39  ;;  %1425 = vmatprep.subr.bf16.mxu1 %v2098_v13 }
  0xa4   :  { %1123 = vmatprep.subr.bf16.mxu0 %v2014_v40 }
  0xa6   :  { %1426 = vmatpush1.bf16.msra.mxu1 %v2096_v14 }
  0xa7   :  { %1124 = vmatpush1.bf16.msra.mxu0 %v2012_v41  ;;  %1545 = vmatprep.subr.bf16.mxu1 %v2101_v56 }
  0xa8   :  { %1125 = vmatprep.subr.bf16.mxu0 %v2020_v42  ;;  %v2104_v42 = vld [vmem:[%s2827_s6 + $0x14] ss:$8 sps:$4 sm:$0xff]  }
  0xab   :  { %1126 = vmatpush1.bf16.msra.mxu0 %v2018_v43  ;;  %v2102_v43 = vld [vmem:[%s2827_s6 + $0x10] ss:$8 sps:$4 sm:$0xff]  }
  0xac   :  { %1127 = vmatprep.subr.bf16.mxu0 %v2026_v44  ;;  %v2107_v44 = vld [vmem:[%s2827_s6 + $0x24] ss:$8 sps:$4 sm:$0xff]  }
  0xaf   :  { %1128 = vmatpush1.bf16.msra.mxu0 %v2024_v46  ;;  %v2105_v46 = vld [vmem:[%s2827_s6 + $0x20] ss:$8 sps:$4 sm:$0xff]  }
  0xb0   :  { %1129 = vmatprep.subr.bf16.mxu0 %v2032_v47  ;;  %v2110_v47 = vld [vmem:[%s2827_s6 + $0x34] ss:$8 sps:$4 sm:$0xff]  }
  0xb3   :  { %1130 = vmatpush1.bf16.msra.mxu0 %v2030_v48  ;;  %v2113_v48 = vld [vmem:[%s2827_s6 + $0x44] ss:$8 sps:$4 sm:$0xff]  }
  0xb4   :  { %1131 = vmatprep.subr.bf16.mxu0 %v2038_v49  ;;  %v2111_v49 = vld [vmem:[%s2827_s6 + $0x40] ss:$8 sps:$4 sm:$0xff]  }
  0xb7   :  { %1132 = vmatpush1.bf16.msra.mxu0 %v2036_v50  ;;  %v2116_v50 = vld [vmem:[%s2827_s6 + $0x54] ss:$8 sps:$4 sm:$0xff]  }
  0xb8   :  { %1133 = vmatprep.subr.bf16.mxu0 %v2044_v51  ;;  %v2114_v51 = vld [vmem:[%s2827_s6 + $0x50] ss:$8 sps:$4 sm:$0xff]  }
  0xbb   :  { %1134 = vmatpush1.bf16.msra.mxu0 %v2042_v52  ;;  %v2119_v52 = vld [vmem:[%s2827_s6 + $0x64] ss:$8 sps:$4 sm:$0xff]  }
  0xbc   :  { %1135 = vmatprep.subr.bf16.mxu0 %v2050_v53  ;;  %v2117_v53 = vld [vmem:[%s2827_s6 + $0x60] ss:$8 sps:$4 sm:$0xff]  }
  0xbf   :  { %1136 = vmatpush1.bf16.msra.mxu0 %v2048_v58  ;;  %v1223_v58 = vld [vmem:[%s2830_s5] sm:$0x3] }
  0xc0   :  { %v1228_v60 = vrot.slane %v1223_v58, %v2751_v23  ;;  %v1232_v62 = vrot.slane %v1223_v58, %v2757_v25 }
  0xc2   :  { %1138 = vmatmul.mubr.bf16.vlgmr.msra.gmra.mrb[0].mxu0 %v236_v61  ;;  %v1458_v61 = vrot.slane %v1453_v59, %v2751_v23  ;;  %v1818_v1 = vadd.f32 %v1462_v63, %v1232_v62 }
  0xc4   :  { %v1816_v0 = vadd.f32 %v1458_v61, %v1228_v60 }
 0x11c   :  { %v1016_v15 = vpop.f32.mrb[0].mxu1 }
 0x11d   :  { %v1018_v4 = vpop.f32.mrb[1].mxu1  ;;  %v1017_v28 = vadd.f32 %v1016_v15, %v181_v26 }
 0x11e   :  { %v1020_v17 = vpop.f32.mrb[2].mxu1  ;;  %v1019_v29 = vadd.f32 %v1018_v4, %v185_v27 }
 0x11f   :  { %v1021_v18 = vpop.f32.mrb[3].mxu1 }
 0x13c   :  { %v1180_v19 = vpop.f32.mrb[4].mxu1 }
 0x13d   :  { %v1182_v20 = vpop.f32.mrb[5].mxu1 }
 0x13e   :  { %v1184_v21 = vpop.f32.mrb[6].mxu1 }
 0x13f   :  { %v1185_v22 = vpop.f32.mrb[7].mxu1 }
 0x195   :  { %v1139_v30 = vpop.f32.mrb[0].mxu0 }
 0x196   :  { %v1811_v31 = vadd.f32 %v1139_v30, %v1017_v28  ;;  %v1141_v32 = vpop.f32.mrb[1].mxu0 }
 0x197   :  { %v1814_v33 = vadd.f32 %v1141_v32, %v1019_v29  ;;  %v1143_v34 = vpop.f32.mrb[2].mxu0 }
 0x198   :  { %v1812_v35 = vadd.f32 %v1811_v31, %v1180_v19  ;;  %v1144_v36 = vpop.f32.mrb[3].mxu0 }
 0x199   :  { %v1815_v37 = vadd.f32 %v1814_v33, %v1182_v20 }
 0x19a   :  { %v1187_v38 = vmax.f32 %v1812_v35, 0.0 }
 0x19b   :  { %v1188_v39 = vmax.f32 %v1815_v37, 0.0 }
 0x19c   :  { %v1189_v41 = vpack.c.bf16 %v1187_v38, %v1187_v38 }
 0x19d   :  { %v1190_v40 = vpack.c.bf16 %v1188_v39, %v1188_v39 }
 0x19f   :  { %1427 = vmatprep.mubr.bf16.mxu1 %v1190_v40 }
 0x1a0   :  { %1428 = vmatmul.mubr.bf16.vlgmr.msra.gmra.mrb[8].mxu1 %v1189_v41 }
 0x1a1   :  { %1546 = vmatpush1.bf16.msra.mxu1 %v2099_v12  ;;  %1577 = vmatprep.mubr.bf16.mxu1 %v2124_v45  ;;  %v2108_v45 = vld [vmem:[%s2827_s6 + $0x30] ss:$8 sps:$4 sm:$0xff]  }
 0x1a2   :  { %1547 = vmatprep.subr.bf16.mxu1 %v2104_v42 }
 0x1a5   :  { %1548 = vmatpush1.bf16.msra.mxu1 %v2102_v43 }
 0x1a6   :  { %1549 = vmatprep.subr.bf16.mxu1 %v2107_v44 }
 0x1a9   :  { %1550 = vmatpush1.bf16.msra.mxu1 %v2105_v46 }
 0x1aa   :  { %1551 = vmatprep.subr.bf16.mxu1 %v2110_v47 }
 0x1ad   :  { %1552 = vmatpush1.bf16.msra.mxu1 %v2108_v45 }
 0x1ae   :  { %1553 = vmatprep.subr.bf16.mxu1 %v2113_v48 }
 0x1b1   :  { %1554 = vmatpush1.bf16.msra.mxu1 %v2111_v49 }
 0x1b2   :  { %1555 = vmatprep.subr.bf16.mxu1 %v2116_v50 }
 0x1b5   :  { %1556 = vmatpush1.bf16.msra.mxu1 %v2114_v51 }
 0x1b6   :  { %1557 = vmatprep.subr.bf16.mxu1 %v2119_v52 }
 0x1b9   :  { %1558 = vmatpush1.bf16.msra.mxu1 %v2117_v53 }
 0x1ba   :  { %1559 = vmatprep.subr.bf16.mxu1 %v2122_v54 }
 0x1bd   :  { %1560 = vmatpush1.bf16.msra.mxu1 %v2120_v55 }
 0x1c0   :  { %1578 = vmatmul.mubr.bf16.vlgmr.msra.gmra.mrb[8].mxu1 %v1436_v57 }
 0x293   :  { %v1579_v2 = vpop.f32.mrb[8].mxu1 }
 0x294   :  { %v1817_v3 = vadd.f32 %v1816_v0, %v1579_v2  ;;  %v1581_v5 = vpop.f32.mrb[9].mxu1 }
 0x295   :  { %v1819_v6 = vadd.f32 %v1818_v1, %v1581_v5  ;;  %v1583_v7 = vpop.f32.mrb[10].mxu1 }
 0x296   :  { %v1588_v8 = vmax.f32 %v1817_v3, 0.0  ;;  %v1584_v9 = vpop.f32.mrb[11].mxu1 }
 0x297   :  { %v1589_v10 = vmax.f32 %v1819_v6, 0.0 }
 0x299   :  { %v1808_v11 = vpack.c.bf16 %v1589_v10, %v1588_v8 }
 0x29b   :  { %v1601_v13 = vrot.slane %v1808_v11, %v2206_v16 }
 0x29d   :  { %1809 = vst.sshfl [vmem:[%s2832_s8] sm:$0x5 pattern:$0x73625140] %v1601_v13 }

// kernel: resnet_forward.25
= control target key start
LH: loop header
LB: loop body
LE: loop exit
PB: predicated region body
PF: predicated region fallthrough
CT: control target
= control target key end

     0   :  { %v96_v9 = vlaneseq  ;;  %v2735_v10 = vmov 1966171168   ;;  %s3621_s2 = inlined_call_operand.vmem [shape: bf16[256,512], index: 2, kind: input, shape index: {}]   ;;  %s3622_s0 = inlined_call_operand.vmem [shape: bf16[2,256], index: 0, kind: input, shape index: {}, may-alias: {0,1}]   ;;  %s3623_s4 = inlined_call_operand.vmem [shape: bf16[512,512], index: 4, kind: input, shape index: {}]   ;;  %s3624_s6 = inlined_call_operand.vmem [shape: bf16[256,512], index: 6, kind: input, shape index: {}]   ;;  %s3625_s3 = inlined_call_operand.vmem [shape: f32[1,512], index: 3, kind: input, shape index: {}]   ;;  %s3626_s1 = inlined_call_operand.vmem [shape: bf16[2,256], index: 1, kind: input, shape index: {}, may-alias: {0,1}]   ;;  %s3627_s5 = inlined_call_operand.vmem [shape: f32[1,512], index: 5, kind: input, shape index: {}]   ;;  %s3628_s7 = inlined_call_operand.vmem [shape: f32[1,512], index: 7, kind: input, shape index: {}]   ;;  %s3629_s8 = inlined_call_operand.vmem [shape: bf16[2,512], index: 8, kind: output, shape index: {}]  }
   0x1   :  { %v2351_v0 = vld [vmem:[%s3621_s2 + $0x4] ss:$16 sps:$4 sm:$0xff]   ;;  %v2353_v1 = vld [vmem:[%s3621_s2] ss:$16 sps:$4 sm:$0xff]   ;;  %v126_v11 = vunpack.c.l.s4 %v2735_v10  ;;  %v2399_v19 = vld [vmem:[%s3621_s2 + $0xc] ss:$16 sps:$4 sm:$0xff]  }
   0x2   :  { %461 = vmatprep.subr.bf16.mxu0 %v2351_v0  ;;  %v2354_v2 = vld [vmem:[%s3621_s2 + $0x24] ss:$16 sps:$4 sm:$0xff]   ;;  %v2356_v3 = vld [vmem:[%s3621_s2 + $0x20] ss:$16 sps:$4 sm:$0xff]   ;;  %v2814_v14 = vshrl.u32 %v96_v9, 7  ;;  %502 = vmatprep.subr.bf16.mxu1 %v2399_v19 }
   0x3   :  { %462 = vmatpush1.bf16.msra.mxu0 %v2353_v1  ;;  %v2357_v4 = vld [vmem:[%s3621_s2 + $0x44] ss:$16 sps:$4 sm:$0xff]   ;;  %v2359_v5 = vld [vmem:[%s3621_s2 + $0x40] ss:$16 sps:$4 sm:$0xff]   ;;  %v127_v15 = vunpack.c.0.s8 %v126_v11  ;;  %v2401_v20 = vld [vmem:[%s3621_s2 + $0x8] ss:$16 sps:$4 sm:$0xff]  }
   0x4   :  { %463 = vmatprep.subr.bf16.mxu0 %v2354_v2  ;;  %v2360_v6 = vld [vmem:[%s3621_s2 + $0x64] ss:$16 sps:$4 sm:$0xff]   ;;  %v2362_v7 = vld [vmem:[%s3621_s2 + $0x60] ss:$16 sps:$4 sm:$0xff]   ;;  %v2402_v25 = vld [vmem:[%s3621_s2 + $0x2c] ss:$16 sps:$4 sm:$0xff]   ;;  %503 = vmatpush1.bf16.msra.mxu1 %v2401_v20 }
   0x5   :  { %v2363_v8 = vld [vmem:[%s3621_s2 + $0x84] ss:$16 sps:$4 sm:$0xff]   ;;  %v2365_v12 = vld [vmem:[%s3621_s2 + $0x80] ss:$16 sps:$4 sm:$0xff]   ;;  %v2832_v21 = vsub.s32 %v127_v15, %v2814_v14  ;;  %v2404_v26 = vld [vmem:[%s3621_s2 + $0x28] ss:$16 sps:$4 sm:$0xff]   ;;  %504 = vmatprep.subr.bf16.mxu1 %v2402_v25 }
   0x6   :  { %v2366_v13 = vld [vmem:[%s3621_s2 + $0xa4] ss:$16 sps:$4 sm:$0xff]   ;;  %v2368_v16 = vld [vmem:[%s3621_s2 + $0xa0] ss:$16 sps:$4 sm:$0xff]   ;;  %v2405_v28 = vld [vmem:[%s3621_s2 + $0x4c] ss:$16 sps:$4 sm:$0xff]  }
   0x7   :  { %464 = vmatpush1.bf16.msra.mxu0 %v2356_v3  ;;  %v2369_v17 = vld [vmem:[%s3621_s2 + $0xc4] ss:$16 sps:$4 sm:$0xff]   ;;  %v2371_v18 = vld [vmem:[%s3621_s2 + $0xc0] ss:$16 sps:$4 sm:$0xff]   ;;  %v2407_v31 = vld [vmem:[%s3621_s2 + $0x48] ss:$16 sps:$4 sm:$0xff]  }
   0x8   :  { %465 = vmatprep.subr.bf16.mxu0 %v2357_v4  ;;  %v2837_v22 = vld.sshfl [vmem:[%s3622_s0] sm:$0x11 pattern:$0x75316420]  ;;  %v2372_v23 = vld [vmem:[%s3621_s2 + $0xe4] ss:$16 sps:$4 sm:$0xff]   ;;  %505 = vmatpush1.bf16.msra.mxu1 %v2404_v26 }
   0x9   :  { %v124_v24 = vcombine.high %v2837_v22, %v2837_v22  ;;  %v2374_v29 = vld [vmem:[%s3621_s2 + $0xe0] ss:$16 sps:$4 sm:$0xff]   ;;  %v2375_v30 = vld [vmem:[%s3621_s2 + $0x104] ss:$16 sps:$4 sm:$0xff]   ;;  %506 = vmatprep.subr.bf16.mxu1 %v2405_v28  ;;  %v2408_v32 = vld [vmem:[%s3621_s2 + $0x6c] ss:$16 sps:$4 sm:$0xff]   ;;  %v131_v0 = vrot.slane %v2837_v22, %v2832_v21 }
   0xa   :  { %v2377_v33 = vld [vmem:[%s3621_s2 + $0x100] ss:$16 sps:$4 sm:$0xff]   ;;  %v2378_v34 = vld [vmem:[%s3621_s2 + $0x124] ss:$16 sps:$4 sm:$0xff]   ;;  %v2410_v35 = vld [vmem:[%s3621_s2 + $0x68] ss:$16 sps:$4 sm:$0xff]  }
   0xb   :  { %466 = vmatpush1.bf16.msra.mxu0 %v2359_v5  ;;  %v138_v27 = vrot.slane %v124_v24, %v2832_v21  ;;  %v2411_v36 = vld [vmem:[%s3621_s2 + $0x8c] ss:$16 sps:$4 sm:$0xff]   ;;  %v2380_v37 = vld [vmem:[%s3621_s2 + $0x120] ss:$16 sps:$4 sm:$0xff]   ;;  %v2381_v38 = vld [vmem:[%s3621_s2 + $0x144] ss:$16 sps:$4 sm:$0xff]  }
   0xc   :  { %467 = vmatprep.subr.bf16.mxu0 %v2360_v6  ;;  %507 = vmatpush1.bf16.msra.mxu1 %v2407_v31  ;;  %v2413_v39 = vld [vmem:[%s3621_s2 + $0x88] ss:$16 sps:$4 sm:$0xff]   ;;  %v2414_v40 = vld [vmem:[%s3621_s2 + $0xac] ss:$16 sps:$4 sm:$0xff]   ;;  %v2383_v41 = vld [vmem:[%s3621_s2 + $0x140] ss:$16 sps:$4 sm:$0xff]  }
   0xd   :  { %493 = vmatprep.mubr.bf16.mxu0 %v138_v27  ;;  %534 = vmatprep.mubr.bf16.mxu1 %v138_v27  ;;  %v2384_v42 = vld [vmem:[%s3621_s2 + $0x164] ss:$16 sps:$4 sm:$0xff]   ;;  %v2416_v43 = vld [vmem:[%s3621_s2 + $0xa8] ss:$16 sps:$4 sm:$0xff]   ;;  %v2417_v44 = vld [vmem:[%s3621_s2 + $0xcc] ss:$16 sps:$4 sm:$0xff]  }
   0xe   :  { %508 = vmatprep.subr.bf16.mxu1 %v2408_v32  ;;  %v2386_v45 = vld [vmem:[%s3621_s2 + $0x160] ss:$16 sps:$4 sm:$0xff]   ;;  %v2387_v46 = vld [vmem:[%s3621_s2 + $0x184] ss:$16 sps:$4 sm:$0xff]   ;;  %v2419_v47 = vld [vmem:[%s3621_s2 + $0xc8] ss:$16 sps:$4 sm:$0xff]  }
   0xf   :  { %468 = vmatpush1.bf16.msra.mxu0 %v2362_v7  ;;  %v2420_v48 = vld [vmem:[%s3621_s2 + $0xec] ss:$16 sps:$4 sm:$0xff]   ;;  %v2389_v49 = vld [vmem:[%s3621_s2 + $0x180] ss:$16 sps:$4 sm:$0xff]   ;;  %v2390_v50 = vld [vmem:[%s3621_s2 + $0x1a4] ss:$16 sps:$4 sm:$0xff]  }
  0x10   :  { %469 = vmatprep.subr.bf16.mxu0 %v2363_v8  ;;  %509 = vmatpush1.bf16.msra.mxu1 %v2410_v35  ;;  %v2422_v51 = vld [vmem:[%s3621_s2 + $0xe8] ss:$16 sps:$4 sm:$0xff]   ;;  %v2423_v52 = vld [vmem:[%s3621_s2 + $0x10c] ss:$16 sps:$4 sm:$0xff]   ;;  %v2392_v53 = vld [vmem:[%s3621_s2 + $0x1a0] ss:$16 sps:$4 sm:$0xff]  }
  0x11   :  { %510 = vmatprep.subr.bf16.mxu1 %v2411_v36  ;;  %v2393_v54 = vld [vmem:[%s3621_s2 + $0x1c4] ss:$16 sps:$4 sm:$0xff]   ;;  %v2425_v55 = vld [vmem:[%s3621_s2 + $0x108] ss:$16 sps:$4 sm:$0xff]   ;;  %v2426_v56 = vld [vmem:[%s3621_s2 + $0x12c] ss:$16 sps:$4 sm:$0xff]  }
  0x12   :  { %v2395_v57 = vld [vmem:[%s3621_s2 + $0x1c0] ss:$16 sps:$4 sm:$0xff]   ;;  %v2396_v58 = vld [vmem:[%s3621_s2 + $0x1e4] ss:$16 sps:$4 sm:$0xff]   ;;  %v2428_v59 = vld [vmem:[%s3621_s2 + $0x128] ss:$16 sps:$4 sm:$0xff]  }
  0x13   :  { %470 = vmatpush1.bf16.msra.mxu0 %v2365_v12  ;;  %v2429_v60 = vld [vmem:[%s3621_s2 + $0x14c] ss:$16 sps:$4 sm:$0xff]   ;;  %v2398_v61 = vld [vmem:[%s3621_s2 + $0x1e0] ss:$16 sps:$4 sm:$0xff]   ;;  %v2449_v62 = vld [vmem:[%s3623_s4 + $0x4] ss:$16 sps:$4 sm:$0xff]  }
  0x14   :  { %471 = vmatprep.subr.bf16.mxu0 %v2366_v13  ;;  %511 = vmatpush1.bf16.msra.mxu1 %v2413_v39  ;;  %v2431_v63 = vld [vmem:[%s3621_s2 + $0x148] ss:$16 sps:$4 sm:$0xff]   ;;  %v2432_v1 = vld [vmem:[%s3621_s2 + $0x16c] ss:$16 sps:$4 sm:$0xff]   ;;  %v2447_v2 = vld [vmem:[%s3623_s4] ss:$16 sps:$4 sm:$0xff]  }
  0x15   :  { %512 = vmatprep.subr.bf16.mxu1 %v2414_v40  ;;  %v2455_v3 = vld [vmem:[%s3623_s4 + $0x24] ss:$16 sps:$4 sm:$0xff]   ;;  %v2434_v4 = vld [vmem:[%s3621_s2 + $0x168] ss:$16 sps:$4 sm:$0xff]   ;;  %v2435_v5 = vld [vmem:[%s3621_s2 + $0x18c] ss:$16 sps:$4 sm:$0xff]  }
  0x16   :  { %v2453_v6 = vld [vmem:[%s3623_s4 + $0x20] ss:$16 sps:$4 sm:$0xff]   ;;  %v2461_v7 = vld [vmem:[%s3623_s4 + $0x44] ss:$16 sps:$4 sm:$0xff]   ;;  %v2437_v8 = vld [vmem:[%s3621_s2 + $0x188] ss:$16 sps:$4 sm:$0xff]  }
  0x17   :  { %472 = vmatpush1.bf16.msra.mxu0 %v2368_v16  ;;  %v2438_v9 = vld [vmem:[%s3621_s2 + $0x1ac] ss:$16 sps:$4 sm:$0xff]   ;;  %v2459_v10 = vld [vmem:[%s3623_s4 + $0x40] ss:$16 sps:$4 sm:$0xff]   ;;  %v2467_v11 = vld [vmem:[%s3623_s4 + $0x64] ss:$16 sps:$4 sm:$0xff]  }
  0x18   :  { %473 = vmatprep.subr.bf16.mxu0 %v2369_v17  ;;  %513 = vmatpush1.bf16.msra.mxu1 %v2416_v43  ;;  %v2440_v12 = vld [vmem:[%s3621_s2 + $0x1a8] ss:$16 sps:$4 sm:$0xff]   ;;  %v2441_v13 = vld [vmem:[%s3621_s2 + $0x1cc] ss:$16 sps:$4 sm:$0xff]   ;;  %v2465_v15 = vld [vmem:[%s3623_s4 + $0x60] ss:$16 sps:$4 sm:$0xff]  }
  0x19   :  { %514 = vmatprep.subr.bf16.mxu1 %v2417_v44  ;;  %v2473_v16 = vld [vmem:[%s3623_s4 + $0x84] ss:$16 sps:$4 sm:$0xff]   ;;  %v2443_v17 = vld [vmem:[%s3621_s2 + $0x1c8] ss:$16 sps:$4 sm:$0xff]   ;;  %v2471_v20 = vld [vmem:[%s3623_s4 + $0x80] ss:$16 sps:$4 sm:$0xff]  }
  0x1a   :  { %v2446_v19 = vld [vmem:[%s3621_s2 + $0x1e8] ss:$16 sps:$4 sm:$0xff]   ;;  %v2452_v22 = vld [vmem:[%s3623_s4 + $0xc] ss:$16 sps:$4 sm:$0xff]   ;;  %v2477_v24 = vld [vmem:[%s3623_s4 + $0xa0] ss:$16 sps:$4 sm:$0xff]  }
  0x1b   :  { %474 = vmatpush1.bf16.msra.mxu0 %v2371_v18  ;;  %v2444_v18 = vld [vmem:[%s3621_s2 + $0x1ec] ss:$16 sps:$4 sm:$0xff]   ;;  %v2485_v25 = vld [vmem:[%s3623_s4 + $0xc4] ss:$16 sps:$4 sm:$0xff]   ;;  %v2450_v26 = vld [vmem:[%s3623_s4 + $0x8] ss:$16 sps:$4 sm:$0xff]  }
  0x1c   :  { %475 = vmatprep.subr.bf16.mxu0 %v2372_v23  ;;  %515 = vmatpush1.bf16.msra.mxu1 %v2419_v47  ;;  %v2479_v23 = vld [vmem:[%s3623_s4 + $0xa4] ss:$16 sps:$4 sm:$0xff]   ;;  %v2458_v27 = vld [vmem:[%s3623_s4 + $0x2c] ss:$16 sps:$4 sm:$0xff]   ;;  %v2483_v28 = vld [vmem:[%s3623_s4 + $0xc0] ss:$16 sps:$4 sm:$0xff]  }
  0x1d   :  { %516 = vmatprep.subr.bf16.mxu1 %v2420_v48  ;;  %v2464_v31 = vld [vmem:[%s3623_s4 + $0x4c] ss:$16 sps:$4 sm:$0xff]   ;;  %v2489_v32 = vld [vmem:[%s3623_s4 + $0xe0] ss:$16 sps:$4 sm:$0xff]  }
  0x1e   :  { %v2470_v35 = vld [vmem:[%s3623_s4 + $0x6c] ss:$16 sps:$4 sm:$0xff]   ;;  %v2495_v36 = vld [vmem:[%s3623_s4 + $0x100] ss:$16 sps:$4 sm:$0xff]  }
  0x1f   :  { %476 = vmatpush1.bf16.msra.mxu0 %v2374_v29  ;;  %v2491_v29 = vld [vmem:[%s3623_s4 + $0xe4] ss:$16 sps:$4 sm:$0xff]   ;;  %v2476_v39 = vld [vmem:[%s3623_s4 + $0x8c] ss:$16 sps:$4 sm:$0xff]   ;;  %v2501_v40 = vld [vmem:[%s3623_s4 + $0x120] ss:$16 sps:$4 sm:$0xff]  }
  0x20   :  { %477 = vmatprep.subr.bf16.mxu0 %v2375_v30  ;;  %517 = vmatpush1.bf16.msra.mxu1 %v2422_v51  ;;  %v2456_v30 = vld [vmem:[%s3623_s4 + $0x28] ss:$16 sps:$4 sm:$0xff]   ;;  %v2482_v43 = vld [vmem:[%s3623_s4 + $0xac] ss:$16 sps:$4 sm:$0xff]   ;;  %v2507_v44 = vld [vmem:[%s3623_s4 + $0x140] ss:$16 sps:$4 sm:$0xff]  }
  0x21   :  { %518 = vmatprep.subr.bf16.mxu1 %v2423_v52  ;;  %v2488_v47 = vld [vmem:[%s3623_s4 + $0xcc] ss:$16 sps:$4 sm:$0xff]   ;;  %v2513_v48 = vld [vmem:[%s3623_s4 + $0x160] ss:$16 sps:$4 sm:$0xff]  }
  0x22   :  { %v2494_v51 = vld [vmem:[%s3623_s4 + $0xec] ss:$16 sps:$4 sm:$0xff]   ;;  %v2519_v52 = vld [vmem:[%s3623_s4 + $0x180] ss:$16 sps:$4 sm:$0xff]  }
  0x23   :  { %478 = vmatpush1.bf16.msra.mxu0 %v2377_v33  ;;  %v2497_v33 = vld [vmem:[%s3623_s4 + $0x104] ss:$16 sps:$4 sm:$0xff]  }
  0x24   :  { %479 = vmatprep.subr.bf16.mxu0 %v2378_v34  ;;  %519 = vmatpush1.bf16.msra.mxu1 %v2425_v55  ;;  %v2462_v34 = vld [vmem:[%s3623_s4 + $0x48] ss:$16 sps:$4 sm:$0xff]   ;;  %v2500_v55 = vld [vmem:[%s3623_s4 + $0x10c] ss:$16 sps:$4 sm:$0xff]  }
  0x25   :  { %520 = vmatprep.subr.bf16.mxu1 %v2426_v56  ;;  %v2525_v56 = vld [vmem:[%s3623_s4 + $0x1a0] ss:$16 sps:$4 sm:$0xff]  }
  0x27   :  { %480 = vmatpush1.bf16.msra.mxu0 %v2380_v37  ;;  %v2503_v37 = vld [vmem:[%s3623_s4 + $0x124] ss:$16 sps:$4 sm:$0xff]  }
  0x28   :  { %481 = vmatprep.subr.bf16.mxu0 %v2381_v38  ;;  %521 = vmatpush1.bf16.msra.mxu1 %v2428_v59  ;;  %v2468_v38 = vld [vmem:[%s3623_s4 + $0x68] ss:$16 sps:$4 sm:$0xff]  }
  0x29   :  { %522 = vmatprep.subr.bf16.mxu1 %v2429_v60  ;;  %v2504_v59 = vld [vmem:[%s3623_s4 + $0x128] ss:$16 sps:$4 sm:$0xff]   ;;  %v2512_v60 = vld [vmem:[%s3623_s4 + $0x14c] ss:$16 sps:$4 sm:$0xff]  }
  0x2b   :  { %482 = vmatpush1.bf16.msra.mxu0 %v2383_v41  ;;  %v2509_v41 = vld [vmem:[%s3623_s4 + $0x144] ss:$16 sps:$4 sm:$0xff]  }
  0x2c   :  { %483 = vmatprep.subr.bf16.mxu0 %v2384_v42  ;;  %523 = vmatpush1.bf16.msra.mxu1 %v2431_v63  ;;  %v2474_v42 = vld [vmem:[%s3623_s4 + $0x88] ss:$16 sps:$4 sm:$0xff]  }
  0x2d   :  { %524 = vmatprep.subr.bf16.mxu1 %v2432_v1  ;;  %v2516_v63 = vld [vmem:[%s3623_s4 + $0x168] ss:$16 sps:$4 sm:$0xff]  }
  0x2e   :  { %v2522_v1 = vld [vmem:[%s3623_s4 + $0x188] ss:$16 sps:$4 sm:$0xff]  }
  0x2f   :  { %484 = vmatpush1.bf16.msra.mxu0 %v2386_v45  ;;  %v2515_v45 = vld [vmem:[%s3623_s4 + $0x164] ss:$16 sps:$4 sm:$0xff]  }
  0x30   :  { %485 = vmatprep.subr.bf16.mxu0 %v2387_v46  ;;  %525 = vmatpush1.bf16.msra.mxu1 %v2434_v4  ;;  %v2480_v46 = vld [vmem:[%s3623_s4 + $0xa8] ss:$16 sps:$4 sm:$0xff]   ;;  %v2533_v4 = vld [vmem:[%s3623_s4 + $0x1c4] ss:$16 sps:$4 sm:$0xff]  }
  0x31   :  { %526 = vmatprep.subr.bf16.mxu1 %v2435_v5  ;;  %v2536_v5 = vld [vmem:[%s3623_s4 + $0x1cc] ss:$16 sps:$4 sm:$0xff]  }
  0x33   :  { %486 = vmatpush1.bf16.msra.mxu0 %v2389_v49  ;;  %v2521_v49 = vld [vmem:[%s3623_s4 + $0x184] ss:$16 sps:$4 sm:$0xff]  }
  0x34   :  { %487 = vmatprep.subr.bf16.mxu0 %v2390_v50  ;;  %527 = vmatpush1.bf16.msra.mxu1 %v2437_v8  ;;  %v2486_v50 = vld [vmem:[%s3623_s4 + $0xc8] ss:$16 sps:$4 sm:$0xff]   ;;  %v2539_v8 = vld [vmem:[%s3623_s4 + $0x1e4] ss:$16 sps:$4 sm:$0xff]  }
  0x35   :  { %528 = vmatprep.subr.bf16.mxu1 %v2438_v9  ;;  %v2542_v9 = vld [vmem:[%s3623_s4 + $0x1ec] ss:$16 sps:$4 sm:$0xff]  }
  0x37   :  { %488 = vmatpush1.bf16.msra.mxu0 %v2392_v53  ;;  %v2527_v53 = vld [vmem:[%s3623_s4 + $0x1a4] ss:$16 sps:$4 sm:$0xff]  }
  0x38   :  { %489 = vmatprep.subr.bf16.mxu0 %v2393_v54  ;;  %529 = vmatpush1.bf16.msra.mxu1 %v2440_v12  ;;  %v2492_v54 = vld [vmem:[%s3623_s4 + $0xe8] ss:$16 sps:$4 sm:$0xff]   ;;  %v2545_v12 = vld [vmem:[%s3623_s4 + $0x204] ss:$16 sps:$4 sm:$0xff]  }
  0x39   :  { %530 = vmatprep.subr.bf16.mxu1 %v2441_v13  ;;  %v2548_v13 = vld [vmem:[%s3623_s4 + $0x20c] ss:$16 sps:$4 sm:$0xff]  }
  0x3b   :  { %490 = vmatpush1.bf16.msra.mxu0 %v2395_v57  ;;  %v2498_v57 = vld [vmem:[%s3623_s4 + $0x108] ss:$16 sps:$4 sm:$0xff]  }
  0x3c   :  { %491 = vmatprep.subr.bf16.mxu0 %v2396_v58  ;;  %531 = vmatpush1.bf16.msra.mxu1 %v2443_v17  ;;  %v2506_v58 = vld [vmem:[%s3623_s4 + $0x12c] ss:$16 sps:$4 sm:$0xff]   ;;  %v3195_v17 = vsub.s32 1, %v2814_v14 }
  0x3d   :  { %532 = vmatprep.subr.bf16.mxu1 %v2444_v18 }
  0x3f   :  { %492 = vmatpush1.bf16.msra.mxu0 %v2398_v61  ;;  %v2510_v61 = vld [vmem:[%s3623_s4 + $0x148] ss:$16 sps:$4 sm:$0xff]  }
  0x40   :  { %1341 = vmatprep.subr.bf16.mxu0 %v2449_v62  ;;  %533 = vmatpush1.bf16.msra.mxu1 %v2446_v19  ;;  %v2518_v62 = vld [vmem:[%s3623_s4 + $0x16c] ss:$16 sps:$4 sm:$0xff]  }
  0x41   :  { %1423 = vmatprep.subr.bf16.mxu1 %v2452_v22 }
  0x42   :  { %494 = vmatmul.mubr.bf16.vlgmr.msra.gmra.mrb[0].mxu0 %v131_v0 }
  0x43   :  { %1342 = vmatpush1.bf16.msra.mxu0 %v2447_v2  ;;  %535 = vmatmul.mubr.bf16.vlgmr.msra.gmra.mrb[0].mxu1 %v131_v0  ;;  %v2524_v0 = vld [vmem:[%s3623_s4 + $0x18c] ss:$16 sps:$4 sm:$0xff]  }
  0x44   :  { %1343 = vmatprep.subr.bf16.mxu0 %v2455_v3  ;;  %1424 = vmatpush1.bf16.msra.mxu1 %v2450_v26  ;;  %v2530_v2 = vld [vmem:[%s3623_s4 + $0x1ac] ss:$16 sps:$4 sm:$0xff]   ;;  %v2528_v3 = vld [vmem:[%s3623_s4 + $0x1a8] ss:$16 sps:$4 sm:$0xff]  }
  0x45   :  { %1425 = vmatprep.subr.bf16.mxu1 %v2458_v27 }
  0x47   :  { %1344 = vmatpush1.bf16.msra.mxu0 %v2453_v6  ;;  %v2531_v6 = vld [vmem:[%s3623_s4 + $0x1c0] ss:$16 sps:$4 sm:$0xff]  }
  0x48   :  { %1345 = vmatprep.subr.bf16.mxu0 %v2461_v7  ;;  %1426 = vmatpush1.bf16.msra.mxu1 %v2456_v30  ;;  %v2534_v7 = vld [vmem:[%s3623_s4 + $0x1c8] ss:$16 sps:$4 sm:$0xff]   ;;  %v2543_v30 = vld [vmem:[%s3623_s4 + $0x200] ss:$16 sps:$4 sm:$0xff]  }
  0x49   :  { %1427 = vmatprep.subr.bf16.mxu1 %v2464_v31  ;;  %v2546_v31 = vld [vmem:[%s3623_s4 + $0x208] ss:$16 sps:$4 sm:$0xff]  }
  0x4b   :  { %1346 = vmatpush1.bf16.msra.mxu0 %v2459_v10  ;;  %v2537_v10 = vld [vmem:[%s3623_s4 + $0x1e0] ss:$16 sps:$4 sm:$0xff]  }
  0x4c   :  { %1347 = vmatprep.subr.bf16.mxu0 %v2467_v11  ;;  %1428 = vmatpush1.bf16.msra.mxu1 %v2462_v34  ;;  %v2540_v11 = vld [vmem:[%s3623_s4 + $0x1e8] ss:$16 sps:$4 sm:$0xff]   ;;  %v2554_v34 = vld [vmem:[%s3623_s4 + $0x22c] ss:$16 sps:$4 sm:$0xff]  }
  0x4d   :  { %1429 = vmatprep.subr.bf16.mxu1 %v2470_v35  ;;  %v2549_v35 = vld [vmem:[%s3623_s4 + $0x220] ss:$16 sps:$4 sm:$0xff]  }
  0x4f   :  { %1348 = vmatpush1.bf16.msra.mxu0 %v2465_v15  ;;  %v3187_v15 = vsub.s32 0, %v2814_v14 }
  0x50   :  { %1349 = vmatprep.subr.bf16.mxu0 %v2473_v16  ;;  %1430 = vmatpush1.bf16.msra.mxu1 %v2468_v38  ;;  %v3192_v16 = vld [vmem:[%s3625_s3] sm:$0xf]  ;;  %v2560_v38 = vld [vmem:[%s3623_s4 + $0x24c] ss:$16 sps:$4 sm:$0xff]  }
  0x51   :  { %1431 = vmatprep.subr.bf16.mxu1 %v2476_v39  ;;  %v99_v18 = vrot.slane %v3192_v16, %v3187_v15  ;;  %v103_v19 = vrot.slane %v3192_v16, %v3195_v17  ;;  %v2555_v39 = vld [vmem:[%s3623_s4 + $0x240] ss:$16 sps:$4 sm:$0xff]  }
  0x53   :  { %1350 = vmatpush1.bf16.msra.mxu0 %v2471_v20 }
  0x54   :  { %1351 = vmatprep.subr.bf16.mxu0 %v2479_v23  ;;  %1432 = vmatpush1.bf16.msra.mxu1 %v2474_v42  ;;  %v2566_v42 = vld [vmem:[%s3623_s4 + $0x26c] ss:$16 sps:$4 sm:$0xff]  }
  0x55   :  { %1433 = vmatprep.subr.bf16.mxu1 %v2482_v43  ;;  %v3238_v43 = vsub.s32 3, %v2814_v14 }
  0x57   :  { %1352 = vmatpush1.bf16.msra.mxu0 %v2477_v24 }
  0x58   :  { %1353 = vmatprep.subr.bf16.mxu0 %v2485_v25  ;;  %1434 = vmatpush1.bf16.msra.mxu1 %v2480_v46  ;;  %v2569_v46 = vld [vmem:[%s3623_s4 + $0x284] ss:$16 sps:$4 sm:$0xff]  }
  0x59   :  { %1435 = vmatprep.subr.bf16.mxu1 %v2488_v47  ;;  %v2572_v47 = vld [vmem:[%s3623_s4 + $0x28c] ss:$16 sps:$4 sm:$0xff]  }
  0x5b   :  { %1354 = vmatpush1.bf16.msra.mxu0 %v2483_v28 }
  0x5c   :  { %1355 = vmatprep.subr.bf16.mxu0 %v2491_v29  ;;  %1436 = vmatpush1.bf16.msra.mxu1 %v2486_v50  ;;  %v2570_v50 = vld [vmem:[%s3623_s4 + $0x288] ss:$16 sps:$4 sm:$0xff]  }
  0x5d   :  { %1437 = vmatprep.subr.bf16.mxu1 %v2494_v51 }
  0x5f   :  { %1356 = vmatpush1.bf16.msra.mxu0 %v2489_v32 }
  0x60   :  { %1357 = vmatprep.subr.bf16.mxu0 %v2497_v33  ;;  %1438 = vmatpush1.bf16.msra.mxu1 %v2492_v54  ;;  %v2551_v33 = vld [vmem:[%s3623_s4 + $0x224] ss:$16 sps:$4 sm:$0xff]  }
  0x61   :  { %1439 = vmatprep.subr.bf16.mxu1 %v2500_v55 }
  0x63   :  { %1358 = vmatpush1.bf16.msra.mxu0 %v2495_v36  ;;  %v2552_v36 = vld [vmem:[%s3623_s4 + $0x228] ss:$16 sps:$4 sm:$0xff]  }
  0x64   :  { %1359 = vmatprep.subr.bf16.mxu0 %v2503_v37  ;;  %1440 = vmatpush1.bf16.msra.mxu1 %v2498_v57  ;;  %v2557_v37 = vld [vmem:[%s3623_s4 + $0x244] ss:$16 sps:$4 sm:$0xff]  }
  0x65   :  { %1441 = vmatprep.subr.bf16.mxu1 %v2506_v58  ;;  %v2573_v58 = vld [vmem:[%s3623_s4 + $0x2a0] ss:$16 sps:$4 sm:$0xff]  }
  0x67   :  { %1360 = vmatpush1.bf16.msra.mxu0 %v2501_v40  ;;  %v2558_v40 = vld [vmem:[%s3623_s4 + $0x248] ss:$16 sps:$4 sm:$0xff]  }
  0x68   :  { %1361 = vmatprep.subr.bf16.mxu0 %v2509_v41  ;;  %1442 = vmatpush1.bf16.msra.mxu1 %v2504_v59  ;;  %v2563_v41 = vld [vmem:[%s3623_s4 + $0x264] ss:$16 sps:$4 sm:$0xff]   ;;  %v2576_v59 = vld [vmem:[%s3623_s4 + $0x2a8] ss:$16 sps:$4 sm:$0xff]  }
  0x69   :  { %1443 = vmatprep.subr.bf16.mxu1 %v2512_v60 }
  0x6b   :  { %1362 = vmatpush1.bf16.msra.mxu0 %v2507_v44  ;;  %v2561_v44 = vld [vmem:[%s3623_s4 + $0x260] ss:$16 sps:$4 sm:$0xff]  }
  0x6c   :  { %1363 = vmatprep.subr.bf16.mxu0 %v2515_v45  ;;  %1444 = vmatpush1.bf16.msra.mxu1 %v2510_v61  ;;  %v2564_v45 = vld [vmem:[%s3623_s4 + $0x268] ss:$16 sps:$4 sm:$0xff]   ;;  %v2581_v61 = vld [vmem:[%s3623_s4 + $0x2c4] ss:$16 sps:$4 sm:$0xff]  }
  0x6d   :  { %1445 = vmatprep.subr.bf16.mxu1 %v2518_v62  ;;  %v2584_v62 = vld [vmem:[%s3623_s4 + $0x2cc] ss:$16 sps:$4 sm:$0xff]  }
  0x6f   :  { %1364 = vmatpush1.bf16.msra.mxu0 %v2513_v48  ;;  %v111_v48 = vrot.slane %v3192_v16, %v3238_v43 }
  0x70   :  { %1365 = vmatprep.subr.bf16.mxu0 %v2521_v49  ;;  %1446 = vmatpush1.bf16.msra.mxu1 %v2516_v63  ;;  %v2567_v49 = vld [vmem:[%s3623_s4 + $0x280] ss:$16 sps:$4 sm:$0xff]  }
  0x71   :  { %1447 = vmatprep.subr.bf16.mxu1 %v2524_v0  ;;  %v2579_v0 = vld [vmem:[%s3623_s4 + $0x2c0] ss:$16 sps:$4 sm:$0xff]  }
  0x73   :  { %1366 = vmatpush1.bf16.msra.mxu0 %v2519_v52  ;;  %v2575_v52 = vld [vmem:[%s3623_s4 + $0x2a4] ss:$16 sps:$4 sm:$0xff]  }
  0x74   :  { %1367 = vmatprep.subr.bf16.mxu0 %v2527_v53  ;;  %1448 = vmatpush1.bf16.msra.mxu1 %v2522_v1  ;;  %v2578_v53 = vld [vmem:[%s3623_s4 + $0x2ac] ss:$16 sps:$4 sm:$0xff]   ;;  %v2582_v1 = vld [vmem:[%s3623_s4 + $0x2c8] ss:$16 sps:$4 sm:$0xff]  }
  0x75   :  { %1449 = vmatprep.subr.bf16.mxu1 %v2530_v2  ;;  %v2587_v2 = vld [vmem:[%s3623_s4 + $0x2e4] ss:$16 sps:$4 sm:$0xff]  }
  0x77   :  { %1368 = vmatpush1.bf16.msra.mxu0 %v2525_v56 }
  0x78   :  { %1450 = vmatpush1.bf16.msra.mxu1 %v2528_v3  ;;  %1369 = vmatprep.subr.bf16.mxu0 %v2533_v4  ;;  %v2590_v3 = vld [vmem:[%s3623_s4 + $0x2ec] ss:$16 sps:$4 sm:$0xff]   ;;  %v2585_v4 = vld [vmem:[%s3623_s4 + $0x2e0] ss:$16 sps:$4 sm:$0xff]  }
  0x79   :  { %1451 = vmatprep.subr.bf16.mxu1 %v2536_v5  ;;  %v2588_v5 = vld [vmem:[%s3623_s4 + $0x2e8] ss:$16 sps:$4 sm:$0xff]  }
  0x7b   :  { %1370 = vmatpush1.bf16.msra.mxu0 %v2531_v6  ;;  %v2593_v6 = vld [vmem:[%s3623_s4 + $0x304] ss:$16 sps:$4 sm:$0xff]  }
  0x7c   :  { %1452 = vmatpush1.bf16.msra.mxu1 %v2534_v7  ;;  %1371 = vmatprep.subr.bf16.mxu0 %v2539_v8  ;;  %v2596_v7 = vld [vmem:[%s3623_s4 + $0x30c] ss:$16 sps:$4 sm:$0xff]   ;;  %v2591_v8 = vld [vmem:[%s3623_s4 + $0x300] ss:$16 sps:$4 sm:$0xff]  }
  0x7d   :  { %1453 = vmatprep.subr.bf16.mxu1 %v2542_v9  ;;  %v2594_v9 = vld [vmem:[%s3623_s4 + $0x308] ss:$16 sps:$4 sm:$0xff]  }
  0x7f   :  { %1372 = vmatpush1.bf16.msra.mxu0 %v2537_v10  ;;  %v2599_v10 = vld [vmem:[%s3623_s4 + $0x324] ss:$16 sps:$4 sm:$0xff]  }
  0x80   :  { %1454 = vmatpush1.bf16.msra.mxu1 %v2540_v11  ;;  %1382 = vmatprep.subr.bf16.mxu0 %v2545_v12  ;;  %v2602_v11 = vld [vmem:[%s3623_s4 + $0x32c] ss:$16 sps:$4 sm:$0xff]   ;;  %v2597_v12 = vld [vmem:[%s3623_s4 + $0x320] ss:$16 sps:$4 sm:$0xff]  }
  0x81   :  { %1464 = vmatprep.subr.bf16.mxu1 %v2548_v13  ;;  %v2600_v13 = vld [vmem:[%s3623_s4 + $0x328] ss:$16 sps:$4 sm:$0xff]  }
 0x115   :  { %v495_v20 = vpop.f32.mrb[0].mxu0 }
 0x116   :  { %v496_v22 = vadd.f32 %v495_v20, %v99_v18  ;;  %v497_v23 = vpop.f32.mrb[1].mxu0  ;;  %v3260_v51 = vpop.f32.mrb[0].mxu1  ;;  %v2605_v18 = vld [vmem:[%s3623_s4 + $0x344] ss:$16 sps:$4 sm:$0xff]   ;;  %v2603_v20 = vld [vmem:[%s3623_s4 + $0x340] ss:$16 sps:$4 sm:$0xff]  }
 0x117   :  { %v498_v24 = vadd.f32 %v497_v23, %v103_v19  ;;  %v499_v25 = vpop.f32.mrb[2].mxu0  ;;  %v538_v54 = vpop.f32.mrb[1].mxu1  ;;  %v2608_v19 = vld [vmem:[%s3623_s4 + $0x34c] ss:$16 sps:$4 sm:$0xff]   ;;  %v2611_v23 = vld [vmem:[%s3623_s4 + $0x364] ss:$16 sps:$4 sm:$0xff]  }
 0x118   :  { %v543_v26 = vmax.f32 %v496_v22, 0.0  ;;  %v500_v27 = vpop.f32.mrb[3].mxu0  ;;  %v539_v55 = vadd.f32 %v538_v54, %v111_v48  ;;  %v540_v56 = vpop.f32.mrb[2].mxu1  ;;  %v2606_v22 = vld [vmem:[%s3623_s4 + $0x348] ss:$16 sps:$4 sm:$0xff]  }
 0x119   :  { %v544_v28 = vmax.f32 %v498_v24, 0.0  ;;  %v541_v57 = vpop.f32.mrb[3].mxu1  ;;  %v2614_v24 = vld [vmem:[%s3623_s4 + $0x36c] ss:$16 sps:$4 sm:$0xff]   ;;  %v2609_v25 = vld [vmem:[%s3623_s4 + $0x360] ss:$16 sps:$4 sm:$0xff]  }
 0x11a   :  { %v547_v32 = vpack.c.bf16 %v543_v26, %v543_v26  ;;  %v546_v60 = vmax.f32 %v539_v55, 0.0  ;;  %v2612_v26 = vld [vmem:[%s3623_s4 + $0x368] ss:$16 sps:$4 sm:$0xff]   ;;  %v2617_v27 = vld [vmem:[%s3623_s4 + $0x384] ss:$16 sps:$4 sm:$0xff]  }
 0x11b   :  { %v548_v29 = vpack.c.bf16 %v544_v28, %v544_v28  ;;  %v2620_v28 = vld [vmem:[%s3623_s4 + $0x38c] ss:$16 sps:$4 sm:$0xff]   ;;  %v2645_v56 = vld [vmem:[%s3624_s6 + $0x20] ss:$16 sps:$4 sm:$0xff]   ;;  %v2648_v57 = vld [vmem:[%s3624_s6 + $0x28] ss:$16 sps:$4 sm:$0xff]  }
 0x11c   :  { %v550_v63 = vpack.c.bf16 %v546_v60, %v546_v60  ;;  %v2644_v48 = vld [vmem:[%s3624_s6 + $0xc] ss:$16 sps:$4 sm:$0xff]   ;;  %v2651_v60 = vld [vmem:[%s3624_s6 + $0x40] ss:$16 sps:$4 sm:$0xff]  }
 0x11d   :  { %1373 = vmatprep.mubr.bf16.mxu0 %v548_v29  ;;  %1455 = vmatprep.mubr.bf16.mxu1 %v548_v29  ;;  %v3353_v29 = vsub.s32 2, %v2814_v14  ;;  %v2626_v14 = vld [vmem:[%s3623_s4 + $0x3ac] ss:$16 sps:$4 sm:$0xff]  }
 0x11e   :  { %1374 = vmatmul.mubr.bf16.vlgmr.msra.gmra.mrb[4].mxu0 %v547_v32  ;;  %1456 = vmatmul.mubr.bf16.vlgmr.msra.gmra.mrb[4].mxu1 %v547_v32  ;;  %v2623_v32 = vld [vmem:[%s3623_s4 + $0x3a4] ss:$16 sps:$4 sm:$0xff]   ;;  %v2650_v54 = vld [vmem:[%s3624_s6 + $0x2c] ss:$16 sps:$4 sm:$0xff]  }
 0x11f   :  { %1383 = vmatpush1.bf16.msra.mxu0 %v2543_v30  ;;  %1465 = vmatpush1.bf16.msra.mxu1 %v2546_v31  ;;  %v2615_v30 = vld [vmem:[%s3623_s4 + $0x380] ss:$16 sps:$4 sm:$0xff]   ;;  %v2618_v31 = vld [vmem:[%s3623_s4 + $0x388] ss:$16 sps:$4 sm:$0xff]  }
 0x120   :  { %1384 = vmatprep.subr.bf16.mxu0 %v2551_v33  ;;  %1466 = vmatprep.subr.bf16.mxu1 %v2554_v34  ;;  %v107_v33 = vrot.slane %v3192_v16, %v3353_v29  ;;  %v2621_v34 = vld [vmem:[%s3623_s4 + $0x3a0] ss:$16 sps:$4 sm:$0xff]   ;;  %v2632_v16 = vld [vmem:[%s3623_s4 + $0x3cc] ss:$16 sps:$4 sm:$0xff]  }
 0x121   :  { %1414 = vmatprep.mubr.bf16.mxu0 %v550_v63  ;;  %1496 = vmatprep.mubr.bf16.mxu1 %v550_v63  ;;  %v2662_v63 = vld [vmem:[%s3624_s6 + $0x6c] ss:$16 sps:$4 sm:$0xff]  }
 0x123   :  { %1385 = vmatpush1.bf16.msra.mxu0 %v2549_v35  ;;  %1467 = vmatpush1.bf16.msra.mxu1 %v2552_v36  ;;  %v2624_v35 = vld [vmem:[%s3623_s4 + $0x3a8] ss:$16 sps:$4 sm:$0xff]   ;;  %v2629_v36 = vld [vmem:[%s3623_s4 + $0x3c4] ss:$16 sps:$4 sm:$0xff]  }
 0x124   :  { %1386 = vmatprep.subr.bf16.mxu0 %v2557_v37  ;;  %1468 = vmatprep.subr.bf16.mxu1 %v2560_v38  ;;  %v537_v37 = vadd.f32 %v3260_v51, %v107_v33  ;;  %v2627_v38 = vld [vmem:[%s3623_s4 + $0x3c0] ss:$16 sps:$4 sm:$0xff]  }
 0x125   :  { %v2639_v51 = vld [vmem:[%s3624_s6] ss:$16 sps:$4 sm:$0xff]  }
 0x126   :  { %v2699_v33 = vld [vmem:[%s3624_s6 + $0x140] ss:$16 sps:$4 sm:$0xff]  }
 0x127   :  { %1387 = vmatpush1.bf16.msra.mxu0 %v2555_v39  ;;  %1469 = vmatpush1.bf16.msra.mxu1 %v2558_v40  ;;  %v2630_v39 = vld [vmem:[%s3623_s4 + $0x3c8] ss:$16 sps:$4 sm:$0xff]   ;;  %v2635_v40 = vld [vmem:[%s3623_s4 + $0x3e4] ss:$16 sps:$4 sm:$0xff]  }
 0x128   :  { %1388 = vmatprep.subr.bf16.mxu0 %v2563_v41  ;;  %1470 = vmatprep.subr.bf16.mxu1 %v2566_v42  ;;  %v2638_v41 = vld [vmem:[%s3623_s4 + $0x3ec] ss:$16 sps:$4 sm:$0xff]   ;;  %v545_v42 = vmax.f32 %v537_v37, 0.0  ;;  %v2708_v37 = vld [vmem:[%s3624_s6 + $0x168] ss:$16 sps:$4 sm:$0xff]  }
 0x12b   :  { %1389 = vmatpush1.bf16.msra.mxu0 %v2561_v44  ;;  %1471 = vmatpush1.bf16.msra.mxu1 %v2564_v45  ;;  %v3397_v44 = vld.sshfl [vmem:[%s3626_s1] sm:$0x11 pattern:$0x75316420] }
 0x12c   :  { %1390 = vmatprep.subr.bf16.mxu0 %v2569_v46  ;;  %1472 = vmatprep.subr.bf16.mxu1 %v2572_v47  ;;  %v2633_v45 = vld [vmem:[%s3623_s4 + $0x3e0] ss:$16 sps:$4 sm:$0xff]   ;;  %v2636_v46 = vld [vmem:[%s3623_s4 + $0x3e8] ss:$16 sps:$4 sm:$0xff]   ;;  %v2641_v47 = vld [vmem:[%s3624_s6 + $0x4] ss:$16 sps:$4 sm:$0xff]  }
 0x12f   :  { %1391 = vmatpush1.bf16.msra.mxu0 %v2567_v49  ;;  %1473 = vmatpush1.bf16.msra.mxu1 %v2570_v50  ;;  %v1600_v49 = vcombine.high %v3397_v44, %v3397_v44  ;;  %v549_v50 = vpack.c.bf16 %v545_v42, %v545_v42  ;;  %v2719_v42 = vld [vmem:[%s3624_s6 + $0x1a4] ss:$16 sps:$4 sm:$0xff]  }
 0x130   :  { %1392 = vmatprep.subr.bf16.mxu0 %v2575_v52  ;;  %1474 = vmatprep.subr.bf16.mxu1 %v2578_v53  ;;  %v2642_v52 = vld [vmem:[%s3624_s6 + $0x8] ss:$16 sps:$4 sm:$0xff]   ;;  %v2647_v53 = vld [vmem:[%s3624_s6 + $0x24] ss:$16 sps:$4 sm:$0xff]  }
 0x131   :  { %v1614_v55 = vrot.slane %v1600_v49, %v2832_v21  ;;  %v2728_v49 = vld [vmem:[%s3624_s6 + $0x1cc] ss:$16 sps:$4 sm:$0xff]  }
 0x133   :  { %1393 = vmatpush1.bf16.msra.mxu0 %v2573_v58  ;;  %1475 = vmatpush1.bf16.msra.mxu1 %v2576_v59  ;;  %v2653_v58 = vld [vmem:[%s3624_s6 + $0x44] ss:$16 sps:$4 sm:$0xff]   ;;  %v2656_v59 = vld [vmem:[%s3624_s6 + $0x4c] ss:$16 sps:$4 sm:$0xff]  }
 0x134   :  { %1394 = vmatprep.subr.bf16.mxu0 %v2581_v61  ;;  %1476 = vmatprep.subr.bf16.mxu1 %v2584_v62  ;;  %v2654_v61 = vld [vmem:[%s3624_s6 + $0x48] ss:$16 sps:$4 sm:$0xff]   ;;  %v2659_v62 = vld [vmem:[%s3624_s6 + $0x64] ss:$16 sps:$4 sm:$0xff]  }
 0x137   :  { %1395 = vmatpush1.bf16.msra.mxu0 %v2579_v0  ;;  %1477 = vmatpush1.bf16.msra.mxu1 %v2582_v1  ;;  %v2657_v0 = vld [vmem:[%s3624_s6 + $0x60] ss:$16 sps:$4 sm:$0xff]   ;;  %v2660_v1 = vld [vmem:[%s3624_s6 + $0x68] ss:$16 sps:$4 sm:$0xff]  }
 0x138   :  { %1396 = vmatprep.subr.bf16.mxu0 %v2587_v2  ;;  %1478 = vmatprep.subr.bf16.mxu1 %v2590_v3  ;;  %v2665_v2 = vld [vmem:[%s3624_s6 + $0x84] ss:$16 sps:$4 sm:$0xff]   ;;  %v2668_v3 = vld [vmem:[%s3624_s6 + $0x8c] ss:$16 sps:$4 sm:$0xff]  }
 0x13b   :  { %1397 = vmatpush1.bf16.msra.mxu0 %v2585_v4  ;;  %1479 = vmatpush1.bf16.msra.mxu1 %v2588_v5  ;;  %v2663_v4 = vld [vmem:[%s3624_s6 + $0x80] ss:$16 sps:$4 sm:$0xff]   ;;  %v2666_v5 = vld [vmem:[%s3624_s6 + $0x88] ss:$16 sps:$4 sm:$0xff]  }
 0x13c   :  { %1398 = vmatprep.subr.bf16.mxu0 %v2593_v6  ;;  %1480 = vmatprep.subr.bf16.mxu1 %v2596_v7  ;;  %v2671_v6 = vld [vmem:[%s3624_s6 + $0xa4] ss:$16 sps:$4 sm:$0xff]   ;;  %v2674_v7 = vld [vmem:[%s3624_s6 + $0xac] ss:$16 sps:$4 sm:$0xff]  }
 0x13f   :  { %1399 = vmatpush1.bf16.msra.mxu0 %v2591_v8  ;;  %1481 = vmatpush1.bf16.msra.mxu1 %v2594_v9  ;;  %v2669_v8 = vld [vmem:[%s3624_s6 + $0xa0] ss:$16 sps:$4 sm:$0xff]   ;;  %v2672_v9 = vld [vmem:[%s3624_s6 + $0xa8] ss:$16 sps:$4 sm:$0xff]  }
 0x140   :  { %1400 = vmatprep.subr.bf16.mxu0 %v2599_v10  ;;  %1482 = vmatprep.subr.bf16.mxu1 %v2602_v11  ;;  %v2677_v10 = vld [vmem:[%s3624_s6 + $0xc4] ss:$16 sps:$4 sm:$0xff]   ;;  %v2680_v11 = vld [vmem:[%s3624_s6 + $0xcc] ss:$16 sps:$4 sm:$0xff]  }
 0x143   :  { %1401 = vmatpush1.bf16.msra.mxu0 %v2597_v12  ;;  %1483 = vmatpush1.bf16.msra.mxu1 %v2600_v13  ;;  %v2675_v12 = vld [vmem:[%s3624_s6 + $0xc0] ss:$16 sps:$4 sm:$0xff]   ;;  %v2678_v13 = vld [vmem:[%s3624_s6 + $0xc8] ss:$16 sps:$4 sm:$0xff]  }
 0x144   :  { %1402 = vmatprep.subr.bf16.mxu0 %v2605_v18  ;;  %1484 = vmatprep.subr.bf16.mxu1 %v2608_v19  ;;  %v2683_v18 = vld [vmem:[%s3624_s6 + $0xe4] ss:$16 sps:$4 sm:$0xff]   ;;  %v2686_v19 = vld [vmem:[%s3624_s6 + $0xec] ss:$16 sps:$4 sm:$0xff]  }
 0x147   :  { %1403 = vmatpush1.bf16.msra.mxu0 %v2603_v20  ;;  %1485 = vmatpush1.bf16.msra.mxu1 %v2606_v22  ;;  %v2681_v20 = vld [vmem:[%s3624_s6 + $0xe0] ss:$16 sps:$4 sm:$0xff]   ;;  %v2684_v22 = vld [vmem:[%s3624_s6 + $0xe8] ss:$16 sps:$4 sm:$0xff]  }
 0x148   :  { %1404 = vmatprep.subr.bf16.mxu0 %v2611_v23  ;;  %1486 = vmatprep.subr.bf16.mxu1 %v2614_v24  ;;  %v2689_v23 = vld [vmem:[%s3624_s6 + $0x104] ss:$16 sps:$4 sm:$0xff]   ;;  %v2692_v24 = vld [vmem:[%s3624_s6 + $0x10c] ss:$16 sps:$4 sm:$0xff]  }
 0x14b   :  { %1405 = vmatpush1.bf16.msra.mxu0 %v2609_v25  ;;  %1487 = vmatpush1.bf16.msra.mxu1 %v2612_v26  ;;  %v2687_v25 = vld [vmem:[%s3624_s6 + $0x100] ss:$16 sps:$4 sm:$0xff]   ;;  %v2690_v26 = vld [vmem:[%s3624_s6 + $0x108] ss:$16 sps:$4 sm:$0xff]  }
 0x14c   :  { %1406 = vmatprep.subr.bf16.mxu0 %v2617_v27  ;;  %1488 = vmatprep.subr.bf16.mxu1 %v2620_v28  ;;  %v2695_v27 = vld [vmem:[%s3624_s6 + $0x124] ss:$16 sps:$4 sm:$0xff]   ;;  %v2698_v28 = vld [vmem:[%s3624_s6 + $0x12c] ss:$16 sps:$4 sm:$0xff]  }
 0x14f   :  { %1407 = vmatpush1.bf16.msra.mxu0 %v2615_v30  ;;  %1489 = vmatpush1.bf16.msra.mxu1 %v2618_v31  ;;  %v2693_v30 = vld [vmem:[%s3624_s6 + $0x120] ss:$16 sps:$4 sm:$0xff]   ;;  %v2696_v31 = vld [vmem:[%s3624_s6 + $0x128] ss:$16 sps:$4 sm:$0xff]  }
 0x150   :  { %1408 = vmatprep.subr.bf16.mxu0 %v2623_v32  ;;  %1490 = vmatprep.subr.bf16.mxu1 %v2626_v14  ;;  %v2701_v32 = vld [vmem:[%s3624_s6 + $0x144] ss:$16 sps:$4 sm:$0xff]   ;;  %v2704_v14 = vld [vmem:[%s3624_s6 + $0x14c] ss:$16 sps:$4 sm:$0xff]  }
 0x153   :  { %1409 = vmatpush1.bf16.msra.mxu0 %v2621_v34  ;;  %1491 = vmatpush1.bf16.msra.mxu1 %v2624_v35  ;;  %v2702_v34 = vld [vmem:[%s3624_s6 + $0x148] ss:$16 sps:$4 sm:$0xff]   ;;  %v2707_v35 = vld [vmem:[%s3624_s6 + $0x164] ss:$16 sps:$4 sm:$0xff]  }
 0x154   :  { %1410 = vmatprep.subr.bf16.mxu0 %v2629_v36  ;;  %1492 = vmatprep.subr.bf16.mxu1 %v2632_v16  ;;  %v2710_v36 = vld [vmem:[%s3624_s6 + $0x16c] ss:$16 sps:$4 sm:$0xff]   ;;  %v2705_v16 = vld [vmem:[%s3624_s6 + $0x160] ss:$16 sps:$4 sm:$0xff]  }
 0x157   :  { %1411 = vmatpush1.bf16.msra.mxu0 %v2627_v38  ;;  %1493 = vmatpush1.bf16.msra.mxu1 %v2630_v39  ;;  %v2713_v38 = vld [vmem:[%s3624_s6 + $0x184] ss:$16 sps:$4 sm:$0xff]   ;;  %v2716_v39 = vld [vmem:[%s3624_s6 + $0x18c] ss:$16 sps:$4 sm:$0xff]  }
 0x158   :  { %1412 = vmatprep.subr.bf16.mxu0 %v2635_v40  ;;  %1494 = vmatprep.subr.bf16.mxu1 %v2638_v41  ;;  %v2711_v40 = vld [vmem:[%s3624_s6 + $0x180] ss:$16 sps:$4 sm:$0xff]   ;;  %v2714_v41 = vld [vmem:[%s3624_s6 + $0x188] ss:$16 sps:$4 sm:$0xff]  }
 0x15b   :  { %1413 = vmatpush1.bf16.msra.mxu0 %v2633_v45  ;;  %1495 = vmatpush1.bf16.msra.mxu1 %v2636_v46  ;;  %v2722_v45 = vld [vmem:[%s3624_s6 + $0x1ac] ss:$16 sps:$4 sm:$0xff]   ;;  %v2717_v46 = vld [vmem:[%s3624_s6 + $0x1a0] ss:$16 sps:$4 sm:$0xff]  }
 0x15c   :  { %1937 = vmatprep.subr.bf16.mxu0 %v2641_v47  ;;  %1978 = vmatprep.subr.bf16.mxu1 %v2644_v48  ;;  %v2720_v47 = vld [vmem:[%s3624_s6 + $0x1a8] ss:$16 sps:$4 sm:$0xff]   ;;  %v2725_v48 = vld [vmem:[%s3624_s6 + $0x1c4] ss:$16 sps:$4 sm:$0xff]  }
 0x15e   :  { %1415 = vmatmul.mubr.bf16.vlgmr.msra.gmra.mrb[4].mxu0 %v549_v50  ;;  %1497 = vmatmul.mubr.bf16.vlgmr.msra.gmra.mrb[4].mxu1 %v549_v50  ;;  %v2723_v50 = vld [vmem:[%s3624_s6 + $0x1c0] ss:$16 sps:$4 sm:$0xff]  }
 0x15f   :  { %1938 = vmatpush1.bf16.msra.mxu0 %v2639_v51  ;;  %1979 = vmatpush1.bf16.msra.mxu1 %v2642_v52  ;;  %v2726_v51 = vld [vmem:[%s3624_s6 + $0x1c8] ss:$16 sps:$4 sm:$0xff]   ;;  %v2731_v52 = vld [vmem:[%s3624_s6 + $0x1e4] ss:$16 sps:$4 sm:$0xff]  }
 0x160   :  { %1939 = vmatprep.subr.bf16.mxu0 %v2647_v53  ;;  %1980 = vmatprep.subr.bf16.mxu1 %v2650_v54  ;;  %v2734_v53 = vld [vmem:[%s3624_s6 + $0x1ec] ss:$16 sps:$4 sm:$0xff]   ;;  %v2729_v54 = vld [vmem:[%s3624_s6 + $0x1e0] ss:$16 sps:$4 sm:$0xff]  }
 0x161   :  { %1969 = vmatprep.mubr.bf16.mxu0 %v1614_v55  ;;  %2010 = vmatprep.mubr.bf16.mxu1 %v1614_v55  ;;  %v2732_v55 = vld [vmem:[%s3624_s6 + $0x1e8] ss:$16 sps:$4 sm:$0xff]  }
 0x163   :  { %1940 = vmatpush1.bf16.msra.mxu0 %v2645_v56  ;;  %1981 = vmatpush1.bf16.msra.mxu1 %v2648_v57  ;;  %v1607_v56 = vrot.slane %v3397_v44, %v2832_v21  ;;  %v679_v57 = vld [vmem:[%s3627_s5] sm:$0xf] }
 0x164   :  { %1941 = vmatprep.subr.bf16.mxu0 %v2653_v58  ;;  %1982 = vmatprep.subr.bf16.mxu1 %v2656_v59  ;;  %v1570_v58 = vld [vmem:[%s3628_s7] sm:$0xf]  ;;  %v684_v59 = vrot.slane %v679_v57, %v3187_v15 }
 0x165   :  { %v1583_v44 = vrot.slane %v1570_v58, %v3353_v29 }
 0x167   :  { %1942 = vmatpush1.bf16.msra.mxu0 %v2651_v60  ;;  %1983 = vmatpush1.bf16.msra.mxu1 %v2654_v61  ;;  %v1575_v60 = vrot.slane %v1570_v58, %v3187_v15  ;;  %v692_v61 = vrot.slane %v679_v57, %v3353_v29 }
 0x168   :  { %1943 = vmatprep.subr.bf16.mxu0 %v2659_v62  ;;  %1984 = vmatprep.subr.bf16.mxu1 %v2662_v63  ;;  %v688_v62 = vrot.slane %v679_v57, %v3195_v17  ;;  %v1579_v63 = vrot.slane %v1570_v58, %v3195_v17 }
 0x16b   :  { %1944 = vmatpush1.bf16.msra.mxu0 %v2657_v0  ;;  %1985 = vmatpush1.bf16.msra.mxu1 %v2660_v1  ;;  %v696_v0 = vrot.slane %v679_v57, %v3238_v43  ;;  %v1587_v1 = vrot.slane %v1570_v58, %v3238_v43 }
 0x16c   :  { %1945 = vmatprep.subr.bf16.mxu0 %v2665_v2  ;;  %1986 = vmatprep.subr.bf16.mxu1 %v2668_v3  ;;  %v2326_v2 = vadd.f32 %v1575_v60, %v684_v59  ;;  %v2330_v3 = vadd.f32 %v1583_v44, %v692_v61 }
 0x16f   :  { %1946 = vmatpush1.bf16.msra.mxu0 %v2663_v4  ;;  %1987 = vmatpush1.bf16.msra.mxu1 %v2666_v5  ;;  %v2328_v4 = vadd.f32 %v1579_v63, %v688_v62  ;;  %v2332_v5 = vadd.f32 %v1587_v1, %v696_v0 }
 0x170   :  { %1947 = vmatprep.subr.bf16.mxu0 %v2671_v6  ;;  %1988 = vmatprep.subr.bf16.mxu1 %v2674_v7 }
 0x173   :  { %1948 = vmatpush1.bf16.msra.mxu0 %v2669_v8  ;;  %1989 = vmatpush1.bf16.msra.mxu1 %v2672_v9 }
 0x174   :  { %1949 = vmatprep.subr.bf16.mxu0 %v2677_v10  ;;  %1990 = vmatprep.subr.bf16.mxu1 %v2680_v11 }
 0x177   :  { %1950 = vmatpush1.bf16.msra.mxu0 %v2675_v12  ;;  %1991 = vmatpush1.bf16.msra.mxu1 %v2678_v13 }
 0x178   :  { %1951 = vmatprep.subr.bf16.mxu0 %v2683_v18  ;;  %1992 = vmatprep.subr.bf16.mxu1 %v2686_v19 }
 0x17b   :  { %1952 = vmatpush1.bf16.msra.mxu0 %v2681_v20  ;;  %1993 = vmatpush1.bf16.msra.mxu1 %v2684_v22 }
 0x17c   :  { %1953 = vmatprep.subr.bf16.mxu0 %v2689_v23  ;;  %1994 = vmatprep.subr.bf16.mxu1 %v2692_v24 }
 0x17f   :  { %1954 = vmatpush1.bf16.msra.mxu0 %v2687_v25  ;;  %1995 = vmatpush1.bf16.msra.mxu1 %v2690_v26 }
 0x180   :  { %1955 = vmatprep.subr.bf16.mxu0 %v2695_v27  ;;  %1996 = vmatprep.subr.bf16.mxu1 %v2698_v28 }
 0x183   :  { %1956 = vmatpush1.bf16.msra.mxu0 %v2693_v30  ;;  %1997 = vmatpush1.bf16.msra.mxu1 %v2696_v31 }
 0x184   :  { %1957 = vmatprep.subr.bf16.mxu0 %v2701_v32  ;;  %1998 = vmatprep.subr.bf16.mxu1 %v2704_v14 }
 0x187   :  { %1958 = vmatpush1.bf16.msra.mxu0 %v2699_v33  ;;  %1999 = vmatpush1.bf16.msra.mxu1 %v2702_v34 }
 0x188   :  { %1959 = vmatprep.subr.bf16.mxu0 %v2707_v35  ;;  %2000 = vmatprep.subr.bf16.mxu1 %v2710_v36 }
 0x18b   :  { %1960 = vmatpush1.bf16.msra.mxu0 %v2705_v16  ;;  %2001 = vmatpush1.bf16.msra.mxu1 %v2708_v37 }
 0x18c   :  { %1961 = vmatprep.subr.bf16.mxu0 %v2713_v38  ;;  %2002 = vmatprep.subr.bf16.mxu1 %v2716_v39 }
 0x18f   :  { %1962 = vmatpush1.bf16.msra.mxu0 %v2711_v40  ;;  %2003 = vmatpush1.bf16.msra.mxu1 %v2714_v41 }
 0x190   :  { %1963 = vmatprep.subr.bf16.mxu0 %v2719_v42  ;;  %2004 = vmatprep.subr.bf16.mxu1 %v2722_v45 }
 0x193   :  { %1964 = vmatpush1.bf16.msra.mxu0 %v2717_v46  ;;  %2005 = vmatpush1.bf16.msra.mxu1 %v2720_v47 }
 0x194   :  { %1965 = vmatprep.subr.bf16.mxu0 %v2725_v48  ;;  %2006 = vmatprep.subr.bf16.mxu1 %v2728_v49 }
 0x197   :  { %1966 = vmatpush1.bf16.msra.mxu0 %v2723_v50  ;;  %2007 = vmatpush1.bf16.msra.mxu1 %v2726_v51 }
 0x198   :  { %1967 = vmatprep.subr.bf16.mxu0 %v2731_v52  ;;  %2008 = vmatprep.subr.bf16.mxu1 %v2734_v53 }
 0x19b   :  { %1968 = vmatpush1.bf16.msra.mxu0 %v2729_v54  ;;  %2009 = vmatpush1.bf16.msra.mxu1 %v2732_v55 }
 0x19e   :  { %1970 = vmatmul.mubr.bf16.vlgmr.msra.gmra.mrb[4].mxu0 %v1607_v56  ;;  %2011 = vmatmul.mubr.bf16.vlgmr.msra.gmra.mrb[4].mxu1 %v1607_v56 }
 0x271   :  { %v1971_v6 = vpop.f32.mrb[4].mxu0  ;;  %v2012_v7 = vpop.f32.mrb[4].mxu1 }
 0x272   :  { %v2327_v8 = vadd.f32 %v2326_v2, %v1971_v6  ;;  %v2331_v15 = vadd.f32 %v2330_v3, %v2012_v7  ;;  %v1973_v9 = vpop.f32.mrb[5].mxu0  ;;  %v2014_v10 = vpop.f32.mrb[5].mxu1 }
 0x273   :  { %v2329_v11 = vadd.f32 %v2328_v4, %v1973_v9  ;;  %v2333_v29 = vadd.f32 %v2332_v5, %v2014_v10  ;;  %v1975_v12 = vpop.f32.mrb[6].mxu0  ;;  %v2016_v13 = vpop.f32.mrb[6].mxu1 }
 0x274   :  { %v2023_v18 = vmax.f32 %v2327_v8, 0.0  ;;  %v2025_v17 = vmax.f32 %v2331_v15, 0.0  ;;  %v1976_v19 = vpop.f32.mrb[7].mxu0  ;;  %v2017_v20 = vpop.f32.mrb[7].mxu1 }
 0x275   :  { %v2024_v22 = vmax.f32 %v2329_v11, 0.0  ;;  %v2026_v43 = vmax.f32 %v2333_v29, 0.0 }
 0x277   :  { %v2323_v23 = vpack.c.bf16 %v2024_v22, %v2023_v18  ;;  %v2324_v24 = vpack.c.bf16 %v2026_v43, %v2025_v17 }
 0x279   :  { %v2043_v25 = vrot.slane %v2323_v23, %v2832_v21  ;;  %v2050_v26 = vrot.slane %v2324_v24, %v2832_v21 }
 0x27b   :  { %v2051_v27 = vcombine.low %v2043_v25, %v2050_v26 }
 0x27d   :  { %2325 = vst.sshfl [vmem:[%s3629_s8] sm:$0x55 pattern:$0x73625140] %v2051_v27 }

// kernel: resnet_forward.26
= control target key start
LH: loop header
LB: loop body
LE: loop exit
PB: predicated region body
PF: predicated region fallthrough
CT: control target
= control target key end

     0   :  { %v151_v36 = vlaneseq  ;;  %v2694_v37 = vmov 1966171168   ;;  %s3553_s1 = inlined_call_operand.vmem [shape: bf16[512,512], index: 1, kind: input, shape index: {}]   ;;  %s3554_s0 = inlined_call_operand.vmem [shape: bf16[2,512], index: 0, kind: input, shape index: {}]   ;;  %s3555_s3 = inlined_call_operand.vmem [shape: bf16[512,512], index: 3, kind: input, shape index: {}]   ;;  %s3556_s2 = inlined_call_operand.vmem [shape: f32[1,512], index: 2, kind: input, shape index: {}]   ;;  %s3557_s4 = inlined_call_operand.vmem [shape: f32[1,512], index: 4, kind: input, shape index: {}]   ;;  %s3558_s5 = inlined_call_operand.vmem [shape: bf16[2,512], index: 5, kind: output, shape index: {}]  }
   0x1   :  { %v2308_v0 = vld [vmem:[%s3553_s1 + $0x4] ss:$16 sps:$4 sm:$0xff]   ;;  %v2310_v1 = vld [vmem:[%s3553_s1 + $0xc] ss:$16 sps:$4 sm:$0xff]   ;;  %v2312_v2 = vld [vmem:[%s3553_s1] ss:$16 sps:$4 sm:$0xff]   ;;  %v173_v38 = vunpack.c.l.s4 %v2694_v37 }
   0x2   :  { %840 = vmatprep.subr.bf16.mxu0 %v2308_v0  ;;  %v2313_v3 = vld [vmem:[%s3553_s1 + $0x8] ss:$16 sps:$4 sm:$0xff]   ;;  %922 = vmatprep.subr.bf16.mxu1 %v2310_v1  ;;  %v2314_v4 = vld [vmem:[%s3553_s1 + $0x24] ss:$16 sps:$4 sm:$0xff]   ;;  %v2316_v5 = vld [vmem:[%s3553_s1 + $0x2c] ss:$16 sps:$4 sm:$0xff]  }
   0x3   :  { %841 = vmatpush1.bf16.msra.mxu0 %v2312_v2  ;;  %923 = vmatpush1.bf16.msra.mxu1 %v2313_v3  ;;  %v2318_v6 = vld [vmem:[%s3553_s1 + $0x20] ss:$16 sps:$4 sm:$0xff]   ;;  %v2319_v7 = vld [vmem:[%s3553_s1 + $0x28] ss:$16 sps:$4 sm:$0xff]   ;;  %v2320_v8 = vld [vmem:[%s3553_s1 + $0x44] ss:$16 sps:$4 sm:$0xff]   ;;  %v174_v43 = vunpack.c.0.s8 %v173_v38 }
   0x4   :  { %842 = vmatprep.subr.bf16.mxu0 %v2314_v4  ;;  %924 = vmatprep.subr.bf16.mxu1 %v2316_v5  ;;  %v2322_v9 = vld [vmem:[%s3553_s1 + $0x4c] ss:$16 sps:$4 sm:$0xff]   ;;  %v2324_v10 = vld [vmem:[%s3553_s1 + $0x40] ss:$16 sps:$4 sm:$0xff]   ;;  %v2325_v11 = vld [vmem:[%s3553_s1 + $0x48] ss:$16 sps:$4 sm:$0xff]  }
   0x5   :  { %v2326_v12 = vld [vmem:[%s3553_s1 + $0x64] ss:$16 sps:$4 sm:$0xff]   ;;  %v2328_v13 = vld [vmem:[%s3553_s1 + $0x6c] ss:$16 sps:$4 sm:$0xff]   ;;  %v2330_v14 = vld [vmem:[%s3553_s1 + $0x60] ss:$16 sps:$4 sm:$0xff]  }
   0x6   :  { %v2331_v15 = vld [vmem:[%s3553_s1 + $0x68] ss:$16 sps:$4 sm:$0xff]   ;;  %v2332_v16 = vld [vmem:[%s3553_s1 + $0x84] ss:$16 sps:$4 sm:$0xff]   ;;  %v2334_v17 = vld [vmem:[%s3553_s1 + $0x8c] ss:$16 sps:$4 sm:$0xff]  }
   0x7   :  { %843 = vmatpush1.bf16.msra.mxu0 %v2318_v6  ;;  %925 = vmatpush1.bf16.msra.mxu1 %v2319_v7  ;;  %v2336_v18 = vld [vmem:[%s3553_s1 + $0x80] ss:$16 sps:$4 sm:$0xff]   ;;  %v2337_v19 = vld [vmem:[%s3553_s1 + $0x88] ss:$16 sps:$4 sm:$0xff]   ;;  %v2338_v20 = vld [vmem:[%s3553_s1 + $0xa4] ss:$16 sps:$4 sm:$0xff]  }
   0x8   :  { %844 = vmatprep.subr.bf16.mxu0 %v2320_v8  ;;  %926 = vmatprep.subr.bf16.mxu1 %v2322_v9  ;;  %v2340_v21 = vld [vmem:[%s3553_s1 + $0xac] ss:$16 sps:$4 sm:$0xff]   ;;  %v2342_v22 = vld [vmem:[%s3553_s1 + $0xa0] ss:$16 sps:$4 sm:$0xff]   ;;  %v2343_v23 = vld [vmem:[%s3553_s1 + $0xa8] ss:$16 sps:$4 sm:$0xff]  }
   0x9   :  { %v2344_v24 = vld [vmem:[%s3553_s1 + $0xc4] ss:$16 sps:$4 sm:$0xff]   ;;  %v2346_v25 = vld [vmem:[%s3553_s1 + $0xcc] ss:$16 sps:$4 sm:$0xff]   ;;  %v2348_v26 = vld [vmem:[%s3553_s1 + $0xc0] ss:$16 sps:$4 sm:$0xff]  }
   0xa   :  { %v2349_v27 = vld [vmem:[%s3553_s1 + $0xc8] ss:$16 sps:$4 sm:$0xff]   ;;  %v2350_v28 = vld [vmem:[%s3553_s1 + $0xe4] ss:$16 sps:$4 sm:$0xff]   ;;  %v2352_v29 = vld [vmem:[%s3553_s1 + $0xec] ss:$16 sps:$4 sm:$0xff]  }
   0xb   :  { %845 = vmatpush1.bf16.msra.mxu0 %v2324_v10  ;;  %927 = vmatpush1.bf16.msra.mxu1 %v2325_v11  ;;  %v2354_v30 = vld [vmem:[%s3553_s1 + $0xe0] ss:$16 sps:$4 sm:$0xff]   ;;  %v2355_v31 = vld [vmem:[%s3553_s1 + $0xe8] ss:$16 sps:$4 sm:$0xff]   ;;  %v2356_v32 = vld [vmem:[%s3553_s1 + $0x104] ss:$16 sps:$4 sm:$0xff]  }
   0xc   :  { %846 = vmatprep.subr.bf16.mxu0 %v2326_v12  ;;  %928 = vmatprep.subr.bf16.mxu1 %v2328_v13  ;;  %v2358_v33 = vld [vmem:[%s3553_s1 + $0x10c] ss:$16 sps:$4 sm:$0xff]   ;;  %v2360_v34 = vld [vmem:[%s3553_s1 + $0x100] ss:$16 sps:$4 sm:$0xff]   ;;  %v2361_v35 = vld [vmem:[%s3553_s1 + $0x108] ss:$16 sps:$4 sm:$0xff]  }
   0xd   :  { %v2362_v39 = vld [vmem:[%s3553_s1 + $0x124] ss:$16 sps:$4 sm:$0xff]   ;;  %v2364_v40 = vld [vmem:[%s3553_s1 + $0x12c] ss:$16 sps:$4 sm:$0xff]   ;;  %v2366_v41 = vld [vmem:[%s3553_s1 + $0x120] ss:$16 sps:$4 sm:$0xff]  }
   0xe   :  { %v2843_v42 = vshrl.u32 %v151_v36, 7  ;;  %v2367_v44 = vld [vmem:[%s3553_s1 + $0x128] ss:$16 sps:$4 sm:$0xff]   ;;  %v2368_v45 = vld [vmem:[%s3553_s1 + $0x144] ss:$16 sps:$4 sm:$0xff]  }
   0xf   :  { %847 = vmatpush1.bf16.msra.mxu0 %v2330_v14  ;;  %929 = vmatpush1.bf16.msra.mxu1 %v2331_v15  ;;  %v2370_v46 = vld [vmem:[%s3553_s1 + $0x14c] ss:$16 sps:$4 sm:$0xff]   ;;  %v2372_v47 = vld [vmem:[%s3553_s1 + $0x140] ss:$16 sps:$4 sm:$0xff]   ;;  %v2373_v48 = vld [vmem:[%s3553_s1 + $0x148] ss:$16 sps:$4 sm:$0xff]  }
  0x10   :  { %848 = vmatprep.subr.bf16.mxu0 %v2332_v16  ;;  %930 = vmatprep.subr.bf16.mxu1 %v2334_v17  ;;  %v2861_v49 = vsub.s32 %v174_v43, %v2843_v42  ;;  %v2374_v50 = vld [vmem:[%s3553_s1 + $0x164] ss:$16 sps:$4 sm:$0xff]   ;;  %v2376_v51 = vld [vmem:[%s3553_s1 + $0x16c] ss:$16 sps:$4 sm:$0xff]   ;;  %v2378_v53 = vld [vmem:[%s3553_s1 + $0x160] ss:$16 sps:$4 sm:$0xff]  }
  0x11   :  { %v2693_v52 = vld.sshfl [vmem:[%s3554_s0] sm:$0x33 pattern:$0x75316420]  ;;  %v2379_v54 = vld [vmem:[%s3553_s1 + $0x168] ss:$16 sps:$4 sm:$0xff]  }
  0x12   :  { %v2380_v55 = vld [vmem:[%s3553_s1 + $0x184] ss:$16 sps:$4 sm:$0xff]   ;;  %v2382_v56 = vld [vmem:[%s3553_s1 + $0x18c] ss:$16 sps:$4 sm:$0xff]   ;;  %v179_v57 = vcombine.high %v2693_v52, %v2693_v52  ;;  %v2384_v58 = vld [vmem:[%s3553_s1 + $0x180] ss:$16 sps:$4 sm:$0xff]   ;;  %v2937_v12 = vrot.slane %v2693_v52, %v2861_v49 }
  0x13   :  { %849 = vmatpush1.bf16.msra.mxu0 %v2336_v18  ;;  %931 = vmatpush1.bf16.msra.mxu1 %v2337_v19  ;;  %v2385_v60 = vld [vmem:[%s3553_s1 + $0x188] ss:$16 sps:$4 sm:$0xff]   ;;  %v2386_v61 = vld [vmem:[%s3553_s1 + $0x1a4] ss:$16 sps:$4 sm:$0xff]   ;;  %v2388_v62 = vld [vmem:[%s3553_s1 + $0x1ac] ss:$16 sps:$4 sm:$0xff]  }
  0x14   :  { %850 = vmatprep.subr.bf16.mxu0 %v2338_v20  ;;  %932 = vmatprep.subr.bf16.mxu1 %v2340_v21  ;;  %v193_v59 = vrot.slane %v179_v57, %v2861_v49  ;;  %v2390_v63 = vld [vmem:[%s3553_s1 + $0x1a0] ss:$16 sps:$4 sm:$0xff]   ;;  %v2391_v0 = vld [vmem:[%s3553_s1 + $0x1a8] ss:$16 sps:$4 sm:$0xff]   ;;  %v2392_v1 = vld [vmem:[%s3553_s1 + $0x1c4] ss:$16 sps:$4 sm:$0xff]  }
  0x15   :  { %v2394_v2 = vld [vmem:[%s3553_s1 + $0x1cc] ss:$16 sps:$4 sm:$0xff]   ;;  %v2396_v3 = vld [vmem:[%s3553_s1 + $0x1c0] ss:$16 sps:$4 sm:$0xff]   ;;  %v2397_v4 = vld [vmem:[%s3553_s1 + $0x1c8] ss:$16 sps:$4 sm:$0xff]  }
  0x16   :  { %872 = vmatprep.mubr.bf16.mxu0 %v193_v59  ;;  %954 = vmatprep.mubr.bf16.mxu1 %v193_v59  ;;  %v2398_v5 = vld [vmem:[%s3553_s1 + $0x1e4] ss:$16 sps:$4 sm:$0xff]   ;;  %v2400_v6 = vld [vmem:[%s3553_s1 + $0x1ec] ss:$16 sps:$4 sm:$0xff]   ;;  %v2402_v7 = vld [vmem:[%s3553_s1 + $0x1e0] ss:$16 sps:$4 sm:$0xff]   ;;  %v195_v16 = vcombine.high %v193_v59, %v193_v59 }
  0x17   :  { %851 = vmatpush1.bf16.msra.mxu0 %v2342_v22  ;;  %933 = vmatpush1.bf16.msra.mxu1 %v2343_v23  ;;  %v2403_v8 = vld [vmem:[%s3553_s1 + $0x1e8] ss:$16 sps:$4 sm:$0xff]   ;;  %v2406_v9 = vld [vmem:[%s3553_s1 + $0x204] ss:$16 sps:$4 sm:$0xff]   ;;  %v2409_v10 = vld [vmem:[%s3553_s1 + $0x20c] ss:$16 sps:$4 sm:$0xff]  }
  0x18   :  { %852 = vmatprep.subr.bf16.mxu0 %v2344_v24  ;;  %934 = vmatprep.subr.bf16.mxu1 %v2346_v25  ;;  %v2404_v11 = vld [vmem:[%s3553_s1 + $0x200] ss:$16 sps:$4 sm:$0xff]   ;;  %v2407_v13 = vld [vmem:[%s3553_s1 + $0x208] ss:$16 sps:$4 sm:$0xff]   ;;  %v2412_v14 = vld [vmem:[%s3553_s1 + $0x224] ss:$16 sps:$4 sm:$0xff]  }
  0x19   :  { %v2415_v15 = vld [vmem:[%s3553_s1 + $0x22c] ss:$16 sps:$4 sm:$0xff]   ;;  %v2410_v17 = vld [vmem:[%s3553_s1 + $0x220] ss:$16 sps:$4 sm:$0xff]   ;;  %v2413_v18 = vld [vmem:[%s3553_s1 + $0x228] ss:$16 sps:$4 sm:$0xff]  }
  0x1a   :  { %v2418_v19 = vld [vmem:[%s3553_s1 + $0x244] ss:$16 sps:$4 sm:$0xff]   ;;  %v2421_v20 = vld [vmem:[%s3553_s1 + $0x24c] ss:$16 sps:$4 sm:$0xff]   ;;  %v2416_v21 = vld [vmem:[%s3553_s1 + $0x240] ss:$16 sps:$4 sm:$0xff]  }
  0x1b   :  { %853 = vmatpush1.bf16.msra.mxu0 %v2348_v26  ;;  %935 = vmatpush1.bf16.msra.mxu1 %v2349_v27  ;;  %v2419_v22 = vld [vmem:[%s3553_s1 + $0x248] ss:$16 sps:$4 sm:$0xff]   ;;  %v2424_v23 = vld [vmem:[%s3553_s1 + $0x264] ss:$16 sps:$4 sm:$0xff]   ;;  %v2427_v24 = vld [vmem:[%s3553_s1 + $0x26c] ss:$16 sps:$4 sm:$0xff]  }
  0x1c   :  { %854 = vmatprep.subr.bf16.mxu0 %v2350_v28  ;;  %936 = vmatprep.subr.bf16.mxu1 %v2352_v29  ;;  %v2422_v25 = vld [vmem:[%s3553_s1 + $0x260] ss:$16 sps:$4 sm:$0xff]   ;;  %v2425_v26 = vld [vmem:[%s3553_s1 + $0x268] ss:$16 sps:$4 sm:$0xff]   ;;  %v2430_v27 = vld [vmem:[%s3553_s1 + $0x284] ss:$16 sps:$4 sm:$0xff]  }
  0x1d   :  { %v2433_v28 = vld [vmem:[%s3553_s1 + $0x28c] ss:$16 sps:$4 sm:$0xff]   ;;  %v2428_v29 = vld [vmem:[%s3553_s1 + $0x280] ss:$16 sps:$4 sm:$0xff]   ;;  %v2443_v38 = vld [vmem:[%s3553_s1 + $0x2c8] ss:$16 sps:$4 sm:$0xff]  }
  0x1e   :  { %v2445_v36 = vld [vmem:[%s3553_s1 + $0x2cc] ss:$16 sps:$4 sm:$0xff]   ;;  %v2440_v37 = vld [vmem:[%s3553_s1 + $0x2c0] ss:$16 sps:$4 sm:$0xff]   ;;  %v2449_v43 = vld [vmem:[%s3553_s1 + $0x2e8] ss:$16 sps:$4 sm:$0xff]  }
  0x1f   :  { %855 = vmatpush1.bf16.msra.mxu0 %v2354_v30  ;;  %937 = vmatpush1.bf16.msra.mxu1 %v2355_v31  ;;  %v2431_v30 = vld [vmem:[%s3553_s1 + $0x288] ss:$16 sps:$4 sm:$0xff]   ;;  %v2436_v31 = vld [vmem:[%s3553_s1 + $0x2a4] ss:$16 sps:$4 sm:$0xff]   ;;  %v2470_v59 = vld [vmem:[%s3553_s1 + $0x360] ss:$16 sps:$4 sm:$0xff]  }
  0x20   :  { %856 = vmatprep.subr.bf16.mxu0 %v2356_v32  ;;  %938 = vmatprep.subr.bf16.mxu1 %v2358_v33  ;;  %v2439_v32 = vld [vmem:[%s3553_s1 + $0x2ac] ss:$16 sps:$4 sm:$0xff]   ;;  %v2434_v33 = vld [vmem:[%s3553_s1 + $0x2a0] ss:$16 sps:$4 sm:$0xff]   ;;  %v2461_v52 = vld [vmem:[%s3553_s1 + $0x328] ss:$16 sps:$4 sm:$0xff]  }
  0x21   :  { %v2472_v57 = vld [vmem:[%s3553_s1 + $0x364] ss:$16 sps:$4 sm:$0xff]  }
  0x23   :  { %857 = vmatpush1.bf16.msra.mxu0 %v2360_v34  ;;  %939 = vmatpush1.bf16.msra.mxu1 %v2361_v35  ;;  %v2437_v34 = vld [vmem:[%s3553_s1 + $0x2a8] ss:$16 sps:$4 sm:$0xff]   ;;  %v2442_v35 = vld [vmem:[%s3553_s1 + $0x2c4] ss:$16 sps:$4 sm:$0xff]  }
  0x24   :  { %858 = vmatprep.subr.bf16.mxu0 %v2362_v39  ;;  %940 = vmatprep.subr.bf16.mxu1 %v2364_v40  ;;  %v2448_v39 = vld [vmem:[%s3553_s1 + $0x2e4] ss:$16 sps:$4 sm:$0xff]   ;;  %v2451_v40 = vld [vmem:[%s3553_s1 + $0x2ec] ss:$16 sps:$4 sm:$0xff]  }
  0x27   :  { %859 = vmatpush1.bf16.msra.mxu0 %v2366_v41  ;;  %941 = vmatpush1.bf16.msra.mxu1 %v2367_v44  ;;  %v2446_v41 = vld [vmem:[%s3553_s1 + $0x2e0] ss:$16 sps:$4 sm:$0xff]   ;;  %v2454_v44 = vld [vmem:[%s3553_s1 + $0x304] ss:$16 sps:$4 sm:$0xff]  }
  0x28   :  { %860 = vmatprep.subr.bf16.mxu0 %v2368_v45  ;;  %942 = vmatprep.subr.bf16.mxu1 %v2370_v46  ;;  %v2457_v45 = vld [vmem:[%s3553_s1 + $0x30c] ss:$16 sps:$4 sm:$0xff]   ;;  %v2452_v46 = vld [vmem:[%s3553_s1 + $0x300] ss:$16 sps:$4 sm:$0xff]  }
  0x2b   :  { %861 = vmatpush1.bf16.msra.mxu0 %v2372_v47  ;;  %943 = vmatpush1.bf16.msra.mxu1 %v2373_v48  ;;  %v2455_v47 = vld [vmem:[%s3553_s1 + $0x308] ss:$16 sps:$4 sm:$0xff]   ;;  %v2460_v48 = vld [vmem:[%s3553_s1 + $0x324] ss:$16 sps:$4 sm:$0xff]  }
  0x2c   :  { %862 = vmatprep.subr.bf16.mxu0 %v2374_v50  ;;  %944 = vmatprep.subr.bf16.mxu1 %v2376_v51  ;;  %v2463_v50 = vld [vmem:[%s3553_s1 + $0x32c] ss:$16 sps:$4 sm:$0xff]   ;;  %v2458_v51 = vld [vmem:[%s3553_s1 + $0x320] ss:$16 sps:$4 sm:$0xff]  }
  0x2f   :  { %863 = vmatpush1.bf16.msra.mxu0 %v2378_v53  ;;  %945 = vmatpush1.bf16.msra.mxu1 %v2379_v54  ;;  %v2466_v53 = vld [vmem:[%s3553_s1 + $0x344] ss:$16 sps:$4 sm:$0xff]   ;;  %v2469_v54 = vld [vmem:[%s3553_s1 + $0x34c] ss:$16 sps:$4 sm:$0xff]  }
  0x30   :  { %864 = vmatprep.subr.bf16.mxu0 %v2380_v55  ;;  %946 = vmatprep.subr.bf16.mxu1 %v2382_v56  ;;  %v2464_v55 = vld [vmem:[%s3553_s1 + $0x340] ss:$16 sps:$4 sm:$0xff]   ;;  %v2467_v56 = vld [vmem:[%s3553_s1 + $0x348] ss:$16 sps:$4 sm:$0xff]  }
  0x33   :  { %865 = vmatpush1.bf16.msra.mxu0 %v2384_v58  ;;  %947 = vmatpush1.bf16.msra.mxu1 %v2385_v60  ;;  %v2475_v58 = vld [vmem:[%s3553_s1 + $0x36c] ss:$16 sps:$4 sm:$0xff]   ;;  %v2473_v60 = vld [vmem:[%s3553_s1 + $0x368] ss:$16 sps:$4 sm:$0xff]  }
  0x34   :  { %866 = vmatprep.subr.bf16.mxu0 %v2386_v61  ;;  %948 = vmatprep.subr.bf16.mxu1 %v2388_v62  ;;  %v2478_v61 = vld [vmem:[%s3553_s1 + $0x384] ss:$16 sps:$4 sm:$0xff]   ;;  %v2481_v62 = vld [vmem:[%s3553_s1 + $0x38c] ss:$16 sps:$4 sm:$0xff]  }
  0x37   :  { %867 = vmatpush1.bf16.msra.mxu0 %v2390_v63  ;;  %949 = vmatpush1.bf16.msra.mxu1 %v2391_v0  ;;  %v2476_v63 = vld [vmem:[%s3553_s1 + $0x380] ss:$16 sps:$4 sm:$0xff]   ;;  %v2479_v0 = vld [vmem:[%s3553_s1 + $0x388] ss:$16 sps:$4 sm:$0xff]  }
  0x38   :  { %868 = vmatprep.subr.bf16.mxu0 %v2392_v1  ;;  %950 = vmatprep.subr.bf16.mxu1 %v2394_v2  ;;  %v2484_v1 = vld [vmem:[%s3553_s1 + $0x3a4] ss:$16 sps:$4 sm:$0xff]   ;;  %v2487_v2 = vld [vmem:[%s3553_s1 + $0x3ac] ss:$16 sps:$4 sm:$0xff]  }
  0x3b   :  { %869 = vmatpush1.bf16.msra.mxu0 %v2396_v3  ;;  %951 = vmatpush1.bf16.msra.mxu1 %v2397_v4  ;;  %v2482_v3 = vld [vmem:[%s3553_s1 + $0x3a0] ss:$16 sps:$4 sm:$0xff]   ;;  %v2485_v4 = vld [vmem:[%s3553_s1 + $0x3a8] ss:$16 sps:$4 sm:$0xff]  }
  0x3c   :  { %870 = vmatprep.subr.bf16.mxu0 %v2398_v5  ;;  %952 = vmatprep.subr.bf16.mxu1 %v2400_v6  ;;  %v2490_v5 = vld [vmem:[%s3553_s1 + $0x3c4] ss:$16 sps:$4 sm:$0xff]   ;;  %v2493_v6 = vld [vmem:[%s3553_s1 + $0x3cc] ss:$16 sps:$4 sm:$0xff]  }
  0x3f   :  { %871 = vmatpush1.bf16.msra.mxu0 %v2402_v7  ;;  %953 = vmatpush1.bf16.msra.mxu1 %v2403_v8  ;;  %v2488_v7 = vld [vmem:[%s3553_s1 + $0x3c0] ss:$16 sps:$4 sm:$0xff]   ;;  %v2491_v8 = vld [vmem:[%s3553_s1 + $0x3c8] ss:$16 sps:$4 sm:$0xff]  }
  0x40   :  { %881 = vmatprep.subr.bf16.mxu0 %v2406_v9  ;;  %963 = vmatprep.subr.bf16.mxu1 %v2409_v10  ;;  %v2496_v9 = vld [vmem:[%s3553_s1 + $0x3e4] ss:$16 sps:$4 sm:$0xff]   ;;  %v2499_v10 = vld [vmem:[%s3553_s1 + $0x3ec] ss:$16 sps:$4 sm:$0xff]  }
  0x42   :  { %873 = vmatmul.mubr.bf16.vlgmr.msra.gmra.mrb[0].mxu0 %v2937_v12  ;;  %955 = vmatmul.mubr.bf16.vlgmr.msra.gmra.mrb[0].mxu1 %v2937_v12 }
  0x43   :  { %882 = vmatpush1.bf16.msra.mxu0 %v2404_v11  ;;  %964 = vmatpush1.bf16.msra.mxu1 %v2407_v13  ;;  %v2494_v11 = vld [vmem:[%s3553_s1 + $0x3e0] ss:$16 sps:$4 sm:$0xff]   ;;  %v2497_v13 = vld [vmem:[%s3553_s1 + $0x3e8] ss:$16 sps:$4 sm:$0xff]  }
  0x44   :  { %883 = vmatprep.subr.bf16.mxu0 %v2412_v14  ;;  %965 = vmatprep.subr.bf16.mxu1 %v2415_v15  ;;  %v2502_v14 = vld [vmem:[%s3555_s3 + $0x4] ss:$16 sps:$4 sm:$0xff]  }
  0x45   :  { %913 = vmatprep.mubr.bf16.mxu0 %v195_v16  ;;  %995 = vmatprep.mubr.bf16.mxu1 %v195_v16  ;;  %v2505_v15 = vld [vmem:[%s3555_s3 + $0x204] ss:$16 sps:$4 sm:$0xff]   ;;  %v2500_v16 = vld [vmem:[%s3555_s3] ss:$16 sps:$4 sm:$0xff]  }
  0x47   :  { %884 = vmatpush1.bf16.msra.mxu0 %v2410_v17  ;;  %966 = vmatpush1.bf16.msra.mxu1 %v2413_v18  ;;  %v2503_v17 = vld [vmem:[%s3555_s3 + $0x200] ss:$16 sps:$4 sm:$0xff]   ;;  %v194_v18 = vcombine.high %v2937_v12, %v2937_v12 }
  0x48   :  { %885 = vmatprep.subr.bf16.mxu0 %v2418_v19  ;;  %967 = vmatprep.subr.bf16.mxu1 %v2421_v20  ;;  %v2508_v19 = vld [vmem:[%s3555_s3 + $0x24] ss:$16 sps:$4 sm:$0xff]   ;;  %v2509_v12 = vld [vmem:[%s3555_s3 + $0x220] ss:$16 sps:$4 sm:$0xff]  }
  0x49   :  { %v2511_v20 = vld [vmem:[%s3555_s3 + $0x224] ss:$16 sps:$4 sm:$0xff]  }
  0x4b   :  { %886 = vmatpush1.bf16.msra.mxu0 %v2416_v21  ;;  %968 = vmatpush1.bf16.msra.mxu1 %v2419_v22  ;;  %v2506_v21 = vld [vmem:[%s3555_s3 + $0x20] ss:$16 sps:$4 sm:$0xff]   ;;  %v2514_v22 = vld [vmem:[%s3555_s3 + $0x44] ss:$16 sps:$4 sm:$0xff]  }
  0x4c   :  { %887 = vmatprep.subr.bf16.mxu0 %v2424_v23  ;;  %969 = vmatprep.subr.bf16.mxu1 %v2427_v24  ;;  %v2517_v23 = vld [vmem:[%s3555_s3 + $0x244] ss:$16 sps:$4 sm:$0xff]   ;;  %v2512_v24 = vld [vmem:[%s3555_s3 + $0x40] ss:$16 sps:$4 sm:$0xff]  }
  0x4f   :  { %888 = vmatpush1.bf16.msra.mxu0 %v2422_v25  ;;  %970 = vmatpush1.bf16.msra.mxu1 %v2425_v26  ;;  %v2515_v25 = vld [vmem:[%s3555_s3 + $0x240] ss:$16 sps:$4 sm:$0xff]   ;;  %v2520_v26 = vld [vmem:[%s3555_s3 + $0x64] ss:$16 sps:$4 sm:$0xff]  }
  0x50   :  { %889 = vmatprep.subr.bf16.mxu0 %v2430_v27  ;;  %971 = vmatprep.subr.bf16.mxu1 %v2433_v28  ;;  %v2523_v27 = vld [vmem:[%s3555_s3 + $0x264] ss:$16 sps:$4 sm:$0xff]   ;;  %v2518_v28 = vld [vmem:[%s3555_s3 + $0x60] ss:$16 sps:$4 sm:$0xff]  }
  0x53   :  { %890 = vmatpush1.bf16.msra.mxu0 %v2428_v29  ;;  %972 = vmatpush1.bf16.msra.mxu1 %v2431_v30  ;;  %v2521_v29 = vld [vmem:[%s3555_s3 + $0x260] ss:$16 sps:$4 sm:$0xff]   ;;  %v2526_v30 = vld [vmem:[%s3555_s3 + $0x84] ss:$16 sps:$4 sm:$0xff]  }
  0x54   :  { %891 = vmatprep.subr.bf16.mxu0 %v2436_v31  ;;  %973 = vmatprep.subr.bf16.mxu1 %v2439_v32  ;;  %v2529_v31 = vld [vmem:[%s3555_s3 + $0x284] ss:$16 sps:$4 sm:$0xff]   ;;  %v2524_v32 = vld [vmem:[%s3555_s3 + $0x80] ss:$16 sps:$4 sm:$0xff]  }
  0x57   :  { %892 = vmatpush1.bf16.msra.mxu0 %v2434_v33  ;;  %974 = vmatpush1.bf16.msra.mxu1 %v2437_v34  ;;  %v2527_v33 = vld [vmem:[%s3555_s3 + $0x280] ss:$16 sps:$4 sm:$0xff]   ;;  %v2532_v34 = vld [vmem:[%s3555_s3 + $0xa4] ss:$16 sps:$4 sm:$0xff]  }
  0x58   :  { %893 = vmatprep.subr.bf16.mxu0 %v2442_v35  ;;  %975 = vmatprep.subr.bf16.mxu1 %v2445_v36  ;;  %v2535_v35 = vld [vmem:[%s3555_s3 + $0x2a4] ss:$16 sps:$4 sm:$0xff]   ;;  %v2530_v36 = vld [vmem:[%s3555_s3 + $0xa0] ss:$16 sps:$4 sm:$0xff]  }
  0x5b   :  { %894 = vmatpush1.bf16.msra.mxu0 %v2440_v37  ;;  %976 = vmatpush1.bf16.msra.mxu1 %v2443_v38  ;;  %v2533_v37 = vld [vmem:[%s3555_s3 + $0x2a0] ss:$16 sps:$4 sm:$0xff]   ;;  %v2538_v38 = vld [vmem:[%s3555_s3 + $0xc4] ss:$16 sps:$4 sm:$0xff]  }
  0x5c   :  { %895 = vmatprep.subr.bf16.mxu0 %v2448_v39  ;;  %977 = vmatprep.subr.bf16.mxu1 %v2451_v40  ;;  %v2541_v39 = vld [vmem:[%s3555_s3 + $0x2c4] ss:$16 sps:$4 sm:$0xff]   ;;  %v2536_v40 = vld [vmem:[%s3555_s3 + $0xc0] ss:$16 sps:$4 sm:$0xff]  }
  0x5f   :  { %896 = vmatpush1.bf16.msra.mxu0 %v2446_v41  ;;  %978 = vmatpush1.bf16.msra.mxu1 %v2449_v43  ;;  %v2539_v41 = vld [vmem:[%s3555_s3 + $0x2c0] ss:$16 sps:$4 sm:$0xff]   ;;  %v2544_v43 = vld [vmem:[%s3555_s3 + $0xe4] ss:$16 sps:$4 sm:$0xff]  }
  0x60   :  { %897 = vmatprep.subr.bf16.mxu0 %v2454_v44  ;;  %979 = vmatprep.subr.bf16.mxu1 %v2457_v45  ;;  %v2547_v44 = vld [vmem:[%s3555_s3 + $0x2e4] ss:$16 sps:$4 sm:$0xff]   ;;  %v2542_v45 = vld [vmem:[%s3555_s3 + $0xe0] ss:$16 sps:$4 sm:$0xff]  }
  0x63   :  { %898 = vmatpush1.bf16.msra.mxu0 %v2452_v46  ;;  %980 = vmatpush1.bf16.msra.mxu1 %v2455_v47  ;;  %v2545_v46 = vld [vmem:[%s3555_s3 + $0x2e0] ss:$16 sps:$4 sm:$0xff]   ;;  %v2550_v47 = vld [vmem:[%s3555_s3 + $0x104] ss:$16 sps:$4 sm:$0xff]  }
  0x64   :  { %899 = vmatprep.subr.bf16.mxu0 %v2460_v48  ;;  %981 = vmatprep.subr.bf16.mxu1 %v2463_v50  ;;  %v2553_v48 = vld [vmem:[%s3555_s3 + $0x304] ss:$16 sps:$4 sm:$0xff]   ;;  %v2548_v50 = vld [vmem:[%s3555_s3 + $0x100] ss:$16 sps:$4 sm:$0xff]  }
  0x67   :  { %900 = vmatpush1.bf16.msra.mxu0 %v2458_v51  ;;  %982 = vmatpush1.bf16.msra.mxu1 %v2461_v52  ;;  %v2551_v51 = vld [vmem:[%s3555_s3 + $0x300] ss:$16 sps:$4 sm:$0xff]   ;;  %v2556_v52 = vld [vmem:[%s3555_s3 + $0x124] ss:$16 sps:$4 sm:$0xff]  }
  0x68   :  { %901 = vmatprep.subr.bf16.mxu0 %v2466_v53  ;;  %983 = vmatprep.subr.bf16.mxu1 %v2469_v54  ;;  %v2559_v53 = vld [vmem:[%s3555_s3 + $0x324] ss:$16 sps:$4 sm:$0xff]   ;;  %v2554_v54 = vld [vmem:[%s3555_s3 + $0x120] ss:$16 sps:$4 sm:$0xff]  }
  0x6b   :  { %902 = vmatpush1.bf16.msra.mxu0 %v2464_v55  ;;  %984 = vmatpush1.bf16.msra.mxu1 %v2467_v56  ;;  %v2557_v55 = vld [vmem:[%s3555_s3 + $0x320] ss:$16 sps:$4 sm:$0xff]   ;;  %v2562_v56 = vld [vmem:[%s3555_s3 + $0x144] ss:$16 sps:$4 sm:$0xff]  }
  0x6c   :  { %903 = vmatprep.subr.bf16.mxu0 %v2472_v57  ;;  %985 = vmatprep.subr.bf16.mxu1 %v2475_v58  ;;  %v2565_v57 = vld [vmem:[%s3555_s3 + $0x344] ss:$16 sps:$4 sm:$0xff]   ;;  %v2560_v58 = vld [vmem:[%s3555_s3 + $0x140] ss:$16 sps:$4 sm:$0xff]  }
  0x6f   :  { %904 = vmatpush1.bf16.msra.mxu0 %v2470_v59  ;;  %986 = vmatpush1.bf16.msra.mxu1 %v2473_v60  ;;  %v2563_v59 = vld [vmem:[%s3555_s3 + $0x340] ss:$16 sps:$4 sm:$0xff]   ;;  %v2568_v60 = vld [vmem:[%s3555_s3 + $0x164] ss:$16 sps:$4 sm:$0xff]  }
  0x70   :  { %905 = vmatprep.subr.bf16.mxu0 %v2478_v61  ;;  %987 = vmatprep.subr.bf16.mxu1 %v2481_v62  ;;  %v2571_v61 = vld [vmem:[%s3555_s3 + $0x364] ss:$16 sps:$4 sm:$0xff]   ;;  %v2566_v62 = vld [vmem:[%s3555_s3 + $0x160] ss:$16 sps:$4 sm:$0xff]  }
  0x73   :  { %906 = vmatpush1.bf16.msra.mxu0 %v2476_v63  ;;  %988 = vmatpush1.bf16.msra.mxu1 %v2479_v0  ;;  %v2569_v63 = vld [vmem:[%s3555_s3 + $0x360] ss:$16 sps:$4 sm:$0xff]   ;;  %v2574_v0 = vld [vmem:[%s3555_s3 + $0x184] ss:$16 sps:$4 sm:$0xff]  }
  0x74   :  { %907 = vmatprep.subr.bf16.mxu0 %v2484_v1  ;;  %989 = vmatprep.subr.bf16.mxu1 %v2487_v2  ;;  %v2577_v1 = vld [vmem:[%s3555_s3 + $0x384] ss:$16 sps:$4 sm:$0xff]   ;;  %v2572_v2 = vld [vmem:[%s3555_s3 + $0x180] ss:$16 sps:$4 sm:$0xff]  }
  0x77   :  { %908 = vmatpush1.bf16.msra.mxu0 %v2482_v3  ;;  %990 = vmatpush1.bf16.msra.mxu1 %v2485_v4  ;;  %v2575_v3 = vld [vmem:[%s3555_s3 + $0x380] ss:$16 sps:$4 sm:$0xff]   ;;  %v2580_v4 = vld [vmem:[%s3555_s3 + $0x1a4] ss:$16 sps:$4 sm:$0xff]  }
  0x78   :  { %909 = vmatprep.subr.bf16.mxu0 %v2490_v5  ;;  %991 = vmatprep.subr.bf16.mxu1 %v2493_v6  ;;  %v2583_v5 = vld [vmem:[%s3555_s3 + $0x3a4] ss:$16 sps:$4 sm:$0xff]   ;;  %v2578_v6 = vld [vmem:[%s3555_s3 + $0x1a0] ss:$16 sps:$4 sm:$0xff]  }
  0x7b   :  { %910 = vmatpush1.bf16.msra.mxu0 %v2488_v7  ;;  %992 = vmatpush1.bf16.msra.mxu1 %v2491_v8  ;;  %v2581_v7 = vld [vmem:[%s3555_s3 + $0x3a0] ss:$16 sps:$4 sm:$0xff]   ;;  %v2586_v8 = vld [vmem:[%s3555_s3 + $0x1c4] ss:$16 sps:$4 sm:$0xff]  }
  0x7c   :  { %911 = vmatprep.subr.bf16.mxu0 %v2496_v9  ;;  %993 = vmatprep.subr.bf16.mxu1 %v2499_v10  ;;  %v2589_v9 = vld [vmem:[%s3555_s3 + $0x3c4] ss:$16 sps:$4 sm:$0xff]   ;;  %v2584_v10 = vld [vmem:[%s3555_s3 + $0x1c0] ss:$16 sps:$4 sm:$0xff]  }
  0x7f   :  { %912 = vmatpush1.bf16.msra.mxu0 %v2494_v11  ;;  %994 = vmatpush1.bf16.msra.mxu1 %v2497_v13  ;;  %v2587_v11 = vld [vmem:[%s3555_s3 + $0x3c0] ss:$16 sps:$4 sm:$0xff]   ;;  %v2592_v13 = vld [vmem:[%s3555_s3 + $0x1e4] ss:$16 sps:$4 sm:$0xff]  }
  0x80   :  { %1802 = vmatprep.subr.bf16.mxu0 %v2502_v14  ;;  %1843 = vmatprep.subr.bf16.mxu1 %v2505_v15  ;;  %v2595_v14 = vld [vmem:[%s3555_s3 + $0x3e4] ss:$16 sps:$4 sm:$0xff]   ;;  %v2590_v15 = vld [vmem:[%s3555_s3 + $0x1e0] ss:$16 sps:$4 sm:$0xff]  }
  0x82   :  { %914 = vmatmul.mubr.bf16.vlgmr.msra.gmra.mrb[0].mxu0 %v194_v18  ;;  %996 = vmatmul.mubr.bf16.vlgmr.msra.gmra.mrb[0].mxu1 %v194_v18  ;;  %v2601_v18 = vld [vmem:[%s3555_s3 + $0x20c] ss:$16 sps:$4 sm:$0xff]  }
  0x83   :  { %1803 = vmatpush1.bf16.msra.mxu0 %v2500_v16  ;;  %1844 = vmatpush1.bf16.msra.mxu1 %v2503_v17  ;;  %v2593_v16 = vld [vmem:[%s3555_s3 + $0x3e0] ss:$16 sps:$4 sm:$0xff]   ;;  %v2598_v17 = vld [vmem:[%s3555_s3 + $0xc] ss:$16 sps:$4 sm:$0xff]  }
  0x84   :  { %1804 = vmatprep.subr.bf16.mxu0 %v2508_v19  ;;  %1845 = vmatprep.subr.bf16.mxu1 %v2511_v20  ;;  %v153_v19 = vsub.s32 0, %v2843_v42  ;;  %v161_v20 = vsub.s32 2, %v2843_v42 }
  0x87   :  { %1805 = vmatpush1.bf16.msra.mxu0 %v2506_v21  ;;  %1846 = vmatpush1.bf16.msra.mxu1 %v2509_v12  ;;  %v149_v21 = vld [vmem:[%s3556_s2] sm:$0xf]  ;;  %v157_v12 = vsub.s32 1, %v2843_v42 }
  0x88   :  { %1806 = vmatprep.subr.bf16.mxu0 %v2514_v22  ;;  %1847 = vmatprep.subr.bf16.mxu1 %v2517_v23  ;;  %v165_v22 = vsub.s32 3, %v2843_v42  ;;  %v154_v23 = vrot.slane %v149_v21, %v153_v19 }
  0x8b   :  { %1807 = vmatpush1.bf16.msra.mxu0 %v2512_v24  ;;  %1848 = vmatpush1.bf16.msra.mxu1 %v2515_v25  ;;  %v162_v24 = vrot.slane %v149_v21, %v161_v20  ;;  %v158_v25 = vrot.slane %v149_v21, %v157_v12 }
  0x8c   :  { %1808 = vmatprep.subr.bf16.mxu0 %v2520_v26  ;;  %1849 = vmatprep.subr.bf16.mxu1 %v2523_v27  ;;  %v166_v26 = vrot.slane %v149_v21, %v165_v22  ;;  %v2647_v21 = vld [vmem:[%s3555_s3 + $0x308] ss:$16 sps:$4 sm:$0xff]  }
  0x8f   :  { %1809 = vmatpush1.bf16.msra.mxu0 %v2518_v28  ;;  %1850 = vmatpush1.bf16.msra.mxu1 %v2521_v29 }
  0x90   :  { %1810 = vmatprep.subr.bf16.mxu0 %v2526_v30  ;;  %1851 = vmatprep.subr.bf16.mxu1 %v2529_v31 }
  0x93   :  { %1811 = vmatpush1.bf16.msra.mxu0 %v2524_v32  ;;  %1852 = vmatpush1.bf16.msra.mxu1 %v2527_v33 }
  0x94   :  { %1812 = vmatprep.subr.bf16.mxu0 %v2532_v34  ;;  %1853 = vmatprep.subr.bf16.mxu1 %v2535_v35 }
  0x97   :  { %1813 = vmatpush1.bf16.msra.mxu0 %v2530_v36  ;;  %1854 = vmatpush1.bf16.msra.mxu1 %v2533_v37 }
  0x98   :  { %1814 = vmatprep.subr.bf16.mxu0 %v2538_v38  ;;  %1855 = vmatprep.subr.bf16.mxu1 %v2541_v39 }
  0x9b   :  { %1815 = vmatpush1.bf16.msra.mxu0 %v2536_v40  ;;  %1856 = vmatpush1.bf16.msra.mxu1 %v2539_v41 }
  0x9c   :  { %1816 = vmatprep.subr.bf16.mxu0 %v2544_v43  ;;  %1857 = vmatprep.subr.bf16.mxu1 %v2547_v44 }
  0x9f   :  { %1817 = vmatpush1.bf16.msra.mxu0 %v2542_v45  ;;  %1858 = vmatpush1.bf16.msra.mxu1 %v2545_v46  ;;  %v2596_v46 = vld [vmem:[%s3555_s3 + $0x8] ss:$16 sps:$4 sm:$0xff]  }
  0xa0   :  { %1818 = vmatprep.subr.bf16.mxu0 %v2550_v47  ;;  %1859 = vmatprep.subr.bf16.mxu1 %v2553_v48  ;;  %v2599_v47 = vld [vmem:[%s3555_s3 + $0x208] ss:$16 sps:$4 sm:$0xff]  }
  0xa3   :  { %1819 = vmatpush1.bf16.msra.mxu0 %v2548_v50  ;;  %1860 = vmatpush1.bf16.msra.mxu1 %v2551_v51  ;;  %v2604_v51 = vld [vmem:[%s3555_s3 + $0x2c] ss:$16 sps:$4 sm:$0xff]  }
  0xa4   :  { %1820 = vmatprep.subr.bf16.mxu0 %v2556_v52  ;;  %1861 = vmatprep.subr.bf16.mxu1 %v2559_v53  ;;  %v2607_v52 = vld [vmem:[%s3555_s3 + $0x22c] ss:$16 sps:$4 sm:$0xff]   ;;  %v2602_v53 = vld [vmem:[%s3555_s3 + $0x28] ss:$16 sps:$4 sm:$0xff]  }
  0xa7   :  { %1821 = vmatpush1.bf16.msra.mxu0 %v2554_v54  ;;  %1862 = vmatpush1.bf16.msra.mxu1 %v2557_v55  ;;  %v2605_v54 = vld [vmem:[%s3555_s3 + $0x228] ss:$16 sps:$4 sm:$0xff]   ;;  %v2610_v55 = vld [vmem:[%s3555_s3 + $0x4c] ss:$16 sps:$4 sm:$0xff]  }
  0xa8   :  { %1822 = vmatprep.subr.bf16.mxu0 %v2562_v56  ;;  %1863 = vmatprep.subr.bf16.mxu1 %v2565_v57  ;;  %v2613_v56 = vld [vmem:[%s3555_s3 + $0x24c] ss:$16 sps:$4 sm:$0xff]   ;;  %v2608_v57 = vld [vmem:[%s3555_s3 + $0x48] ss:$16 sps:$4 sm:$0xff]  }
  0xab   :  { %1823 = vmatpush1.bf16.msra.mxu0 %v2560_v58  ;;  %1864 = vmatpush1.bf16.msra.mxu1 %v2563_v59  ;;  %v2611_v58 = vld [vmem:[%s3555_s3 + $0x248] ss:$16 sps:$4 sm:$0xff]   ;;  %v2616_v59 = vld [vmem:[%s3555_s3 + $0x6c] ss:$16 sps:$4 sm:$0xff]  }
  0xac   :  { %1824 = vmatprep.subr.bf16.mxu0 %v2568_v60  ;;  %1865 = vmatprep.subr.bf16.mxu1 %v2571_v61  ;;  %v2619_v60 = vld [vmem:[%s3555_s3 + $0x26c] ss:$16 sps:$4 sm:$0xff]   ;;  %v2614_v61 = vld [vmem:[%s3555_s3 + $0x68] ss:$16 sps:$4 sm:$0xff]  }
  0xaf   :  { %1825 = vmatpush1.bf16.msra.mxu0 %v2566_v62  ;;  %1866 = vmatpush1.bf16.msra.mxu1 %v2569_v63  ;;  %v2617_v62 = vld [vmem:[%s3555_s3 + $0x268] ss:$16 sps:$4 sm:$0xff]   ;;  %v2622_v63 = vld [vmem:[%s3555_s3 + $0x8c] ss:$16 sps:$4 sm:$0xff]  }
  0xb0   :  { %1826 = vmatprep.subr.bf16.mxu0 %v2574_v0  ;;  %1867 = vmatprep.subr.bf16.mxu1 %v2577_v1  ;;  %v2625_v0 = vld [vmem:[%s3555_s3 + $0x28c] ss:$16 sps:$4 sm:$0xff]   ;;  %v2620_v1 = vld [vmem:[%s3555_s3 + $0x88] ss:$16 sps:$4 sm:$0xff]  }
  0xb3   :  { %1827 = vmatpush1.bf16.msra.mxu0 %v2572_v2  ;;  %1868 = vmatpush1.bf16.msra.mxu1 %v2575_v3  ;;  %v2623_v2 = vld [vmem:[%s3555_s3 + $0x288] ss:$16 sps:$4 sm:$0xff]   ;;  %v2628_v3 = vld [vmem:[%s3555_s3 + $0xac] ss:$16 sps:$4 sm:$0xff]  }
  0xb4   :  { %1828 = vmatprep.subr.bf16.mxu0 %v2580_v4  ;;  %1869 = vmatprep.subr.bf16.mxu1 %v2583_v5  ;;  %v2631_v4 = vld [vmem:[%s3555_s3 + $0x2ac] ss:$16 sps:$4 sm:$0xff]   ;;  %v2626_v5 = vld [vmem:[%s3555_s3 + $0xa8] ss:$16 sps:$4 sm:$0xff]  }
  0xb7   :  { %1829 = vmatpush1.bf16.msra.mxu0 %v2578_v6  ;;  %1870 = vmatpush1.bf16.msra.mxu1 %v2581_v7  ;;  %v2629_v6 = vld [vmem:[%s3555_s3 + $0x2a8] ss:$16 sps:$4 sm:$0xff]   ;;  %v2634_v7 = vld [vmem:[%s3555_s3 + $0xcc] ss:$16 sps:$4 sm:$0xff]  }
  0xb8   :  { %1830 = vmatprep.subr.bf16.mxu0 %v2586_v8  ;;  %1871 = vmatprep.subr.bf16.mxu1 %v2589_v9  ;;  %v2637_v8 = vld [vmem:[%s3555_s3 + $0x2cc] ss:$16 sps:$4 sm:$0xff]   ;;  %v2632_v9 = vld [vmem:[%s3555_s3 + $0xc8] ss:$16 sps:$4 sm:$0xff]  }
  0xbb   :  { %1831 = vmatpush1.bf16.msra.mxu0 %v2584_v10  ;;  %1872 = vmatpush1.bf16.msra.mxu1 %v2587_v11  ;;  %v2635_v10 = vld [vmem:[%s3555_s3 + $0x2c8] ss:$16 sps:$4 sm:$0xff]   ;;  %v2640_v11 = vld [vmem:[%s3555_s3 + $0xec] ss:$16 sps:$4 sm:$0xff]  }
  0xbc   :  { %1832 = vmatprep.subr.bf16.mxu0 %v2592_v13  ;;  %1873 = vmatprep.subr.bf16.mxu1 %v2595_v14  ;;  %v2643_v13 = vld [vmem:[%s3555_s3 + $0x2ec] ss:$16 sps:$4 sm:$0xff]   ;;  %v2638_v14 = vld [vmem:[%s3555_s3 + $0xe8] ss:$16 sps:$4 sm:$0xff]  }
  0xbf   :  { %1833 = vmatpush1.bf16.msra.mxu0 %v2590_v15  ;;  %1874 = vmatpush1.bf16.msra.mxu1 %v2593_v16  ;;  %v2641_v15 = vld [vmem:[%s3555_s3 + $0x2e8] ss:$16 sps:$4 sm:$0xff]   ;;  %v2646_v16 = vld [vmem:[%s3555_s3 + $0x10c] ss:$16 sps:$4 sm:$0xff]  }
  0xc0   :  { %1884 = vmatprep.subr.bf16.mxu0 %v2598_v17  ;;  %1925 = vmatprep.subr.bf16.mxu1 %v2601_v18  ;;  %v2649_v17 = vld [vmem:[%s3555_s3 + $0x30c] ss:$16 sps:$4 sm:$0xff]   ;;  %v2644_v18 = vld [vmem:[%s3555_s3 + $0x108] ss:$16 sps:$4 sm:$0xff]  }
 0x155   :  { %v915_v27 = vpop.f32.mrb[0].mxu0  ;;  %v997_v28 = vpop.f32.mrb[0].mxu1 }
 0x156   :  { %v2294_v29 = vadd.f32 %v915_v27, %v154_v23  ;;  %v2296_v30 = vadd.f32 %v997_v28, %v162_v24  ;;  %v917_v31 = vpop.f32.mrb[1].mxu0  ;;  %v999_v32 = vpop.f32.mrb[1].mxu1  ;;  %v2652_v23 = vld [vmem:[%s3555_s3 + $0x12c] ss:$16 sps:$4 sm:$0xff]  }
 0x157   :  { %v2295_v33 = vadd.f32 %v917_v31, %v158_v25  ;;  %v2297_v34 = vadd.f32 %v999_v32, %v166_v26  ;;  %v919_v35 = vpop.f32.mrb[2].mxu0  ;;  %v1001_v36 = vpop.f32.mrb[2].mxu1  ;;  %v2655_v24 = vld [vmem:[%s3555_s3 + $0x32c] ss:$16 sps:$4 sm:$0xff]   ;;  %v2650_v25 = vld [vmem:[%s3555_s3 + $0x128] ss:$16 sps:$4 sm:$0xff]  }
 0x158   :  { %v1004_v37 = vmax.f32 %v2294_v29, 0.0  ;;  %v1006_v38 = vmax.f32 %v2296_v30, 0.0  ;;  %v920_v39 = vpop.f32.mrb[3].mxu0  ;;  %v1002_v40 = vpop.f32.mrb[3].mxu1  ;;  %v2653_v26 = vld [vmem:[%s3555_s3 + $0x328] ss:$16 sps:$4 sm:$0xff]  }
 0x159   :  { %v1005_v41 = vmax.f32 %v2295_v33, 0.0  ;;  %v1007_v43 = vmax.f32 %v2297_v34, 0.0  ;;  %v2658_v27 = vld [vmem:[%s3555_s3 + $0x14c] ss:$16 sps:$4 sm:$0xff]   ;;  %v2656_v29 = vld [vmem:[%s3555_s3 + $0x148] ss:$16 sps:$4 sm:$0xff]  }
 0x15a   :  { %v3345_v48 = vpack.c.bf16 %v1004_v37, %v1004_v37  ;;  %v3347_v50 = vpack.c.bf16 %v1006_v38, %v1006_v38  ;;  %v2661_v28 = vld [vmem:[%s3555_s3 + $0x34c] ss:$16 sps:$4 sm:$0xff]   ;;  %v2659_v30 = vld [vmem:[%s3555_s3 + $0x348] ss:$16 sps:$4 sm:$0xff]  }
 0x15b   :  { %v1009_v44 = vpack.c.bf16 %v1005_v41, %v1005_v41  ;;  %v1011_v45 = vpack.c.bf16 %v1007_v43, %v1007_v43  ;;  %v2664_v31 = vld [vmem:[%s3555_s3 + $0x16c] ss:$16 sps:$4 sm:$0xff]   ;;  %v2662_v33 = vld [vmem:[%s3555_s3 + $0x168] ss:$16 sps:$4 sm:$0xff]  }
 0x15c   :  { %v2667_v32 = vld [vmem:[%s3555_s3 + $0x36c] ss:$16 sps:$4 sm:$0xff]   ;;  %v2665_v34 = vld [vmem:[%s3555_s3 + $0x368] ss:$16 sps:$4 sm:$0xff]  }
 0x15d   :  { %1834 = vmatprep.mubr.bf16.mxu0 %v1009_v44  ;;  %1875 = vmatprep.mubr.bf16.mxu1 %v1011_v45  ;;  %v2670_v35 = vld [vmem:[%s3555_s3 + $0x18c] ss:$16 sps:$4 sm:$0xff]   ;;  %v2668_v37 = vld [vmem:[%s3555_s3 + $0x188] ss:$16 sps:$4 sm:$0xff]  }
 0x15e   :  { %1835 = vmatmul.mubr.bf16.vlgmr.msra.gmra.mrb[4].mxu0 %v3345_v48  ;;  %1876 = vmatmul.mubr.bf16.vlgmr.msra.gmra.mrb[4].mxu1 %v3347_v50  ;;  %v2673_v36 = vld [vmem:[%s3555_s3 + $0x38c] ss:$16 sps:$4 sm:$0xff]   ;;  %v2671_v38 = vld [vmem:[%s3555_s3 + $0x388] ss:$16 sps:$4 sm:$0xff]  }
 0x15f   :  { %1885 = vmatpush1.bf16.msra.mxu0 %v2596_v46  ;;  %1926 = vmatpush1.bf16.msra.mxu1 %v2599_v47  ;;  %v2676_v39 = vld [vmem:[%s3555_s3 + $0x1ac] ss:$16 sps:$4 sm:$0xff]   ;;  %v2674_v41 = vld [vmem:[%s3555_s3 + $0x1a8] ss:$16 sps:$4 sm:$0xff]  }
 0x160   :  { %1916 = vmatprep.mubr.bf16.mxu0 %v1009_v44  ;;  %1957 = vmatprep.mubr.bf16.mxu1 %v1011_v45  ;;  %v2679_v40 = vld [vmem:[%s3555_s3 + $0x3ac] ss:$16 sps:$4 sm:$0xff]   ;;  %v2677_v43 = vld [vmem:[%s3555_s3 + $0x3a8] ss:$16 sps:$4 sm:$0xff]  }
 0x161   :  { %1886 = vmatprep.subr.bf16.mxu0 %v2604_v51  ;;  %1927 = vmatprep.subr.bf16.mxu1 %v2607_v52  ;;  %v2682_v44 = vld [vmem:[%s3555_s3 + $0x1cc] ss:$16 sps:$4 sm:$0xff]   ;;  %v2680_v46 = vld [vmem:[%s3555_s3 + $0x1c8] ss:$16 sps:$4 sm:$0xff]  }
 0x162   :  { %v2685_v45 = vld [vmem:[%s3555_s3 + $0x3cc] ss:$16 sps:$4 sm:$0xff]   ;;  %v2683_v47 = vld [vmem:[%s3555_s3 + $0x3c8] ss:$16 sps:$4 sm:$0xff]  }
 0x163   :  { %1887 = vmatpush1.bf16.msra.mxu0 %v2602_v53  ;;  %1928 = vmatpush1.bf16.msra.mxu1 %v2605_v54  ;;  %v2688_v51 = vld [vmem:[%s3555_s3 + $0x1ec] ss:$16 sps:$4 sm:$0xff]   ;;  %v2686_v53 = vld [vmem:[%s3555_s3 + $0x1e8] ss:$16 sps:$4 sm:$0xff]  }
 0x164   :  { %1888 = vmatprep.subr.bf16.mxu0 %v2610_v55  ;;  %1929 = vmatprep.subr.bf16.mxu1 %v2613_v56  ;;  %v2691_v52 = vld [vmem:[%s3555_s3 + $0x3ec] ss:$16 sps:$4 sm:$0xff]   ;;  %v2689_v54 = vld [vmem:[%s3555_s3 + $0x3e8] ss:$16 sps:$4 sm:$0xff]   ;;  %v2695_v55 = vmov 1983009808  }
 0x165   :  { %v1970_v56 = vunpack.c.l.s4 %v2695_v55 }
 0x167   :  { %1889 = vmatpush1.bf16.msra.mxu0 %v2608_v57  ;;  %1930 = vmatpush1.bf16.msra.mxu1 %v2611_v58  ;;  %v1971_v57 = vunpack.c.0.s8 %v1970_v56  ;;  %v1140_v58 = vld [vmem:[%s3557_s4] sm:$0xf] }
 0x168   :  { %1890 = vmatprep.subr.bf16.mxu0 %v2616_v59  ;;  %1931 = vmatprep.subr.bf16.mxu1 %v2619_v60  ;;  %v2692_v59 = vld [vmem:[%s3554_s0] sm:$0xf] }
 0x169   :  { %v1966_v60 = vunpack.c.l.bf16 %v2692_v59 }
 0x16b   :  { %1891 = vmatpush1.bf16.msra.mxu0 %v2614_v61  ;;  %1932 = vmatpush1.bf16.msra.mxu1 %v2617_v62  ;;  %v1974_v61 = vsub.s32 %v1971_v57, %v2843_v42  ;;  %v1145_v62 = vrot.slane %v1140_v58, %v153_v19 }
 0x16c   :  { %1892 = vmatprep.subr.bf16.mxu0 %v2622_v63  ;;  %1933 = vmatprep.subr.bf16.mxu1 %v2625_v0 }
 0x16f   :  { %1893 = vmatpush1.bf16.msra.mxu0 %v2620_v1  ;;  %1934 = vmatpush1.bf16.msra.mxu1 %v2623_v2 }
 0x170   :  { %1894 = vmatprep.subr.bf16.mxu0 %v2628_v3  ;;  %1935 = vmatprep.subr.bf16.mxu1 %v2631_v4 }
 0x173   :  { %1895 = vmatpush1.bf16.msra.mxu0 %v2626_v5  ;;  %1936 = vmatpush1.bf16.msra.mxu1 %v2629_v6 }
 0x174   :  { %1896 = vmatprep.subr.bf16.mxu0 %v2634_v7  ;;  %1937 = vmatprep.subr.bf16.mxu1 %v2637_v8 }
 0x177   :  { %1897 = vmatpush1.bf16.msra.mxu0 %v2632_v9  ;;  %1938 = vmatpush1.bf16.msra.mxu1 %v2635_v10 }
 0x178   :  { %1898 = vmatprep.subr.bf16.mxu0 %v2640_v11  ;;  %1939 = vmatprep.subr.bf16.mxu1 %v2643_v13 }
 0x17b   :  { %1899 = vmatpush1.bf16.msra.mxu0 %v2638_v14  ;;  %1940 = vmatpush1.bf16.msra.mxu1 %v2641_v15 }
 0x17c   :  { %1900 = vmatprep.subr.bf16.mxu0 %v2646_v16  ;;  %1941 = vmatprep.subr.bf16.mxu1 %v2649_v17  ;;  %v1968_v17 = vcombine.high %v1966_v60, %v1966_v60 }
 0x17f   :  { %1901 = vmatpush1.bf16.msra.mxu0 %v2644_v18  ;;  %1942 = vmatpush1.bf16.msra.mxu1 %v2647_v21  ;;  %v1982_v18 = vrot.slane %v1968_v17, %v1974_v61  ;;  %v1157_v21 = vrot.slane %v1140_v58, %v165_v22 }
 0x180   :  { %1902 = vmatprep.subr.bf16.mxu0 %v2652_v23  ;;  %1943 = vmatprep.subr.bf16.mxu1 %v2655_v24 }
 0x183   :  { %1903 = vmatpush1.bf16.msra.mxu0 %v2650_v25  ;;  %1944 = vmatpush1.bf16.msra.mxu1 %v2653_v26 }
 0x184   :  { %1904 = vmatprep.subr.bf16.mxu0 %v2658_v27  ;;  %1945 = vmatprep.subr.bf16.mxu1 %v2661_v28 }
 0x187   :  { %1905 = vmatpush1.bf16.msra.mxu0 %v2656_v29  ;;  %1946 = vmatpush1.bf16.msra.mxu1 %v2659_v30  ;;  %v1984_v29 = vcombine.high %v1982_v18, %v1982_v18 }
 0x188   :  { %1906 = vmatprep.subr.bf16.mxu0 %v2664_v31  ;;  %1947 = vmatprep.subr.bf16.mxu1 %v2667_v32 }
 0x18b   :  { %1907 = vmatpush1.bf16.msra.mxu0 %v2662_v33  ;;  %1948 = vmatpush1.bf16.msra.mxu1 %v2665_v34 }
 0x18c   :  { %1908 = vmatprep.subr.bf16.mxu0 %v2670_v35  ;;  %1949 = vmatprep.subr.bf16.mxu1 %v2673_v36 }
 0x18f   :  { %1909 = vmatpush1.bf16.msra.mxu0 %v2668_v37  ;;  %1950 = vmatpush1.bf16.msra.mxu1 %v2671_v38 }
 0x190   :  { %1910 = vmatprep.subr.bf16.mxu0 %v2676_v39  ;;  %1951 = vmatprep.subr.bf16.mxu1 %v2679_v40 }
 0x193   :  { %1911 = vmatpush1.bf16.msra.mxu0 %v2674_v41  ;;  %1952 = vmatpush1.bf16.msra.mxu1 %v2677_v43 }
 0x194   :  { %1912 = vmatprep.subr.bf16.mxu0 %v2682_v44  ;;  %1953 = vmatprep.subr.bf16.mxu1 %v2685_v45 }
 0x197   :  { %1913 = vmatpush1.bf16.msra.mxu0 %v2680_v46  ;;  %1954 = vmatpush1.bf16.msra.mxu1 %v2683_v47 }
 0x198   :  { %1914 = vmatprep.subr.bf16.mxu0 %v2688_v51  ;;  %1955 = vmatprep.subr.bf16.mxu1 %v2691_v52 }
 0x19b   :  { %1915 = vmatpush1.bf16.msra.mxu0 %v2686_v53  ;;  %1956 = vmatpush1.bf16.msra.mxu1 %v2689_v54 }
 0x19e   :  { %1917 = vmatmul.mubr.bf16.vlgmr.msra.gmra.mrb[8].mxu0 %v3345_v48  ;;  %1958 = vmatmul.mubr.bf16.vlgmr.msra.gmra.mrb[8].mxu1 %v3347_v50  ;;  %v1975_v48 = vrot.slane %v1966_v60, %v1974_v61  ;;  %v1149_v50 = vrot.slane %v1140_v58, %v157_v12  ;;  %v1153_v12 = vrot.slane %v1140_v58, %v161_v20 }
 0x1a0   :  { %v1983_v5 = vcombine.high %v1975_v48, %v1975_v48 }
 0x231   :  { %v1836_v63 = vpop.f32.mrb[4].mxu0  ;;  %v1877_v0 = vpop.f32.mrb[4].mxu1 }
 0x232   :  { %v1837_v1 = vadd.f32 %v1836_v63, %v1145_v62  ;;  %v1838_v2 = vpop.f32.mrb[5].mxu0  ;;  %v1879_v3 = vpop.f32.mrb[5].mxu1 }
 0x233   :  { %v1839_v4 = vadd.f32 %v1838_v2, %v1149_v50  ;;  %v1840_v6 = vpop.f32.mrb[6].mxu0  ;;  %v1881_v7 = vpop.f32.mrb[6].mxu1 }
 0x234   :  { %v1878_v8 = vadd.f32 %v1877_v0, %v1837_v1  ;;  %v1841_v9 = vpop.f32.mrb[7].mxu0  ;;  %v1882_v10 = vpop.f32.mrb[7].mxu1 }
 0x235   :  { %v1880_v11 = vadd.f32 %v1879_v3, %v1839_v4 }
 0x236   :  { %v1989_v13 = vadd.f32 %v1975_v48, %v1878_v8 }
 0x237   :  { %v1990_v14 = vadd.f32 %v1983_v5, %v1880_v11 }
 0x238   :  { %v1993_v19 = vmax.f32 %v1989_v13, 0.0 }
 0x239   :  { %v1994_v15 = vmax.f32 %v1990_v14, 0.0 }
 0x23b   :  { %v2291_v16 = vpack.c.bf16 %v1994_v15, %v1993_v19 }
 0x23d   :  { %v2013_v42 = vrot.slane %v2291_v16, %v2861_v49 }
 0x271   :  { %v1918_v23 = vpop.f32.mrb[8].mxu0  ;;  %v1959_v24 = vpop.f32.mrb[8].mxu1 }
 0x272   :  { %v1919_v25 = vadd.f32 %v1918_v23, %v1153_v12  ;;  %v1920_v26 = vpop.f32.mrb[9].mxu0  ;;  %v1961_v27 = vpop.f32.mrb[9].mxu1 }
 0x273   :  { %v1921_v28 = vadd.f32 %v1920_v26, %v1157_v21  ;;  %v1922_v30 = vpop.f32.mrb[10].mxu0  ;;  %v1963_v31 = vpop.f32.mrb[10].mxu1 }
 0x274   :  { %v1960_v32 = vadd.f32 %v1959_v24, %v1919_v25  ;;  %v1923_v33 = vpop.f32.mrb[11].mxu0  ;;  %v1964_v34 = vpop.f32.mrb[11].mxu1 }
 0x275   :  { %v1962_v35 = vadd.f32 %v1961_v27, %v1921_v28 }
 0x276   :  { %v1991_v36 = vadd.f32 %v1982_v18, %v1960_v32 }
 0x277   :  { %v1992_v37 = vadd.f32 %v1984_v29, %v1962_v35 }
 0x278   :  { %v1995_v20 = vmax.f32 %v1991_v36, 0.0 }
 0x279   :  { %v1996_v38 = vmax.f32 %v1992_v37, 0.0 }
 0x27b   :  { %v2292_v39 = vpack.c.bf16 %v1996_v38, %v1995_v20 }
 0x27d   :  { %v2020_v22 = vrot.slane %v2292_v39, %v2861_v49 }
 0x27f   :  { %v2021_v40 = vcombine.low %v2013_v42, %v2020_v22 }
 0x281   :  { %2293 = vst.sshfl [vmem:[%s3558_s5] sm:$0x55 pattern:$0x73625140] %v2021_v40 }

// kernel: resnet_forward.27
= control target key start
LH: loop header
LB: loop body
LE: loop exit
PB: predicated region body
PF: predicated region fallthrough
CT: control target
= control target key end

     0   :  { %v100_v30 = vlaneseq  ;;  %v551_v34 = vmov 1966171168   ;;  %s687_s0 = inlined_call_operand.vmem [shape: bf16[2,512], index: 0, kind: input, shape index: {}]   ;;  %s688_s1 = inlined_call_operand.vmem [shape: bf16[512,128], index: 1, kind: input, shape index: {}]   ;;  %s689_s2 = inlined_call_operand.vmem [shape: f32[1,128], index: 2, kind: input, shape index: {}]   ;;  %s690_s3 = inlined_call_operand.hbm [shape: f32[2,128], index: 3, kind: output, shape index: {}]  }
   0x1   :  { %v491_v0 = vld [vmem:[%s688_s1 + $0x40] sm:$0xff]   ;;  %v495_v4 = vld [vmem:[%s688_s1 + $0x48] sm:$0xff]   ;;  %v499_v8 = vld [vmem:[%s688_s1 + $0x50] sm:$0xff]   ;;  %v98_v35 = vunpack.c.l.s4 %v551_v34 }
   0x2   :  { %v492_v1 = vld [vmem:[%s688_s1 + $0xc0] sm:$0xff]   ;;  %445 = vmatprep.subr.bf16.mxu0 %v491_v0  ;;  %v496_v5 = vld [vmem:[%s688_s1 + $0xc8] sm:$0xff]   ;;  %v500_v9 = vld [vmem:[%s688_s1 + $0xd0] sm:$0xff]   ;;  %v101_v36 = vshrl.u32 %v100_v30, 7 }
   0x3   :  { %v493_v2 = vld [vmem:[%s688_s1] sm:$0xff]   ;;  %467 = vmatprep.subr.bf16.mxu1 %v492_v1  ;;  %v497_v6 = vld [vmem:[%s688_s1 + $0x8] sm:$0xff]   ;;  %v501_v10 = vld [vmem:[%s688_s1 + $0x10] sm:$0xff]  }
   0x4   :  { %v494_v3 = vld [vmem:[%s688_s1 + $0x80] sm:$0xff]   ;;  %446 = vmatpush3.bf16.msra.mxu0 %v493_v2  ;;  %v498_v7 = vld [vmem:[%s688_s1 + $0x88] sm:$0xff]   ;;  %v502_v11 = vld [vmem:[%s688_s1 + $0x90] sm:$0xff]  }
   0x5   :  { %468 = vmatpush3.bf16.msra.mxu1 %v494_v3  ;;  %447 = vmatprep.subr.bf16.mxu0 %v495_v4  ;;  %v503_v12 = vld [vmem:[%s688_s1 + $0x58] sm:$0xff]   ;;  %v507_v16 = vld [vmem:[%s688_s1 + $0x60] sm:$0xff]   ;;  %v511_v20 = vld [vmem:[%s688_s1 + $0x68] sm:$0xff]  }
   0x6   :  { %469 = vmatprep.subr.bf16.mxu1 %v496_v5  ;;  %v504_v13 = vld [vmem:[%s688_s1 + $0xd8] sm:$0xff]   ;;  %v508_v17 = vld [vmem:[%s688_s1 + $0xe0] sm:$0xff]   ;;  %v512_v21 = vld [vmem:[%s688_s1 + $0xe8] sm:$0xff]  }
   0x7   :  { %v505_v14 = vld [vmem:[%s688_s1 + $0x18] sm:$0xff]   ;;  %v509_v18 = vld [vmem:[%s688_s1 + $0x20] sm:$0xff]   ;;  %v513_v22 = vld [vmem:[%s688_s1 + $0x28] sm:$0xff]  }
   0x8   :  { %448 = vmatpush3.bf16.msra.mxu0 %v497_v6  ;;  %v506_v15 = vld [vmem:[%s688_s1 + $0x98] sm:$0xff]   ;;  %v510_v19 = vld [vmem:[%s688_s1 + $0xa0] sm:$0xff]   ;;  %v514_v23 = vld [vmem:[%s688_s1 + $0xa8] sm:$0xff]  }
   0x9   :  { %470 = vmatpush3.bf16.msra.mxu1 %v498_v7  ;;  %449 = vmatprep.subr.bf16.mxu0 %v499_v8  ;;  %v515_v24 = vld [vmem:[%s688_s1 + $0x70] sm:$0xff]   ;;  %v519_v28 = vld [vmem:[%s688_s1 + $0x78] sm:$0xff]   ;;  %v411_v33 = vld.sshfl [vmem:[%s687_s0] sm:$0x33 pattern:$0x75316420] }
   0xa   :  { %471 = vmatprep.subr.bf16.mxu1 %v500_v9  ;;  %v516_v25 = vld [vmem:[%s688_s1 + $0xf0] sm:$0xff]   ;;  %v520_v29 = vld [vmem:[%s688_s1 + $0xf8] sm:$0xff]  }
   0xb   :  { %v517_v26 = vld [vmem:[%s688_s1 + $0x30] sm:$0xff]   ;;  %v521_v31 = vld [vmem:[%s688_s1 + $0x38] sm:$0xff]  }
   0xc   :  { %450 = vmatpush3.bf16.msra.mxu0 %v501_v10  ;;  %v518_v27 = vld [vmem:[%s688_s1 + $0xb0] sm:$0xff]   ;;  %v522_v32 = vld [vmem:[%s688_s1 + $0xb8] sm:$0xff]  }
   0xd   :  { %472 = vmatpush3.bf16.msra.mxu1 %v502_v11  ;;  %451 = vmatprep.subr.bf16.mxu0 %v503_v12 }
   0xe   :  { %473 = vmatprep.subr.bf16.mxu1 %v504_v13 }
  0x10   :  { %452 = vmatpush3.bf16.msra.mxu0 %v505_v14 }
  0x11   :  { %474 = vmatpush3.bf16.msra.mxu1 %v506_v15  ;;  %453 = vmatprep.subr.bf16.mxu0 %v507_v16 }
  0x12   :  { %475 = vmatprep.subr.bf16.mxu1 %v508_v17 }
  0x14   :  { %454 = vmatpush3.bf16.msra.mxu0 %v509_v18 }
  0x15   :  { %476 = vmatpush3.bf16.msra.mxu1 %v510_v19  ;;  %455 = vmatprep.subr.bf16.mxu0 %v511_v20 }
  0x16   :  { %477 = vmatprep.subr.bf16.mxu1 %v512_v21 }
  0x18   :  { %456 = vmatpush3.bf16.msra.mxu0 %v513_v22 }
  0x19   :  { %478 = vmatpush3.bf16.msra.mxu1 %v514_v23  ;;  %457 = vmatprep.subr.bf16.mxu0 %v515_v24 }
  0x1a   :  { %479 = vmatprep.subr.bf16.mxu1 %v516_v25 }
  0x1c   :  { %458 = vmatpush3.bf16.msra.mxu0 %v517_v26 }
  0x1d   :  { %480 = vmatpush3.bf16.msra.mxu1 %v518_v27  ;;  %459 = vmatprep.subr.bf16.mxu0 %v519_v28 }
  0x1e   :  { %481 = vmatprep.subr.bf16.mxu1 %v520_v29 }
  0x20   :  { %460 = vmatpush3.bf16.msra.mxu0 %v521_v31 }
  0x21   :  { %482 = vmatpush3.bf16.msra.mxu1 %v522_v32 }
  0x22   :  { %8 = vsyncpa [#allocation3], 0  ;;  %v96_v37 = vcombine.high %v411_v33, %v411_v33  ;;  %v99_v38 = vunpack.c.0.s8 %v98_v35  ;;  %v410_v45 = vld [vmem:[%s689_s2] ss:$0 sm:$0xff]  ;;  %s552_s0 = smov [#allocation2]  }
  0x23   :  { %s402_s25 = sshll.u32 %s552_s0, 4  ;;  %s403_s25 = int_to_ptr.vmem [resolvable:$true] %s402_s25 }
  0x24   :  { %v102_v39 = vsub.s32 %v99_v38, %v101_v36  ;;  %s527_s2 = scalar_lea.vmem %s403_s25, 32  ;;  %p532_p1 = scmp.lt.s32.totalorder %s403_s25, %s403_s25 }
  0x25   :  { %p528_p0 = scmp.ne.s32.totalorder %s403_s25, %s527_s2  ;;  %p533_p2 = scmp.lt.s32.totalorder %s527_s2, %s527_s2 }
  0x26   :  { %v110_v40 = vrot.slane %v96_v37, %v102_v39  ;;  %v103_v41 = vrot.slane %v411_v33, %v102_v39 }
  0x27   :  { %p534_p3 = por %p533_p2, %p532_p1 }
  0x28   :  { %341 = vmatprep.mubr.bf16.mxu0 %v110_v40  ;;  %v112_v42 = vcombine.high %v110_v40, %v110_v40  ;;  %v111_v43 = vcombine.high %v103_v41, %v103_v41 }
  0x29   :  { %342 = vmatmul.mubr.bf16.vlgmr.msra.gmra.mrb[0].mxu0 %v103_v41  ;;  %p535_p4 = pnand %p534_p3, %p528_p0 }
  0x2a   :  { %381 = vmatprep.mubr.bf16.mxu1 %v112_v42 }
  0x2b   :  { %382 = vmatmul.mubr.bf16.vlgmr.msra.gmra.mrb[0].mxu1 %v111_v43 }
  0xfc   :  { %v461_v44 = vpop.f32.mrb[0].mxu0 }
  0xfd   :  { %v462_v46 = vpop.f32.mrb[1].mxu0 }
  0xfe   :  { %v483_v47 = vpop.f32.mrb[0].mxu1  ;;  %v463_v48 = vadd.f32 %v462_v46, %v461_v44  ;;  %v464_v49 = vpop.f32.mrb[2].mxu0 }
  0xff   :  { %v484_v50 = vpop.f32.mrb[1].mxu1  ;;  %v465_v51 = vpop.f32.mrb[3].mxu0 }
 0x100   :  { %v344_v52 = vadd.f32 %v463_v48, %v410_v45  ;;  %v485_v53 = vadd.f32 %v484_v50, %v483_v47  ;;  %v486_v54 = vpop.f32.mrb[2].mxu1 }
 0x101   :  { %v487_v55 = vpop.f32.mrb[3].mxu1 }
 0x102   :  { %v384_v56 = vadd.f32 %v485_v53, %v344_v52 }
 0x104   :  { %v444_v57 = vmul.f32 -1.442695, %v384_v56 }
 0x106   :  { %523 = vpow2.f32 %v444_v57 }
 0x110   :  { %v524_v58 = vpop.eup %523 }
 0x111   :  { %v392_v59 = vadd.f32 1.0, %v524_v58 }
 0x113   :  { %525 = vrcp.f32 %v392_v59 }
 0x11d   :  { %v526_v60 = vpop.eup %525 }
 0x11e   :  { %395 = vst [vmem:[#allocation2] sm:$0x3] %v526_v60 }
 0x11f   :  { %538 = shalt.err (!%p535_p4)
}
 0x120   :  { %s539_s28 = scalar_lea.hbm %s690_s3, 32 }
 0x121   :  { %p540_p5 = scmp.ne.s32.totalorder %s690_s3, %s539_s28  ;;  %p543_p6 = scmp.lt.u32.totalorder %s539_s28, %s690_s3 }
 0x123   :  { %p545_p7 = pnand %p543_p6, %p540_p5 }
 0x125   :  { %548 = shalt.err (!%p545_p7)
}
 0x126   :  { %405 = dma.vmem_to_hbm [thread:$0]  %s403_s25, 32, %s690_s3, [#allocation3]  }
 0x127   :  { %549 = dma.done.wait [#allocation3], 32  }
 0x128   :  { %550 = vsyncadd [#allocation3], 4294967264 }
 0x129   :  { %409 = vsyncpa [#allocation3], 1 }

</bundles_post_ra>
